<compile_context>
chip_gen: v7x
topology: tpu7x:2x2x1
jax: 0.10.0
libtpu: 0.0.40
codegen_flags: <defaults>
</compile_context>

<pallas_src>
import functools

import jax
import jax.numpy as jnp
from jax.experimental import pallas as pl
from jax.experimental.pallas import tpu as pltpu

# Row tile: multiple of 128 (it is also the lane tile for the transposed path),
# and small enough to be comfortable under v5e's 16 MiB scoped-VMEM default.
_TILE_M = 256


# ----------------------------- Pallas kernels ------------------------------ #
def _apply_act(acc, act):
    if act == "relu":
        return jnp.maximum(acc, 0.0)
    if act == "sigmoid":
        # exp + approximate reciprocal both go to the EUP slot; clip guarantees
        # the output stays strictly inside [0, 1].
        acc = pl.reciprocal(1.0 + jnp.exp(-acc), approx=True)
        return jnp.clip(acc, 0.0, 1.0)
    return acc


def _mm_bias_act_kernel(p_ref, w_ref, b_ref, o_ref, *, act):
    # p_ref: (tm, K) bf16, w_ref: (K, C) bf16, b_ref: (1, C) f32, o_ref: (tm, C) f32
    acc = jnp.dot(p_ref[...], w_ref[...], preferred_element_type=jnp.float32)
    o_ref[...] = _apply_act(acc + b_ref[...], act)


def _mm_bias_act_kernel_t(w_ref, p_ref, b_ref, o_ref, *, act):
    # Lane-dense variant for tiny Cout:
    # w_ref: (C, K) bf16, p_ref: (K, tm) bf16, b_ref: (C, 1) f32, o_ref: (C, tm) f32
    acc = jnp.dot(w_ref[...], p_ref[...], preferred_element_type=jnp.float32)
    o_ref[...] = _apply_act(acc + b_ref[...], act)


def _matmul_bias_act(patches, w_mat, bias, act, *, tile_m=_TILE_M):
    """act(patches @ w_mat + bias); patches (M, K) f32, w_mat (K, C) f32."""
    M, K = patches.shape
    C = w_mat.shape[1]
    tm = M if M <= tile_m else tile_m            # full-dim block if M is small
    grid = (pl.cdiv(M, tm),)
    return pl.pallas_call(
        functools.partial(_mm_bias_act_kernel, act=act),
        out_shape=jax.ShapeDtypeStruct((M, C), jnp.float32),
        grid=grid,
        in_specs=[
            pl.BlockSpec((tm, K), lambda i: (i, 0)),   # patches: tiled over M
            pl.BlockSpec((K, C), lambda i: (0, 0)),    # weights: resident
            pl.BlockSpec((1, C), lambda i: (0, 0)),    # bias:    resident
        ],
        out_specs=pl.BlockSpec((tm, C), lambda i: (i, 0)),
        compiler_params=pltpu.CompilerParams(
            dimension_semantics=("parallel",)),
    )(patches.astype(jnp.bfloat16), w_mat.astype(jnp.bfloat16),
      bias.reshape(1, C).astype(jnp.float32))


def _matmul_bias_act_lane_dense(patches, w_mat, bias, act, *, tile_m=_TILE_M):
    """Same contraction with the big M axis on lanes (for tiny Cout). Returns (C, M)."""
    M, K = patches.shape
    C = w_mat.shape[1]
    tm = M if M <= tile_m else tile_m            # tile_m is a multiple of 128
    grid = (pl.cdiv(M, tm),)
    return pl.pallas_call(
        functools.partial(_mm_bias_act_kernel_t, act=act),
        out_shape=jax.ShapeDtypeStruct((C, M), jnp.float32),
        grid=grid,
        in_specs=[
            pl.BlockSpec((C, K), lambda i: (0, 0)),    # W^T:       resident
            pl.BlockSpec((K, tm), lambda i: (0, i)),   # patches^T: tiled over M (lanes)
            pl.BlockSpec((C, 1), lambda i: (0, 0)),    # bias
        ],
        out_specs=pl.BlockSpec((C, tm), lambda i: (0, i)),
        compiler_params=pltpu.CompilerParams(
            dimension_semantics=("parallel",)),
        # patches.T is a tiny one-off transpose at this scale; for large batch,
        # generate the patches already transposed instead.
    )(w_mat.T.astype(jnp.bfloat16), patches.T.astype(jnp.bfloat16),
      bias.reshape(C, 1).astype(jnp.float32))


# ------------------------------ conv helpers ------------------------------- #
def _im2col_nhwc(x, kh, kw, stride):
    """x (N, H, W, C) already padded -> patches (N*Ho*Wo, kh*kw*C), Ho, Wo.

    Feature ordering is (kh, kw, C); the weight is reordered to match below.
    """
    N, H, W, C = x.shape
    Ho = (H - kh) // stride + 1
    Wo = (W - kw) // stride + 1
    cols = []
    for i in range(kh):
        for j in range(kw):
            cols.append(x[:, i:i + stride * Ho:stride,
                          j:j + stride * Wo:stride, :])
    p = jnp.concatenate(cols, axis=-1)                 # (N, Ho, Wo, kh*kw*C)
    return p.reshape(N * Ho * Wo, kh * kw * C), Ho, Wo


def conv2d_nhwc(x, w, b, *, stride, padding, act):
    """x (N, H, W, Cin); w (Cout, Cin, kh, kw) (PyTorch Conv2d layout)."""
    Cout, Cin, kh, kw = w.shape
    N = x.shape[0]
    if padding:
        x = jnp.pad(x, ((0, 0), (padding, padding), (padding, padding), (0, 0)))
    patches, Ho, Wo = _im2col_nhwc(x, kh, kw, stride)
    # (kh, kw, Cin, Cout) row-major flatten matches the (kh, kw, C) patch ordering.
    w_mat = jnp.transpose(w, (2, 3, 1, 0)).reshape(kh * kw * Cin, Cout)
    if Cout < 8:
        out_t = _matmul_bias_act_lane_dense(patches, w_mat, b, act)   # (Cout, M)
        return out_t.reshape(Cout, N, Ho, Wo).transpose(1, 2, 3, 0)
    out = _matmul_bias_act(patches, w_mat, b, act)                    # (M, Cout)
    return out.reshape(N, Ho, Wo, Cout)


def conv_transpose2d_nhwc(x, w, b, *, stride, padding, output_padding, act):
    """x (N, H, W, Cin); w (Cin, Cout, kh, kw) (PyTorch ConvTranspose2d layout)."""
    Cin, Cout, kh, kw = w.shape
    N, H, W, C = x.shape
    s = stride
    if s > 1:                                          # input dilation
        xd = jnp.zeros((N, (H - 1) * s + 1, (W - 1) * s + 1, C), x.dtype)
        xd = xd.at[:, ::s, ::s, :].set(x)
    else:
        xd = x
    ph, pw = kh - 1 - padding, kw - 1 - padding
    xp = jnp.pad(xd, ((0, 0), (ph, ph + output_padding),
                      (pw, pw + output_padding), (0, 0)))
    # spatial flip + in/out channel swap -> ordinary conv weight
    w_eq = jnp.transpose(w[:, :, ::-1, ::-1], (1, 0, 2, 3))
    return conv2d_nhwc(xp, w_eq, b, stride=1, padding=0, act=act)


# --------------------------------- model ----------------------------------- #
def _conv_init(key, w_shape, fan_in, n_bias):
    """PyTorch default Conv/ConvTranspose init: U(-1/sqrt(fan_in), +1/sqrt(fan_in))."""
    kw_, kb_ = jax.random.split(key)
    bound = 1.0 / float(fan_in) ** 0.5
    w = jax.random.uniform(kw_, w_shape, jnp.float32, -bound, bound)
    b = jax.random.uniform(kb_, (n_bias,), jnp.float32, -bound, bound)
    return w, b


def init_params(key):
    keys = jax.random.split(key, 6)
    p = {}
    # encoder: Conv2d(1,16,3,s2,p1) -> Conv2d(16,32,3,s2,p1) -> Conv2d(32,64,7)
    p["ew1"], p["eb1"] = _conv_init(keys[0], (16, 1, 3, 3), 1 * 3 * 3, 16)
    p["ew2"], p["eb2"] = _conv_init(keys[1], (32, 16, 3, 3), 16 * 3 * 3, 32)
    p["ew3"], p["eb3"] = _conv_init(keys[2], (64, 32, 7, 7), 32 * 7 * 7, 64)
    # decoder: ConvT(64,32,7) -> ConvT(32,16,3,s2,p1,op1) -> ConvT(16,1,3,s2,p1,op1)
    # (PyTorch uses weight.size(1)*kh*kw == Cout*kh*kw as fan_in for ConvTranspose.)
    p["dw1"], p["db1"] = _conv_init(keys[3], (64, 32, 7, 7), 32 * 7 * 7, 32)
    p["dw2"], p["db2"] = _conv_init(keys[4], (32, 16, 3, 3), 16 * 3 * 3, 16)
    p["dw3"], p["db3"] = _conv_init(keys[5], (16, 1, 3, 3), 1 * 3 * 3, 1)
    return p


def conv_autoencoder_forward(params, x):
    """x: (N, 1, 28, 28) NCHW (PyTorch convention) -> (N, 1, 28, 28)."""
    h = jnp.transpose(x, (0, 2, 3, 1))                      # NCHW -> NHWC once
    # ---------------- encoder ----------------
    h = conv2d_nhwc(h, params["ew1"], params["eb1"], stride=2, padding=1, act="relu")
    h = conv2d_nhwc(h, params["ew2"], params["eb2"], stride=2, padding=1, act="relu")
    h = conv2d_nhwc(h, params["ew3"], params["eb3"], stride=1, padding=0, act="none")
    # ---------------- decoder ----------------
    h = conv_transpose2d_nhwc(h, params["dw1"], params["db1"],
                              stride=1, padding=0, output_padding=0, act="relu")
    h = conv_transpose2d_nhwc(h, params["dw2"], params["db2"],
                              stride=2, padding=1, output_padding=1, act="relu")
    h = conv_transpose2d_nhwc(h, params["dw3"], params["db3"],
                              stride=2, padding=1, output_padding=1, act="sigmoid")
    return jnp.transpose(h, (0, 3, 1, 2))                   # NHWC -> NCHW once


# --------------------- pure-XLA reference (for checking) -------------------- #
def _bf16(x):
    # Mirror the kernel's bf16 operand cast so the comparison is tight.
    return x.astype(jnp.bfloat16).astype(jnp.float32)


def _ref_conv(x, w, b, stride, padding, lhs_dilation=(1, 1)):
    y = jax.lax.conv_general_dilated(
        _bf16(x), _bf16(w), window_strides=(stride, stride), padding=padding,
        lhs_dilation=lhs_dilation, dimension_numbers=("NCHW", "OIHW", "NCHW"))
    return y + b.reshape(1, -1, 1, 1)


def _ref_convT(x, w, b, stride, padding, output_padding):
    kh, kw = w.shape[2], w.shape[3]
    w_eq = jnp.transpose(w[:, :, ::-1, ::-1], (1, 0, 2, 3))
    pad = ((kh - 1 - padding, kh - 1 - padding + output_padding),
           (kw - 1 - padding, kw - 1 - padding + output_padding))
    return _ref_conv(x, w_eq, b, 1, pad, lhs_dilation=(stride, stride))


def reference_forward(params, x):
    relu = jax.nn.relu
    h = relu(_ref_conv(x, params["ew1"], params["eb1"], 2, ((1, 1), (1, 1))))
    h = relu(_ref_conv(h, params["ew2"], params["eb2"], 2, ((1, 1), (1, 1))))
    h = _ref_conv(h, params["ew3"], params["eb3"], 1, ((0, 0), (0, 0)))
    h = relu(_ref_convT(h, params["dw1"], params["db1"], 1, 0, 0))
    h = relu(_ref_convT(h, params["dw2"], params["db2"], 2, 1, 1))
    h = jax.nn.sigmoid(_ref_convT(h, params["dw3"], params["db3"], 2, 1, 1))
    return h


# ----------------------------------- main ----------------------------------- #
if __name__ == "__main__":
    key = jax.random.PRNGKey(0)
    k_param, k_x = jax.random.split(key)
    params = init_params(k_param)

    # MNIST-like input: the 7x7 bottleneck conv requires 28x28 spatial input.
    x = jax.random.uniform(k_x, (2, 1, 28, 28), jnp.float32)

    fwd = jax.jit(conv_autoencoder_forward)
    out = jax.block_until_ready(fwd(params, x))

    assert out.shape == (2, 1, 28, 28), out.shape
    assert out.dtype == jnp.float32
    # Sigmoid output range sanity check.
    assert bool(jnp.all(out >= 0.0)) and bool(jnp.all(out <= 1.0))

    # Numerical check against a pure-XLA reference using the same bf16 operand
    # rounding (loose tolerance covers the approximate-reciprocal sigmoid).
    ref = jax.block_until_ready(jax.jit(reference_forward)(params, x))
    max_err = float(jnp.max(jnp.abs(out - ref)))
    assert max_err < 5e-2, f"mismatch vs XLA reference: max_err={max_err}"

    print("KERNEL_OK")
</pallas_src>

<mosaic_0001>
module attributes {stable_mosaic.version = 11 : i64} {
  func.func @_mm_bias_act_kernel(%arg0: i32, %arg1: memref<256x9xbf16, #tpu.memory_space<vmem>>, %arg2: memref<9x16xbf16, #tpu.memory_space<vmem>>, %arg3: memref<1x16xf32, #tpu.memory_space<vmem>>, %arg4: memref<256x16xf32, #tpu.memory_space<vmem>>) attributes {dimension_semantics = [#tpu.dimension_semantics<parallel>], iteration_bounds = array<i64: 2>, scalar_prefetch = 0 : i64, scratch_operands = 0 : i64, tpu.core_type = #tpu.core_type<tc>, window_params = [{transform_indices = @transform_0, window_bounds = array<i64: 256, 9>}, {pipeline_mode = #tpu.pipeline_mode<synchronous>, transform_indices = @transform_1, window_bounds = array<i64: 9, 16>}, {pipeline_mode = #tpu.pipeline_mode<synchronous>, transform_indices = @transform_2, window_bounds = array<i64: 1, 16>}, {transform_indices = @transform_3, window_bounds = array<i64: 256, 16>}]} {
    %c0 = arith.constant 0 : index
    %c0_0 = arith.constant 0 : index
    %0 = vector.load %arg1[%c0, %c0_0] : memref<256x9xbf16, #tpu.memory_space<vmem>>, vector<256x9xbf16>
    %c0_1 = arith.constant 0 : index
    %c0_2 = arith.constant 0 : index
    %1 = vector.load %arg2[%c0_1, %c0_2] : memref<9x16xbf16, #tpu.memory_space<vmem>>, vector<9x16xbf16>
    %cst = arith.constant dense<0.000000e+00> : vector<256x16xf32>
    %2 = tpu.matmul %0, %1, %cst {dimension_numbers = #tpu.dot_dimension_numbers<[1], [0], [0], [1], [0, 0, 1, 1], [], []>} : vector<256x9xbf16>, vector<9x16xbf16>, vector<256x16xf32> -> vector<256x16xf32>
    %c0_3 = arith.constant 0 : index
    %c0_4 = arith.constant 0 : index
    %3 = vector.load %arg3[%c0_3, %c0_4] : memref<1x16xf32, #tpu.memory_space<vmem>>, vector<1x16xf32>
    %4 = vector.broadcast %3 : vector<1x16xf32> to vector<256x16xf32>
    %5 = arith.addf %2, %4 : vector<256x16xf32>
    %cst_5 = arith.constant 0.000000e+00 : f32
    %6 = vector.broadcast %cst_5 : f32 to vector<256x16xf32>
    %7 = arith.maximumf %5, %6 : vector<256x16xf32>
    %c0_6 = arith.constant 0 : index
    %c0_7 = arith.constant 0 : index
    %8 = vector.load %arg4[%c0_6, %c0_7] : memref<256x16xf32, #tpu.memory_space<vmem>>, vector<256x16xf32>
    tpu.vector_store %arg4[%c0_6, %c0_7], %7 {strides = array<i32>} : memref<256x16xf32, #tpu.memory_space<vmem>>, vector<256x16xf32>,
    return
  }
  func.func @transform_0(%arg0: i32) -> (i32, i32) {
    %c0_i32 = arith.constant 0 : i32
    %c0_i32_0 = arith.constant 0 : i32
    return %arg0, %c0_i32 : i32, i32
  }
  func.func @transform_1(%arg0: i32) -> (i32, i32) {
    %c0_i32 = arith.constant 0 : i32
    %c0_i32_0 = arith.constant 0 : i32
    %c0_i32_1 = arith.constant 0 : i32
    return %c0_i32, %c0_i32_0 : i32, i32
  }
  func.func @transform_2(%arg0: i32) -> (i32, i32) {
    %c0_i32 = arith.constant 0 : i32
    %c0_i32_0 = arith.constant 0 : i32
    %c0_i32_1 = arith.constant 0 : i32
    return %c0_i32, %c0_i32_0 : i32, i32
  }
  func.func @transform_3(%arg0: i32) -> (i32, i32) {
    %c0_i32 = arith.constant 0 : i32
    %c0_i32_0 = arith.constant 0 : i32
    return %arg0, %c0_i32 : i32, i32
  }
}

module attributes {stable_mosaic.version = 11 : i64} {
  func.func @_mm_bias_act_kernel(%arg0: i32, %arg1: memref<98x144xbf16, #tpu.memory_space<vmem>>, %arg2: memref<144x32xbf16, #tpu.memory_space<vmem>>, %arg3: memref<1x32xf32, #tpu.memory_space<vmem>>, %arg4: memref<98x32xf32, #tpu.memory_space<vmem>>) attributes {dimension_semantics = [#tpu.dimension_semantics<parallel>], iteration_bounds = array<i64: 1>, scalar_prefetch = 0 : i64, scratch_operands = 0 : i64, tpu.core_type = #tpu.core_type<tc>, window_params = [{transform_indices = @transform_0, window_bounds = array<i64: 98, 144>}, {pipeline_mode = #tpu.pipeline_mode<synchronous>, transform_indices = @transform_1, window_bounds = array<i64: 144, 32>}, {pipeline_mode = #tpu.pipeline_mode<synchronous>, transform_indices = @transform_2, window_bounds = array<i64: 1, 32>}, {transform_indices = @transform_3, window_bounds = array<i64: 98, 32>}]} {
    %c0 = arith.constant 0 : index
    %c0_0 = arith.constant 0 : index
    %0 = vector.load %arg1[%c0, %c0_0] : memref<98x144xbf16, #tpu.memory_space<vmem>>, vector<98x144xbf16>
    %c0_1 = arith.constant 0 : index
    %c0_2 = arith.constant 0 : index
    %1 = vector.load %arg2[%c0_1, %c0_2] : memref<144x32xbf16, #tpu.memory_space<vmem>>, vector<144x32xbf16>
    %cst = arith.constant dense<0.000000e+00> : vector<98x32xf32>
    %2 = tpu.matmul %0, %1, %cst {dimension_numbers = #tpu.dot_dimension_numbers<[1], [0], [0], [1], [0, 0, 1, 1], [], []>} : vector<98x144xbf16>, vector<144x32xbf16>, vector<98x32xf32> -> vector<98x32xf32>
    %c0_3 = arith.constant 0 : index
    %c0_4 = arith.constant 0 : index
    %3 = vector.load %arg3[%c0_3, %c0_4] : memref<1x32xf32, #tpu.memory_space<vmem>>, vector<1x32xf32>
    %4 = vector.broadcast %3 : vector<1x32xf32> to vector<98x32xf32>
    %5 = arith.addf %2, %4 : vector<98x32xf32>
    %cst_5 = arith.constant 0.000000e+00 : f32
    %6 = vector.broadcast %cst_5 : f32 to vector<98x32xf32>
    %7 = arith.maximumf %5, %6 : vector<98x32xf32>
    %c0_6 = arith.constant 0 : index
    %c0_7 = arith.constant 0 : index
    %8 = vector.load %arg4[%c0_6, %c0_7] : memref<98x32xf32, #tpu.memory_space<vmem>>, vector<98x32xf32>
    tpu.vector_store %arg4[%c0_6, %c0_7], %7 {strides = array<i32>} : memref<98x32xf32, #tpu.memory_space<vmem>>, vector<98x32xf32>,
    return
  }
  func.func @transform_0(%arg0: i32) -> (i32, i32) {
    %c0_i32 = arith.constant 0 : i32
    %c0_i32_0 = arith.constant 0 : i32
    return %arg0, %c0_i32 : i32, i32
  }
  func.func @transform_1(%arg0: i32) -> (i32, i32) {
    %c0_i32 = arith.constant 0 : i32
    %c0_i32_0 = arith.constant 0 : i32
    %c0_i32_1 = arith.constant 0 : i32
    return %c0_i32, %c0_i32_0 : i32, i32
  }
  func.func @transform_2(%arg0: i32) -> (i32, i32) {
    %c0_i32 = arith.constant 0 : i32
    %c0_i32_0 = arith.constant 0 : i32
    %c0_i32_1 = arith.constant 0 : i32
    return %c0_i32, %c0_i32_0 : i32, i32
  }
  func.func @transform_3(%arg0: i32) -> (i32, i32) {
    %c0_i32 = arith.constant 0 : i32
    %c0_i32_0 = arith.constant 0 : i32
    return %arg0, %c0_i32 : i32, i32
  }
}

module attributes {stable_mosaic.version = 11 : i64} {
  func.func @_mm_bias_act_kernel(%arg0: i32, %arg1: memref<2x1568xbf16, #tpu.memory_space<vmem>>, %arg2: memref<1568x64xbf16, #tpu.memory_space<vmem>>, %arg3: memref<1x64xf32, #tpu.memory_space<vmem>>, %arg4: memref<2x64xf32, #tpu.memory_space<vmem>>) attributes {dimension_semantics = [#tpu.dimension_semantics<parallel>], iteration_bounds = array<i64: 1>, scalar_prefetch = 0 : i64, scratch_operands = 0 : i64, tpu.core_type = #tpu.core_type<tc>, window_params = [{transform_indices = @transform_0, window_bounds = array<i64: 2, 1568>}, {pipeline_mode = #tpu.pipeline_mode<synchronous>, transform_indices = @transform_1, window_bounds = array<i64: 1568, 64>}, {pipeline_mode = #tpu.pipeline_mode<synchronous>, transform_indices = @transform_2, window_bounds = array<i64: 1, 64>}, {transform_indices = @transform_3, window_bounds = array<i64: 2, 64>}]} {
    %c0 = arith.constant 0 : index
    %c0_0 = arith.constant 0 : index
    %0 = vector.load %arg1[%c0, %c0_0] : memref<2x1568xbf16, #tpu.memory_space<vmem>>, vector<2x1568xbf16>
    %c0_1 = arith.constant 0 : index
    %c0_2 = arith.constant 0 : index
    %1 = vector.load %arg2[%c0_1, %c0_2] : memref<1568x64xbf16, #tpu.memory_space<vmem>>, vector<1568x64xbf16>
    %cst = arith.constant dense<0.000000e+00> : vector<2x64xf32>
    %2 = tpu.matmul %0, %1, %cst {dimension_numbers = #tpu.dot_dimension_numbers<[1], [0], [0], [1], [0, 0, 1, 1], [], []>} : vector<2x1568xbf16>, vector<1568x64xbf16>, vector<2x64xf32> -> vector<2x64xf32>
    %c0_3 = arith.constant 0 : index
    %c0_4 = arith.constant 0 : index
    %3 = vector.load %arg3[%c0_3, %c0_4] : memref<1x64xf32, #tpu.memory_space<vmem>>, vector<1x64xf32>
    %4 = vector.broadcast %3 : vector<1x64xf32> to vector<2x64xf32>
    %5 = arith.addf %2, %4 : vector<2x64xf32>
    %c0_5 = arith.constant 0 : index
    %c0_6 = arith.constant 0 : index
    %6 = vector.load %arg4[%c0_5, %c0_6] : memref<2x64xf32, #tpu.memory_space<vmem>>, vector<2x64xf32>
    tpu.vector_store %arg4[%c0_5, %c0_6], %5 {strides = array<i32>} : memref<2x64xf32, #tpu.memory_space<vmem>>, vector<2x64xf32>,
    return
  }
  func.func @transform_0(%arg0: i32) -> (i32, i32) {
    %c0_i32 = arith.constant 0 : i32
    %c0_i32_0 = arith.constant 0 : i32
    return %arg0, %c0_i32 : i32, i32
  }
  func.func @transform_1(%arg0: i32) -> (i32, i32) {
    %c0_i32 = arith.constant 0 : i32
    %c0_i32_0 = arith.constant 0 : i32
    %c0_i32_1 = arith.constant 0 : i32
    return %c0_i32, %c0_i32_0 : i32, i32
  }
  func.func @transform_2(%arg0: i32) -> (i32, i32) {
    %c0_i32 = arith.constant 0 : i32
    %c0_i32_0 = arith.constant 0 : i32
    %c0_i32_1 = arith.constant 0 : i32
    return %c0_i32, %c0_i32_0 : i32, i32
  }
  func.func @transform_3(%arg0: i32) -> (i32, i32) {
    %c0_i32 = arith.constant 0 : i32
    %c0_i32_0 = arith.constant 0 : i32
    return %arg0, %c0_i32 : i32, i32
  }
}

module attributes {stable_mosaic.version = 11 : i64} {
  func.func @_mm_bias_act_kernel(%arg0: i32, %arg1: memref<98x3136xbf16, #tpu.memory_space<vmem>>, %arg2: memref<3136x32xbf16, #tpu.memory_space<vmem>>, %arg3: memref<1x32xf32, #tpu.memory_space<vmem>>, %arg4: memref<98x32xf32, #tpu.memory_space<vmem>>) attributes {dimension_semantics = [#tpu.dimension_semantics<parallel>], iteration_bounds = array<i64: 1>, scalar_prefetch = 0 : i64, scratch_operands = 0 : i64, tpu.core_type = #tpu.core_type<tc>, window_params = [{transform_indices = @transform_0, window_bounds = array<i64: 98, 3136>}, {pipeline_mode = #tpu.pipeline_mode<synchronous>, transform_indices = @transform_1, window_bounds = array<i64: 3136, 32>}, {pipeline_mode = #tpu.pipeline_mode<synchronous>, transform_indices = @transform_2, window_bounds = array<i64: 1, 32>}, {transform_indices = @transform_3, window_bounds = array<i64: 98, 32>}]} {
    %c0 = arith.constant 0 : index
    %c0_0 = arith.constant 0 : index
    %0 = vector.load %arg1[%c0, %c0_0] : memref<98x3136xbf16, #tpu.memory_space<vmem>>, vector<98x3136xbf16>
    %c0_1 = arith.constant 0 : index
    %c0_2 = arith.constant 0 : index
    %1 = vector.load %arg2[%c0_1, %c0_2] : memref<3136x32xbf16, #tpu.memory_space<vmem>>, vector<3136x32xbf16>
    %cst = arith.constant dense<0.000000e+00> : vector<98x32xf32>
    %2 = tpu.matmul %0, %1, %cst {dimension_numbers = #tpu.dot_dimension_numbers<[1], [0], [0], [1], [0, 0, 1, 1], [], []>} : vector<98x3136xbf16>, vector<3136x32xbf16>, vector<98x32xf32> -> vector<98x32xf32>
    %c0_3 = arith.constant 0 : index
    %c0_4 = arith.constant 0 : index
    %3 = vector.load %arg3[%c0_3, %c0_4] : memref<1x32xf32, #tpu.memory_space<vmem>>, vector<1x32xf32>
    %4 = vector.broadcast %3 : vector<1x32xf32> to vector<98x32xf32>
    %5 = arith.addf %2, %4 : vector<98x32xf32>
    %cst_5 = arith.constant 0.000000e+00 : f32
    %6 = vector.broadcast %cst_5 : f32 to vector<98x32xf32>
    %7 = arith.maximumf %5, %6 : vector<98x32xf32>
    %c0_6 = arith.constant 0 : index
    %c0_7 = arith.constant 0 : index
    %8 = vector.load %arg4[%c0_6, %c0_7] : memref<98x32xf32, #tpu.memory_space<vmem>>, vector<98x32xf32>
    tpu.vector_store %arg4[%c0_6, %c0_7], %7 {strides = array<i32>} : memref<98x32xf32, #tpu.memory_space<vmem>>, vector<98x32xf32>,
    return
  }
  func.func @transform_0(%arg0: i32) -> (i32, i32) {
    %c0_i32 = arith.constant 0 : i32
    %c0_i32_0 = arith.constant 0 : i32
    return %arg0, %c0_i32 : i32, i32
  }
  func.func @transform_1(%arg0: i32) -> (i32, i32) {
    %c0_i32 = arith.constant 0 : i32
    %c0_i32_0 = arith.constant 0 : i32
    %c0_i32_1 = arith.constant 0 : i32
    return %c0_i32, %c0_i32_0 : i32, i32
  }
  func.func @transform_2(%arg0: i32) -> (i32, i32) {
    %c0_i32 = arith.constant 0 : i32
    %c0_i32_0 = arith.constant 0 : i32
    %c0_i32_1 = arith.constant 0 : i32
    return %c0_i32, %c0_i32_0 : i32, i32
  }
  func.func @transform_3(%arg0: i32) -> (i32, i32) {
    %c0_i32 = arith.constant 0 : i32
    %c0_i32_0 = arith.constant 0 : i32
    return %arg0, %c0_i32 : i32, i32
  }
}

module attributes {stable_mosaic.version = 11 : i64} {
  func.func @_mm_bias_act_kernel(%arg0: i32, %arg1: memref<256x288xbf16, #tpu.memory_space<vmem>>, %arg2: memref<288x16xbf16, #tpu.memory_space<vmem>>, %arg3: memref<1x16xf32, #tpu.memory_space<vmem>>, %arg4: memref<256x16xf32, #tpu.memory_space<vmem>>) attributes {dimension_semantics = [#tpu.dimension_semantics<parallel>], iteration_bounds = array<i64: 2>, scalar_prefetch = 0 : i64, scratch_operands = 0 : i64, tpu.core_type = #tpu.core_type<tc>, window_params = [{transform_indices = @transform_0, window_bounds = array<i64: 256, 288>}, {pipeline_mode = #tpu.pipeline_mode<synchronous>, transform_indices = @transform_1, window_bounds = array<i64: 288, 16>}, {pipeline_mode = #tpu.pipeline_mode<synchronous>, transform_indices = @transform_2, window_bounds = array<i64: 1, 16>}, {transform_indices = @transform_3, window_bounds = array<i64: 256, 16>}]} {
    %c0 = arith.constant 0 : index
    %c0_0 = arith.constant 0 : index
    %0 = vector.load %arg1[%c0, %c0_0] : memref<256x288xbf16, #tpu.memory_space<vmem>>, vector<256x288xbf16>
    %c0_1 = arith.constant 0 : index
    %c0_2 = arith.constant 0 : index
    %1 = vector.load %arg2[%c0_1, %c0_2] : memref<288x16xbf16, #tpu.memory_space<vmem>>, vector<288x16xbf16>
    %cst = arith.constant dense<0.000000e+00> : vector<256x16xf32>
    %2 = tpu.matmul %0, %1, %cst {dimension_numbers = #tpu.dot_dimension_numbers<[1], [0], [0], [1], [0, 0, 1, 1], [], []>} : vector<256x288xbf16>, vector<288x16xbf16>, vector<256x16xf32> -> vector<256x16xf32>
    %c0_3 = arith.constant 0 : index
    %c0_4 = arith.constant 0 : index
    %3 = vector.load %arg3[%c0_3, %c0_4] : memref<1x16xf32, #tpu.memory_space<vmem>>, vector<1x16xf32>
    %4 = vector.broadcast %3 : vector<1x16xf32> to vector<256x16xf32>
    %5 = arith.addf %2, %4 : vector<256x16xf32>
    %cst_5 = arith.constant 0.000000e+00 : f32
    %6 = vector.broadcast %cst_5 : f32 to vector<256x16xf32>
    %7 = arith.maximumf %5, %6 : vector<256x16xf32>
    %c0_6 = arith.constant 0 : index
    %c0_7 = arith.constant 0 : index
    %8 = vector.load %arg4[%c0_6, %c0_7] : memref<256x16xf32, #tpu.memory_space<vmem>>, vector<256x16xf32>
    tpu.vector_store %arg4[%c0_6, %c0_7], %7 {strides = array<i32>} : memref<256x16xf32, #tpu.memory_space<vmem>>, vector<256x16xf32>,
    return
  }
  func.func @transform_0(%arg0: i32) -> (i32, i32) {
    %c0_i32 = arith.constant 0 : i32
    %c0_i32_0 = arith.constant 0 : i32
    return %arg0, %c0_i32 : i32, i32
  }
  func.func @transform_1(%arg0: i32) -> (i32, i32) {
    %c0_i32 = arith.constant 0 : i32
    %c0_i32_0 = arith.constant 0 : i32
    %c0_i32_1 = arith.constant 0 : i32
    return %c0_i32, %c0_i32_0 : i32, i32
  }
  func.func @transform_2(%arg0: i32) -> (i32, i32) {
    %c0_i32 = arith.constant 0 : i32
    %c0_i32_0 = arith.constant 0 : i32
    %c0_i32_1 = arith.constant 0 : i32
    return %c0_i32, %c0_i32_0 : i32, i32
  }
  func.func @transform_3(%arg0: i32) -> (i32, i32) {
    %c0_i32 = arith.constant 0 : i32
    %c0_i32_0 = arith.constant 0 : i32
    return %arg0, %c0_i32 : i32, i32
  }
}

module attributes {stable_mosaic.version = 11 : i64} {
  func.func @_mm_bias_act_kernel_t(%arg0: i32, %arg1: memref<1x144xbf16, #tpu.memory_space<vmem>>, %arg2: memref<144x256xbf16, #tpu.memory_space<vmem>>, %arg3: memref<1x1xf32, #tpu.memory_space<vmem>>, %arg4: memref<1x256xf32, #tpu.memory_space<vmem>>) attributes {dimension_semantics = [#tpu.dimension_semantics<parallel>], iteration_bounds = array<i64: 7>, scalar_prefetch = 0 : i64, scratch_operands = 0 : i64, tpu.core_type = #tpu.core_type<tc>, window_params = [{pipeline_mode = #tpu.pipeline_mode<synchronous>, transform_indices = @transform_0, window_bounds = array<i64: 1, 144>}, {transform_indices = @transform_1, window_bounds = array<i64: 144, 256>}, {pipeline_mode = #tpu.pipeline_mode<synchronous>, transform_indices = @transform_2, window_bounds = array<i64: 1, 1>}, {transform_indices = @transform_3, window_bounds = array<i64: 1, 256>}]} {
    %c0 = arith.constant 0 : index
    %c0_0 = arith.constant 0 : index
    %0 = vector.load %arg1[%c0, %c0_0] : memref<1x144xbf16, #tpu.memory_space<vmem>>, vector<1x144xbf16>
    %c0_1 = arith.constant 0 : index
    %c0_2 = arith.constant 0 : index
    %1 = vector.load %arg2[%c0_1, %c0_2] : memref<144x256xbf16, #tpu.memory_space<vmem>>, vector<144x256xbf16>
    %cst = arith.constant dense<0.000000e+00> : vector<1x256xf32>
    %2 = tpu.matmul %0, %1, %cst {dimension_numbers = #tpu.dot_dimension_numbers<[1], [0], [0], [1], [0, 0, 1, 1], [], []>} : vector<1x144xbf16>, vector<144x256xbf16>, vector<1x256xf32> -> vector<1x256xf32>
    %c0_3 = arith.constant 0 : index
    %c0_4 = arith.constant 0 : index
    %3 = vector.load %arg3[%c0_3, %c0_4] : memref<1x1xf32, #tpu.memory_space<vmem>>, vector<1x1xf32>
    %4 = vector.broadcast %3 : vector<1x1xf32> to vector<1x256xf32>
    %5 = arith.addf %2, %4 : vector<1x256xf32>
    %cst_5 = arith.constant 0.000000e+00 : f32
    %6 = vector.broadcast %cst_5 : f32 to vector<1x256xf32>
    %7 = arith.subf %6, %5 : vector<1x256xf32>
    %8 = math.exp %7 : vector<1x256xf32>
    %cst_6 = arith.constant 1.000000e+00 : f32
    %9 = vector.broadcast %cst_6 : f32 to vector<1x256xf32>
    %10 = arith.addf %9, %8 : vector<1x256xf32>
    %11 = tpu.reciprocal %10 {approx = true} : vector<1x256xf32> -> vector<1x256xf32>
    %cst_7 = arith.constant 0.000000e+00 : f32
    %cst_8 = arith.constant 1.000000e+00 : f32
    %12 = vector.broadcast %cst_7 : f32 to vector<1x256xf32>
    %13 = arith.maximumf %12, %11 : vector<1x256xf32>
    %14 = vector.broadcast %cst_8 : f32 to vector<1x256xf32>
    %15 = arith.minimumf %14, %13 : vector<1x256xf32>
    %c0_9 = arith.constant 0 : index
    %c0_10 = arith.constant 0 : index
    %16 = vector.load %arg4[%c0_9, %c0_10] : memref<1x256xf32, #tpu.memory_space<vmem>>, vector<1x256xf32>
    tpu.vector_store %arg4[%c0_9, %c0_10], %15 {strides = array<i32>} : memref<1x256xf32, #tpu.memory_space<vmem>>, vector<1x256xf32>,
    return
  }
  func.func @transform_0(%arg0: i32) -> (i32, i32) {
    %c0_i32 = arith.constant 0 : i32
    %c0_i32_0 = arith.constant 0 : i32
    %c0_i32_1 = arith.constant 0 : i32
    return %c0_i32, %c0_i32_0 : i32, i32
  }
  func.func @transform_1(%arg0: i32) -> (i32, i32) {
    %c0_i32 = arith.constant 0 : i32
    %c0_i32_0 = arith.constant 0 : i32
    return %c0_i32, %arg0 : i32, i32
  }
  func.func @transform_2(%arg0: i32) -> (i32, i32) {
    %c0_i32 = arith.constant 0 : i32
    %c0_i32_0 = arith.constant 0 : i32
    %c0_i32_1 = arith.constant 0 : i32
    return %c0_i32, %c0_i32_0 : i32, i32
  }
  func.func @transform_3(%arg0: i32) -> (i32, i32) {
    %c0_i32 = arith.constant 0 : i32
    %c0_i32_0 = arith.constant 0 : i32
    return %c0_i32, %arg0 : i32, i32
  }
}

</mosaic_0001>

<bundles_post_ra>
// kernel: conv_autoencoder_forward.6
= control target key start
LH: loop header
LB: loop body
LE: loop exit
PB: predicated region body
PF: predicated region fallthrough
CT: control target
= control target key end

     0   :  { %s1269_s12 = smov 0   ;;  %s1271_s13 = smov 0   ;;  %s1586_s0 = inlined_call_operand.vmem [shape: bf16[392,9], index: 0, kind: input, shape index: {}]   ;;  %s1587_s1 = inlined_call_operand.vmem [shape: bf16[9,16], index: 1, kind: input, shape index: {}]   ;;  %s1588_s2 = inlined_call_operand.vmem [shape: f32[1,16], index: 2, kind: input, shape index: {}]   ;;  %s1589_s3 = inlined_call_operand.vmem [shape: f32[392,16], index: 3, kind: output, shape index: {}]  }
   0x1   :  { %s1273_s14 = smov 0  }
   0x2 LB: > { %s1282_s15 = sadd.s32 4294967295, %s1214_s14   ;;  %s1284_s16 = sadd.s32 1, %s1214_s14   ;;  %s1214_s14 = sphi %s1273_s14, %s1598_s14   ;;  %s1210_s13 = sphi %s1271_s13, %s1597_s13   ;;  %s1206_s12 = sphi %s1269_s12, %s1596_s12  }
   0x3   : > { %s85_s17 = ssub.s32 %s1214_s14, %s1284_s16  ;;  %s88_s18 = sadd.s32 1, %s1210_s13 }
   0x4   : > { %p86_p0 = scmp.eq.s32.totalorder %s85_s17, 0  ;;  %p98_p1 = scmp.ne.s32.totalorder %s1210_s13, %s1206_s12 }
   0x5   : > { %p99_p2 = scmp.eq.s32.totalorder %s1282_s15, 1  ;;  %p943_p3 = scmp.ge.s32.totalorder %s1214_s14, 1 }
   0x6   : > { %s1292_s19 = scalar_select %p86_p0, %s1210_s13, %s88_s18  }
   0x7   : > { %p1294_p4 = por %p99_p2, %p98_p1  ;;  %p146_p5 = scmp.lt.s32.totalorder %s1214_s14, 3 }
   0x9   : > { %p147_p6 = pnand %p943_p3, %p146_p5 }
   0xa   : > { %v1143_v0 = vld [vmem:[%s1587_s1] sm:$0x1f] (!%p147_p6)   ;;  %vm368_vm0 = vcmask (!%p147_p6), 1043456   ;;  %vm369_vm1 = vcmask (!%p147_p6), 1044480   ;;  %s1302_s23 = sshll.u32 (!%p147_p6), %s1282_s15, 5  ;;  %v1248_v1 = vmov (!%p147_p6), 65535  }
   0xb   : > { %150 = sbr.rel (%p147_p6) target bundleno = 325 (0x145), region = 32  ;;  %v370_v2 = vsel (!%p147_p6), %vm368_vm0, 4294967295, %v1248_v1  ;;  %p178_p7 = scmp.lt.s32.totalorder (!%p147_p6), %s1302_s23, 48  ;;  %vm319_vm2 = vcmask (!%p147_p6), 72704   ;;  %v1347_v21 = vld [vmem:[%s1588_s2] ss:$0 sm:$0xff] (!%p147_p6) }
   0xc   : > { %v371_v3 = vsel (!%p147_p6), %vm369_vm1, %v370_v2, 0  ;;  %s170_s29 = sand.u32 (!%p147_p6), 1, %s1206_s12   ;;  %vm568_vm3 = vcmask (!%p147_p6), 130048  }
   0xd   : > { %v373_v4 = vand.u32 (!%p147_p6), %v1143_v0, %v371_v3  ;;  %s944_s5 = sshll.u32 (!%p147_p6), %s170_s29, 8 }
   0xe   : > { %s1356_s6 = scalar_lea.vmem (!%p147_p6), [#allocation2], %s944_s5  }
   0xf   : > { %1018 = vmatprep.subr.bf16.mxu0 (!%p147_p6), %v373_v4  ;;  %1052 = vmatprep.subr.bf16.mxu1 (!%p147_p6), %v373_v4 }
  0x10   : > { %1019 = vmatpush3.bf16.msra.mxu0 (!%p147_p6), %v373_v4  ;;  %1053 = vmatpush3.bf16.msra.mxu1 (!%p147_p6), %v373_v4 }
  0x12   : > { %s179_s24 = scalar_select %p178_p7, %s1302_s23, 48 }
  0x13   : > { %s609_s7 = ssub.s32 (%p1294_p4), 49, %s1302_s23  ;;  %s998_s8 = sshll.u32 (%p1294_p4), %s1282_s15, 8 }
  0x14   : > { %s946_s25 = sshll.u32 %s179_s24, 2  ;;  %p610_p8 = scmp.lt.s32.totalorder (%p1294_p4), %s609_s7, 32 }
  0x15   : > { %s1309_s28 = scalar_lea.vmem %s1586_s0, %s946_s25  ;;  %s1454_s11 = scalar_lea.vmem (%p1294_p4), %s1589_s3, %s998_s8  }
  0x16   : > { %v1144_v5 = vld [vmem:[%s1309_s28] sm:$0xff]   ;;  %v1146_v7 = vld [vmem:[%s1309_s28 + $0x8] sm:$0xff]   ;;  %v1148_v9 = vld [vmem:[%s1309_s28 + $0x10] sm:$0xff]  }
  0x17   : > { %v1145_v6 = vld [vmem:[%s1309_s28 + $0x40] sm:$0xff]   ;;  %1020 = vmatprep.mubr.msk.bf16.mxu0 %vm319_vm2, %v1144_v5  ;;  %v1147_v8 = vld [vmem:[%s1309_s28 + $0x48] sm:$0xff]   ;;  %v1149_v10 = vld [vmem:[%s1309_s28 + $0x50] sm:$0xff]  }
  0x18   : > { %1036 = vmatprep.mubr.msk.bf16.mxu1 %vm319_vm2, %v1145_v6  ;;  %1021 = vmatmul.mubr.msk.bf16.vlgmr.msra.gmra.mrb[0].mxu0 %vm319_vm2, %v1146_v7  ;;  %v1150_v11 = vld [vmem:[%s1309_s28 + $0x18] sm:$0xff]   ;;  %v1152_v13 = vld [vmem:[%s1309_s28 + $0x20] sm:$0xff]   ;;  %v1154_v15 = vld [vmem:[%s1309_s28 + $0x28] sm:$0xff]  }
  0x19   : > { %1037 = vmatmul.mubr.msk.bf16.vlgmr.msra.gmra.mrb[0].mxu1 %vm319_vm2, %v1147_v8  ;;  %1024 = vmatprep.mubr.msk.bf16.mxu0 %vm319_vm2, %v1148_v9  ;;  %v1151_v12 = vld [vmem:[%s1309_s28 + $0x58] sm:$0xff]   ;;  %v1153_v14 = vld [vmem:[%s1309_s28 + $0x60] sm:$0xff]   ;;  %v1155_v16 = vld [vmem:[%s1309_s28 + $0x68] sm:$0xff]  }
  0x1a   : > { %1040 = vmatprep.mubr.msk.bf16.mxu1 %vm319_vm2, %v1149_v10  ;;  %v1156_v17 = vld [vmem:[%s1309_s28 + $0x30] sm:$0xff]   ;;  %v1158_v19 = vld [vmem:[%s1309_s28 + $0x38] sm:$0xff]  }
  0x1b   : > { %v1157_v18 = vld [vmem:[%s1309_s28 + $0x70] sm:$0xff]   ;;  %v1159_v20 = vld [vmem:[%s1309_s28 + $0x78] sm:$0xff]  }
  0x20   : > { %1025 = vmatmul.mubr.msk.bf16.gmra.mrb[4].mxu0 %vm319_vm2, %v1150_v11 }
  0x21   : > { %1041 = vmatmul.mubr.msk.bf16.gmra.mrb[4].mxu1 %vm319_vm2, %v1151_v12  ;;  %1028 = vmatprep.mubr.msk.bf16.mxu0 %vm319_vm2, %v1152_v13 }
  0x22   : > { %1044 = vmatprep.mubr.msk.bf16.mxu1 %vm319_vm2, %v1153_v14 }
  0x28   : > { %1029 = vmatmul.mubr.msk.bf16.gmra.mrb[8].mxu0 %vm319_vm2, %v1154_v15 }
  0x29   : > { %1045 = vmatmul.mubr.msk.bf16.gmra.mrb[8].mxu1 %vm319_vm2, %v1155_v16  ;;  %1032 = vmatprep.mubr.msk.bf16.mxu0 %vm319_vm2, %v1156_v17 }
  0x2a   : > { %1048 = vmatprep.mubr.msk.bf16.mxu1 %vm319_vm2, %v1157_v18 }
  0x30   : > { %1033 = vmatmul.mubr.msk.bf16.gmra.mrb[12].mxu0 %vm319_vm2, %v1158_v19 }
  0x31   : > { %1049 = vmatmul.mubr.msk.bf16.gmra.mrb[12].mxu1 %vm319_vm2, %v1159_v20 }
  0xeb   : > { %v1022_v22 = vpop.f32.mrb[0].mxu0 }
  0xec   : > { %v418_v23 = vadd.f32 %v1022_v22, %v1347_v21  ;;  %v1038_v24 = vpop.f32.mrb[0].mxu1  ;;  %v409_v25 = vpop.f32.mrb[1].mxu0 }
  0xed   : > { %v482_v26 = vadd.f32 %v1038_v24, %v1347_v21  ;;  %v410_v27 = vadd.f32 %v1347_v21, %v409_v25  ;;  %v473_v28 = vpop.f32.mrb[1].mxu1  ;;  %v1023_v29 = vpop.f32.mrb[2].mxu0 }
  0xee   : > { %v538_v30 = vmax.f32 %v418_v23, 0.0  ;;  %v474_v31 = vadd.f32 %v1347_v21, %v473_v28  ;;  %v421_v32 = vadd.f32 %v1023_v29, %v1347_v21  ;;  %v1039_v33 = vpop.f32.mrb[2].mxu1  ;;  %v412_v34 = vpop.f32.mrb[3].mxu0 }
  0xef   : > { %v554_v35 = vmax.f32 %v482_v26, 0.0  ;;  %v536_v36 = vmax.f32 %v410_v27, 0.0  ;;  %v485_v37 = vadd.f32 %v1039_v33, %v1347_v21  ;;  %v413_v38 = vadd.f32 %v1347_v21, %v412_v34  ;;  %v476_v39 = vpop.f32.mrb[3].mxu1 }
  0xf0   : > { %571 = vst.msk [vmem:[%s1356_s6 + $0x10] sm:$0xff] %vm568_vm3, %v538_v30  ;;  %v552_v40 = vmax.f32 %v474_v31, 0.0  ;;  %v539_v41 = vmax.f32 %v421_v32, 0.0  ;;  %v477_v42 = vadd.f32 %v1347_v21, %v476_v39 }
  0xf1   : > { %587 = vst.msk [vmem:[%s1356_s6 + $0x90] sm:$0xff] %vm568_vm3, %v554_v35  ;;  %569 = vst.msk [vmem:[%s1356_s6] sm:$0xff] %vm568_vm3, %v536_v36  ;;  %v555_v43 = vmax.f32 %v485_v37, 0.0  ;;  %v537_v44 = vmax.f32 %v413_v38, 0.0 }
  0xf2   : > { %585 = vst.msk [vmem:[%s1356_s6 + $0x80] sm:$0xff] %vm568_vm3, %v552_v40  ;;  %572 = vst.msk [vmem:[%s1356_s6 + $0x18] sm:$0xff] %vm568_vm3, %v539_v41  ;;  %v553_v45 = vmax.f32 %v477_v42, 0.0 }
  0xf3   : > { %588 = vst.msk [vmem:[%s1356_s6 + $0x98] sm:$0xff] %vm568_vm3, %v555_v43  ;;  %570 = vst.msk [vmem:[%s1356_s6 + $0x8] sm:$0xff] %vm568_vm3, %v537_v44  ;;  %v1026_v46 = vpop.f32.mrb[4].mxu0 }
  0xf4   : > { %586 = vst.msk [vmem:[%s1356_s6 + $0x88] sm:$0xff] %vm568_vm3, %v553_v45  ;;  %v434_v47 = vadd.f32 %v1026_v46, %v1347_v21  ;;  %v1042_v48 = vpop.f32.mrb[4].mxu1  ;;  %v425_v49 = vpop.f32.mrb[5].mxu0 }
  0xf5   : > { %v498_v50 = vadd.f32 %v1042_v48, %v1347_v21  ;;  %v426_v51 = vadd.f32 %v1347_v21, %v425_v49  ;;  %v489_v52 = vpop.f32.mrb[5].mxu1  ;;  %v1027_v53 = vpop.f32.mrb[6].mxu0 }
  0xf6   : > { %v542_v54 = vmax.f32 %v434_v47, 0.0  ;;  %v490_v55 = vadd.f32 %v1347_v21, %v489_v52  ;;  %v437_v56 = vadd.f32 %v1027_v53, %v1347_v21  ;;  %v1043_v57 = vpop.f32.mrb[6].mxu1  ;;  %v428_v58 = vpop.f32.mrb[7].mxu0 }
  0xf7   : > { %v558_v59 = vmax.f32 %v498_v50, 0.0  ;;  %v540_v60 = vmax.f32 %v426_v51, 0.0  ;;  %v501_v61 = vadd.f32 %v1043_v57, %v1347_v21  ;;  %v429_v62 = vadd.f32 %v1347_v21, %v428_v58  ;;  %v492_v63 = vpop.f32.mrb[7].mxu1 }
  0xf8   : > { %575 = vst.msk [vmem:[%s1356_s6 + $0x30] sm:$0xff] %vm568_vm3, %v542_v54  ;;  %v556_v0 = vmax.f32 %v490_v55, 0.0  ;;  %v543_v1 = vmax.f32 %v437_v56, 0.0  ;;  %v493_v2 = vadd.f32 %v1347_v21, %v492_v63 }
  0xf9   : > { %591 = vst.msk [vmem:[%s1356_s6 + $0xb0] sm:$0xff] %vm568_vm3, %v558_v59  ;;  %573 = vst.msk [vmem:[%s1356_s6 + $0x20] sm:$0xff] %vm568_vm3, %v540_v60  ;;  %v559_v3 = vmax.f32 %v501_v61, 0.0  ;;  %v541_v4 = vmax.f32 %v429_v62, 0.0 }
  0xfa   : > { %589 = vst.msk [vmem:[%s1356_s6 + $0xa0] sm:$0xff] %vm568_vm3, %v556_v0  ;;  %576 = vst.msk [vmem:[%s1356_s6 + $0x38] sm:$0xff] %vm568_vm3, %v543_v1  ;;  %v557_v5 = vmax.f32 %v493_v2, 0.0 }
  0xfb   : > { %592 = vst.msk [vmem:[%s1356_s6 + $0xb8] sm:$0xff] %vm568_vm3, %v559_v3  ;;  %574 = vst.msk [vmem:[%s1356_s6 + $0x28] sm:$0xff] %vm568_vm3, %v541_v4  ;;  %v1030_v6 = vpop.f32.mrb[8].mxu0 }
  0xfc   : > { %590 = vst.msk [vmem:[%s1356_s6 + $0xa8] sm:$0xff] %vm568_vm3, %v557_v5  ;;  %v450_v7 = vadd.f32 %v1030_v6, %v1347_v21  ;;  %v1046_v8 = vpop.f32.mrb[8].mxu1  ;;  %v441_v9 = vpop.f32.mrb[9].mxu0 }
  0xfd   : > { %v514_v10 = vadd.f32 %v1046_v8, %v1347_v21  ;;  %v442_v11 = vadd.f32 %v1347_v21, %v441_v9  ;;  %v505_v12 = vpop.f32.mrb[9].mxu1  ;;  %v1031_v13 = vpop.f32.mrb[10].mxu0 }
  0xfe   : > { %v546_v14 = vmax.f32 %v450_v7, 0.0  ;;  %v506_v15 = vadd.f32 %v1347_v21, %v505_v12  ;;  %v453_v16 = vadd.f32 %v1031_v13, %v1347_v21  ;;  %v1047_v17 = vpop.f32.mrb[10].mxu1  ;;  %v444_v18 = vpop.f32.mrb[11].mxu0 }
  0xff   : > { %v562_v19 = vmax.f32 %v514_v10, 0.0  ;;  %v544_v20 = vmax.f32 %v442_v11, 0.0  ;;  %v517_v22 = vadd.f32 %v1047_v17, %v1347_v21  ;;  %v445_v23 = vadd.f32 %v1347_v21, %v444_v18  ;;  %v508_v24 = vpop.f32.mrb[11].mxu1 }
 0x100   : > { %579 = vst.msk [vmem:[%s1356_s6 + $0x50] sm:$0xff] %vm568_vm3, %v546_v14  ;;  %v560_v25 = vmax.f32 %v506_v15, 0.0  ;;  %v547_v26 = vmax.f32 %v453_v16, 0.0  ;;  %v509_v27 = vadd.f32 %v1347_v21, %v508_v24 }
 0x101   : > { %595 = vst.msk [vmem:[%s1356_s6 + $0xd0] sm:$0xff] %vm568_vm3, %v562_v19  ;;  %577 = vst.msk [vmem:[%s1356_s6 + $0x40] sm:$0xff] %vm568_vm3, %v544_v20  ;;  %v563_v28 = vmax.f32 %v517_v22, 0.0  ;;  %v545_v29 = vmax.f32 %v445_v23, 0.0 }
 0x102   : > { %593 = vst.msk [vmem:[%s1356_s6 + $0xc0] sm:$0xff] %vm568_vm3, %v560_v25  ;;  %580 = vst.msk [vmem:[%s1356_s6 + $0x58] sm:$0xff] %vm568_vm3, %v547_v26  ;;  %v561_v30 = vmax.f32 %v509_v27, 0.0 }
 0x103   : > { %596 = vst.msk [vmem:[%s1356_s6 + $0xd8] sm:$0xff] %vm568_vm3, %v563_v28  ;;  %578 = vst.msk [vmem:[%s1356_s6 + $0x48] sm:$0xff] %vm568_vm3, %v545_v29  ;;  %v1034_v31 = vpop.f32.mrb[12].mxu0 }
 0x104   : > { %594 = vst.msk [vmem:[%s1356_s6 + $0xc8] sm:$0xff] %vm568_vm3, %v561_v30  ;;  %v466_v32 = vadd.f32 %v1034_v31, %v1347_v21  ;;  %v1050_v33 = vpop.f32.mrb[12].mxu1  ;;  %v457_v34 = vpop.f32.mrb[13].mxu0 }
 0x105   : > { %v530_v35 = vadd.f32 %v1050_v33, %v1347_v21  ;;  %v458_v36 = vadd.f32 %v1347_v21, %v457_v34  ;;  %v521_v37 = vpop.f32.mrb[13].mxu1  ;;  %v1035_v38 = vpop.f32.mrb[14].mxu0 }
 0x106   : > { %v550_v39 = vmax.f32 %v466_v32, 0.0  ;;  %v522_v40 = vadd.f32 %v1347_v21, %v521_v37  ;;  %v469_v41 = vadd.f32 %v1035_v38, %v1347_v21  ;;  %v1051_v42 = vpop.f32.mrb[14].mxu1  ;;  %v460_v43 = vpop.f32.mrb[15].mxu0  ;;  %607 = sbr.rel (!%p1294_p4) target bundleno = 325 (0x145), region = 36 }
 0x107   : > { %v566_v44 = vmax.f32 %v530_v35, 0.0  ;;  %v548_v45 = vmax.f32 %v458_v36, 0.0  ;;  %v533_v46 = vadd.f32 %v1051_v42, %v1347_v21  ;;  %v461_v47 = vadd.f32 %v1347_v21, %v460_v43  ;;  %v524_v48 = vpop.f32.mrb[15].mxu1 }
 0x108   : > { %583 = vst.msk [vmem:[%s1356_s6 + $0x70] sm:$0xff] %vm568_vm3, %v550_v39  ;;  %v564_v49 = vmax.f32 %v522_v40, 0.0  ;;  %v551_v50 = vmax.f32 %v469_v41, 0.0  ;;  %v525_v51 = vadd.f32 %v1347_v21, %v524_v48 }
 0x109   : > { %599 = vst.msk [vmem:[%s1356_s6 + $0xf0] sm:$0xff] %vm568_vm3, %v566_v44  ;;  %581 = vst.msk [vmem:[%s1356_s6 + $0x60] sm:$0xff] %vm568_vm3, %v548_v45  ;;  %v567_v52 = vmax.f32 %v533_v46, 0.0  ;;  %v549_v53 = vmax.f32 %v461_v47, 0.0 }
 0x10a   : > { %597 = vst.msk [vmem:[%s1356_s6 + $0xe0] sm:$0xff] %vm568_vm3, %v564_v49  ;;  %584 = vst.msk [vmem:[%s1356_s6 + $0x78] sm:$0xff] %vm568_vm3, %v551_v50  ;;  %v565_v54 = vmax.f32 %v525_v51, 0.0 }
 0x10b   : > { %600 = vst.msk [vmem:[%s1356_s6 + $0xf8] sm:$0xff] %vm568_vm3, %v567_v52  ;;  %582 = vst.msk [vmem:[%s1356_s6 + $0x68] sm:$0xff] %vm568_vm3, %v549_v53 }
 0x10c   : > { %598 = vst.msk [vmem:[%s1356_s6 + $0xe8] sm:$0xff] %vm568_vm3, %v565_v54 }
 0x10d   : > { %s1600_s7 = smov (!%p610_p8, %s609_s7), 32 }
 0x10e   : > { %s983_s12 = sshll.u32 %s1600_s7, 7 }
 0x10f   : > { %p986_p9 = scmp.eq.s32.totalorder %s983_s12, 0 }
 0x110   : > { %s1460_s14 = sshrl.u32 (!%p986_p9), %s1600_s7, 5 }
 0x111   : > { %618 = sbr.rel (%p986_p9) target bundleno = 325 (0x145), region = 40  ;;  %p987_p10 = scmp.le.s32.totalorder (!%p986_p9), %s1460_s14, 0 }
 0x118   : > { %896 = sbr.rel (%p987_p10) target bundleno = 304 (0x130), region = 116  ;;  %s1591_s15 = smov (!%p987_p10), %s1454_s11 }
 0x119   : > { %s1592_s17 = smov (!%p987_p10), %s1356_s6  ;;  %s1469_s18 = smov (!%p987_p10), 0  }
 0x11a   : > { %s1471_s20 = smov (!%p987_p10), 0  }
 0x11f LB: >> { %v742_v21 = vld [vmem:[%s1222_s17] sm:$0xff]  ;;  %v744_v55 = vld [vmem:[%s1222_s17 + $0x8] sm:$0xff]  ;;  %v746_v56 = vld [vmem:[%s1222_s17 + $0x10] sm:$0xff]  ;;  %s806_s21 = sadd.s32 1, %s1226_s18  ;;  %s736_s20 = sadd.s32 1, %s1230_s20   ;;  %s1230_s20 = sphi %s1471_s20, %s736_s20   ;;  %s1226_s18 = sphi %s1469_s18, %s1595_s18   ;;  %s1222_s17 = sphi %s1592_s17, %s1594_s17   ;;  %s1218_s15 = sphi %s1591_s15, %s1593_s15  }
 0x120   : >> { %743 = vst [vmem:[%s1218_s15] sm:$0xff] %v742_v21  ;;  %745 = vst [vmem:[%s1218_s15 + $0x8] sm:$0xff] %v744_v55  ;;  %v748_v57 = vld [vmem:[%s1222_s17 + $0x18] sm:$0xff]  ;;  %v750_v58 = vld [vmem:[%s1222_s17 + $0x20] sm:$0xff]  ;;  %p807_p11 = scmp.ge.s32.totalorder %s806_s21, %s1460_s14  ;;  %p735_p12 = scmp.ge.s32.totalorder %s736_s20, %s1460_s14 }
 0x121   : >> { %747 = vst [vmem:[%s1218_s15 + $0x10] sm:$0xff] %v746_v56  ;;  %v752_v59 = vld [vmem:[%s1222_s17 + $0x28] sm:$0xff]  ;;  %749 = vst [vmem:[%s1218_s15 + $0x18] sm:$0xff] %v748_v57  ;;  %v754_v60 = vld [vmem:[%s1222_s17 + $0x30] sm:$0xff] }
 0x122   : >> { %751 = vst [vmem:[%s1218_s15 + $0x20] sm:$0xff] %v750_v58  ;;  %753 = vst [vmem:[%s1218_s15 + $0x28] sm:$0xff] %v752_v59  ;;  %v756_v61 = vld [vmem:[%s1222_s17 + $0x38] sm:$0xff]  ;;  %v758_v62 = vld [vmem:[%s1222_s17 + $0x40] sm:$0xff]  ;;  %s1602_s21 = smov (%p807_p11, %s806_s21), 0 }
 0x123   : >> { %755 = vst [vmem:[%s1218_s15 + $0x30] sm:$0xff] %v754_v60  ;;  %757 = vst [vmem:[%s1218_s15 + $0x38] sm:$0xff] %v756_v61  ;;  %v760_v63 = vld [vmem:[%s1222_s17 + $0x48] sm:$0xff]  ;;  %v762_v0 = vld [vmem:[%s1222_s17 + $0x50] sm:$0xff]  ;;  %s988_s22 = sshll.u32 %s1602_s21, 8  ;;  %s1595_s18 = smov %s1602_s21 }
 0x124   : >> { %759 = vst [vmem:[%s1218_s15 + $0x40] sm:$0xff] %v758_v62  ;;  %v764_v1 = vld [vmem:[%s1222_s17 + $0x58] sm:$0xff]  ;;  %761 = vst [vmem:[%s1218_s15 + $0x48] sm:$0xff] %v760_v63  ;;  %v766_v2 = vld [vmem:[%s1222_s17 + $0x60] sm:$0xff]  ;;  %s1527_s23 = scalar_lea.vmem %s1356_s6, %s988_s22 [#allocation2]   ;;  %s812_s24 = scalar_lea.vmem %s1454_s11, %s988_s22  }
 0x125   : >> { %763 = vst [vmem:[%s1218_s15 + $0x50] sm:$0xff] %v762_v0  ;;  %765 = vst [vmem:[%s1218_s15 + $0x58] sm:$0xff] %v764_v1  ;;  %v768_v3 = vld [vmem:[%s1222_s17 + $0x68] sm:$0xff]  ;;  %v770_v4 = vld [vmem:[%s1222_s17 + $0x70] sm:$0xff] }
 0x126   : >> { %767 = vst [vmem:[%s1218_s15 + $0x60] sm:$0xff] %v766_v2  ;;  %769 = vst [vmem:[%s1218_s15 + $0x68] sm:$0xff] %v768_v3  ;;  %v772_v5 = vld [vmem:[%s1222_s17 + $0x78] sm:$0xff]  ;;  %v774_v6 = vld [vmem:[%s1222_s17 + $0x80] sm:$0xff] }
 0x127   : >> { %771 = vst [vmem:[%s1218_s15 + $0x70] sm:$0xff] %v770_v4  ;;  %v776_v7 = vld [vmem:[%s1222_s17 + $0x88] sm:$0xff]  ;;  %773 = vst [vmem:[%s1218_s15 + $0x78] sm:$0xff] %v772_v5  ;;  %v778_v8 = vld [vmem:[%s1222_s17 + $0x90] sm:$0xff] }
 0x128   : >> { %775 = vst [vmem:[%s1218_s15 + $0x80] sm:$0xff] %v774_v6  ;;  %777 = vst [vmem:[%s1218_s15 + $0x88] sm:$0xff] %v776_v7  ;;  %v780_v9 = vld [vmem:[%s1222_s17 + $0x98] sm:$0xff]  ;;  %v782_v10 = vld [vmem:[%s1222_s17 + $0xa0] sm:$0xff] }
 0x129   : >> { %779 = vst [vmem:[%s1218_s15 + $0x90] sm:$0xff] %v778_v8  ;;  %781 = vst [vmem:[%s1218_s15 + $0x98] sm:$0xff] %v780_v9  ;;  %v784_v11 = vld [vmem:[%s1222_s17 + $0xa8] sm:$0xff]  ;;  %v786_v12 = vld [vmem:[%s1222_s17 + $0xb0] sm:$0xff]  ;;  %738 = sbr.rel (!%p735_p12) target bundleno = 287 (0x11f), region = 122 }
 0x12a   : >> { %783 = vst [vmem:[%s1218_s15 + $0xa0] sm:$0xff] %v782_v10  ;;  %v788_v13 = vld [vmem:[%s1222_s17 + $0xb8] sm:$0xff]  ;;  %785 = vst [vmem:[%s1218_s15 + $0xa8] sm:$0xff] %v784_v11  ;;  %v790_v14 = vld [vmem:[%s1222_s17 + $0xc0] sm:$0xff] }
 0x12b   : >> { %787 = vst [vmem:[%s1218_s15 + $0xb0] sm:$0xff] %v786_v12  ;;  %789 = vst [vmem:[%s1218_s15 + $0xb8] sm:$0xff] %v788_v13  ;;  %v792_v15 = vld [vmem:[%s1222_s17 + $0xc8] sm:$0xff]  ;;  %v794_v16 = vld [vmem:[%s1222_s17 + $0xd0] sm:$0xff] }
 0x12c   : >> { %791 = vst [vmem:[%s1218_s15 + $0xc0] sm:$0xff] %v790_v14  ;;  %793 = vst [vmem:[%s1218_s15 + $0xc8] sm:$0xff] %v792_v15  ;;  %v796_v17 = vld [vmem:[%s1222_s17 + $0xd8] sm:$0xff]  ;;  %v798_v18 = vld [vmem:[%s1222_s17 + $0xe0] sm:$0xff] }
 0x12d   : >> { %795 = vst [vmem:[%s1218_s15 + $0xd0] sm:$0xff] %v794_v16  ;;  %v800_v19 = vld [vmem:[%s1222_s17 + $0xe8] sm:$0xff]  ;;  %797 = vst [vmem:[%s1218_s15 + $0xd8] sm:$0xff] %v796_v17  ;;  %v802_v20 = vld [vmem:[%s1222_s17 + $0xf0] sm:$0xff] }
 0x12e   : >> { %799 = vst [vmem:[%s1218_s15 + $0xe0] sm:$0xff] %v798_v18  ;;  %801 = vst [vmem:[%s1218_s15 + $0xe8] sm:$0xff] %v800_v19  ;;  %v804_v22 = vld [vmem:[%s1222_s17 + $0xf8] sm:$0xff]  ;;  %s1594_s17 = smov %s1527_s23 }
 0x12f   : >> { %803 = vst [vmem:[%s1218_s15 + $0xf0] sm:$0xff] %v802_v20  ;;  %805 = vst [vmem:[%s1218_s15 + $0xf8] sm:$0xff] %v804_v22  ;;  %s1593_s15 = smov %s812_s24 }
 0x130 PF: > { %s1568_s25 = sand.u32 31, %s1600_s7   ;;  %s999_s26 = sshll.u32 %s1460_s14, 8 }
 0x131   : > { %s817_s27 = scalar_lea.vmem %s1356_s6, %s999_s26 [#allocation2]   ;;  %s819_s28 = scalar_lea.vmem %s1454_s11, %s999_s26  }
 0x132   : > { %p993_p13 = scmp.le.s32.totalorder %s1568_s25, 0 }
 0x133   : > { %s1232_s29 = smov (!%p993_p13), %s819_s28   ;;  %s1236_s30 = smov (!%p993_p13), %s817_s27  }
 0x134   : > { %910 = sbr.rel (%p993_p13) target bundleno = 325 (0x145), region = 127  ;;  %s1240_s4 = smov (!%p993_p13), 0  }
 0x135   : > { %s1244_s5 = smov (!%p993_p13), 0  }
 0x13b LB: >> { %v829_v23 = vld [vmem:[%s1238_s30] sm:$0xff]  ;;  %s831_s7 = sadd.s32 1, %s1242_s4  ;;  %s823_s5 = sadd.s32 1, %s1246_s5   ;;  %s1246_s5 = sphi %s1244_s5, %s823_s5   ;;  %s1242_s4 = sphi %s1240_s4, %s1241_s4   ;;  %s1238_s30 = sphi %s1236_s30, %s836_s30   ;;  %s1234_s29 = sphi %s1232_s29, %s837_s29  }
 0x13c   : >> { %830 = vst [vmem:[%s1234_s29] sm:$0xff] %v829_v23  ;;  %p832_p0 = scmp.ge.s32.totalorder %s831_s7, %s1568_s25  ;;  %p822_p1 = scmp.ge.s32.totalorder %s823_s5, %s1568_s25 }
 0x13e   : >> { %s1604_s7 = smov (%p832_p0, %s831_s7), 0  ;;  %825 = sbr.rel (!%p822_p1) target bundleno = 315 (0x13b), region = 133 }
 0x13f   : >> { %s994_s6 = sshll.u32 %s1604_s7, 3  ;;  %s1241_s4 = smov %s1604_s7  }
 0x140   : >> { %s836_s30 = scalar_lea.vmem %s817_s27, %s994_s6 [#allocation2]   ;;  %s837_s29 = scalar_lea.vmem %s819_s28, %s994_s6  }
 0x145 PF: > { %p10_p2 = scmp.ge.s32.totalorder %s1284_s16, 4   ;;  %s1596_s12 = smov %s1210_s13 }
 0x146   : > { %s1597_s13 = smov %s1292_s19  ;;  %s1598_s14 = smov %s1284_s16 }
 0x147   :  { %12 = sbr.rel (!%p10_p2) target bundleno = 2 (0x2), region = 144 }

// kernel: conv_autoencoder_forward.7
= control target key start
LH: loop header
LB: loop body
LE: loop exit
PB: predicated region body
PF: predicated region fallthrough
CT: control target
= control target key end

     0   :  { %v388_v0 = vmov 0   ;;  %vm167_vm0 = vcmask 130048   ;;  %vm290_vm1 = vcmask 261120   ;;  %vm303_vm2 = vcmask 254976   ;;  %s551_s1 = inlined_call_operand.vmem [shape: bf16[144,32], index: 1, kind: input, shape index: {}]   ;;  %s552_s0 = inlined_call_operand.vmem [shape: bf16[98,144], index: 0, kind: input, shape index: {}]   ;;  %s553_s2 = inlined_call_operand.vmem [shape: f32[1,32], index: 2, kind: input, shape index: {}]   ;;  %s554_s3 = inlined_call_operand.vmem [shape: f32[98,32], index: 3, kind: output, shape index: {}]  }
   0x1   :  { %189 = vmatprep.subr.bf16.mxu0 %v388_v0  ;;  %v359_v1 = vld [vmem:[%s551_s1] sm:$0xff]   ;;  %340 = vmatprep.subr.bf16.mxu1 %v388_v0  ;;  %v360_v2 = vld [vmem:[%s551_s1 + $0x8] sm:$0xff]   ;;  %v361_v3 = vld [vmem:[%s551_s1 + $0x10] sm:$0xff]  }
   0x2   :  { %190 = vmatpush1.bf16.msra.mxu0 %v359_v1  ;;  %349 = vmatpush1.bf16.msra.mxu1 %v359_v1  ;;  %v362_v4 = vld [vmem:[%s551_s1 + $0x18] sm:$0xff]   ;;  %v370_v5 = vld [vmem:[%s552_s0 + $0x4] ss:$8 sps:$4 sm:$0xff]   ;;  %v365_v9 = vld [vmem:[%s551_s1 + $0x30] sm:$0xff]  }
   0x3   :  { %191 = vmatprep.subr.bf16.mxu0 %v388_v0  ;;  %341 = vmatprep.subr.bf16.mxu1 %v388_v0  ;;  %v373_v6 = vld [vmem:[%s552_s0 + $0x44] ss:$8 sps:$4 sm:$0xff]   ;;  %v366_v10 = vld [vmem:[%s551_s1 + $0x38] sm:$0xff]   ;;  %v368_v12 = vld [vmem:[%s552_s0] ss:$8 sps:$4 sm:$0xff]  }
   0x4   :  { %333 = vmatprep.mubr.msk.bf16.mxu0 %vm167_vm0, %v370_v5  ;;  %337 = vmatprep.mubr.msk.bf16.mxu1 %vm167_vm0, %v373_v6  ;;  %v363_v7 = vld [vmem:[%s551_s1 + $0x20] sm:$0xff]   ;;  %v364_v8 = vld [vmem:[%s551_s1 + $0x28] sm:$0xff]   ;;  %v374_v14 = vld [vmem:[%s552_s0 + $0x14] ss:$8 sps:$4 sm:$0xff]  }
   0x5   :  { %v367_v11 = vld [vmem:[%s551_s1 + $0x40] sm:$0xff]   ;;  %v377_v15 = vld [vmem:[%s552_s0 + $0x54] ss:$8 sps:$4 sm:$0xff]   ;;  %v376_v17 = vld [vmem:[%s552_s0 + $0x10] ss:$8 sps:$4 sm:$0xff]  }
   0x6   :  { %192 = vmatpush1.bf16.msra.mxu0 %v360_v2  ;;  %350 = vmatpush1.bf16.msra.mxu1 %v360_v2  ;;  %v371_v13 = vld [vmem:[%s552_s0 + $0x40] ss:$8 sps:$4 sm:$0xff]   ;;  %v381_v18 = vld [vmem:[%s552_s0 + $0x50] ss:$8 sps:$4 sm:$0xff]   ;;  %v379_v19 = vld [vmem:[%s552_s0 + $0x24] ss:$8 sps:$4 sm:$0xff]  }
   0x7   :  { %193 = vmatprep.subr.bf16.mxu0 %v388_v0  ;;  %342 = vmatprep.subr.bf16.mxu1 %v388_v0  ;;  %v27_v16 = vld [vmem:[%s552_s0 + $0x60] sm:$0x11]  ;;  %v384_v23 = vld [vmem:[%s552_s0 + $0x34] ss:$8 sps:$4 sm:$0xff]   ;;  %v387_v24 = vld [vmem:[%s552_s0 + $0x30] ss:$8 sps:$4 sm:$0xff]  }
   0x8   :  { %v323_v20 = vcombine.high %v27_v16, %v27_v16  ;;  %v382_v21 = vld [vmem:[%s552_s0 + $0x20] ss:$8 sps:$4 sm:$0xff]   ;;  %v322_v22 = vcombine.low %v27_v16, %v27_v16 }
   0x9   :  { %v485_v25 = vld [vmem:[%s553_s2] ss:$0 sm:$0xff] }
   0xa   :  { %194 = vmatpush1.bf16.msra.mxu0 %v361_v3  ;;  %351 = vmatpush1.bf16.msra.mxu1 %v361_v3 }
   0xb   :  { %195 = vmatprep.subr.bf16.mxu0 %v388_v0  ;;  %343 = vmatprep.subr.bf16.mxu1 %v388_v0 }
   0xe   :  { %196 = vmatpush1.bf16.msra.mxu0 %v362_v4  ;;  %352 = vmatpush1.bf16.msra.mxu1 %v362_v4 }
   0xf   :  { %197 = vmatprep.subr.bf16.mxu0 %v388_v0  ;;  %344 = vmatprep.subr.bf16.mxu1 %v388_v0 }
  0x12   :  { %198 = vmatpush1.bf16.msra.mxu0 %v363_v7  ;;  %353 = vmatpush1.bf16.msra.mxu1 %v363_v7 }
  0x13   :  { %199 = vmatprep.subr.bf16.mxu0 %v388_v0  ;;  %345 = vmatprep.subr.bf16.mxu1 %v388_v0 }
  0x16   :  { %200 = vmatpush1.bf16.msra.mxu0 %v364_v8  ;;  %354 = vmatpush1.bf16.msra.mxu1 %v364_v8 }
  0x17   :  { %201 = vmatprep.subr.bf16.mxu0 %v388_v0  ;;  %346 = vmatprep.subr.bf16.mxu1 %v388_v0 }
  0x1a   :  { %202 = vmatpush1.bf16.msra.mxu0 %v365_v9  ;;  %355 = vmatpush1.bf16.msra.mxu1 %v365_v9 }
  0x1b   :  { %203 = vmatprep.subr.bf16.mxu0 %v388_v0  ;;  %347 = vmatprep.subr.bf16.mxu1 %v388_v0 }
  0x1e   :  { %204 = vmatpush1.bf16.msra.mxu0 %v366_v10  ;;  %356 = vmatpush1.bf16.msra.mxu1 %v366_v10 }
  0x1f   :  { %205 = vmatprep.subr.bf16.mxu0 %v388_v0  ;;  %348 = vmatprep.subr.bf16.mxu1 %v388_v0 }
  0x22   :  { %206 = vmatpush1.bf16.msra.mxu0 %v367_v11  ;;  %357 = vmatpush1.bf16.msra.mxu1 %v367_v11 }
  0x25   :  { %222 = vmatmul.mubr.bf16.vlgmr.msra.gmra.mrb[0].mxu0 %v368_v12  ;;  %254 = vmatmul.mubr.bf16.vlgmr.msra.gmra.mrb[0].mxu1 %v371_v13 }
  0x26   :  { %334 = vmatprep.mubr.msk.bf16.mxu0 %vm167_vm0, %v374_v14  ;;  %338 = vmatprep.mubr.msk.bf16.mxu1 %vm167_vm0, %v377_v15 }
  0x2d   :  { %230 = vmatmul.mubr.bf16.gmra.mrb[4].mxu0 %v376_v17  ;;  %262 = vmatmul.mubr.bf16.gmra.mrb[4].mxu1 %v381_v18 }
  0x2e   :  { %335 = vmatprep.mubr.msk.bf16.mxu0 %vm167_vm0, %v379_v19  ;;  %339 = vmatprep.mubr.msk.bf16.mxu1 %vm167_vm0, %v323_v20 }
  0x35   :  { %238 = vmatmul.mubr.bf16.gmra.mrb[8].mxu0 %v382_v21  ;;  %270 = vmatmul.mubr.bf16.gmra.mrb[8].mxu1 %v322_v22 }
  0x36   :  { %336 = vmatprep.mubr.msk.bf16.mxu0 %vm167_vm0, %v384_v23 }
  0x3d   :  { %246 = vmatmul.mubr.bf16.gmra.mrb[12].mxu0 %v387_v24 }
  0xf8   :  { %v223_v26 = vpop.f32.mrb[0].mxu0  ;;  %v255_v27 = vpop.f32.mrb[0].mxu1 }
  0xf9   :  { %v224_v28 = vadd.f32 %v485_v25, %v223_v26  ;;  %v225_v29 = vpop.f32.mrb[1].mxu0  ;;  %v256_v30 = vadd.f32 %v485_v25, %v255_v27  ;;  %v257_v31 = vpop.f32.mrb[1].mxu1 }
  0xfa   :  { %v226_v32 = vpop.f32.mrb[2].mxu0  ;;  %v258_v33 = vpop.f32.mrb[2].mxu1 }
  0xfb   :  { %v277_v34 = vmax.f32 %v224_v28, 0.0  ;;  %v227_v35 = vadd.f32 %v485_v25, %v226_v32  ;;  %v228_v36 = vpop.f32.mrb[3].mxu0  ;;  %v285_v37 = vmax.f32 %v256_v30, 0.0  ;;  %v259_v38 = vadd.f32 %v485_v25, %v258_v33  ;;  %v260_v39 = vpop.f32.mrb[3].mxu1 }
  0xfd   :  { %291 = vst.msk [vmem:[%s554_s3] sm:$0xff] %vm290_vm1, %v277_v34  ;;  %v278_v40 = vmax.f32 %v227_v35, 0.0  ;;  %299 = vst.msk [vmem:[%s554_s3 + $0x40] sm:$0xff] %vm290_vm1, %v285_v37  ;;  %v286_v41 = vmax.f32 %v259_v38, 0.0 }
  0xff   :  { %292 = vst.msk [vmem:[%s554_s3 + $0x8] sm:$0xff] %vm290_vm1, %v278_v40  ;;  %300 = vst.msk [vmem:[%s554_s3 + $0x48] sm:$0xff] %vm290_vm1, %v286_v41 }
 0x100   :  { %v231_v42 = vpop.f32.mrb[4].mxu0  ;;  %v263_v43 = vpop.f32.mrb[4].mxu1 }
 0x101   :  { %v232_v44 = vadd.f32 %v485_v25, %v231_v42  ;;  %v233_v45 = vpop.f32.mrb[5].mxu0  ;;  %v264_v46 = vadd.f32 %v485_v25, %v263_v43  ;;  %v265_v47 = vpop.f32.mrb[5].mxu1 }
 0x102   :  { %v234_v48 = vpop.f32.mrb[6].mxu0  ;;  %v266_v49 = vpop.f32.mrb[6].mxu1 }
 0x103   :  { %v279_v50 = vmax.f32 %v232_v44, 0.0  ;;  %v235_v51 = vadd.f32 %v485_v25, %v234_v48  ;;  %v236_v52 = vpop.f32.mrb[7].mxu0  ;;  %v287_v53 = vmax.f32 %v264_v46, 0.0  ;;  %v267_v54 = vadd.f32 %v485_v25, %v266_v49  ;;  %v268_v55 = vpop.f32.mrb[7].mxu1 }
 0x105   :  { %293 = vst.msk [vmem:[%s554_s3 + $0x10] sm:$0xff] %vm290_vm1, %v279_v50  ;;  %v280_v56 = vmax.f32 %v235_v51, 0.0  ;;  %301 = vst.msk [vmem:[%s554_s3 + $0x50] sm:$0xff] %vm290_vm1, %v287_v53  ;;  %v288_v57 = vmax.f32 %v267_v54, 0.0 }
 0x107   :  { %294 = vst.msk [vmem:[%s554_s3 + $0x18] sm:$0xff] %vm290_vm1, %v280_v56  ;;  %302 = vst.msk [vmem:[%s554_s3 + $0x58] sm:$0xff] %vm290_vm1, %v288_v57 }
 0x108   :  { %v239_v58 = vpop.f32.mrb[8].mxu0  ;;  %v271_v59 = vpop.f32.mrb[8].mxu1 }
 0x109   :  { %v240_v60 = vadd.f32 %v485_v25, %v239_v58  ;;  %v241_v61 = vpop.f32.mrb[9].mxu0  ;;  %v272_v62 = vadd.f32 %v485_v25, %v271_v59  ;;  %v273_v63 = vpop.f32.mrb[9].mxu1 }
 0x10a   :  { %v242_v0 = vpop.f32.mrb[10].mxu0  ;;  %v274_v1 = vpop.f32.mrb[10].mxu1 }
 0x10b   :  { %v281_v2 = vmax.f32 %v240_v60, 0.0  ;;  %v243_v3 = vadd.f32 %v485_v25, %v242_v0  ;;  %v244_v4 = vpop.f32.mrb[11].mxu0  ;;  %v289_v5 = vmax.f32 %v272_v62, 0.0  ;;  %v275_v6 = vpop.f32.mrb[11].mxu1 }
 0x10d   :  { %295 = vst.msk [vmem:[%s554_s3 + $0x20] sm:$0xff] %vm290_vm1, %v281_v2  ;;  %v282_v7 = vmax.f32 %v243_v3, 0.0 }
 0x10e   :  { %304 = vst.msk [vmem:[%s554_s3 + $0x60] sm:$0x3] %vm303_vm2, %v289_v5 }
 0x10f   :  { %296 = vst.msk [vmem:[%s554_s3 + $0x28] sm:$0xff] %vm290_vm1, %v282_v7 }
 0x110   :  { %v247_v8 = vpop.f32.mrb[12].mxu0 }
 0x111   :  { %v248_v9 = vadd.f32 %v485_v25, %v247_v8  ;;  %v249_v10 = vpop.f32.mrb[13].mxu0 }
 0x112   :  { %v250_v11 = vpop.f32.mrb[14].mxu0 }
 0x113   :  { %v283_v12 = vmax.f32 %v248_v9, 0.0  ;;  %v251_v13 = vadd.f32 %v485_v25, %v250_v11  ;;  %v252_v14 = vpop.f32.mrb[15].mxu0 }
 0x115   :  { %297 = vst.msk [vmem:[%s554_s3 + $0x30] sm:$0xff] %vm290_vm1, %v283_v12  ;;  %v284_v15 = vmax.f32 %v251_v13, 0.0 }
 0x117   :  { %298 = vst.msk [vmem:[%s554_s3 + $0x38] sm:$0xff] %vm290_vm1, %v284_v15 }

// kernel: conv_autoencoder_forward.8
= control target key start
LH: loop header
LB: loop body
LE: loop exit
PB: predicated region body
PF: predicated region fallthrough
CT: control target
= control target key end

     0   :  { %v1546_v22 = vmov 1966171168   ;;  %v226_v24 = vlaneseq  ;;  %vm1548_vm0 = vmmov 0   ;;  %vm910_vm1 = vcmask 261120   ;;  %s1903_s1 = inlined_call_operand.vmem [shape: bf16[1568,64], index: 1, kind: input, shape index: {}]   ;;  %s1904_s0 = inlined_call_operand.vmem [shape: bf16[2,1568], index: 0, kind: input, shape index: {}]   ;;  %s1905_s2 = inlined_call_operand.vmem [shape: f32[1,64], index: 2, kind: input, shape index: {}]   ;;  %s1906_s3 = inlined_call_operand.vmem [shape: f32[2,64], index: 3, kind: output, shape index: {}]  }
   0x1   :  { %v1446_v0 = vld [vmem:[%s1903_s1 + $0x40] sm:$0xff]   ;;  %v1450_v4 = vld [vmem:[%s1903_s1 + $0x48] sm:$0xff]   ;;  %v1454_v8 = vld [vmem:[%s1903_s1 + $0x50] sm:$0xff]   ;;  %v224_v23 = vunpack.c.l.s4 %v1546_v22  ;;  %vm1194_vm2 = vcmask 517120  }
   0x2   :  { %v1447_v1 = vld [vmem:[%s1903_s1] sm:$0xff]   ;;  %1300 = vmatprep.subr.bf16.mxu0 %v1446_v0  ;;  %v1451_v5 = vld [vmem:[%s1903_s1 + $0x8] sm:$0xff]   ;;  %v1455_v9 = vld [vmem:[%s1903_s1 + $0x10] sm:$0xff]   ;;  %v227_v30 = vshrl.u32 %v226_v24, 7 }
   0x3   :  { %v1448_v2 = vld [vmem:[%s1903_s1 + $0xc0] sm:$0xff]   ;;  %1301 = vmatpush3.bf16.msra.mxu0 %v1447_v1  ;;  %v1452_v6 = vld [vmem:[%s1903_s1 + $0xc8] sm:$0xff]   ;;  %v1456_v10 = vld [vmem:[%s1903_s1 + $0xd0] sm:$0xff]   ;;  %v225_v29 = vunpack.c.0.s8 %v224_v23 }
   0x4   :  { %v1449_v3 = vld [vmem:[%s1903_s1 + $0x80] sm:$0xff]   ;;  %1322 = vmatprep.subr.bf16.mxu1 %v1448_v2  ;;  %1302 = vmatprep.subr.bf16.mxu0 %v1450_v4  ;;  %v1453_v7 = vld [vmem:[%s1903_s1 + $0x88] sm:$0xff]   ;;  %v1457_v11 = vld [vmem:[%s1903_s1 + $0x90] sm:$0xff]  }
   0x5   :  { %1323 = vmatpush3.bf16.msra.mxu1 %v1449_v3  ;;  %v1458_v12 = vld [vmem:[%s1903_s1 + $0x58] sm:$0xff]   ;;  %v1462_v16 = vld [vmem:[%s1903_s1 + $0x60] sm:$0xff]   ;;  %v1466_v20 = vld [vmem:[%s1903_s1 + $0x68] sm:$0xff]   ;;  %v1659_v35 = vsub.s32 %v225_v29, %v227_v30 }
   0x6   :  { %1324 = vmatprep.subr.bf16.mxu1 %v1452_v6  ;;  %v1459_v13 = vld [vmem:[%s1903_s1 + $0x18] sm:$0xff]   ;;  %v1463_v17 = vld [vmem:[%s1903_s1 + $0x20] sm:$0xff]   ;;  %v1467_v21 = vld [vmem:[%s1903_s1 + $0x28] sm:$0xff]  }
   0x7   :  { %1303 = vmatpush3.bf16.msra.mxu0 %v1451_v5  ;;  %v1460_v14 = vld [vmem:[%s1903_s1 + $0xd8] sm:$0xff]   ;;  %v1464_v18 = vld [vmem:[%s1903_s1 + $0xe0] sm:$0xff]   ;;  %v1468_v25 = vld [vmem:[%s1903_s1 + $0xe8] sm:$0xff]  }
   0x8   :  { %1304 = vmatprep.subr.bf16.mxu0 %v1454_v8  ;;  %v1461_v15 = vld [vmem:[%s1903_s1 + $0x98] sm:$0xff]   ;;  %v1465_v19 = vld [vmem:[%s1903_s1 + $0xa0] sm:$0xff]   ;;  %v1469_v26 = vld [vmem:[%s1903_s1 + $0xa8] sm:$0xff]  }
   0x9   :  { %1325 = vmatpush3.bf16.msra.mxu1 %v1453_v7  ;;  %v1470_v27 = vld [vmem:[%s1903_s1 + $0x70] sm:$0xff]   ;;  %v1474_v33 = vld [vmem:[%s1903_s1 + $0x78] sm:$0xff]   ;;  %v15_v38 = vld [vmem:[%s1904_s0] sm:$0xff] }
   0xa   :  { %1326 = vmatprep.subr.bf16.mxu1 %v1456_v10  ;;  %v1471_v28 = vld [vmem:[%s1903_s1 + $0x30] sm:$0xff]   ;;  %v1475_v34 = vld [vmem:[%s1903_s1 + $0x38] sm:$0xff]   ;;  %v222_v39 = vcombine.high %v15_v38, %v15_v38  ;;  %v229_v40 = vrot.slane %v15_v38, %v1659_v35  ;;  %v1480_v41 = vld [vmem:[%s1903_s1 + $0x140] sm:$0xff]  }
   0xb   :  { %1305 = vmatpush3.bf16.msra.mxu0 %v1455_v9  ;;  %v1472_v31 = vld [vmem:[%s1903_s1 + $0xf0] sm:$0xff]   ;;  %v1476_v36 = vld [vmem:[%s1903_s1 + $0xf8] sm:$0xff]   ;;  %v1482_v44 = vld [vmem:[%s1903_s1 + $0x1c0] sm:$0xff]  }
   0xc   :  { %1306 = vmatprep.subr.bf16.mxu0 %v1458_v12  ;;  %v1473_v32 = vld [vmem:[%s1903_s1 + $0xb0] sm:$0xff]   ;;  %v1477_v37 = vld [vmem:[%s1903_s1 + $0xb8] sm:$0xff]   ;;  %v237_v42 = vcombine.high %v229_v40, %v229_v40  ;;  %v245_v43 = vrot.slane %v229_v40, %v1659_v35  ;;  %v1679_v45 = vrot.slane %v222_v39, %v1659_v35  ;;  %v1481_v47 = vld [vmem:[%s1903_s1 + $0x100] sm:$0xff]  }
   0xd   :  { %1327 = vmatpush3.bf16.msra.mxu1 %v1457_v11  ;;  %v1484_v50 = vld [vmem:[%s1903_s1 + $0x148] sm:$0xff]   ;;  %v1483_v52 = vld [vmem:[%s1903_s1 + $0x180] sm:$0xff]   ;;  %v1488_v57 = vld [vmem:[%s1903_s1 + $0x150] sm:$0xff]  }
   0xe   :  { %1328 = vmatprep.subr.bf16.mxu1 %v1460_v14  ;;  %v259_v46 = vrot.slane %v237_v42, %v1659_v35  ;;  %v238_v48 = vcombine.high %v1679_v45, %v1679_v45  ;;  %v267_v49 = vcombine.high %v245_v43, %v245_v43  ;;  %v1486_v54 = vld [vmem:[%s1903_s1 + $0x1c8] sm:$0xff]   ;;  %v1490_v59 = vld [vmem:[%s1903_s1 + $0x1d0] sm:$0xff]   ;;  %v1492_v61 = vld [vmem:[%s1903_s1 + $0x158] sm:$0xff]  }
   0xf   :  { %1307 = vmatpush3.bf16.msra.mxu0 %v1459_v13  ;;  %v1485_v55 = vld [vmem:[%s1903_s1 + $0x108] sm:$0xff]   ;;  %v1489_v60 = vld [vmem:[%s1903_s1 + $0x110] sm:$0xff]   ;;  %v1494_v63 = vld [vmem:[%s1903_s1 + $0x1d8] sm:$0xff]  }
  0x10   :  { %1308 = vmatprep.subr.bf16.mxu0 %v1462_v16  ;;  %946 = vmatprep.mubr.bf16.mxu0 %v259_v46  ;;  %v269_v51 = vcombine.high %v259_v46, %v259_v46  ;;  %v266_v53 = vrot.slane %v238_v48, %v1659_v35  ;;  %v1487_v58 = vld [vmem:[%s1903_s1 + $0x188] sm:$0xff]   ;;  %v1491_v62 = vld [vmem:[%s1903_s1 + $0x190] sm:$0xff]   ;;  %v1493_v0 = vld [vmem:[%s1903_s1 + $0x118] sm:$0xff]  }
  0x11   :  { %1329 = vmatpush3.bf16.msra.mxu1 %v1461_v15  ;;  %v1496_v1 = vld [vmem:[%s1903_s1 + $0x160] sm:$0xff]   ;;  %v1495_v2 = vld [vmem:[%s1903_s1 + $0x198] sm:$0xff]   ;;  %v1739_v5 = vld [vmem:[%s1904_s0 + $0x8] sm:$0x1f] }
  0x12   :  { %1330 = vmatprep.subr.bf16.mxu1 %v1464_v18  ;;  %986 = vmatprep.mubr.bf16.mxu1 %v269_v51  ;;  %v270_v56 = vcombine.high %v266_v53, %v266_v53  ;;  %v1498_v3 = vld [vmem:[%s1903_s1 + $0x1e0] sm:$0xff]   ;;  %v1500_v6 = vld [vmem:[%s1903_s1 + $0x168] sm:$0xff]   ;;  %v1504_v10 = vld [vmem:[%s1903_s1 + $0x170] sm:$0xff]   ;;  %v1761_v12 = vrot.slane %v1739_v5, %v1659_v35 }
  0x13   :  { %1309 = vmatpush3.bf16.msra.mxu0 %v1463_v17  ;;  %v1497_v4 = vld [vmem:[%s1903_s1 + $0x120] sm:$0xff]   ;;  %v1502_v8 = vld [vmem:[%s1903_s1 + $0x1e8] sm:$0xff]   ;;  %v1506_v13 = vld [vmem:[%s1903_s1 + $0x1f0] sm:$0xff]  }
  0x14   :  { %1310 = vmatprep.subr.bf16.mxu0 %v1466_v20  ;;  %v1499_v7 = vld [vmem:[%s1903_s1 + $0x1a0] sm:$0xff]   ;;  %v1501_v9 = vld [vmem:[%s1903_s1 + $0x128] sm:$0xff]   ;;  %v1505_v14 = vld [vmem:[%s1903_s1 + $0x130] sm:$0xff]   ;;  %v286_v17 = vcombine.high %v1761_v12, %v1761_v12  ;;  %v252_v20 = vrot.slane %v1679_v45, %v1659_v35 }
  0x15   :  { %1331 = vmatpush3.bf16.msra.mxu1 %v1465_v19  ;;  %v1503_v11 = vld [vmem:[%s1903_s1 + $0x1a8] sm:$0xff]   ;;  %v1508_v15 = vld [vmem:[%s1903_s1 + $0x178] sm:$0xff]   ;;  %v1507_v16 = vld [vmem:[%s1903_s1 + $0x1b0] sm:$0xff]  }
  0x16   :  { %1332 = vmatprep.subr.bf16.mxu1 %v1468_v25  ;;  %v1510_v18 = vld [vmem:[%s1903_s1 + $0x1f8] sm:$0xff]   ;;  %v307_v23 = vrot.slane %v286_v17, %v1659_v35  ;;  %v1514_v24 = vld [vmem:[%s1903_s1 + $0x2c0] sm:$0xff]   ;;  %v1518_v30 = vld [vmem:[%s1903_s1 + $0x2c8] sm:$0xff]  }
  0x17   :  { %1311 = vmatpush3.bf16.msra.mxu0 %v1467_v21  ;;  %v1509_v19 = vld [vmem:[%s1903_s1 + $0x138] sm:$0xff]   ;;  %v1512_v21 = vld [vmem:[%s1903_s1 + $0x240] sm:$0xff]   ;;  %v1523_v38 = vld [vmem:[%s1903_s1 + $0x290] sm:$0xff]  }
  0x18   :  { %1312 = vmatprep.subr.bf16.mxu0 %v1470_v27  ;;  %v1511_v22 = vld [vmem:[%s1903_s1 + $0x1b8] sm:$0xff]   ;;  %v1513_v25 = vld [vmem:[%s1903_s1 + $0x200] sm:$0xff]   ;;  %v1516_v27 = vld [vmem:[%s1903_s1 + $0x248] sm:$0xff]   ;;  %v309_v29 = vcombine.high %v307_v23, %v307_v23 }
  0x19   :  { %1333 = vmatpush3.bf16.msra.mxu1 %v1469_v26  ;;  %v268_v26 = vcombine.high %v252_v20, %v252_v20  ;;  %v1526_v39 = vld [vmem:[%s1903_s1 + $0x2d8] sm:$0xff]   ;;  %v1532_v45 = vld [vmem:[%s1903_s1 + $0x268] sm:$0xff]   ;;  %v1531_v46 = vld [vmem:[%s1903_s1 + $0x2a0] sm:$0xff]  }
  0x1a   :  { %1334 = vmatprep.subr.bf16.mxu1 %v1472_v31  ;;  %v1517_v31 = vld [vmem:[%s1903_s1 + $0x208] sm:$0xff]   ;;  %v1525_v40 = vld [vmem:[%s1903_s1 + $0x218] sm:$0xff]   ;;  %v1538_v51 = vld [vmem:[%s1903_s1 + $0x2f0] sm:$0xff]  }
  0x1b   :  { %1313 = vmatpush3.bf16.msra.mxu0 %v1471_v28  ;;  %v1515_v28 = vld [vmem:[%s1903_s1 + $0x280] sm:$0xff]   ;;  %v1527_v42 = vld [vmem:[%s1903_s1 + $0x298] sm:$0xff]   ;;  %v1533_v48 = vld [vmem:[%s1903_s1 + $0x228] sm:$0xff]  }
  0x1c   :  { %1314 = vmatprep.subr.bf16.mxu0 %v1474_v33  ;;  %v1519_v33 = vld [vmem:[%s1903_s1 + $0x288] sm:$0xff]  }
  0x1d   :  { %1335 = vmatpush3.bf16.msra.mxu1 %v1473_v32  ;;  %v1520_v32 = vld [vmem:[%s1903_s1 + $0x250] sm:$0xff]  }
  0x1e   :  { %1336 = vmatprep.subr.bf16.mxu1 %v1476_v36  ;;  %v1521_v36 = vld [vmem:[%s1903_s1 + $0x210] sm:$0xff]  }
  0x1f   :  { %1315 = vmatpush3.bf16.msra.mxu0 %v1475_v34  ;;  %v1522_v34 = vld [vmem:[%s1903_s1 + $0x2d0] sm:$0xff]  }
  0x20   :  { %1344 = vmatprep.subr.bf16.mxu0 %v1480_v41  ;;  %v1528_v41 = vld [vmem:[%s1903_s1 + $0x260] sm:$0xff]  }
  0x21   :  { %1337 = vmatpush3.bf16.msra.mxu1 %v1477_v37  ;;  %v1524_v37 = vld [vmem:[%s1903_s1 + $0x258] sm:$0xff]  }
  0x22   :  { %1366 = vmatprep.subr.bf16.mxu1 %v1482_v44  ;;  %947 = vmatmul.mubr.bf16.vlgmr.msra.gmra.mrb[0].mxu0 %v245_v43  ;;  %v1530_v43 = vld [vmem:[%s1903_s1 + $0x2e0] sm:$0xff]  }
  0x23   :  { %1345 = vmatpush3.bf16.msra.mxu0 %v1481_v47  ;;  %1026 = vmatprep.mubr.bf16.mxu0 %v266_v53  ;;  %v1529_v44 = vld [vmem:[%s1903_s1 + $0x220] sm:$0xff]   ;;  %v1534_v47 = vld [vmem:[%s1903_s1 + $0x2e8] sm:$0xff]   ;;  %v1540_v53 = vld [vmem:[%s1903_s1 + $0x278] sm:$0xff]  }
  0x24   :  { %987 = vmatmul.mubr.bf16.vlgmr.msra.gmra.mrb[0].mxu1 %v267_v49  ;;  %1346 = vmatprep.subr.bf16.mxu0 %v1484_v50  ;;  %v1536_v49 = vld [vmem:[%s1903_s1 + $0x270] sm:$0xff]   ;;  %v1535_v50 = vld [vmem:[%s1903_s1 + $0x2a8] sm:$0xff]  }
  0x25   :  { %1367 = vmatpush3.bf16.msra.mxu1 %v1483_v52  ;;  %1066 = vmatprep.mubr.bf16.mxu1 %v270_v56  ;;  %v1537_v52 = vld [vmem:[%s1903_s1 + $0x230] sm:$0xff]   ;;  %v1541_v56 = vld [vmem:[%s1903_s1 + $0x238] sm:$0xff]  }
  0x26   :  { %1368 = vmatprep.subr.bf16.mxu1 %v1486_v54  ;;  %v1539_v54 = vld [vmem:[%s1903_s1 + $0x2b0] sm:$0xff]  }
  0x27   :  { %1347 = vmatpush3.bf16.msra.mxu0 %v1485_v55  ;;  %v1542_v55 = vld [vmem:[%s1903_s1 + $0x2f8] sm:$0xff]  }
  0x28   :  { %1348 = vmatprep.subr.bf16.mxu0 %v1488_v57  ;;  %v293_v57 = vrot.slane %v1761_v12, %v1659_v35 }
  0x29   :  { %1369 = vmatpush3.bf16.msra.mxu1 %v1487_v58  ;;  %v1543_v58 = vld [vmem:[%s1903_s1 + $0x2b8] sm:$0xff]  }
  0x2a   :  { %1370 = vmatprep.subr.bf16.mxu1 %v1490_v59  ;;  %v271_v59 = vcombine.high %v1739_v5, %v1739_v5 }
  0x2b   :  { %1349 = vmatpush3.bf16.msra.mxu0 %v1489_v60  ;;  %v1544_v60 = vld [vmem:[%s1903_s1 + $0x300] sm:$0xff]  }
  0x2c   :  { %1350 = vmatprep.subr.bf16.mxu0 %v1492_v61  ;;  %v1547_v61 = vmov 0.0  }
  0x2d   :  { %1371 = vmatpush3.bf16.msra.mxu1 %v1491_v62  ;;  %v308_v62 = vcombine.high %v293_v57, %v293_v57 }
  0x2e   :  { %1372 = vmatprep.subr.bf16.mxu1 %v1494_v63  ;;  %v285_v63 = vrot.slane %v271_v59, %v1659_v35 }
  0x2f   :  { %1351 = vmatpush3.bf16.msra.mxu0 %v1493_v0  ;;  %v1545_v0 = vld [vmem:[%s1903_s1 + $0x308] sm:$0xff]  }
  0x30   :  { %1352 = vmatprep.subr.bf16.mxu0 %v1496_v1  ;;  %v300_v1 = vrot.slane %v285_v63, %v1659_v35 }
  0x31   :  { %1373 = vmatpush3.bf16.msra.mxu1 %v1495_v2 }
  0x32   :  { %1374 = vmatprep.subr.bf16.mxu1 %v1498_v3  ;;  %v1200_v3 = vld [vmem:[%s1905_s2] ss:$0 sm:$0xff] }
  0x33   :  { %1353 = vmatpush3.bf16.msra.mxu0 %v1497_v4 }
  0x34   :  { %1354 = vmatprep.subr.bf16.mxu0 %v1500_v6 }
  0x35   :  { %1375 = vmatpush3.bf16.msra.mxu1 %v1499_v7 }
  0x36   :  { %1376 = vmatprep.subr.bf16.mxu1 %v1502_v8 }
  0x37   :  { %1355 = vmatpush3.bf16.msra.mxu0 %v1501_v9 }
  0x38   :  { %1356 = vmatprep.subr.bf16.mxu0 %v1504_v10 }
  0x39   :  { %1377 = vmatpush3.bf16.msra.mxu1 %v1503_v11 }
  0x3a   :  { %1378 = vmatprep.subr.bf16.mxu1 %v1506_v13 }
  0x3b   :  { %1357 = vmatpush3.bf16.msra.mxu0 %v1505_v14 }
  0x3c   :  { %1358 = vmatprep.subr.bf16.mxu0 %v1508_v15 }
  0x3d   :  { %1379 = vmatpush3.bf16.msra.mxu1 %v1507_v16 }
  0x3e   :  { %1380 = vmatprep.subr.bf16.mxu1 %v1510_v18 }
  0x3f   :  { %1359 = vmatpush3.bf16.msra.mxu0 %v1509_v19 }
  0x40   :  { %1388 = vmatprep.subr.bf16.mxu0 %v1512_v21 }
  0x41   :  { %1381 = vmatpush3.bf16.msra.mxu1 %v1511_v22 }
  0x42   :  { %1027 = vmatmul.mubr.bf16.vlgmr.msra.gmra.mrb[4].mxu0 %v252_v20  ;;  %1410 = vmatprep.subr.bf16.mxu1 %v1514_v24 }
  0x43   :  { %1389 = vmatpush3.bf16.msra.mxu0 %v1513_v25  ;;  %1106 = vmatprep.mubr.bf16.mxu0 %v307_v23 }
  0x44   :  { %1067 = vmatmul.mubr.bf16.vlgmr.msra.gmra.mrb[4].mxu1 %v268_v26  ;;  %1390 = vmatprep.subr.bf16.mxu0 %v1516_v27 }
  0x45   :  { %1411 = vmatpush3.bf16.msra.mxu1 %v1515_v28  ;;  %1146 = vmatprep.mubr.bf16.mxu1 %v309_v29 }
  0x46   :  { %1412 = vmatprep.subr.bf16.mxu1 %v1518_v30 }
  0x47   :  { %1391 = vmatpush3.bf16.msra.mxu0 %v1517_v31 }
  0x48   :  { %1392 = vmatprep.subr.bf16.mxu0 %v1520_v32 }
  0x49   :  { %1413 = vmatpush3.bf16.msra.mxu1 %v1519_v33 }
  0x4a   :  { %1414 = vmatprep.subr.bf16.mxu1 %v1522_v34 }
  0x4b   :  { %1393 = vmatpush3.bf16.msra.mxu0 %v1521_v36 }
  0x4c   :  { %1394 = vmatprep.subr.bf16.mxu0 %v1524_v37 }
  0x4d   :  { %1415 = vmatpush3.bf16.msra.mxu1 %v1523_v38 }
  0x4e   :  { %1416 = vmatprep.subr.bf16.mxu1 %v1526_v39 }
  0x4f   :  { %1395 = vmatpush3.bf16.msra.mxu0 %v1525_v40 }
  0x50   :  { %1396 = vmatprep.subr.bf16.mxu0 %v1528_v41 }
  0x51   :  { %1417 = vmatpush3.bf16.msra.mxu1 %v1527_v42 }
  0x52   :  { %1418 = vmatprep.subr.bf16.mxu1 %v1530_v43 }
  0x53   :  { %1397 = vmatpush3.bf16.msra.mxu0 %v1529_v44 }
  0x54   :  { %1398 = vmatprep.subr.bf16.mxu0 %v1532_v45 }
  0x55   :  { %1419 = vmatpush3.bf16.msra.mxu1 %v1531_v46 }
  0x56   :  { %1420 = vmatprep.subr.bf16.mxu1 %v1534_v47 }
  0x57   :  { %1399 = vmatpush3.bf16.msra.mxu0 %v1533_v48 }
  0x58   :  { %1400 = vmatprep.subr.bf16.mxu0 %v1536_v49 }
  0x59   :  { %1421 = vmatpush3.bf16.msra.mxu1 %v1535_v50 }
  0x5a   :  { %1422 = vmatprep.subr.bf16.mxu1 %v1538_v51 }
  0x5b   :  { %1401 = vmatpush3.bf16.msra.mxu0 %v1537_v52 }
  0x5c   :  { %1402 = vmatprep.subr.bf16.mxu0 %v1540_v53 }
  0x5d   :  { %1423 = vmatpush3.bf16.msra.mxu1 %v1539_v54 }
  0x5e   :  { %1424 = vmatprep.subr.bf16.mxu1 %v1542_v55 }
  0x5f   :  { %1403 = vmatpush3.bf16.msra.mxu0 %v1541_v56 }
  0x60   :  { %1435 = vmatprep.subr.bf16.mxu0 %v1547_v61 }
  0x61   :  { %1425 = vmatpush3.bf16.msra.mxu1 %v1543_v58 }
  0x62   :  { %1107 = vmatmul.mubr.bf16.vlgmr.msra.gmra.mrb[8].mxu0 %v293_v57 }
  0x63   :  { %1436 = vmatpush3.bf16.msra.mxu0 %v1544_v60  ;;  %1439 = vmatprep.mubr.msk.bf16.mxu0 %vm1548_vm0, %v1547_v61 }
  0x64   :  { %1147 = vmatmul.mubr.bf16.vlgmr.msra.gmra.mrb[8].mxu1 %v308_v62  ;;  %1437 = vmatprep.subr.bf16.mxu0 %v1547_v61 }
  0x67   :  { %1438 = vmatpush3.bf16.msra.mxu0 %v1545_v0 }
  0x6a   :  { %1440 = vmatmul.mubr.msk.bf16.vlgmr.msra.gmra.mrb[12].mxu0 %vm910_vm1, %v300_v1 }
  0xf5   :  { %v1316_v2 = vpop.f32.mrb[0].mxu0 }
  0xf6   :  { %v1317_v4 = vpop.f32.mrb[1].mxu0 }
  0xf7   :  { %v1318_v5 = vadd.f32 %v1317_v4, %v1316_v2  ;;  %v1319_v6 = vpop.f32.mrb[2].mxu0  ;;  %v1338_v7 = vpop.f32.mrb[0].mxu1 }
  0xf8   :  { %v1320_v8 = vpop.f32.mrb[3].mxu0  ;;  %v1339_v9 = vpop.f32.mrb[1].mxu1 }
  0xf9   :  { %v949_v10 = vadd.f32 %v1318_v5, %v1200_v3  ;;  %v1340_v11 = vadd.f32 %v1339_v9, %v1338_v7  ;;  %v1341_v12 = vpop.f32.mrb[2].mxu1 }
  0xfa   :  { %v1342_v13 = vpop.f32.mrb[3].mxu1 }
  0xfb   :  { %v989_v14 = vadd.f32 %v1340_v11, %v949_v10 }
 0x115   :  { %v1360_v35 = vpop.f32.mrb[4].mxu0 }
 0x116   :  { %v1361_v15 = vpop.f32.mrb[5].mxu0 }
 0x117   :  { %v1362_v16 = vadd.f32 %v1361_v15, %v1360_v35  ;;  %v1363_v17 = vpop.f32.mrb[6].mxu0  ;;  %v1382_v18 = vpop.f32.mrb[4].mxu1 }
 0x118   :  { %v1364_v19 = vpop.f32.mrb[7].mxu0  ;;  %v1383_v20 = vpop.f32.mrb[5].mxu1 }
 0x119   :  { %v1029_v21 = vadd.f32 %v1362_v16, %v989_v14  ;;  %v1384_v22 = vadd.f32 %v1383_v20, %v1382_v18  ;;  %v1385_v23 = vpop.f32.mrb[6].mxu1 }
 0x11a   :  { %v1386_v24 = vpop.f32.mrb[7].mxu1 }
 0x11b   :  { %v1069_v25 = vadd.f32 %v1384_v22, %v1029_v21 }
 0x135   :  { %v1404_v26 = vpop.f32.mrb[8].mxu0 }
 0x136   :  { %v1405_v27 = vpop.f32.mrb[9].mxu0 }
 0x137   :  { %v1406_v28 = vadd.f32 %v1405_v27, %v1404_v26  ;;  %v1426_v29 = vpop.f32.mrb[8].mxu1  ;;  %v1407_v30 = vpop.f32.mrb[10].mxu0 }
 0x138   :  { %v1427_v31 = vpop.f32.mrb[9].mxu1  ;;  %v1408_v32 = vpop.f32.mrb[11].mxu0 }
 0x139   :  { %v1109_v33 = vadd.f32 %v1406_v28, %v1069_v25  ;;  %v1428_v34 = vadd.f32 %v1427_v31, %v1426_v29  ;;  %v1429_v36 = vpop.f32.mrb[10].mxu1 }
 0x13a   :  { %v1430_v37 = vpop.f32.mrb[11].mxu1 }
 0x13b   :  { %v1149_v38 = vadd.f32 %v1428_v34, %v1109_v33 }
 0x13d   :  { %v1188_v39 = vpop.f32.mrb[12].mxu0 }
 0x13e   :  { %v1189_v40 = vadd.f32 %v1188_v39, %v1149_v38  ;;  %v1441_v41 = vpop.f32.mrb[13].mxu0 }
 0x13f   :  { %v1191_v42 = vpop.f32.mrb[14].mxu0 }
 0x140   :  { %1195 = vst.msk [vmem:[%s1906_s3] sm:$0x3] %vm1194_vm2, %v1189_v40  ;;  %v1442_v43 = vpop.f32.mrb[15].mxu0 }

// kernel: conv_autoencoder_forward.9
= control target key start
LH: loop header
LB: loop body
LE: loop exit
PB: predicated region body
PF: predicated region fallthrough
CT: control target
= control target key end

     0   :  { %vm5378_vm0 = vmmov 0   ;;  %vm2596_vm1 = vcmask 523264   ;;  %vm3775_vm2 = vcmask 261120   ;;  %vm3788_vm3 = vcmask 254976   ;;  %s6804_s1 = inlined_call_operand.vmem [shape: bf16[3136,32], index: 1, kind: input, shape index: {}]   ;;  %s6805_s0 = inlined_call_operand.vmem [shape: bf16[98,3136], index: 0, kind: input, shape index: {}]   ;;  %s6806_s2 = inlined_call_operand.vmem [shape: f32[1,32], index: 2, kind: input, shape index: {}]   ;;  %s6807_s3 = inlined_call_operand.vmem [shape: f32[98,32], index: 3, kind: output, shape index: {}]  }
   0x1   :  { %v4934_v0 = vld [vmem:[%s6804_s1 + $0x40] sm:$0xff]   ;;  %v4936_v2 = vld [vmem:[%s6804_s1 + $0x48] sm:$0xff]   ;;  %v4938_v4 = vld [vmem:[%s6804_s1 + $0x50] sm:$0xff]  }
   0x2   :  { %v4935_v1 = vld [vmem:[%s6804_s1] sm:$0xff]   ;;  %4916 = vmatprep.subr.bf16.mxu1 %v4934_v0  ;;  %4173 = vmatprep.subr.bf16.mxu0 %v4934_v0  ;;  %v4937_v3 = vld [vmem:[%s6804_s1 + $0x8] sm:$0xff]   ;;  %v4939_v5 = vld [vmem:[%s6804_s1 + $0x10] sm:$0xff]  }
   0x3   :  { %4924 = vmatpush3.bf16.msra.mxu1 %v4935_v1  ;;  %4174 = vmatpush3.bf16.msra.mxu0 %v4935_v1  ;;  %v4940_v6 = vld [vmem:[%s6804_s1 + $0x58] sm:$0xff]   ;;  %v4942_v8 = vld [vmem:[%s6804_s1 + $0x60] sm:$0xff]   ;;  %v4944_v10 = vld [vmem:[%s6804_s1 + $0x68] sm:$0xff]  }
   0x4   :  { %4917 = vmatprep.subr.bf16.mxu1 %v4936_v2  ;;  %4175 = vmatprep.subr.bf16.mxu0 %v4936_v2  ;;  %v4941_v7 = vld [vmem:[%s6804_s1 + $0x18] sm:$0xff]   ;;  %v4943_v9 = vld [vmem:[%s6804_s1 + $0x20] sm:$0xff]   ;;  %v4945_v12 = vld [vmem:[%s6804_s1 + $0x28] sm:$0xff]  }
   0x5   :  { %v4952_v11 = vld [vmem:[%s6805_s0 + $0x324] ss:$100 sps:$4 sm:$0xff]   ;;  %v4946_v14 = vld [vmem:[%s6804_s1 + $0x70] sm:$0xff]   ;;  %v4948_v16 = vld [vmem:[%s6804_s1 + $0x78] sm:$0xff]  }
   0x6   :  { %v4956_v13 = vld [vmem:[%s6805_s0 + $0x4] ss:$100 sps:$4 sm:$0xff]   ;;  %2682 = vmatprep.mubr.bf16.mxu1 %v4952_v11  ;;  %v4947_v15 = vld [vmem:[%s6804_s1 + $0x30] sm:$0xff]   ;;  %v4949_v17 = vld [vmem:[%s6804_s1 + $0x38] sm:$0xff]  }
   0x7   :  { %4925 = vmatpush3.bf16.msra.mxu1 %v4937_v3  ;;  %4176 = vmatpush3.bf16.msra.mxu0 %v4937_v3  ;;  %v4953_v18 = vld [vmem:[%s6804_s1 + $0xc0] sm:$0xff]   ;;  %v4960_v24 = vld [vmem:[%s6804_s1 + $0xc8] sm:$0xff]   ;;  %v4964_v30 = vld [vmem:[%s6804_s1 + $0xd0] sm:$0xff]  }
   0x8   :  { %4918 = vmatprep.subr.bf16.mxu1 %v4938_v4  ;;  %4177 = vmatprep.subr.bf16.mxu0 %v4938_v4  ;;  %v4950_v19 = vld [vmem:[%s6805_s0 + $0x320] ss:$100 sps:$4 sm:$0xff]   ;;  %v4962_v25 = vld [vmem:[%s6804_s1 + $0x148] sm:$0xff]   ;;  %v4969_v31 = vld [vmem:[%s6804_s1 + $0x150] sm:$0xff]  }
   0x9   :  { %2650 = vmatprep.mubr.bf16.mxu0 %v4956_v13  ;;  %v4954_v20 = vld [vmem:[%s6805_s0] ss:$100 sps:$4 sm:$0xff]   ;;  %v4965_v26 = vld [vmem:[%s6805_s0 + $0xcc] ss:$100 sps:$4 sm:$0xff]   ;;  %v4971_v36 = vld [vmem:[%s6804_s1 + $0xd8] sm:$0xff]  }
   0xa   :  { %v4958_v21 = vld [vmem:[%s6804_s1 + $0x140] sm:$0xff]   ;;  %v4961_v27 = vld [vmem:[%s6804_s1 + $0x88] sm:$0xff]   ;;  %v4967_v32 = vld [vmem:[%s6804_s1 + $0x90] sm:$0xff]  }
   0xb   :  { %4926 = vmatpush3.bf16.msra.mxu1 %v4939_v5  ;;  %4178 = vmatpush3.bf16.msra.mxu0 %v4939_v5  ;;  %v4957_v22 = vld [vmem:[%s6804_s1 + $0x80] sm:$0xff]   ;;  %v4972_v28 = vld [vmem:[%s6805_s0 + $0x3ec] ss:$100 sps:$4 sm:$0xff]   ;;  %v4976_v37 = vld [vmem:[%s6804_s1 + $0x158] sm:$0xff]  }
   0xc   :  { %4919 = vmatprep.subr.bf16.mxu1 %v4940_v6  ;;  %4179 = vmatprep.subr.bf16.mxu0 %v4940_v6  ;;  %v4959_v23 = vld [vmem:[%s6804_s1 + $0x100] sm:$0xff]   ;;  %v4963_v29 = vld [vmem:[%s6804_s1 + $0x108] sm:$0xff]   ;;  %v4970_v35 = vld [vmem:[%s6804_s1 + $0x110] sm:$0xff]  }
   0xd   :  { %v4968_v33 = vld [vmem:[%s6805_s0 + $0xc8] ss:$100 sps:$4 sm:$0xff]   ;;  %v4974_v38 = vld [vmem:[%s6804_s1 + $0x98] sm:$0xff]   ;;  %v4978_v41 = vld [vmem:[%s6804_s1 + $0xe0] sm:$0xff]  }
   0xe   :  { %v4975_v34 = vld [vmem:[%s6805_s0 + $0x3e8] ss:$100 sps:$4 sm:$0xff]   ;;  %v4979_v39 = vld [vmem:[%s6805_s0 + $0x194] ss:$100 sps:$4 sm:$0xff]   ;;  %v4983_v43 = vld [vmem:[%s6804_s1 + $0x160] sm:$0xff]  }
   0xf   :  { %4927 = vmatpush3.bf16.msra.mxu1 %v4941_v7  ;;  %4180 = vmatpush3.bf16.msra.mxu0 %v4941_v7  ;;  %v4977_v40 = vld [vmem:[%s6804_s1 + $0x118] sm:$0xff]   ;;  %v171_v42 = vld [vmem:[%s6805_s0 + $0x4b0] sm:$0x11]  ;;  %v4981_v45 = vld [vmem:[%s6804_s1 + $0xa0] sm:$0xff]  }
  0x10   :  { %4920 = vmatprep.subr.bf16.mxu1 %v4942_v8  ;;  %4181 = vmatprep.subr.bf16.mxu0 %v4942_v8  ;;  %v3946_v44 = vcombine.high %v171_v42, %v171_v42  ;;  %v4982_v46 = vld [vmem:[%s6805_s0 + $0x190] ss:$100 sps:$4 sm:$0xff]   ;;  %v4984_v47 = vld [vmem:[%s6804_s1 + $0x120] sm:$0xff]   ;;  %v3945_v48 = vcombine.low %v171_v42, %v171_v42  ;;  %v4985_v49 = vld [vmem:[%s6804_s1 + $0xe8] sm:$0xff]  }
  0x11   :  { %v4989_v50 = vld [vmem:[%s6804_s1 + $0x168] sm:$0xff]   ;;  %v4992_v52 = vld [vmem:[%s6805_s0 + $0x25c] ss:$100 sps:$4 sm:$0xff]   ;;  %v4991_v54 = vld [vmem:[%s6804_s1 + $0xf0] sm:$0xff]  }
  0x12   :  { %v4987_v51 = vld [vmem:[%s6804_s1 + $0xa8] sm:$0xff]   ;;  %v4996_v55 = vld [vmem:[%s6804_s1 + $0x170] sm:$0xff]   ;;  %v4995_v57 = vld [vmem:[%s6805_s0 + $0x258] ss:$100 sps:$4 sm:$0xff]  }
  0x13   :  { %4928 = vmatpush3.bf16.msra.mxu1 %v4943_v9  ;;  %4182 = vmatpush3.bf16.msra.mxu0 %v4943_v9  ;;  %v4990_v53 = vld [vmem:[%s6804_s1 + $0x128] sm:$0xff]   ;;  %v4994_v56 = vld [vmem:[%s6804_s1 + $0xb0] sm:$0xff]   ;;  %v4998_v59 = vld [vmem:[%s6804_s1 + $0xf8] sm:$0xff]  }
  0x14   :  { %4921 = vmatprep.subr.bf16.mxu1 %v4944_v10  ;;  %4183 = vmatprep.subr.bf16.mxu0 %v4944_v10  ;;  %v4997_v58 = vld [vmem:[%s6804_s1 + $0x130] sm:$0xff]   ;;  %v5000_v60 = vld [vmem:[%s6804_s1 + $0x178] sm:$0xff]   ;;  %v5005_v0 = vld [vmem:[%s6804_s1 + $0x1c0] sm:$0xff]  }
  0x15   :  { %v5003_v61 = vld [vmem:[%s6805_s0 + $0xc] ss:$100 sps:$4 sm:$0xff]   ;;  %v4999_v62 = vld [vmem:[%s6804_s1 + $0xb8] sm:$0xff]   ;;  %v5009_v4 = vld [vmem:[%s6804_s1 + $0x180] sm:$0xff]  }
  0x16   :  { %v5004_v63 = vld [vmem:[%s6804_s1 + $0x138] sm:$0xff]   ;;  %v5001_v2 = vld [vmem:[%s6805_s0 + $0x8] ss:$100 sps:$4 sm:$0xff]   ;;  %v5006_v3 = vld [vmem:[%s6805_s0 + $0x10] ss:$100 sps:$4 sm:$0xff]  }
  0x17   :  { %4929 = vmatpush3.bf16.msra.mxu1 %v4945_v12  ;;  %4184 = vmatpush3.bf16.msra.mxu0 %v4945_v12  ;;  %v5008_v1 = vld [vmem:[%s6805_s0 + $0x14] ss:$100 sps:$4 sm:$0xff]   ;;  %v5010_v5 = vld [vmem:[%s6804_s1 + $0x240] sm:$0xff]   ;;  %v5014_v8 = vld [vmem:[%s6804_s1 + $0x1c8] sm:$0xff]  }
  0x18   :  { %4922 = vmatprep.subr.bf16.mxu1 %v4946_v14  ;;  %4185 = vmatprep.subr.bf16.mxu0 %v4946_v14  ;;  %v5011_v6 = vld [vmem:[%s6804_s1 + $0x200] sm:$0xff]   ;;  %v5012_v7 = vld [vmem:[%s6805_s0 + $0xd4] ss:$100 sps:$4 sm:$0xff]   ;;  %v5016_v9 = vld [vmem:[%s6804_s1 + $0x188] sm:$0xff]  }
  0x19   :  { %v5017_v10 = vld [vmem:[%s6805_s0 + $0xdc] ss:$100 sps:$4 sm:$0xff]   ;;  %v5015_v11 = vld [vmem:[%s6805_s0 + $0xd0] ss:$100 sps:$4 sm:$0xff]   ;;  %v5020_v13 = vld [vmem:[%s6804_s1 + $0x248] sm:$0xff]  }
  0x1a   :  { %v5019_v12 = vld [vmem:[%s6805_s0 + $0xd8] ss:$100 sps:$4 sm:$0xff]   ;;  %v5021_v14 = vld [vmem:[%s6804_s1 + $0x208] sm:$0xff]  }
  0x1b   :  { %4930 = vmatpush3.bf16.msra.mxu1 %v4947_v15  ;;  %4186 = vmatpush3.bf16.msra.mxu0 %v4947_v15  ;;  %v5022_v15 = vld [vmem:[%s6804_s1 + $0x1d0] sm:$0xff]   ;;  %v5057_v42 = vld [vmem:[%s6804_s1 + $0x268] sm:$0xff]  }
  0x1c   :  { %4923 = vmatprep.subr.bf16.mxu1 %v4948_v16  ;;  %4187 = vmatprep.subr.bf16.mxu0 %v4948_v16  ;;  %v5023_v16 = vld [vmem:[%s6805_s0 + $0x19c] ss:$100 sps:$4 sm:$0xff]  }
  0x1f   :  { %4931 = vmatpush3.bf16.msra.mxu1 %v4949_v17  ;;  %4188 = vmatpush3.bf16.msra.mxu0 %v4949_v17  ;;  %v5025_v17 = vld [vmem:[%s6804_s1 + $0x190] sm:$0xff]  }
  0x20   :  { %4231 = vmatprep.subr.bf16.mxu1 %v4953_v18  ;;  %4289 = vmatprep.subr.bf16.mxu0 %v4958_v21  ;;  %v5027_v18 = vld [vmem:[%s6805_s0 + $0x1a4] ss:$100 sps:$4 sm:$0xff]  }
  0x21   :  { %v5029_v21 = vld [vmem:[%s6805_s0 + $0x1a0] ss:$100 sps:$4 sm:$0xff]  }
  0x22   :  { %2683 = vmatmul.mubr.bf16.vlgmr.msra.gmra.mrb[0].mxu1 %v4950_v19  ;;  %2651 = vmatmul.mubr.bf16.vlgmr.msra.gmra.mrb[0].mxu0 %v4954_v20  ;;  %v5030_v19 = vld [vmem:[%s6804_s1 + $0x250] sm:$0xff]   ;;  %v5026_v20 = vld [vmem:[%s6805_s0 + $0x198] ss:$100 sps:$4 sm:$0xff]  }
  0x23   :  { %4232 = vmatpush3.bf16.msra.mxu1 %v4957_v22  ;;  %4290 = vmatpush3.bf16.msra.mxu0 %v4959_v23  ;;  %v5031_v22 = vld [vmem:[%s6804_s1 + $0x210] sm:$0xff]   ;;  %v5032_v23 = vld [vmem:[%s6804_s1 + $0x1d8] sm:$0xff]  }
  0x24   :  { %4233 = vmatprep.subr.bf16.mxu1 %v4960_v24  ;;  %4291 = vmatprep.subr.bf16.mxu0 %v4962_v25  ;;  %v5033_v24 = vld [vmem:[%s6804_s1 + $0x198] sm:$0xff]   ;;  %v5034_v25 = vld [vmem:[%s6805_s0 + $0x264] ss:$100 sps:$4 sm:$0xff]  }
  0x25   :  { %2658 = vmatprep.mubr.bf16.mxu0 %v4965_v26  ;;  %2690 = vmatprep.mubr.bf16.mxu1 %v4972_v28  ;;  %v5037_v26 = vld [vmem:[%s6805_s0 + $0x26c] ss:$100 sps:$4 sm:$0xff]   ;;  %v5041_v28 = vld [vmem:[%s6804_s1 + $0x218] sm:$0xff]  }
  0x27   :  { %4234 = vmatpush3.bf16.msra.mxu1 %v4961_v27  ;;  %4292 = vmatpush3.bf16.msra.mxu0 %v4963_v29  ;;  %v5040_v27 = vld [vmem:[%s6804_s1 + $0x258] sm:$0xff]   ;;  %v5042_v29 = vld [vmem:[%s6804_s1 + $0x1e0] sm:$0xff]  }
  0x28   :  { %4235 = vmatprep.subr.bf16.mxu1 %v4964_v30  ;;  %4293 = vmatprep.subr.bf16.mxu0 %v4969_v31  ;;  %v5036_v30 = vld [vmem:[%s6805_s0 + $0x260] ss:$100 sps:$4 sm:$0xff]  }
  0x29   :  { %v5043_v31 = vld [vmem:[%s6804_s1 + $0x1a0] sm:$0xff]  }
  0x2a   :  { %2659 = vmatmul.mubr.bf16.gmra.mrb[4].mxu0 %v4968_v33  ;;  %2691 = vmatmul.mubr.bf16.gmra.mrb[4].mxu1 %v4975_v34  ;;  %v5044_v33 = vld [vmem:[%s6805_s0 + $0x32c] ss:$100 sps:$4 sm:$0xff]   ;;  %v5047_v34 = vld [vmem:[%s6805_s0 + $0x334] ss:$100 sps:$4 sm:$0xff]  }
  0x2b   :  { %4236 = vmatpush3.bf16.msra.mxu1 %v4967_v32  ;;  %4294 = vmatpush3.bf16.msra.mxu0 %v4970_v35  ;;  %v5039_v32 = vld [vmem:[%s6805_s0 + $0x268] ss:$100 sps:$4 sm:$0xff]   ;;  %v5049_v35 = vld [vmem:[%s6804_s1 + $0x260] sm:$0xff]  }
  0x2c   :  { %4237 = vmatprep.subr.bf16.mxu1 %v4971_v36  ;;  %4295 = vmatprep.subr.bf16.mxu0 %v4976_v37  ;;  %v5051_v36 = vld [vmem:[%s6804_s1 + $0x220] sm:$0xff]   ;;  %v5052_v37 = vld [vmem:[%s6804_s1 + $0x1e8] sm:$0xff]  }
  0x2d   :  { %2666 = vmatprep.mubr.bf16.mxu0 %v4979_v39  ;;  %2698 = vmatprep.mubr.bf16.mxu1 %v3946_v44  ;;  %v5046_v39 = vld [vmem:[%s6805_s0 + $0x328] ss:$100 sps:$4 sm:$0xff]  }
  0x2e   :  { %v5060_v44 = vld [vmem:[%s6804_s1 + $0x228] sm:$0xff]  }
  0x2f   :  { %4238 = vmatpush3.bf16.msra.mxu1 %v4974_v38  ;;  %4296 = vmatpush3.bf16.msra.mxu0 %v4977_v40  ;;  %v5053_v38 = vld [vmem:[%s6804_s1 + $0x1a8] sm:$0xff]   ;;  %v5050_v40 = vld [vmem:[%s6805_s0 + $0x330] ss:$100 sps:$4 sm:$0xff]  }
  0x30   :  { %4239 = vmatprep.subr.bf16.mxu1 %v4978_v41  ;;  %4297 = vmatprep.subr.bf16.mxu0 %v4983_v43  ;;  %v5054_v41 = vld [vmem:[%s6805_s0 + $0x3f4] ss:$100 sps:$4 sm:$0xff]   ;;  %v5058_v43 = vld [vmem:[%s6805_s0 + $0x3fc] ss:$100 sps:$4 sm:$0xff]  }
  0x32   :  { %2667 = vmatmul.mubr.bf16.gmra.mrb[8].mxu0 %v4982_v46  ;;  %2699 = vmatmul.mubr.bf16.gmra.mrb[8].mxu1 %v3945_v48  ;;  %v5063_v46 = vld [vmem:[%s6804_s1 + $0x1b0] sm:$0xff]  }
  0x33   :  { %4240 = vmatpush3.bf16.msra.mxu1 %v4981_v45  ;;  %4298 = vmatpush3.bf16.msra.mxu0 %v4984_v47  ;;  %v5062_v45 = vld [vmem:[%s6804_s1 + $0x1f0] sm:$0xff]   ;;  %v172_v47 = vld [vmem:[%s6805_s0 + $0x4b8] sm:$0x11] }
  0x34   :  { %4241 = vmatprep.subr.bf16.mxu1 %v4985_v49  ;;  %4299 = vmatprep.subr.bf16.mxu0 %v4989_v50  ;;  %v5065_v48 = vld [vmem:[%s6804_s1 + $0x270] sm:$0xff]   ;;  %v5061_v50 = vld [vmem:[%s6805_s0 + $0x3f8] ss:$100 sps:$4 sm:$0xff]  }
  0x35   :  { %2674 = vmatprep.mubr.bf16.mxu0 %v4992_v52  ;;  %2738 = vmatprep.mubr.bf16.mxu1 %v5003_v61  ;;  %v5056_v49 = vld [vmem:[%s6805_s0 + $0x3f0] ss:$100 sps:$4 sm:$0xff]   ;;  %v173_v52 = vld [vmem:[%s6805_s0 + $0x4c0] sm:$0x11]  ;;  %v3947_v61 = vcombine.low %v172_v47, %v172_v47 }
  0x37   :  { %4242 = vmatpush3.bf16.msra.mxu1 %v4987_v51  ;;  %4300 = vmatpush3.bf16.msra.mxu0 %v4990_v53  ;;  %v5067_v51 = vld [vmem:[%s6804_s1 + $0x230] sm:$0xff]   ;;  %v5069_v53 = vld [vmem:[%s6804_s1 + $0x1f8] sm:$0xff]  }
  0x38   :  { %4243 = vmatprep.subr.bf16.mxu1 %v4991_v54  ;;  %4301 = vmatprep.subr.bf16.mxu0 %v4996_v55  ;;  %v5071_v54 = vld [vmem:[%s6804_s1 + $0x1b8] sm:$0xff]   ;;  %v3948_v55 = vcombine.high %v172_v47, %v172_v47 }
  0x39   :  { %v5141_v47 = vld [vmem:[%s6804_s1 + $0x2f8] sm:$0xff]  }
  0x3a   :  { %2675 = vmatmul.mubr.bf16.gmra.mrb[12].mxu0 %v4995_v57  ;;  %v5072_v57 = vld [vmem:[%s6804_s1 + $0x278] sm:$0xff]  }
  0x3b   :  { %4244 = vmatpush3.bf16.msra.mxu1 %v4994_v56  ;;  %4302 = vmatpush3.bf16.msra.mxu0 %v4997_v58  ;;  %v3950_v56 = vcombine.high %v173_v52, %v173_v52  ;;  %v5076_v58 = vld [vmem:[%s6804_s1 + $0x238] sm:$0xff]  }
  0x3c   :  { %4245 = vmatprep.subr.bf16.mxu1 %v4998_v59  ;;  %4303 = vmatprep.subr.bf16.mxu0 %v5000_v60  ;;  %v5077_v59 = vld [vmem:[%s6804_s1 + $0x2c0] sm:$0xff]  }
  0x3d   :  { %2826 = vmatprep.mubr.bf16.mxu0 %v5008_v1  ;;  %v5075_v60 = vld [vmem:[%s6805_s0 + $0x1c] ss:$100 sps:$4 sm:$0xff]  }
  0x3e   :  { %v5073_v1 = vld [vmem:[%s6805_s0 + $0x18] ss:$100 sps:$4 sm:$0xff]  }
  0x3f   :  { %4246 = vmatpush3.bf16.msra.mxu1 %v4999_v62  ;;  %4304 = vmatpush3.bf16.msra.mxu0 %v5004_v63  ;;  %v3949_v62 = vcombine.low %v173_v52, %v173_v52  ;;  %v5082_v63 = vld [vmem:[%s6804_s1 + $0x340] sm:$0xff]  }
  0x40   :  { %4347 = vmatprep.subr.bf16.mxu1 %v5005_v0  ;;  %4405 = vmatprep.subr.bf16.mxu0 %v5010_v5  ;;  %v5080_v0 = vld [vmem:[%s6805_s0 + $0x24] ss:$100 sps:$4 sm:$0xff]  }
  0x41   :  { %v5084_v5 = vld [vmem:[%s6805_s0 + $0xe4] ss:$100 sps:$4 sm:$0xff]  }
  0x42   :  { %2739 = vmatmul.mubr.bf16.vlgmr.msra.gmra.mrb[12].mxu1 %v5001_v2  ;;  %2827 = vmatmul.mubr.bf16.vlgmr.msra.gmra.mrb[16].mxu0 %v5006_v3  ;;  %v5078_v2 = vld [vmem:[%s6805_s0 + $0x20] ss:$100 sps:$4 sm:$0xff]  }
  0x43   :  { %4348 = vmatpush3.bf16.msra.mxu1 %v5009_v4  ;;  %4406 = vmatpush3.bf16.msra.mxu0 %v5011_v6  ;;  %v5081_v3 = vld [vmem:[%s6804_s1 + $0x280] sm:$0xff]   ;;  %v5086_v6 = vld [vmem:[%s6804_s1 + $0x2c8] sm:$0xff]  }
  0x44   :  { %2746 = vmatprep.mubr.bf16.mxu1 %v5012_v7  ;;  %4349 = vmatprep.subr.bf16.mxu1 %v5014_v8  ;;  %v5083_v4 = vld [vmem:[%s6804_s1 + $0x300] sm:$0xff]   ;;  %v5089_v7 = vld [vmem:[%s6805_s0 + $0xec] ss:$100 sps:$4 sm:$0xff]  }
  0x45   :  { %2834 = vmatprep.mubr.bf16.mxu0 %v5017_v10  ;;  %4407 = vmatprep.subr.bf16.mxu0 %v5020_v13  ;;  %v5092_v8 = vld [vmem:[%s6804_s1 + $0x348] sm:$0xff]   ;;  %v5149_v52 = vld [vmem:[%s6804_s1 + $0x3c0] sm:$0xff]  }
  0x46   :  { %v5093_v10 = vld [vmem:[%s6804_s1 + $0x308] sm:$0xff]  }
  0x47   :  { %4350 = vmatpush3.bf16.msra.mxu1 %v5016_v9  ;;  %4408 = vmatpush3.bf16.msra.mxu0 %v5021_v14  ;;  %v5088_v9 = vld [vmem:[%s6804_s1 + $0x288] sm:$0xff]   ;;  %v5102_v14 = vld [vmem:[%s6804_s1 + $0x350] sm:$0xff]  }
  0x48   :  { %4351 = vmatprep.subr.bf16.mxu1 %v5022_v15  ;;  %4409 = vmatprep.subr.bf16.mxu0 %v5030_v19  ;;  %v5091_v13 = vld [vmem:[%s6805_s0 + $0xe8] ss:$100 sps:$4 sm:$0xff]   ;;  %v5104_v19 = vld [vmem:[%s6804_s1 + $0x2d8] sm:$0xff]  }
  0x49   :  { %v5095_v15 = vld [vmem:[%s6805_s0 + $0x1ac] ss:$100 sps:$4 sm:$0xff]  }
  0x4a   :  { %2747 = vmatmul.mubr.bf16.gmra.mrb[16].mxu1 %v5015_v11  ;;  %2835 = vmatmul.mubr.bf16.gmra.mrb[20].mxu0 %v5019_v12  ;;  %v5094_v11 = vld [vmem:[%s6804_s1 + $0x2d0] sm:$0xff]   ;;  %v5087_v12 = vld [vmem:[%s6805_s0 + $0xe0] ss:$100 sps:$4 sm:$0xff]  }
  0x4b   :  { %2754 = vmatprep.mubr.bf16.mxu1 %v5023_v16  ;;  %4352 = vmatpush3.bf16.msra.mxu1 %v5025_v17  ;;  %v5097_v16 = vld [vmem:[%s6804_s1 + $0x290] sm:$0xff]  }
  0x4c   :  { %2842 = vmatprep.mubr.bf16.mxu0 %v5027_v18  ;;  %4410 = vmatpush3.bf16.msra.mxu0 %v5031_v22  ;;  %v5099_v17 = vld [vmem:[%s6805_s0 + $0x1b4] ss:$100 sps:$4 sm:$0xff]  }
  0x4d   :  { %4353 = vmatprep.subr.bf16.mxu1 %v5032_v23  ;;  %4411 = vmatprep.subr.bf16.mxu0 %v5040_v27  ;;  %v5103_v18 = vld [vmem:[%s6804_s1 + $0x310] sm:$0xff]   ;;  %v5113_v22 = vld [vmem:[%s6804_s1 + $0x318] sm:$0xff]   ;;  %v5098_v23 = vld [vmem:[%s6805_s0 + $0x1a8] ss:$100 sps:$4 sm:$0xff]  }
  0x4e   :  { %v5109_v27 = vld [vmem:[%s6805_s0 + $0x27c] ss:$100 sps:$4 sm:$0xff]  }
  0x4f   :  { %4354 = vmatpush3.bf16.msra.mxu1 %v5033_v24  ;;  %v5114_v24 = vld [vmem:[%s6804_s1 + $0x2e0] sm:$0xff]  }
  0x50   :  { %4412 = vmatpush3.bf16.msra.mxu0 %v5041_v28  ;;  %4355 = vmatprep.subr.bf16.mxu1 %v5042_v29  ;;  %v5115_v28 = vld [vmem:[%s6804_s1 + $0x2a0] sm:$0xff]  }
  0x51   :  { %4413 = vmatprep.subr.bf16.mxu0 %v5049_v35  ;;  %v5121_v29 = vld [vmem:[%s6804_s1 + $0x360] sm:$0xff]  }
  0x52   :  { %2755 = vmatmul.mubr.bf16.gmra.mrb[20].mxu1 %v5026_v20  ;;  %2843 = vmatmul.mubr.bf16.gmra.mrb[24].mxu0 %v5029_v21  ;;  %v5105_v20 = vld [vmem:[%s6804_s1 + $0x298] sm:$0xff]  }
  0x53   :  { %2762 = vmatprep.mubr.bf16.mxu1 %v5034_v25  ;;  %2850 = vmatprep.mubr.bf16.mxu0 %v5037_v26  ;;  %v5112_v21 = vld [vmem:[%s6804_s1 + $0x358] sm:$0xff]   ;;  %v5101_v25 = vld [vmem:[%s6805_s0 + $0x1b0] ss:$100 sps:$4 sm:$0xff]  }
  0x54   :  { %4356 = vmatpush3.bf16.msra.mxu1 %v5043_v31  ;;  %4414 = vmatpush3.bf16.msra.mxu0 %v5051_v36  ;;  %v5106_v26 = vld [vmem:[%s6805_s0 + $0x274] ss:$100 sps:$4 sm:$0xff]   ;;  %v5124_v31 = vld [vmem:[%s6804_s1 + $0x2e8] sm:$0xff]   ;;  %v5116_v35 = vld [vmem:[%s6805_s0 + $0x33c] ss:$100 sps:$4 sm:$0xff]  }
  0x55   :  { %4357 = vmatprep.subr.bf16.mxu1 %v5052_v37  ;;  %4415 = vmatprep.subr.bf16.mxu0 %v5057_v42  ;;  %v5129_v36 = vld [vmem:[%s6804_s1 + $0x368] sm:$0xff]   ;;  %v5122_v42 = vld [vmem:[%s6805_s0 + $0x340] ss:$100 sps:$4 sm:$0xff]  }
  0x56   :  { %v5119_v37 = vld [vmem:[%s6805_s0 + $0x344] ss:$100 sps:$4 sm:$0xff]  }
  0x58   :  { %4358 = vmatpush3.bf16.msra.mxu1 %v5053_v38  ;;  %4416 = vmatpush3.bf16.msra.mxu0 %v5060_v44  ;;  %v5132_v38 = vld [vmem:[%s6804_s1 + $0x328] sm:$0xff]  }
  0x59   :  { %4359 = vmatprep.subr.bf16.mxu1 %v5062_v45  ;;  %4417 = vmatprep.subr.bf16.mxu0 %v5065_v48  ;;  %v5126_v44 = vld [vmem:[%s6805_s0 + $0x404] ss:$100 sps:$4 sm:$0xff]   ;;  %v5130_v45 = vld [vmem:[%s6805_s0 + $0x40c] ss:$100 sps:$4 sm:$0xff]   ;;  %v5143_v48 = vld [vmem:[%s6804_s1 + $0x2b8] sm:$0xff]  }
  0x5a   :  { %2763 = vmatmul.mubr.bf16.gmra.mrb[24].mxu1 %v5036_v30  ;;  %2851 = vmatmul.mubr.bf16.gmra.mrb[28].mxu0 %v5039_v32  ;;  %v5123_v30 = vld [vmem:[%s6804_s1 + $0x320] sm:$0xff]   ;;  %v5108_v32 = vld [vmem:[%s6805_s0 + $0x270] ss:$100 sps:$4 sm:$0xff]  }
  0x5b   :  { %2770 = vmatprep.mubr.bf16.mxu1 %v5044_v33  ;;  %2858 = vmatprep.mubr.bf16.mxu0 %v5047_v34  ;;  %v5125_v33 = vld [vmem:[%s6804_s1 + $0x2a8] sm:$0xff]   ;;  %v5111_v34 = vld [vmem:[%s6805_s0 + $0x278] ss:$100 sps:$4 sm:$0xff]  }
  0x5c   :  { %4360 = vmatpush3.bf16.msra.mxu1 %v5063_v46  ;;  %4418 = vmatpush3.bf16.msra.mxu0 %v5067_v51  ;;  %v5139_v46 = vld [vmem:[%s6804_s1 + $0x330] sm:$0xff]   ;;  %v5148_v51 = vld [vmem:[%s6804_s1 + $0x338] sm:$0xff]  }
  0x5d   :  { %4361 = vmatprep.subr.bf16.mxu1 %v5069_v53  ;;  %4419 = vmatprep.subr.bf16.mxu0 %v5072_v57  ;;  %v175_v53 = vld [vmem:[%s6805_s0 + $0x4d0] sm:$0x11] }
  0x5e   :  { %v3954_v57 = vcombine.high %v175_v53, %v175_v53 }
  0x60   :  { %4362 = vmatpush3.bf16.msra.mxu1 %v5071_v54  ;;  %4420 = vmatpush3.bf16.msra.mxu0 %v5076_v58  ;;  %v5128_v54 = vld [vmem:[%s6805_s0 + $0x400] ss:$100 sps:$4 sm:$0xff]  }
  0x61   :  { %4463 = vmatprep.subr.bf16.mxu1 %v5077_v59  ;;  %4521 = vmatprep.subr.bf16.mxu0 %v5082_v63  ;;  %v5154_v58 = vld [vmem:[%s6804_s1 + $0x440] sm:$0xff]   ;;  %v5145_v63 = vld [vmem:[%s6805_s0 + $0x28] ss:$100 sps:$4 sm:$0xff]  }
  0x62   :  { %2771 = vmatmul.mubr.bf16.gmra.mrb[28].mxu1 %v5046_v39  ;;  %2859 = vmatmul.mubr.bf16.gmra.mrb[32].mxu0 %v5050_v40  ;;  %v5134_v39 = vld [vmem:[%s6804_s1 + $0x2f0] sm:$0xff]  }
  0x63   :  { %2778 = vmatprep.mubr.bf16.mxu1 %v5054_v41  ;;  %2866 = vmatprep.mubr.bf16.mxu0 %v5058_v43  ;;  %v5135_v40 = vld [vmem:[%s6804_s1 + $0x2b0] sm:$0xff]   ;;  %v5118_v41 = vld [vmem:[%s6805_s0 + $0x338] ss:$100 sps:$4 sm:$0xff]  }
  0x64   :  { %v5137_v43 = vld [vmem:[%s6804_s1 + $0x370] sm:$0xff]  }
  0x6a   :  { %2779 = vmatmul.mubr.bf16.gmra.mrb[32].mxu1 %v5056_v49  ;;  %2867 = vmatmul.mubr.bf16.gmra.mrb[36].mxu0 %v5061_v50  ;;  %v5144_v49 = vld [vmem:[%s6804_s1 + $0x378] sm:$0xff]   ;;  %v174_v50 = vld [vmem:[%s6805_s0 + $0x4c8] sm:$0x11] }
  0x6b   :  { %2786 = vmatprep.mubr.bf16.mxu1 %v3948_v55  ;;  %2874 = vmatprep.mubr.bf16.mxu0 %v3950_v56  ;;  %v5133_v55 = vld [vmem:[%s6805_s0 + $0x408] ss:$100 sps:$4 sm:$0xff]   ;;  %v3952_v56 = vcombine.high %v174_v50, %v174_v50  ;;  %v3951_v59 = vcombine.low %v174_v50, %v174_v50  ;;  %v5226_v50 = vld [vmem:[%s6804_s1 + $0x540] sm:$0xff]  }
  0x72   :  { %2787 = vmatmul.mubr.bf16.gmra.mrb[36].mxu1 %v3947_v61  ;;  %2875 = vmatmul.mubr.bf16.gmra.mrb[40].mxu0 %v3949_v62  ;;  %v5147_v61 = vld [vmem:[%s6805_s0 + $0x2c] ss:$100 sps:$4 sm:$0xff]   ;;  %v5152_v62 = vld [vmem:[%s6805_s0 + $0x34] ss:$100 sps:$4 sm:$0xff]  }
  0x73   :  { %2914 = vmatprep.mubr.bf16.mxu1 %v5075_v60  ;;  %3002 = vmatprep.mubr.bf16.mxu0 %v5080_v0  ;;  %v3953_v60 = vcombine.low %v175_v53, %v175_v53  ;;  %v5150_v0 = vld [vmem:[%s6805_s0 + $0x30] ss:$100 sps:$4 sm:$0xff]  }
  0x74   :  { %v5200_v53 = vld [vmem:[%s6805_s0 + $0x410] ss:$100 sps:$4 sm:$0xff]  }
  0x7a   :  { %2915 = vmatmul.mubr.bf16.vlgmr.msra.gmra.mrb[40].mxu1 %v5073_v1  ;;  %3003 = vmatmul.mubr.bf16.vlgmr.msra.gmra.mrb[44].mxu0 %v5078_v2  ;;  %v5153_v1 = vld [vmem:[%s6804_s1 + $0x380] sm:$0xff]  }
  0x7b   :  { %4464 = vmatpush3.bf16.msra.mxu1 %v5081_v3  ;;  %4522 = vmatpush3.bf16.msra.mxu0 %v5083_v4  ;;  %v5155_v2 = vld [vmem:[%s6804_s1 + $0x400] sm:$0xff]   ;;  %v5156_v3 = vld [vmem:[%s6805_s0 + $0xf4] ss:$100 sps:$4 sm:$0xff]   ;;  %v5158_v4 = vld [vmem:[%s6804_s1 + $0x3c8] sm:$0xff]  }
  0x7c   :  { %2922 = vmatprep.mubr.bf16.mxu1 %v5084_v5  ;;  %4465 = vmatprep.subr.bf16.mxu1 %v5086_v6  ;;  %v5161_v5 = vld [vmem:[%s6805_s0 + $0xfc] ss:$100 sps:$4 sm:$0xff]   ;;  %v5160_v6 = vld [vmem:[%s6804_s1 + $0x388] sm:$0xff]  }
  0x7d   :  { %3010 = vmatprep.mubr.bf16.mxu0 %v5089_v7  ;;  %4523 = vmatprep.subr.bf16.mxu0 %v5092_v8  ;;  %v5164_v7 = vld [vmem:[%s6804_s1 + $0x448] sm:$0xff]  }
  0x7e   :  { %v5165_v8 = vld [vmem:[%s6804_s1 + $0x408] sm:$0xff]  }
  0x7f   :  { %4466 = vmatpush3.bf16.msra.mxu1 %v5088_v9  ;;  %4524 = vmatpush3.bf16.msra.mxu0 %v5093_v10  ;;  %v5166_v9 = vld [vmem:[%s6804_s1 + $0x3d0] sm:$0xff]  }
  0x80   :  { %4467 = vmatprep.subr.bf16.mxu1 %v5094_v11  ;;  %4525 = vmatprep.subr.bf16.mxu0 %v5102_v14  ;;  %v5159_v10 = vld [vmem:[%s6805_s0 + $0xf0] ss:$100 sps:$4 sm:$0xff]  }
  0x81   :  { %v5174_v11 = vld [vmem:[%s6804_s1 + $0x450] sm:$0xff]  }
  0x82   :  { %2923 = vmatmul.mubr.bf16.gmra.mrb[44].mxu1 %v5087_v12  ;;  %3011 = vmatmul.mubr.bf16.gmra.mrb[48].mxu0 %v5091_v13  ;;  %v5163_v12 = vld [vmem:[%s6805_s0 + $0xf8] ss:$100 sps:$4 sm:$0xff]   ;;  %v5169_v14 = vld [vmem:[%s6804_s1 + $0x390] sm:$0xff]  }
  0x83   :  { %2930 = vmatprep.mubr.bf16.mxu1 %v5095_v15  ;;  %4468 = vmatpush3.bf16.msra.mxu1 %v5097_v16  ;;  %v5167_v13 = vld [vmem:[%s6805_s0 + $0x1bc] ss:$100 sps:$4 sm:$0xff]   ;;  %v5171_v15 = vld [vmem:[%s6805_s0 + $0x1c4] ss:$100 sps:$4 sm:$0xff]   ;;  %v5175_v16 = vld [vmem:[%s6804_s1 + $0x410] sm:$0xff]  }
  0x84   :  { %3018 = vmatprep.mubr.bf16.mxu0 %v5099_v17  ;;  %4526 = vmatpush3.bf16.msra.mxu0 %v5103_v18  ;;  %v5176_v17 = vld [vmem:[%s6804_s1 + $0x3d8] sm:$0xff]  }
  0x85   :  { %4469 = vmatprep.subr.bf16.mxu1 %v5104_v19  ;;  %4527 = vmatprep.subr.bf16.mxu0 %v5112_v21  ;;  %v5184_v18 = vld [vmem:[%s6804_s1 + $0x458] sm:$0xff]  }
  0x86   :  { %v5177_v19 = vld [vmem:[%s6804_s1 + $0x398] sm:$0xff]  }
  0x87   :  { %4470 = vmatpush3.bf16.msra.mxu1 %v5105_v20  ;;  %v5185_v20 = vld [vmem:[%s6804_s1 + $0x418] sm:$0xff]  }
  0x88   :  { %4528 = vmatpush3.bf16.msra.mxu0 %v5113_v22  ;;  %4471 = vmatprep.subr.bf16.mxu1 %v5114_v24  ;;  %v5170_v21 = vld [vmem:[%s6805_s0 + $0x1b8] ss:$100 sps:$4 sm:$0xff]   ;;  %v5173_v22 = vld [vmem:[%s6805_s0 + $0x1c0] ss:$100 sps:$4 sm:$0xff]  }
  0x89   :  { %4529 = vmatprep.subr.bf16.mxu0 %v5121_v29  ;;  %v5178_v24 = vld [vmem:[%s6805_s0 + $0x284] ss:$100 sps:$4 sm:$0xff]  }
  0x8a   :  { %2931 = vmatmul.mubr.bf16.gmra.mrb[48].mxu1 %v5098_v23  ;;  %3019 = vmatmul.mubr.bf16.gmra.mrb[52].mxu0 %v5101_v25  ;;  %v5186_v23 = vld [vmem:[%s6804_s1 + $0x3e0] sm:$0xff]   ;;  %v5196_v29 = vld [vmem:[%s6804_s1 + $0x3e8] sm:$0xff]  }
  0x8b   :  { %2938 = vmatprep.mubr.bf16.mxu1 %v5106_v26  ;;  %3026 = vmatprep.mubr.bf16.mxu0 %v5109_v27  ;;  %v5193_v25 = vld [vmem:[%s6804_s1 + $0x460] sm:$0xff]   ;;  %v5181_v26 = vld [vmem:[%s6805_s0 + $0x28c] ss:$100 sps:$4 sm:$0xff]  }
  0x8c   :  { %4472 = vmatpush3.bf16.msra.mxu1 %v5115_v28  ;;  %4530 = vmatpush3.bf16.msra.mxu0 %v5123_v30  ;;  %v5187_v27 = vld [vmem:[%s6804_s1 + $0x3a0] sm:$0xff]   ;;  %v5201_v30 = vld [vmem:[%s6804_s1 + $0x468] sm:$0xff]  }
  0x8d   :  { %4473 = vmatprep.subr.bf16.mxu1 %v5124_v31  ;;  %4531 = vmatprep.subr.bf16.mxu0 %v5129_v36  ;;  %v5195_v28 = vld [vmem:[%s6804_s1 + $0x420] sm:$0xff]   ;;  %v5197_v31 = vld [vmem:[%s6804_s1 + $0x3a8] sm:$0xff]  }
  0x8e   :  { %v5188_v36 = vld [vmem:[%s6805_s0 + $0x34c] ss:$100 sps:$4 sm:$0xff]  }
  0x90   :  { %4474 = vmatpush3.bf16.msra.mxu1 %v5125_v33  ;;  %4532 = vmatpush3.bf16.msra.mxu0 %v5132_v38  ;;  %v5180_v33 = vld [vmem:[%s6805_s0 + $0x280] ss:$100 sps:$4 sm:$0xff]   ;;  %v5209_v38 = vld [vmem:[%s6804_s1 + $0x470] sm:$0xff]  }
  0x91   :  { %4475 = vmatprep.subr.bf16.mxu1 %v5134_v39  ;;  %4533 = vmatprep.subr.bf16.mxu0 %v5137_v43  ;;  %v5207_v39 = vld [vmem:[%s6804_s1 + $0x3b0] sm:$0xff]   ;;  %v5215_v43 = vld [vmem:[%s6804_s1 + $0x3b8] sm:$0xff]  }
  0x92   :  { %2939 = vmatmul.mubr.bf16.gmra.mrb[52].mxu1 %v5108_v32  ;;  %3027 = vmatmul.mubr.bf16.gmra.mrb[56].mxu0 %v5111_v34  ;;  %v5204_v32 = vld [vmem:[%s6804_s1 + $0x428] sm:$0xff]  }
  0x93   :  { %2946 = vmatprep.mubr.bf16.mxu1 %v5116_v35  ;;  %3034 = vmatprep.mubr.bf16.mxu0 %v5119_v37  ;;  %v5183_v34 = vld [vmem:[%s6805_s0 + $0x288] ss:$100 sps:$4 sm:$0xff]   ;;  %v5206_v35 = vld [vmem:[%s6804_s1 + $0x3f0] sm:$0xff]  }
  0x94   :  { %4476 = vmatpush3.bf16.msra.mxu1 %v5135_v40  ;;  %4534 = vmatpush3.bf16.msra.mxu0 %v5139_v46  ;;  %v5191_v37 = vld [vmem:[%s6805_s0 + $0x354] ss:$100 sps:$4 sm:$0xff]  }
  0x95   :  { %4477 = vmatprep.subr.bf16.mxu1 %v5141_v47  ;;  %4535 = vmatprep.subr.bf16.mxu0 %v5144_v49  ;;  %v5211_v40 = vld [vmem:[%s6804_s1 + $0x430] sm:$0xff]   ;;  %v5220_v46 = vld [vmem:[%s6804_s1 + $0x438] sm:$0xff]  }
  0x96   :  { %v5198_v47 = vld [vmem:[%s6805_s0 + $0x414] ss:$100 sps:$4 sm:$0xff]   ;;  %v5202_v49 = vld [vmem:[%s6805_s0 + $0x41c] ss:$100 sps:$4 sm:$0xff]  }
  0x98   :  { %4478 = vmatpush3.bf16.msra.mxu1 %v5143_v48  ;;  %4536 = vmatpush3.bf16.msra.mxu0 %v5148_v51  ;;  %v5221_v48 = vld [vmem:[%s6804_s1 + $0x4c0] sm:$0xff]   ;;  %v176_v51 = vld [vmem:[%s6805_s0 + $0x4d8] sm:$0x11] }
  0x99   :  { %4579 = vmatprep.subr.bf16.mxu1 %v5149_v52  ;;  %4637 = vmatprep.subr.bf16.mxu0 %v5154_v58  ;;  %v177_v52 = vld [vmem:[%s6805_s0 + $0x4e0] sm:$0x11] }
  0x9a   :  { %2947 = vmatmul.mubr.bf16.gmra.mrb[56].mxu1 %v5118_v41  ;;  %3035 = vmatmul.mubr.bf16.gmra.mrb[60].mxu0 %v5122_v42  ;;  %v5213_v41 = vld [vmem:[%s6804_s1 + $0x3f8] sm:$0xff]   ;;  %v3957_v58 = vcombine.low %v177_v52, %v177_v52 }
  0x9b   :  { %2954 = vmatprep.mubr.bf16.mxu1 %v5126_v44  ;;  %3042 = vmatprep.mubr.bf16.mxu0 %v5130_v45  ;;  %v5216_v42 = vld [vmem:[%s6804_s1 + $0x478] sm:$0xff]   ;;  %v5190_v44 = vld [vmem:[%s6805_s0 + $0x348] ss:$100 sps:$4 sm:$0xff]   ;;  %v5194_v45 = vld [vmem:[%s6805_s0 + $0x350] ss:$100 sps:$4 sm:$0xff]  }
  0xa2   :  { %2955 = vmatmul.mubr.bf16.gmra.mrb[60].mxu1 %v5128_v54  ;;  %3043 = vmatmul.mubr.bf16.gmra.mrb[64].mxu0 %v5133_v55  ;;  %v5205_v54 = vld [vmem:[%s6805_s0 + $0x418] ss:$100 sps:$4 sm:$0xff]   ;;  %v3956_v55 = vcombine.high %v176_v51, %v176_v51 }
  0xa3   :  { %2962 = vmatprep.mubr.bf16.mxu1 %v3952_v56  ;;  %3050 = vmatprep.mubr.bf16.mxu0 %v3954_v57  ;;  %v3958_v56 = vcombine.high %v177_v52, %v177_v52  ;;  %v3955_v57 = vcombine.low %v176_v51, %v176_v51 }
  0xaa   :  { %2963 = vmatmul.mubr.bf16.gmra.mrb[64].mxu1 %v3951_v59  ;;  %3051 = vmatmul.mubr.bf16.gmra.mrb[68].mxu0 %v3953_v60  ;;  %v5219_v59 = vld [vmem:[%s6805_s0 + $0x3c] ss:$100 sps:$4 sm:$0xff]   ;;  %v5224_v60 = vld [vmem:[%s6805_s0 + $0x44] ss:$100 sps:$4 sm:$0xff]  }
  0xab   :  { %3090 = vmatprep.mubr.bf16.mxu1 %v5147_v61  ;;  %3178 = vmatprep.mubr.bf16.mxu0 %v5152_v62  ;;  %v5217_v61 = vld [vmem:[%s6805_s0 + $0x38] ss:$100 sps:$4 sm:$0xff]   ;;  %v5222_v62 = vld [vmem:[%s6805_s0 + $0x40] ss:$100 sps:$4 sm:$0xff]  }
  0xb2   :  { %3091 = vmatmul.mubr.bf16.vlgmr.msra.gmra.mrb[68].mxu1 %v5145_v63  ;;  %3179 = vmatmul.mubr.bf16.vlgmr.msra.gmra.mrb[72].mxu0 %v5150_v0  ;;  %v5225_v63 = vld [vmem:[%s6804_s1 + $0x480] sm:$0xff]  }
  0xb3   :  { %4580 = vmatpush3.bf16.msra.mxu1 %v5153_v1  ;;  %4638 = vmatpush3.bf16.msra.mxu0 %v5155_v2  ;;  %v5227_v0 = vld [vmem:[%s6804_s1 + $0x500] sm:$0xff]   ;;  %v5230_v2 = vld [vmem:[%s6804_s1 + $0x4c8] sm:$0xff]  }
  0xb4   :  { %3098 = vmatprep.mubr.bf16.mxu1 %v5156_v3  ;;  %4581 = vmatprep.subr.bf16.mxu1 %v5158_v4  ;;  %v5228_v1 = vld [vmem:[%s6805_s0 + $0x104] ss:$100 sps:$4 sm:$0xff]   ;;  %v5233_v3 = vld [vmem:[%s6805_s0 + $0x10c] ss:$100 sps:$4 sm:$0xff]  }
  0xb5   :  { %3186 = vmatprep.mubr.bf16.mxu0 %v5161_v5  ;;  %4639 = vmatprep.subr.bf16.mxu0 %v5164_v7  ;;  %v5236_v4 = vld [vmem:[%s6804_s1 + $0x548] sm:$0xff]   ;;  %v5238_v7 = vld [vmem:[%s6804_s1 + $0x4d0] sm:$0xff]  }
  0xb6   :  { %v5232_v5 = vld [vmem:[%s6804_s1 + $0x488] sm:$0xff]  }
  0xb7   :  { %4582 = vmatpush3.bf16.msra.mxu1 %v5160_v6  ;;  %4640 = vmatpush3.bf16.msra.mxu0 %v5165_v8  ;;  %v5237_v6 = vld [vmem:[%s6804_s1 + $0x508] sm:$0xff]   ;;  %v5231_v8 = vld [vmem:[%s6805_s0 + $0x100] ss:$100 sps:$4 sm:$0xff]  }
  0xb8   :  { %4583 = vmatprep.subr.bf16.mxu1 %v5166_v9  ;;  %4641 = vmatprep.subr.bf16.mxu0 %v5174_v11  ;;  %v5235_v9 = vld [vmem:[%s6805_s0 + $0x108] ss:$100 sps:$4 sm:$0xff]  }
  0xb9   :  { %v5239_v11 = vld [vmem:[%s6805_s0 + $0x1cc] ss:$100 sps:$4 sm:$0xff]  }
  0xba   :  { %3099 = vmatmul.mubr.bf16.gmra.mrb[72].mxu1 %v5159_v10  ;;  %3187 = vmatmul.mubr.bf16.gmra.mrb[76].mxu0 %v5163_v12  ;;  %v5246_v10 = vld [vmem:[%s6804_s1 + $0x550] sm:$0xff]  }
  0xbb   :  { %3106 = vmatprep.mubr.bf16.mxu1 %v5167_v13  ;;  %4584 = vmatpush3.bf16.msra.mxu1 %v5169_v14  ;;  %v5241_v12 = vld [vmem:[%s6804_s1 + $0x490] sm:$0xff]  }
  0xbc   :  { %3194 = vmatprep.mubr.bf16.mxu0 %v5171_v15  ;;  %4642 = vmatpush3.bf16.msra.mxu0 %v5175_v16  ;;  %v5243_v13 = vld [vmem:[%s6805_s0 + $0x1d4] ss:$100 sps:$4 sm:$0xff]  }
  0xbd   :  { %4585 = vmatprep.subr.bf16.mxu1 %v5176_v17  ;;  %4643 = vmatprep.subr.bf16.mxu0 %v5184_v18  ;;  %v5247_v14 = vld [vmem:[%s6804_s1 + $0x510] sm:$0xff]   ;;  %v5248_v15 = vld [vmem:[%s6804_s1 + $0x4d8] sm:$0xff]  }
  0xbe   :  { %v5256_v16 = vld [vmem:[%s6804_s1 + $0x558] sm:$0xff]  }
  0xbf   :  { %4586 = vmatpush3.bf16.msra.mxu1 %v5177_v19  ;;  %v5249_v17 = vld [vmem:[%s6804_s1 + $0x498] sm:$0xff]   ;;  %v5242_v19 = vld [vmem:[%s6805_s0 + $0x1c8] ss:$100 sps:$4 sm:$0xff]  }
  0xc0   :  { %4644 = vmatpush3.bf16.msra.mxu0 %v5185_v20  ;;  %4587 = vmatprep.subr.bf16.mxu1 %v5186_v23  ;;  %v5257_v18 = vld [vmem:[%s6804_s1 + $0x518] sm:$0xff]   ;;  %v5245_v20 = vld [vmem:[%s6805_s0 + $0x1d0] ss:$100 sps:$4 sm:$0xff]  }
  0xc1   :  { %4645 = vmatprep.subr.bf16.mxu0 %v5193_v25  ;;  %v5250_v25 = vld [vmem:[%s6805_s0 + $0x294] ss:$100 sps:$4 sm:$0xff]  }
  0xc2   :  { %3107 = vmatmul.mubr.bf16.gmra.mrb[76].mxu1 %v5170_v21  ;;  %3195 = vmatmul.mubr.bf16.gmra.mrb[80].mxu0 %v5173_v22  ;;  %v5258_v21 = vld [vmem:[%s6804_s1 + $0x4e0] sm:$0xff]  }
  0xc3   :  { %3114 = vmatprep.mubr.bf16.mxu1 %v5178_v24  ;;  %3202 = vmatprep.mubr.bf16.mxu0 %v5181_v26  ;;  %v5265_v22 = vld [vmem:[%s6804_s1 + $0x560] sm:$0xff]  }
  0xc4   :  { %4588 = vmatpush3.bf16.msra.mxu1 %v5187_v27  ;;  %4646 = vmatpush3.bf16.msra.mxu0 %v5195_v28  ;;  %v5253_v26 = vld [vmem:[%s6805_s0 + $0x29c] ss:$100 sps:$4 sm:$0xff]  }
  0xc5   :  { %4589 = vmatprep.subr.bf16.mxu1 %v5196_v29  ;;  %4647 = vmatprep.subr.bf16.mxu0 %v5201_v30  ;;  %v5259_v29 = vld [vmem:[%s6804_s1 + $0x4a0] sm:$0xff]  }
  0xc8   :  { %4590 = vmatpush3.bf16.msra.mxu1 %v5197_v31  ;;  %4648 = vmatpush3.bf16.msra.mxu0 %v5204_v32 }
  0xc9   :  { %4591 = vmatprep.subr.bf16.mxu1 %v5206_v35  ;;  %4649 = vmatprep.subr.bf16.mxu0 %v5209_v38  ;;  %v5268_v35 = vld [vmem:[%s6804_s1 + $0x4e8] sm:$0xff]  }
  0xca   :  { %3115 = vmatmul.mubr.bf16.gmra.mrb[80].mxu1 %v5180_v33  ;;  %3203 = vmatmul.mubr.bf16.gmra.mrb[84].mxu0 %v5183_v34  ;;  %v5267_v34 = vld [vmem:[%s6804_s1 + $0x520] sm:$0xff]  }
  0xcb   :  { %3122 = vmatprep.mubr.bf16.mxu1 %v5188_v36  ;;  %3210 = vmatprep.mubr.bf16.mxu0 %v5191_v37 }
  0xcc   :  { %4592 = vmatpush3.bf16.msra.mxu1 %v5207_v39  ;;  %4650 = vmatpush3.bf16.msra.mxu0 %v5211_v40  ;;  %v5273_v40 = vld [vmem:[%s6804_s1 + $0x568] sm:$0xff]  }
  0xcd   :  { %4593 = vmatprep.subr.bf16.mxu1 %v5213_v41  ;;  %4651 = vmatprep.subr.bf16.mxu0 %v5216_v42  ;;  %v5252_v41 = vld [vmem:[%s6805_s0 + $0x290] ss:$100 sps:$4 sm:$0xff]   ;;  %v5255_v42 = vld [vmem:[%s6805_s0 + $0x298] ss:$100 sps:$4 sm:$0xff]  }
  0xd0   :  { %4594 = vmatpush3.bf16.msra.mxu1 %v5215_v43  ;;  %4652 = vmatpush3.bf16.msra.mxu0 %v5220_v46  ;;  %v5269_v43 = vld [vmem:[%s6804_s1 + $0x4a8] sm:$0xff]  }
  0xd1   :  { %4695 = vmatprep.subr.bf16.mxu1 %v5221_v48  ;;  %4753 = vmatprep.subr.bf16.mxu0 %v5226_v50  ;;  %v5263_v48 = vld [vmem:[%s6805_s0 + $0x364] ss:$100 sps:$4 sm:$0xff]  }
  0xd2   :  { %3123 = vmatmul.mubr.bf16.gmra.mrb[84].mxu1 %v5190_v44  ;;  %3211 = vmatmul.mubr.bf16.gmra.mrb[88].mxu0 %v5194_v45  ;;  %v5276_v44 = vld [vmem:[%s6804_s1 + $0x528] sm:$0xff]  }
  0xd3   :  { %3130 = vmatprep.mubr.bf16.mxu1 %v5198_v47  ;;  %3218 = vmatprep.mubr.bf16.mxu0 %v5202_v49  ;;  %v5260_v47 = vld [vmem:[%s6805_s0 + $0x35c] ss:$100 sps:$4 sm:$0xff]   ;;  %v5278_v49 = vld [vmem:[%s6804_s1 + $0x4f0] sm:$0xff]  }
  0xda   :  { %3131 = vmatmul.mubr.bf16.gmra.mrb[88].mxu1 %v5200_v53  ;;  %3219 = vmatmul.mubr.bf16.gmra.mrb[92].mxu0 %v5205_v54 }
  0xdb   :  { %3138 = vmatprep.mubr.bf16.mxu1 %v3956_v55  ;;  %3226 = vmatprep.mubr.bf16.mxu0 %v3958_v56  ;;  %v5279_v56 = vld [vmem:[%s6804_s1 + $0x4b0] sm:$0xff]  }
  0xe2   :  { %3139 = vmatmul.mubr.bf16.gmra.mrb[92].mxu1 %v3955_v57  ;;  %3227 = vmatmul.mubr.bf16.gmra.mrb[96].mxu0 %v3957_v58 }
  0xe3   :  { %3266 = vmatprep.mubr.bf16.mxu1 %v5219_v59  ;;  %3354 = vmatprep.mubr.bf16.mxu0 %v5224_v60  ;;  %v5281_v59 = vld [vmem:[%s6804_s1 + $0x570] sm:$0xff]  }
  0xe4   :  { %v5283_v60 = vld [vmem:[%s6804_s1 + $0x530] sm:$0xff]  }
  0xea   :  { %3267 = vmatmul.mubr.bf16.vlgmr.msra.gmra.mrb[96].mxu1 %v5217_v61  ;;  %3355 = vmatmul.mubr.bf16.vlgmr.msra.gmra.mrb[100].mxu0 %v5222_v62 }
  0xeb   :  { %4696 = vmatpush3.bf16.msra.mxu1 %v5225_v63  ;;  %4754 = vmatpush3.bf16.msra.mxu0 %v5227_v0  ;;  %v5285_v63 = vld [vmem:[%s6804_s1 + $0x4f8] sm:$0xff]  }
  0xec   :  { %3274 = vmatprep.mubr.bf16.mxu1 %v5228_v1  ;;  %4697 = vmatprep.subr.bf16.mxu1 %v5230_v2  ;;  %v5288_v0 = vld [vmem:[%s6804_s1 + $0x578] sm:$0xff]  }
  0xed   :  { %3362 = vmatprep.mubr.bf16.mxu0 %v5233_v3  ;;  %4755 = vmatprep.subr.bf16.mxu0 %v5236_v4  ;;  %v5287_v1 = vld [vmem:[%s6804_s1 + $0x4b8] sm:$0xff]   ;;  %v5293_v4 = vld [vmem:[%s6804_s1 + $0x5c0] sm:$0xff]  }
  0xee   :  { %v5262_v2 = vld [vmem:[%s6805_s0 + $0x358] ss:$100 sps:$4 sm:$0xff]  }
  0xef   :  { %4698 = vmatpush3.bf16.msra.mxu1 %v5232_v5  ;;  %4756 = vmatpush3.bf16.msra.mxu0 %v5237_v6  ;;  %v5292_v3 = vld [vmem:[%s6804_s1 + $0x538] sm:$0xff]  }
  0xf0   :  { %4699 = vmatprep.subr.bf16.mxu1 %v5238_v7  ;;  %4757 = vmatprep.subr.bf16.mxu0 %v5246_v10 }
  0xf2   :  { %3275 = vmatmul.mubr.bf16.gmra.mrb[100].mxu1 %v5231_v8  ;;  %3363 = vmatmul.mubr.bf16.gmra.mrb[104].mxu0 %v5235_v9  ;;  %v5266_v9 = vld [vmem:[%s6805_s0 + $0x360] ss:$100 sps:$4 sm:$0xff]  }
  0xf3   :  { %3282 = vmatprep.mubr.bf16.mxu1 %v5239_v11  ;;  %4700 = vmatpush3.bf16.msra.mxu1 %v5241_v12 }
  0xf4   :  { %3370 = vmatprep.mubr.bf16.mxu0 %v5243_v13  ;;  %4758 = vmatpush3.bf16.msra.mxu0 %v5247_v14  ;;  %v5270_v14 = vld [vmem:[%s6805_s0 + $0x424] ss:$100 sps:$4 sm:$0xff]  }
  0xf5   :  { %v4213_v23 = vpop.f32.mrb[0].mxu1  ;;  %v4189_v24 = vpop.f32.mrb[0].mxu0  ;;  %4701 = vmatprep.subr.bf16.mxu1 %v5248_v15  ;;  %4759 = vmatprep.subr.bf16.mxu0 %v5256_v16  ;;  %v5274_v15 = vld [vmem:[%s6805_s0 + $0x42c] ss:$100 sps:$4 sm:$0xff]  }
  0xf6   :  { %v4214_v27 = vpop.f32.mrb[1].mxu1  ;;  %v4190_v28 = vpop.f32.mrb[1].mxu0 }
  0xf7   :  { %v6203_v30 = vadd.f32 %v4214_v27, %v4213_v23  ;;  %v4216_v31 = vpop.f32.mrb[2].mxu1  ;;  %v6205_v32 = vadd.f32 %v4190_v28, %v4189_v24  ;;  %v4192_v33 = vpop.f32.mrb[2].mxu0  ;;  %4702 = vmatpush3.bf16.msra.mxu1 %v5249_v17  ;;  %v5377_v23 = vmov 0.0  }
  0xf8   :  { %v4217_v36 = vpop.f32.mrb[3].mxu1  ;;  %v4193_v37 = vpop.f32.mrb[3].mxu0  ;;  %4760 = vmatpush3.bf16.msra.mxu0 %v5257_v18  ;;  %4703 = vmatprep.subr.bf16.mxu1 %v5258_v21  ;;  %v178_v21 = vld [vmem:[%s6805_s0 + $0x4e8] sm:$0x11] }
  0xf9   :  { %v6213_v38 = vadd.f32 %v4217_v36, %v4216_v31  ;;  %v6215_v39 = vadd.f32 %v4193_v37, %v4192_v33  ;;  %4761 = vmatprep.subr.bf16.mxu0 %v5265_v22  ;;  %v179_v22 = vld [vmem:[%s6805_s0 + $0x4f0] sm:$0x11]  ;;  %v3960_v28 = vcombine.high %v178_v21, %v178_v21  ;;  %v6311_v36 = vld [vmem:[%s6806_s2] ss:$0 sm:$0xff] }
  0xfa   :  { %3283 = vmatmul.mubr.bf16.gmra.mrb[104].mxu1 %v5242_v19  ;;  %3371 = vmatmul.mubr.bf16.gmra.mrb[108].mxu0 %v5245_v20  ;;  %v5272_v19 = vld [vmem:[%s6805_s0 + $0x420] ss:$100 sps:$4 sm:$0xff]   ;;  %v5277_v20 = vld [vmem:[%s6805_s0 + $0x428] ss:$100 sps:$4 sm:$0xff]  }
  0xfb   :  { %3290 = vmatprep.mubr.bf16.mxu1 %v5250_v25  ;;  %3378 = vmatprep.mubr.bf16.mxu0 %v5253_v26 }
  0xfc   :  { %4704 = vmatpush3.bf16.msra.mxu1 %v5259_v29  ;;  %4762 = vmatpush3.bf16.msra.mxu0 %v5267_v34  ;;  %v3962_v29 = vcombine.high %v179_v22, %v179_v22 }
  0xfd   :  { %v4195_v45 = vpop.f32.mrb[4].mxu0  ;;  %v4219_v46 = vpop.f32.mrb[4].mxu1  ;;  %4705 = vmatprep.subr.bf16.mxu1 %v5268_v35  ;;  %4763 = vmatprep.subr.bf16.mxu0 %v5273_v40 }
  0xfe   :  { %v4196_v50 = vpop.f32.mrb[5].mxu0  ;;  %v4220_v51 = vpop.f32.mrb[5].mxu1 }
  0xff   :  { %v6241_v52 = vadd.f32 %v4196_v50, %v4195_v45  ;;  %v4198_v53 = vpop.f32.mrb[6].mxu0  ;;  %v6243_v54 = vadd.f32 %v4220_v51, %v4219_v46  ;;  %v4222_v55 = vpop.f32.mrb[6].mxu1 }
 0x100   :  { %v4199_v57 = vpop.f32.mrb[7].mxu0  ;;  %v4223_v58 = vpop.f32.mrb[7].mxu1  ;;  %4706 = vmatpush3.bf16.msra.mxu1 %v5269_v43  ;;  %4764 = vmatpush3.bf16.msra.mxu0 %v5276_v44  ;;  %v2653_v43 = vadd.f32 %v6205_v32, %v6311_v36 }
 0x101   :  { %v6254_v61 = vadd.f32 %v4199_v57, %v4198_v53  ;;  %v6256_v62 = vadd.f32 %v4223_v58, %v4222_v55  ;;  %4707 = vmatprep.subr.bf16.mxu1 %v5278_v49  ;;  %4765 = vmatprep.subr.bf16.mxu0 %v5281_v59  ;;  %v5296_v49 = vld [vmem:[%s6805_s0 + $0x54] ss:$100 sps:$4 sm:$0xff]   ;;  %v2656_v53 = vadd.f32 %v6215_v39, %v6311_v36  ;;  %v5289_v59 = vld [vmem:[%s6805_s0 + $0x48] ss:$100 sps:$4 sm:$0xff]  }
 0x102   :  { %3291 = vmatmul.mubr.bf16.gmra.mrb[108].mxu1 %v5252_v41  ;;  %3379 = vmatmul.mubr.bf16.gmra.mrb[112].mxu0 %v5255_v42  ;;  %v3959_v41 = vcombine.low %v178_v21, %v178_v21  ;;  %v3961_v42 = vcombine.low %v179_v22, %v179_v22  ;;  %v5294_v39 = vld [vmem:[%s6805_s0 + $0x50] ss:$100 sps:$4 sm:$0xff]   ;;  %v5303_v21 = vld [vmem:[%s6804_s1 + $0x588] sm:$0xff]  }
 0x103   :  { %3298 = vmatprep.mubr.bf16.mxu1 %v5260_v47  ;;  %3386 = vmatprep.mubr.bf16.mxu0 %v5263_v48  ;;  %v5291_v48 = vld [vmem:[%s6805_s0 + $0x4c] ss:$100 sps:$4 sm:$0xff]  }
 0x104   :  { %4708 = vmatpush3.bf16.msra.mxu1 %v5279_v56  ;;  %4766 = vmatpush3.bf16.msra.mxu0 %v5283_v60 }
 0x105   :  { %v4201_v5 = vpop.f32.mrb[8].mxu0  ;;  %v4225_v6 = vpop.f32.mrb[8].mxu1  ;;  %4709 = vmatprep.subr.bf16.mxu1 %v5285_v63  ;;  %4767 = vmatprep.subr.bf16.mxu0 %v5288_v0 }
 0x106   :  { %v4202_v7 = vpop.f32.mrb[9].mxu0  ;;  %v4226_v8 = vpop.f32.mrb[9].mxu1 }
 0x107   :  { %v6279_v10 = vadd.f32 %v4202_v7, %v4201_v5  ;;  %v4204_v11 = vpop.f32.mrb[10].mxu0  ;;  %v6281_v12 = vadd.f32 %v4226_v8, %v4225_v6  ;;  %v4228_v13 = vpop.f32.mrb[10].mxu1  ;;  %v2661_v5 = vadd.f32 %v6241_v52, %v6311_v36 }
 0x108   :  { %v4205_v16 = vpop.f32.mrb[11].mxu0  ;;  %v4229_v17 = vpop.f32.mrb[11].mxu1  ;;  %4710 = vmatpush3.bf16.msra.mxu1 %v5287_v1  ;;  %4768 = vmatpush3.bf16.msra.mxu0 %v5292_v3  ;;  %v5297_v1 = vld [vmem:[%s6804_s1 + $0x580] sm:$0xff]  }
 0x109   :  { %v6289_v18 = vadd.f32 %v4205_v16, %v4204_v11  ;;  %4811 = vmatprep.subr.bf16.mxu1 %v5293_v4  ;;  %4880 = vmatprep.subr.bf16.mxu0 %v5377_v23  ;;  %v5299_v11 = vld [vmem:[%s6805_s0 + $0x114] ss:$100 sps:$4 sm:$0xff]   ;;  %v2664_v16 = vadd.f32 %v6254_v61, %v6311_v36  ;;  %v5315_v61 = vld [vmem:[%s6804_s1 + $0x608] sm:$0xff]  }
 0x10a   :  { %3299 = vmatmul.mubr.bf16.gmra.mrb[112].mxu1 %v5262_v2  ;;  %3387 = vmatmul.mubr.bf16.gmra.mrb[116].mxu0 %v5266_v9  ;;  %v5298_v2 = vld [vmem:[%s6804_s1 + $0x600] sm:$0xff]  }
 0x10b   :  { %3306 = vmatprep.mubr.bf16.mxu1 %v5270_v14  ;;  %3394 = vmatprep.mubr.bf16.mxu0 %v5274_v15  ;;  %v5301_v15 = vld [vmem:[%s6804_s1 + $0x5c8] sm:$0xff]  }
 0x10d   :  { %v4207_v24 = vpop.f32.mrb[12].mxu0 }
 0x10e   :  { %v4208_v25 = vpop.f32.mrb[13].mxu0 }
 0x10f   :  { %v6304_v26 = vadd.f32 %v4208_v25, %v4207_v24  ;;  %v4210_v27 = vpop.f32.mrb[14].mxu0  ;;  %v5302_v25 = vld [vmem:[%s6805_s0 + $0x110] ss:$100 sps:$4 sm:$0xff]  }
 0x110   :  { %v4211_v31 = vpop.f32.mrb[15].mxu0 }
 0x111   :  { %v6306_v33 = vadd.f32 %v4211_v31, %v4210_v27  ;;  %v5307_v27 = vld [vmem:[%s6804_s1 + $0x5d0] sm:$0xff]  }
 0x112   :  { %3307 = vmatmul.mubr.bf16.gmra.mrb[116].mxu1 %v5272_v19  ;;  %3395 = vmatmul.mubr.bf16.gmra.mrb[120].mxu0 %v5277_v20  ;;  %v5304_v20 = vld [vmem:[%s6805_s0 + $0x11c] ss:$100 sps:$4 sm:$0xff]  }
 0x113   :  { %3314 = vmatprep.mubr.bf16.mxu1 %v3960_v28  ;;  %3402 = vmatprep.mubr.bf16.mxu0 %v3962_v29 }
 0x115   :  { %v4247_v34 = vpop.f32.mrb[12].mxu1  ;;  %v4305_v35 = vpop.f32.mrb[16].mxu0 }
 0x116   :  { %v4248_v37 = vpop.f32.mrb[13].mxu1  ;;  %v4306_v40 = vpop.f32.mrb[17].mxu0 }
 0x117   :  { %v4249_v44 = vadd.f32 %v4248_v37, %v4247_v34  ;;  %v4250_v45 = vpop.f32.mrb[14].mxu1  ;;  %v4307_v46 = vadd.f32 %v4306_v40, %v4305_v35  ;;  %v4308_v47 = vpop.f32.mrb[18].mxu0  ;;  %v5306_v34 = vld [vmem:[%s6805_s0 + $0x118] ss:$100 sps:$4 sm:$0xff]  }
 0x118   :  { %v4251_v50 = vpop.f32.mrb[15].mxu1  ;;  %v4309_v51 = vpop.f32.mrb[19].mxu0  ;;  %v5308_v35 = vld [vmem:[%s6805_s0 + $0x1dc] ss:$100 sps:$4 sm:$0xff]  }
 0x119   :  { %v2741_v55 = vadd.f32 %v4249_v44, %v2653_v43  ;;  %v4252_v56 = vadd.f32 %v4251_v50, %v4250_v45  ;;  %v4310_v32 = vadd.f32 %v4309_v51, %v4308_v47  ;;  %v2672_v50 = vadd.f32 %v6289_v18, %v6311_v36  ;;  %v5311_v18 = vld [vmem:[%s6805_s0 + $0x1d8] ss:$100 sps:$4 sm:$0xff]  }
 0x11a   :  { %3315 = vmatmul.mubr.bf16.gmra.mrb[120].mxu1 %v3959_v41  ;;  %3403 = vmatmul.mubr.bf16.gmra.mrb[124].mxu0 %v3961_v42  ;;  %v2669_v41 = vadd.f32 %v6279_v10, %v6311_v36  ;;  %v5316_v10 = vld [vmem:[%s6804_s1 + $0x5d8] sm:$0xff]  }
 0x11b   :  { %v2744_v57 = vadd.f32 %v4252_v56, %v2656_v53  ;;  %v6323_v58 = vadd.f32 %v4307_v46, %v2741_v55  ;;  %3442 = vmatprep.mubr.bf16.mxu1 %v5291_v48  ;;  %3530 = vmatprep.mubr.bf16.mxu0 %v5296_v49  ;;  %v5310_v46 = vld [vmem:[%s6804_s1 + $0x590] sm:$0xff]   ;;  %v5312_v49 = vld [vmem:[%s6805_s0 + $0x1e4] ss:$100 sps:$4 sm:$0xff]  }
 0x11c   :  { %v5332_v56 = vld [vmem:[%s6804_s1 + $0x610] sm:$0xff]  }
 0x11d   :  { %v6328_v60 = vadd.f32 %v4310_v32, %v2744_v57  ;;  %v4253_v63 = vpop.f32.mrb[16].mxu1  ;;  %v4311_v0 = vpop.f32.mrb[20].mxu0 }
 0x11e   :  { %v4254_v3 = vpop.f32.mrb[17].mxu1  ;;  %v4312_v4 = vpop.f32.mrb[21].mxu0 }
 0x11f   :  { %v4255_v6 = vadd.f32 %v4254_v3, %v4253_v63  ;;  %v4256_v7 = vpop.f32.mrb[18].mxu1  ;;  %v4313_v8 = vadd.f32 %v4312_v4, %v4311_v0  ;;  %v4314_v9 = vpop.f32.mrb[22].mxu0  ;;  %v5314_v63 = vld [vmem:[%s6805_s0 + $0x1e0] ss:$100 sps:$4 sm:$0xff]   ;;  %v5345_v4 = vld [vmem:[%s6804_s1 + $0x618] sm:$0xff]  }
 0x120   :  { %v4257_v13 = vpop.f32.mrb[19].mxu1  ;;  %v4315_v14 = vpop.f32.mrb[23].mxu0  ;;  %v5324_v0 = vld [vmem:[%s6804_s1 + $0x5e0] sm:$0xff]  }
 0x121   :  { %v2749_v17 = vadd.f32 %v4255_v6, %v2661_v5  ;;  %v4258_v19 = vadd.f32 %v4257_v13, %v4256_v7  ;;  %v4316_v52 = vadd.f32 %v4315_v14, %v4314_v9  ;;  %v5318_v3 = vld [vmem:[%s6805_s0 + $0x2a4] ss:$100 sps:$4 sm:$0xff]   ;;  %v2677_v7 = vadd.f32 %v6304_v26, %v6311_v36  ;;  %v5321_v14 = vld [vmem:[%s6805_s0 + $0x2ac] ss:$100 sps:$4 sm:$0xff]  }
 0x122   :  { %3443 = vmatmul.mubr.bf16.vlgmr.msra.gmra.mrb[124].mxu1 %v5289_v59  ;;  %3531 = vmatmul.mubr.bf16.vlgmr.msra.gmra.mrb[128].mxu0 %v5294_v39  ;;  %v5317_v59 = vld [vmem:[%s6804_s1 + $0x598] sm:$0xff]  }
 0x123   :  { %v2752_v22 = vadd.f32 %v4258_v19, %v2664_v16  ;;  %v6355_v24 = vadd.f32 %v4313_v8, %v2749_v17  ;;  %4812 = vmatpush3.bf16.msra.mxu1 %v5297_v1  ;;  %4881 = vmatpush3.bf16.msra.mxu0 %v5298_v2  ;;  %v5325_v17 = vld [vmem:[%s6804_s1 + $0x5a0] sm:$0xff]   ;;  %v2680_v19 = vadd.f32 %v6306_v33, %v6311_v36  ;;  %v5334_v33 = vld [vmem:[%s6804_s1 + $0x5a8] sm:$0xff]  }
 0x124   :  { %3450 = vmatprep.mubr.bf16.mxu1 %v5299_v11  ;;  %4813 = vmatprep.subr.bf16.mxu1 %v5301_v15 }
 0x125   :  { %v6366_v28 = vadd.f32 %v4316_v52, %v2752_v22  ;;  %v4259_v29 = vpop.f32.mrb[20].mxu1  ;;  %v4317_v31 = vpop.f32.mrb[24].mxu0  ;;  %3538 = vmatprep.mubr.bf16.mxu0 %v5304_v20  ;;  %4882 = vmatprep.subr.bf16.mxu0 %v5377_v23 }
 0x126   :  { %v4260_v37 = vpop.f32.mrb[21].mxu1  ;;  %v4318_v40 = vpop.f32.mrb[25].mxu0 }
 0x127   :  { %v4261_v42 = vadd.f32 %v4260_v37, %v4259_v29  ;;  %v4262_v43 = vpop.f32.mrb[22].mxu1  ;;  %v4319_v44 = vadd.f32 %v4318_v40, %v4317_v31  ;;  %v4320_v45 = vpop.f32.mrb[26].mxu0  ;;  %4814 = vmatpush3.bf16.msra.mxu1 %v5303_v21  ;;  %4883 = vmatpush3.bf16.msra.mxu0 %v5315_v61  ;;  %v5333_v21 = vld [vmem:[%s6804_s1 + $0x5e8] sm:$0xff]   ;;  %v5341_v31 = vld [vmem:[%s6804_s1 + $0x5f0] sm:$0xff]   ;;  %v5320_v37 = vld [vmem:[%s6805_s0 + $0x2a0] ss:$100 sps:$4 sm:$0xff]  }
 0x128   :  { %v4263_v47 = vpop.f32.mrb[23].mxu1  ;;  %v4321_v48 = vpop.f32.mrb[27].mxu0  ;;  %4815 = vmatprep.subr.bf16.mxu1 %v5307_v27  ;;  %4884 = vmatprep.subr.bf16.mxu0 %v5377_v23  ;;  %v5323_v40 = vld [vmem:[%s6805_s0 + $0x2a8] ss:$100 sps:$4 sm:$0xff]  }
 0x129   :  { %v2757_v51 = vadd.f32 %v4261_v42, %v2669_v41  ;;  %v4264_v53 = vadd.f32 %v4263_v47, %v4262_v43  ;;  %v4322_v55 = vadd.f32 %v4321_v48, %v4320_v45  ;;  %v2685_v41 = vadd.f32 %v6203_v30, %v6311_v36  ;;  %v5329_v47 = vld [vmem:[%s6805_s0 + $0x374] ss:$100 sps:$4 sm:$0xff]  }
 0x12a   :  { %3451 = vmatmul.mubr.bf16.gmra.mrb[128].mxu1 %v5302_v25  ;;  %3539 = vmatmul.mubr.bf16.gmra.mrb[132].mxu0 %v5306_v34  ;;  %v2688_v30 = vadd.f32 %v6213_v38, %v6311_v36  ;;  %v5349_v38 = vld [vmem:[%s6804_s1 + $0x5b8] sm:$0xff]  }
 0x12b   :  { %v2760_v32 = vadd.f32 %v4264_v53, %v2672_v50  ;;  %v6392_v57 = vadd.f32 %v4319_v44, %v2757_v51  ;;  %3458 = vmatprep.mubr.bf16.mxu1 %v5308_v35  ;;  %4816 = vmatpush3.bf16.msra.mxu1 %v5310_v46  ;;  %v5326_v46 = vld [vmem:[%s6805_s0 + $0x36c] ss:$100 sps:$4 sm:$0xff]  }
 0x12c   :  { %3546 = vmatprep.mubr.bf16.mxu0 %v5312_v49  ;;  %4817 = vmatprep.subr.bf16.mxu1 %v5316_v10  ;;  %v5342_v10 = vld [vmem:[%s6804_s1 + $0x5b0] sm:$0xff]  }
 0x12d   :  { %v6406_v39 = vadd.f32 %v4322_v55, %v2760_v32  ;;  %v4265_v1 = vpop.f32.mrb[24].mxu1  ;;  %v4323_v2 = vpop.f32.mrb[28].mxu0  ;;  %4885 = vmatpush3.bf16.msra.mxu0 %v5332_v56  ;;  %v5347_v55 = vld [vmem:[%s6804_s1 + $0x5f8] sm:$0xff]  }
 0x12e   :  { %v4266_v5 = vpop.f32.mrb[25].mxu1  ;;  %v4324_v6 = vpop.f32.mrb[29].mxu0  ;;  %4886 = vmatprep.subr.bf16.mxu0 %v5377_v23 }
 0x12f   :  { %v4267_v8 = vadd.f32 %v4266_v5, %v4265_v1  ;;  %v4268_v9 = vpop.f32.mrb[26].mxu1  ;;  %v4325_v11 = vadd.f32 %v4324_v6, %v4323_v2  ;;  %v4326_v13 = vpop.f32.mrb[30].mxu0  ;;  %4818 = vmatpush3.bf16.msra.mxu1 %v5317_v59  ;;  %v5328_v2 = vld [vmem:[%s6805_s0 + $0x368] ss:$100 sps:$4 sm:$0xff]  }
 0x130   :  { %v4269_v15 = vpop.f32.mrb[27].mxu1  ;;  %v4327_v16 = vpop.f32.mrb[31].mxu0  ;;  %4819 = vmatprep.subr.bf16.mxu1 %v5324_v0 }
 0x131   :  { %v2765_v26 = vadd.f32 %v4267_v8, %v2677_v7  ;;  %v4270_v52 = vadd.f32 %v4269_v15, %v4268_v9  ;;  %v4328_v20 = vadd.f32 %v4327_v16, %v4326_v13  ;;  %4887 = vmatpush3.bf16.msra.mxu0 %v5345_v4  ;;  %v2693_v4 = vadd.f32 %v6243_v54, %v6311_v36  ;;  %v5335_v9 = vld [vmem:[%s6805_s0 + $0x434] ss:$100 sps:$4 sm:$0xff]  }
 0x132   :  { %3459 = vmatmul.mubr.bf16.gmra.mrb[132].mxu1 %v5311_v18  ;;  %3547 = vmatmul.mubr.bf16.gmra.mrb[136].mxu0 %v5314_v63  ;;  %v2696_v15 = vadd.f32 %v6256_v62, %v6311_v36 }
 0x133   :  { %v2768_v22 = vadd.f32 %v4270_v52, %v2680_v19  ;;  %v6428_v61 = vadd.f32 %v4325_v11, %v2765_v26  ;;  %3466 = vmatprep.mubr.bf16.mxu1 %v5318_v3  ;;  %3554 = vmatprep.mubr.bf16.mxu0 %v5321_v14  ;;  %v5331_v3 = vld [vmem:[%s6805_s0 + $0x370] ss:$100 sps:$4 sm:$0xff]   ;;  %v5338_v11 = vld [vmem:[%s6805_s0 + $0x43c] ss:$100 sps:$4 sm:$0xff]  }
 0x134   :  { %4820 = vmatpush3.bf16.msra.mxu1 %v5325_v17  ;;  %v180_v52 = vld [vmem:[%s6805_s0 + $0x4f8] sm:$0x11] }
 0x135   :  { %v6433_v25 = vadd.f32 %v4328_v20, %v2768_v22  ;;  %v4271_v27 = vpop.f32.mrb[28].mxu1  ;;  %v4329_v29 = vpop.f32.mrb[32].mxu0  ;;  %4821 = vmatprep.subr.bf16.mxu1 %v5333_v21  ;;  %v181_v20 = vld [vmem:[%s6805_s0 + $0x500] sm:$0x11] }
 0x136   :  { %v4272_v34 = vpop.f32.mrb[29].mxu1  ;;  %v4330_v35 = vpop.f32.mrb[33].mxu0 }
 0x137   :  { %v4273_v42 = vadd.f32 %v4272_v34, %v4271_v27  ;;  %v4274_v43 = vpop.f32.mrb[30].mxu1  ;;  %v4331_v44 = vadd.f32 %v4330_v35, %v4329_v29  ;;  %v4332_v45 = vpop.f32.mrb[34].mxu0  ;;  %v5340_v34 = vld [vmem:[%s6805_s0 + $0x438] ss:$100 sps:$4 sm:$0xff]  }
 0x138   :  { %v4275_v48 = vpop.f32.mrb[31].mxu1  ;;  %v4333_v49 = vpop.f32.mrb[35].mxu0  ;;  %4822 = vmatpush3.bf16.msra.mxu1 %v5334_v33  ;;  %v2701_v33 = vadd.f32 %v6281_v12, %v6311_v36 }
 0x139   :  { %v2773_v50 = vadd.f32 %v4273_v42, %v2685_v41  ;;  %v4276_v51 = vadd.f32 %v4275_v48, %v4274_v43  ;;  %v4334_v53 = vadd.f32 %v4333_v49, %v4332_v45  ;;  %4823 = vmatprep.subr.bf16.mxu1 %v5341_v31  ;;  %v5337_v31 = vld [vmem:[%s6805_s0 + $0x430] ss:$100 sps:$4 sm:$0xff]   ;;  %v3964_v42 = vcombine.high %v180_v52, %v180_v52 }
 0x13a   :  { %3467 = vmatmul.mubr.bf16.gmra.mrb[136].mxu1 %v5320_v37  ;;  %3555 = vmatmul.mubr.bf16.gmra.mrb[140].mxu0 %v5323_v40  ;;  %v3966_v43 = vcombine.high %v181_v20, %v181_v20 }
 0x13b   :  { %v2776_v56 = vadd.f32 %v4276_v51, %v2688_v30  ;;  %v6460_v32 = vadd.f32 %v4331_v44, %v2773_v50  ;;  %3474 = vmatprep.mubr.bf16.mxu1 %v5326_v46  ;;  %3562 = vmatprep.mubr.bf16.mxu0 %v5329_v47  ;;  %v3965_v30 = vcombine.low %v181_v20, %v181_v20 }
 0x13c   :  { %4824 = vmatpush3.bf16.msra.mxu1 %v5342_v10  ;;  %v3963_v10 = vcombine.low %v180_v52, %v180_v52 }
 0x13d   :  { %v6465_v59 = vadd.f32 %v4334_v53, %v2776_v56  ;;  %v4277_v18 = vpop.f32.mrb[32].mxu1  ;;  %v4335_v63 = vpop.f32.mrb[36].mxu0  ;;  %4825 = vmatprep.subr.bf16.mxu1 %v5347_v55  ;;  %v5352_v56 = vld [vmem:[%s6805_s0 + $0x5c] ss:$100 sps:$4 sm:$0xff]  }
 0x13e   :  { %v4278_v0 = vpop.f32.mrb[33].mxu1  ;;  %v4336_v1 = vpop.f32.mrb[37].mxu0 }
 0x13f   :  { %v4279_v5 = vadd.f32 %v4278_v0, %v4277_v18  ;;  %v4280_v6 = vpop.f32.mrb[34].mxu1  ;;  %v4337_v7 = vadd.f32 %v4336_v1, %v4335_v63  ;;  %v4338_v8 = vpop.f32.mrb[38].mxu0 }
 0x140   :  { %v4281_v13 = vpop.f32.mrb[35].mxu1  ;;  %v4339_v14 = vpop.f32.mrb[39].mxu0  ;;  %4826 = vmatpush3.bf16.msra.mxu1 %v5349_v38 }
 0x141   :  { %v2781_v16 = vadd.f32 %v4279_v5, %v2693_v4  ;;  %v4282_v54 = vadd.f32 %v4281_v13, %v4280_v6  ;;  %v4340_v17 = vadd.f32 %v4339_v14, %v4338_v8 }
 0x142   :  { %3475 = vmatmul.mubr.bf16.gmra.mrb[140].mxu1 %v5328_v2  ;;  %3563 = vmatmul.mubr.bf16.gmra.mrb[144].mxu0 %v5331_v3 }
 0x143   :  { %v2784_v19 = vadd.f32 %v4282_v54, %v2696_v15  ;;  %v6483_v26 = vadd.f32 %v4337_v7, %v2781_v16  ;;  %3482 = vmatprep.mubr.bf16.mxu1 %v5335_v9  ;;  %3570 = vmatprep.mubr.bf16.mxu0 %v5338_v11  ;;  %v5354_v15 = vld [vmem:[%s6805_s0 + $0x124] ss:$100 sps:$4 sm:$0xff]  }
 0x145   :  { %v6491_v21 = vadd.f32 %v4340_v17, %v2784_v19  ;;  %v4283_v62 = vpop.f32.mrb[36].mxu1  ;;  %v4341_v22 = vpop.f32.mrb[40].mxu0 }
 0x146   :  { %v4284_v27 = vpop.f32.mrb[37].mxu1  ;;  %v4342_v29 = vpop.f32.mrb[41].mxu0 }
 0x147   :  { %v4285_v35 = vadd.f32 %v4284_v27, %v4283_v62  ;;  %v4286_v37 = vpop.f32.mrb[38].mxu1  ;;  %v4343_v40 = vadd.f32 %v4342_v29, %v4341_v22  ;;  %v4344_v41 = vpop.f32.mrb[42].mxu0 }
 0x148   :  { %v4287_v44 = vpop.f32.mrb[39].mxu1  ;;  %v4345_v45 = vpop.f32.mrb[43].mxu0  ;;  %v5358_v41 = vld [vmem:[%s6805_s0 + $0x1ec] ss:$100 sps:$4 sm:$0xff]  }
 0x149   :  { %v2789_v46 = vadd.f32 %v4285_v35, %v2701_v33 }
 0x14a   :  { %3483 = vmatmul.mubr.bf16.gmra.mrb[144].mxu1 %v5337_v31  ;;  %3571 = vmatmul.mubr.bf16.gmra.mrb[148].mxu0 %v5340_v34 }
 0x14b   :  { %v6501_v12 = vadd.f32 %v4343_v40, %v2789_v46  ;;  %3490 = vmatprep.mubr.bf16.mxu1 %v3964_v42  ;;  %3578 = vmatprep.mubr.bf16.mxu0 %v3966_v43 }
 0x14d   :  { %v4363_v36 = vpop.f32.mrb[40].mxu1  ;;  %v4421_v47 = vpop.f32.mrb[44].mxu0 }
 0x14e   :  { %v4364_v48 = vpop.f32.mrb[41].mxu1  ;;  %v4422_v49 = vpop.f32.mrb[45].mxu0 }
 0x14f   :  { %v4365_v50 = vadd.f32 %v4364_v48, %v4363_v36  ;;  %v4366_v51 = vpop.f32.mrb[42].mxu1  ;;  %v4423_v53 = vadd.f32 %v4422_v49, %v4421_v47  ;;  %v4424_v55 = vpop.f32.mrb[46].mxu0 }
 0x150   :  { %v4367_v38 = vpop.f32.mrb[43].mxu1  ;;  %v4425_v18 = vpop.f32.mrb[47].mxu0 }
 0x151   :  { %v2917_v63 = vadd.f32 %v4365_v50, %v6323_v58  ;;  %v4368_v0 = vadd.f32 %v4367_v38, %v4366_v51  ;;  %v4426_v1 = vadd.f32 %v4425_v18, %v4424_v55  ;;  %v5350_v58 = vld [vmem:[%s6805_s0 + $0x58] ss:$100 sps:$4 sm:$0xff]  }
 0x152   :  { %3491 = vmatmul.mubr.bf16.gmra.mrb[148].mxu1 %v3963_v10  ;;  %3579 = vmatmul.mubr.bf16.gmra.mrb[152].mxu0 %v3965_v30  ;;  %v5362_v38 = vld [vmem:[%s6805_s0 + $0x2b4] ss:$100 sps:$4 sm:$0xff]  }
 0x153   :  { %v2920_v2 = vadd.f32 %v4368_v0, %v6328_v60  ;;  %v6508_v3 = vadd.f32 %v4423_v53, %v2917_v63  ;;  %3618 = vmatprep.mubr.bf16.mxu1 %v5352_v56  ;;  %4888 = vmatprep.mubr.msk.bf16.mxu0 %vm5378_vm0, %v5377_v23  ;;  %v5353_v60 = vld [vmem:[%s6805_s0 + $0x60] ss:$100 sps:$4 sm:$0xff]  }
 0x155   :  { %v6512_v4 = vadd.f32 %v4426_v1, %v2920_v2  ;;  %v4369_v5 = vpop.f32.mrb[44].mxu1  ;;  %v4427_v6 = vpop.f32.mrb[48].mxu0 }
 0x156   :  { %v4370_v7 = vpop.f32.mrb[45].mxu1  ;;  %v4428_v8 = vpop.f32.mrb[49].mxu0 }
 0x157   :  { %v4371_v9 = vadd.f32 %v4370_v7, %v4369_v5  ;;  %v4372_v11 = vpop.f32.mrb[46].mxu1  ;;  %v4429_v13 = vadd.f32 %v4428_v8, %v4427_v6  ;;  %v4430_v14 = vpop.f32.mrb[50].mxu0 }
 0x158   :  { %v4373_v16 = vpop.f32.mrb[47].mxu1  ;;  %v4431_v54 = vpop.f32.mrb[51].mxu0 }
 0x159   :  { %v2925_v17 = vadd.f32 %v4371_v9, %v6355_v24  ;;  %v4374_v19 = vadd.f32 %v4373_v16, %v4372_v11  ;;  %v4432_v52 = vadd.f32 %v4431_v54, %v4430_v14  ;;  %v5356_v24 = vld [vmem:[%s6805_s0 + $0x120] ss:$100 sps:$4 sm:$0xff]  }
 0x15a   :  { %3619 = vmatmul.mubr.bf16.vlgmr.msra.gmra.mrb[152].mxu1 %v5350_v58  ;;  %4889 = vmatmul.mubr.msk.bf16.vlgmr.msra.gmra.mrb[156].mxu0 %vm2596_vm1, %v5353_v60  ;;  %v5366_v16 = vld [vmem:[%s6805_s0 + $0x37c] ss:$100 sps:$4 sm:$0xff]  }
 0x15b   :  { %v2928_v20 = vadd.f32 %v4374_v19, %v6366_v28  ;;  %v6526_v62 = vadd.f32 %v4429_v13, %v2925_v17  ;;  %3626 = vmatprep.mubr.bf16.mxu1 %v5354_v15  ;;  %4892 = vmatprep.mubr.msk.bf16.mxu0 %vm5378_vm0, %v5377_v23  ;;  %v5357_v28 = vld [vmem:[%s6805_s0 + $0x128] ss:$100 sps:$4 sm:$0xff]  }
 0x15d   :  { %v6530_v22 = vadd.f32 %v4432_v52, %v2928_v20  ;;  %v4375_v33 = vpop.f32.mrb[48].mxu1  ;;  %v4433_v27 = vpop.f32.mrb[52].mxu0 }
 0x15e   :  { %v4376_v29 = vpop.f32.mrb[49].mxu1  ;;  %v4434_v31 = vpop.f32.mrb[53].mxu0 }
 0x15f   :  { %v4377_v34 = vadd.f32 %v4376_v29, %v4375_v33  ;;  %v4378_v35 = vpop.f32.mrb[50].mxu1  ;;  %v4435_v37 = vadd.f32 %v4434_v31, %v4433_v27  ;;  %v4436_v40 = vpop.f32.mrb[54].mxu0 }
 0x160   :  { %v4379_v42 = vpop.f32.mrb[51].mxu1  ;;  %v4437_v43 = vpop.f32.mrb[55].mxu0 }
 0x161   :  { %v2933_v44 = vadd.f32 %v4377_v34, %v6392_v57  ;;  %v4380_v45 = vadd.f32 %v4379_v42, %v4378_v35  ;;  %v4438_v46 = vadd.f32 %v4437_v43, %v4436_v40  ;;  %v5360_v57 = vld [vmem:[%s6805_s0 + $0x1e8] ss:$100 sps:$4 sm:$0xff]  }
 0x162   :  { %3627 = vmatmul.mubr.bf16.gmra.mrb[156].mxu1 %v5356_v24  ;;  %4893 = vmatmul.mubr.msk.bf16.gmra.mrb[160].mxu0 %vm2596_vm1, %v5357_v28  ;;  %v5370_v42 = vld [vmem:[%s6805_s0 + $0x444] ss:$100 sps:$4 sm:$0xff]  }
 0x163   :  { %v2936_v36 = vadd.f32 %v4380_v45, %v6406_v39  ;;  %v6544_v47 = vadd.f32 %v4435_v37, %v2933_v44  ;;  %3634 = vmatprep.mubr.bf16.mxu1 %v5358_v41  ;;  %4896 = vmatprep.mubr.msk.bf16.mxu0 %vm5378_vm0, %v5377_v23  ;;  %v5361_v39 = vld [vmem:[%s6805_s0 + $0x1f0] ss:$100 sps:$4 sm:$0xff]  }
 0x165   :  { %v6548_v48 = vadd.f32 %v4438_v46, %v2936_v36  ;;  %v4381_v49 = vpop.f32.mrb[52].mxu1  ;;  %v4439_v10 = vpop.f32.mrb[56].mxu0 }
 0x166   :  { %v4382_v30 = vpop.f32.mrb[53].mxu1  ;;  %v4440_v50 = vpop.f32.mrb[57].mxu0 }
 0x167   :  { %v4383_v51 = vadd.f32 %v4382_v30, %v4381_v49  ;;  %v4384_v53 = vpop.f32.mrb[54].mxu1  ;;  %v4441_v55 = vadd.f32 %v4440_v50, %v4439_v10  ;;  %v4442_v56 = vpop.f32.mrb[58].mxu0  ;;  %v182_v30 = vld [vmem:[%s6805_s0 + $0x508] sm:$0x11] }
 0x168   :  { %v4385_v18 = vpop.f32.mrb[55].mxu1  ;;  %v4443_v63 = vpop.f32.mrb[59].mxu0 }
 0x169   :  { %v2941_v0 = vadd.f32 %v4383_v51, %v6428_v61  ;;  %v4386_v1 = vadd.f32 %v4385_v18, %v4384_v53  ;;  %v4444_v2 = vadd.f32 %v4443_v63, %v4442_v56  ;;  %v5364_v61 = vld [vmem:[%s6805_s0 + $0x2b0] ss:$100 sps:$4 sm:$0xff]   ;;  %v5373_v53 = vld [vmem:[%s6805_s0 + $0x448] ss:$100 sps:$4 sm:$0xff]   ;;  %v3968_v63 = vcombine.high %v182_v30, %v182_v30 }
 0x16a   :  { %3635 = vmatmul.mubr.bf16.gmra.mrb[160].mxu1 %v5360_v57  ;;  %4897 = vmatmul.mubr.msk.bf16.gmra.mrb[164].mxu0 %vm2596_vm1, %v5361_v39 }
 0x16b   :  { %v2944_v5 = vadd.f32 %v4386_v1, %v6433_v25  ;;  %v6562_v6 = vadd.f32 %v4441_v55, %v2941_v0  ;;  %3642 = vmatprep.mubr.bf16.mxu1 %v5362_v38  ;;  %4900 = vmatprep.mubr.msk.bf16.mxu0 %vm5378_vm0, %v5377_v23  ;;  %v5365_v25 = vld [vmem:[%s6805_s0 + $0x2b8] ss:$100 sps:$4 sm:$0xff]  }
 0x16d   :  { %v6566_v7 = vadd.f32 %v4444_v2, %v2944_v5  ;;  %v4387_v8 = vpop.f32.mrb[56].mxu1  ;;  %v4445_v58 = vpop.f32.mrb[60].mxu0 }
 0x16e   :  { %v4388_v60 = vpop.f32.mrb[57].mxu1  ;;  %v4446_v9 = vpop.f32.mrb[61].mxu0 }
 0x16f   :  { %v4389_v11 = vadd.f32 %v4388_v60, %v4387_v8  ;;  %v4390_v13 = vpop.f32.mrb[58].mxu1  ;;  %v4447_v14 = vadd.f32 %v4446_v9, %v4445_v58  ;;  %v4448_v15 = vpop.f32.mrb[62].mxu0 }
 0x170   :  { %v4391_v54 = vpop.f32.mrb[59].mxu1  ;;  %v4449_v17 = vpop.f32.mrb[63].mxu0 }
 0x171   :  { %v2949_v19 = vadd.f32 %v4389_v11, %v6460_v32  ;;  %v4392_v52 = vadd.f32 %v4391_v54, %v4390_v13  ;;  %v4450_v20 = vadd.f32 %v4449_v17, %v4448_v15  ;;  %v5368_v32 = vld [vmem:[%s6805_s0 + $0x378] ss:$100 sps:$4 sm:$0xff]  }
 0x172   :  { %3643 = vmatmul.mubr.bf16.gmra.mrb[164].mxu1 %v5364_v61  ;;  %4901 = vmatmul.mubr.msk.bf16.gmra.mrb[168].mxu0 %vm2596_vm1, %v5365_v25  ;;  %v3967_v61 = vcombine.low %v182_v30, %v182_v30  ;;  %v5376_v25 = vld [vmem:[%s6805_s0 + $0x510] ss:$0 sps:$4 sm:$0x11]  }
 0x173   :  { %v2952_v33 = vadd.f32 %v4392_v52, %v6465_v59  ;;  %v6580_v27 = vadd.f32 %v4447_v14, %v2949_v19  ;;  %3650 = vmatprep.mubr.bf16.mxu1 %v5366_v16  ;;  %4904 = vmatprep.mubr.msk.bf16.mxu0 %vm5378_vm0, %v5377_v23  ;;  %v5369_v59 = vld [vmem:[%s6805_s0 + $0x380] ss:$100 sps:$4 sm:$0xff]  }
 0x175   :  { %v6584_v29 = vadd.f32 %v4450_v20, %v2952_v33  ;;  %v4393_v31 = vpop.f32.mrb[60].mxu1  ;;  %v4451_v24 = vpop.f32.mrb[64].mxu0 }
 0x176   :  { %v4394_v28 = vpop.f32.mrb[61].mxu1  ;;  %v4452_v34 = vpop.f32.mrb[65].mxu0 }
 0x177   :  { %v4395_v35 = vadd.f32 %v4394_v28, %v4393_v31  ;;  %v4396_v37 = vpop.f32.mrb[62].mxu1  ;;  %v4453_v40 = vadd.f32 %v4452_v34, %v4451_v24  ;;  %v4454_v41 = vpop.f32.mrb[66].mxu0 }
 0x178   :  { %v4397_v43 = vpop.f32.mrb[63].mxu1  ;;  %v4455_v44 = vpop.f32.mrb[67].mxu0 }
 0x179   :  { %v2957_v45 = vadd.f32 %v4395_v35, %v6483_v26  ;;  %v4398_v46 = vadd.f32 %v4397_v43, %v4396_v37  ;;  %v4456_v36 = vadd.f32 %v4455_v44, %v4454_v41 }
 0x17a   :  { %3651 = vmatmul.mubr.bf16.gmra.mrb[168].mxu1 %v5368_v32  ;;  %4905 = vmatmul.mubr.msk.bf16.gmra.mrb[172].mxu0 %vm2596_vm1, %v5369_v59 }
 0x17b   :  { %v2960_v49 = vadd.f32 %v4398_v46, %v6491_v21  ;;  %v6598_v10 = vadd.f32 %v4453_v40, %v2957_v45  ;;  %3658 = vmatprep.mubr.bf16.mxu1 %v5370_v42  ;;  %4908 = vmatprep.mubr.msk.bf16.mxu0 %vm5378_vm0, %v5377_v23  ;;  %v5372_v21 = vld [vmem:[%s6805_s0 + $0x440] ss:$100 sps:$4 sm:$0xff]  }
 0x17d   :  { %v6605_v50 = vadd.f32 %v4456_v36, %v2960_v49  ;;  %v4399_v26 = vpop.f32.mrb[64].mxu1  ;;  %v4457_v57 = vpop.f32.mrb[68].mxu0 }
 0x17e   :  { %v4400_v39 = vpop.f32.mrb[65].mxu1  ;;  %v4458_v51 = vpop.f32.mrb[69].mxu0 }
 0x17f   :  { %v4401_v55 = vadd.f32 %v4400_v39, %v4399_v26  ;;  %v4402_v56 = vpop.f32.mrb[66].mxu1  ;;  %v4459_v38 = vadd.f32 %v4458_v51, %v4457_v57  ;;  %v4460_v18 = vpop.f32.mrb[70].mxu0 }
 0x180   :  { %v4403_v0 = vpop.f32.mrb[67].mxu1  ;;  %v4461_v1 = vpop.f32.mrb[71].mxu0 }
 0x181   :  { %v2965_v2 = vadd.f32 %v4401_v55, %v6501_v12 }
 0x182   :  { %3659 = vmatmul.mubr.bf16.gmra.mrb[172].mxu1 %v5372_v21  ;;  %4909 = vmatmul.mubr.msk.bf16.gmra.mrb[176].mxu0 %vm2596_vm1, %v5373_v53 }
 0x183   :  { %v6615_v5 = vadd.f32 %v4459_v38, %v2965_v2  ;;  %3666 = vmatprep.mubr.bf16.mxu1 %v3968_v63  ;;  %4912 = vmatprep.mubr.msk.bf16.mxu0 %vm5378_vm0, %v5377_v23 }
 0x185   :  { %v4479_v8 = vpop.f32.mrb[68].mxu1  ;;  %v4537_v58 = vpop.f32.mrb[72].mxu0 }
 0x186   :  { %v4480_v60 = vpop.f32.mrb[69].mxu1  ;;  %v4538_v9 = vpop.f32.mrb[73].mxu0 }
 0x187   :  { %v4481_v11 = vadd.f32 %v4480_v60, %v4479_v8  ;;  %v4482_v12 = vpop.f32.mrb[70].mxu1  ;;  %v4539_v13 = vadd.f32 %v4538_v9, %v4537_v58  ;;  %v4540_v14 = vpop.f32.mrb[74].mxu0 }
 0x188   :  { %v4483_v15 = vpop.f32.mrb[71].mxu1  ;;  %v4541_v16 = vpop.f32.mrb[75].mxu0 }
 0x189   :  { %v3093_v54 = vadd.f32 %v4481_v11, %v6508_v3  ;;  %v4484_v17 = vadd.f32 %v4483_v15, %v4482_v12  ;;  %v4542_v19 = vadd.f32 %v4541_v16, %v4540_v14 }
 0x18a   :  { %3667 = vmatmul.mubr.bf16.gmra.mrb[176].mxu1 %v3967_v61  ;;  %4913 = vmatmul.mubr.msk.bf16.gmra.mrb[180].mxu0 %vm2596_vm1, %v5376_v25 }
 0x18b   :  { %v3096_v23 = vadd.f32 %v4484_v17, %v6512_v4  ;;  %v6625_v52 = vadd.f32 %v4539_v13, %v3093_v54 }
 0x18d   :  { %v6627_v20 = vadd.f32 %v4542_v19, %v3096_v23  ;;  %v4485_v33 = vpop.f32.mrb[72].mxu1  ;;  %v4543_v31 = vpop.f32.mrb[76].mxu0 }
 0x18e   :  { %v4486_v24 = vpop.f32.mrb[73].mxu1  ;;  %v4544_v28 = vpop.f32.mrb[77].mxu0 }
 0x18f   :  { %v4487_v34 = vadd.f32 %v4486_v24, %v4485_v33  ;;  %v4488_v32 = vpop.f32.mrb[74].mxu1  ;;  %v4545_v59 = vadd.f32 %v4544_v28, %v4543_v31  ;;  %v4546_v35 = vpop.f32.mrb[78].mxu0 }
 0x190   :  { %v4489_v3 = vpop.f32.mrb[75].mxu1  ;;  %v4547_v37 = vpop.f32.mrb[79].mxu0 }
 0x191   :  { %v3101_v40 = vadd.f32 %v4487_v34, %v6526_v62  ;;  %v4490_v41 = vadd.f32 %v4489_v3, %v4488_v32  ;;  %v4548_v42 = vadd.f32 %v4547_v37, %v4546_v35 }
 0x193   :  { %v3104_v4 = vadd.f32 %v4490_v41, %v6530_v22  ;;  %v6631_v43 = vadd.f32 %v4545_v59, %v3101_v40 }
 0x195   :  { %v6633_v44 = vadd.f32 %v4548_v42, %v3104_v4  ;;  %v4491_v45 = vpop.f32.mrb[76].mxu1  ;;  %v4549_v46 = vpop.f32.mrb[80].mxu0 }
 0x196   :  { %v4492_v36 = vpop.f32.mrb[77].mxu1  ;;  %v4550_v49 = vpop.f32.mrb[81].mxu0 }
 0x197   :  { %v4493_v30 = vadd.f32 %v4492_v36, %v4491_v45  ;;  %v4494_v26 = vpop.f32.mrb[78].mxu1  ;;  %v4551_v57 = vadd.f32 %v4550_v49, %v4549_v46  ;;  %v4552_v39 = vpop.f32.mrb[82].mxu0 }
 0x198   :  { %v4495_v51 = vpop.f32.mrb[79].mxu1  ;;  %v4553_v21 = vpop.f32.mrb[83].mxu0 }
 0x199   :  { %v3109_v62 = vadd.f32 %v4493_v30, %v6544_v47  ;;  %v4496_v53 = vadd.f32 %v4495_v51, %v4494_v26  ;;  %v4554_v55 = vadd.f32 %v4553_v21, %v4552_v39 }
 0x19b   :  { %v3112_v22 = vadd.f32 %v4496_v53, %v6548_v48  ;;  %v6637_v56 = vadd.f32 %v4551_v57, %v3109_v62 }
 0x19d   :  { %v6639_v38 = vadd.f32 %v4554_v55, %v3112_v22  ;;  %v4497_v18 = vpop.f32.mrb[80].mxu1  ;;  %v4555_v63 = vpop.f32.mrb[84].mxu0 }
 0x19e   :  { %v4498_v0 = vpop.f32.mrb[81].mxu1  ;;  %v4556_v1 = vpop.f32.mrb[85].mxu0 }
 0x19f   :  { %v4499_v2 = vadd.f32 %v4498_v0, %v4497_v18  ;;  %v4500_v8 = vpop.f32.mrb[82].mxu1  ;;  %v4557_v58 = vadd.f32 %v4556_v1, %v4555_v63  ;;  %v4558_v60 = vpop.f32.mrb[86].mxu0 }
 0x1a0   :  { %v4501_v9 = vpop.f32.mrb[83].mxu1  ;;  %v4559_v61 = vpop.f32.mrb[87].mxu0 }
 0x1a1   :  { %v3117_v47 = vadd.f32 %v4499_v2, %v6562_v6  ;;  %v4502_v25 = vadd.f32 %v4501_v9, %v4500_v8  ;;  %v4560_v11 = vadd.f32 %v4559_v61, %v4558_v60 }
 0x1a3   :  { %v3120_v48 = vadd.f32 %v4502_v25, %v6566_v7  ;;  %v6643_v12 = vadd.f32 %v4557_v58, %v3117_v47 }
 0x1a5   :  { %v6645_v13 = vadd.f32 %v4560_v11, %v3120_v48  ;;  %v4503_v14 = vpop.f32.mrb[84].mxu1  ;;  %v4561_v15 = vpop.f32.mrb[88].mxu0 }
 0x1a6   :  { %v4504_v16 = vpop.f32.mrb[85].mxu1  ;;  %v4562_v54 = vpop.f32.mrb[89].mxu0 }
 0x1a7   :  { %v4505_v17 = vadd.f32 %v4504_v16, %v4503_v14  ;;  %v4506_v19 = vpop.f32.mrb[86].mxu1  ;;  %v4563_v23 = vadd.f32 %v4562_v54, %v4561_v15  ;;  %v4564_v33 = vpop.f32.mrb[90].mxu0 }
 0x1a8   :  { %v4507_v31 = vpop.f32.mrb[87].mxu1  ;;  %v4565_v24 = vpop.f32.mrb[91].mxu0 }
 0x1a9   :  { %v3125_v6 = vadd.f32 %v4505_v17, %v6580_v27  ;;  %v4508_v28 = vadd.f32 %v4507_v31, %v4506_v19  ;;  %v4566_v34 = vadd.f32 %v4565_v24, %v4564_v33 }
 0x1ab   :  { %v3128_v7 = vadd.f32 %v4508_v28, %v6584_v29  ;;  %v6649_v32 = vadd.f32 %v4563_v23, %v3125_v6 }
 0x1ad   :  { %v6651_v59 = vadd.f32 %v4566_v34, %v3128_v7  ;;  %v4509_v35 = vpop.f32.mrb[88].mxu1  ;;  %v4567_v3 = vpop.f32.mrb[92].mxu0 }
 0x1ae   :  { %v4510_v37 = vpop.f32.mrb[89].mxu1  ;;  %v4568_v40 = vpop.f32.mrb[93].mxu0 }
 0x1af   :  { %v4511_v41 = vadd.f32 %v4510_v37, %v4509_v35  ;;  %v4512_v42 = vpop.f32.mrb[90].mxu1  ;;  %v4569_v4 = vadd.f32 %v4568_v40, %v4567_v3  ;;  %v4570_v45 = vpop.f32.mrb[94].mxu0 }
 0x1b0   :  { %v4513_v46 = vpop.f32.mrb[91].mxu1  ;;  %v4571_v36 = vpop.f32.mrb[95].mxu0 }
 0x1b1   :  { %v3133_v27 = vadd.f32 %v4511_v41, %v6598_v10  ;;  %v4514_v49 = vadd.f32 %v4513_v46, %v4512_v42  ;;  %v4572_v30 = vadd.f32 %v4571_v36, %v4570_v45 }
 0x1b3   :  { %v3136_v29 = vadd.f32 %v4514_v49, %v6605_v50  ;;  %v6655_v26 = vadd.f32 %v4569_v4, %v3133_v27 }
 0x1b5   :  { %v6657_v57 = vadd.f32 %v4572_v30, %v3136_v29  ;;  %v4515_v39 = vpop.f32.mrb[92].mxu1  ;;  %v4573_v51 = vpop.f32.mrb[96].mxu0 }
 0x1b6   :  { %v4516_v21 = vpop.f32.mrb[93].mxu1  ;;  %v4574_v62 = vpop.f32.mrb[97].mxu0 }
 0x1b7   :  { %v4517_v53 = vadd.f32 %v4516_v21, %v4515_v39  ;;  %v4518_v55 = vpop.f32.mrb[94].mxu1  ;;  %v4575_v22 = vadd.f32 %v4574_v62, %v4573_v51  ;;  %v4576_v18 = vpop.f32.mrb[98].mxu0 }
 0x1b8   :  { %v4519_v63 = vpop.f32.mrb[95].mxu1  ;;  %v4577_v0 = vpop.f32.mrb[99].mxu0 }
 0x1b9   :  { %v3141_v10 = vadd.f32 %v4517_v53, %v6615_v5 }
 0x1bb   :  { %v6660_v1 = vadd.f32 %v4575_v22, %v3141_v10 }
 0x1bd   :  { %v4595_v2 = vpop.f32.mrb[96].mxu1  ;;  %v4653_v50 = vpop.f32.mrb[100].mxu0 }
 0x1be   :  { %v4596_v8 = vpop.f32.mrb[97].mxu1  ;;  %v4654_v58 = vpop.f32.mrb[101].mxu0 }
 0x1bf   :  { %v4597_v60 = vadd.f32 %v4596_v8, %v4595_v2  ;;  %v4598_v9 = vpop.f32.mrb[98].mxu1  ;;  %v4655_v61 = vadd.f32 %v4654_v58, %v4653_v50  ;;  %v4656_v47 = vpop.f32.mrb[102].mxu0 }
 0x1c0   :  { %v4599_v25 = vpop.f32.mrb[99].mxu1  ;;  %v4657_v11 = vpop.f32.mrb[103].mxu0 }
 0x1c1   :  { %v3269_v48 = vadd.f32 %v4597_v60, %v6625_v52  ;;  %v4600_v14 = vadd.f32 %v4599_v25, %v4598_v9  ;;  %v4658_v15 = vadd.f32 %v4657_v11, %v4656_v47 }
 0x1c3   :  { %v3272_v16 = vadd.f32 %v4600_v14, %v6627_v20  ;;  %v6664_v54 = vadd.f32 %v4655_v61, %v3269_v48 }
 0x1c5   :  { %v6666_v5 = vadd.f32 %v4658_v15, %v3272_v16  ;;  %v4601_v17 = vpop.f32.mrb[100].mxu1  ;;  %v4659_v19 = vpop.f32.mrb[104].mxu0 }
 0x1c6   :  { %v4602_v23 = vpop.f32.mrb[101].mxu1  ;;  %v4660_v33 = vpop.f32.mrb[105].mxu0 }
 0x1c7   :  { %v4603_v31 = vadd.f32 %v4602_v23, %v4601_v17  ;;  %v4604_v24 = vpop.f32.mrb[102].mxu1  ;;  %v4661_v6 = vadd.f32 %v4660_v33, %v4659_v19  ;;  %v4662_v28 = vpop.f32.mrb[106].mxu0 }
 0x1c8   :  { %v4605_v34 = vpop.f32.mrb[103].mxu1  ;;  %v4663_v7 = vpop.f32.mrb[107].mxu0 }
 0x1c9   :  { %v3277_v52 = vadd.f32 %v4603_v31, %v6631_v43  ;;  %v4606_v35 = vadd.f32 %v4605_v34, %v4604_v24  ;;  %v4664_v3 = vadd.f32 %v4663_v7, %v4662_v28 }
 0x1cb   :  { %v3280_v20 = vadd.f32 %v4606_v35, %v6633_v44  ;;  %v6670_v37 = vadd.f32 %v4661_v6, %v3277_v52 }
 0x1cd   :  { %v6672_v40 = vadd.f32 %v4664_v3, %v3280_v20  ;;  %v4607_v41 = vpop.f32.mrb[104].mxu1  ;;  %v4665_v42 = vpop.f32.mrb[108].mxu0 }
 0x1ce   :  { %v4608_v4 = vpop.f32.mrb[105].mxu1  ;;  %v4666_v45 = vpop.f32.mrb[109].mxu0 }
 0x1cf   :  { %v4609_v46 = vadd.f32 %v4608_v4, %v4607_v41  ;;  %v4610_v36 = vpop.f32.mrb[106].mxu1  ;;  %v4667_v27 = vadd.f32 %v4666_v45, %v4665_v42  ;;  %v4668_v49 = vpop.f32.mrb[110].mxu0 }
 0x1d0   :  { %v4611_v30 = vpop.f32.mrb[107].mxu1  ;;  %v4669_v29 = vpop.f32.mrb[111].mxu0 }
 0x1d1   :  { %v3285_v43 = vadd.f32 %v4609_v46, %v6637_v56  ;;  %v4612_v39 = vadd.f32 %v4611_v30, %v4610_v36  ;;  %v4670_v51 = vadd.f32 %v4669_v29, %v4668_v49 }
 0x1d3   :  { %v3288_v44 = vadd.f32 %v4612_v39, %v6639_v38  ;;  %v6676_v21 = vadd.f32 %v4667_v27, %v3285_v43 }
 0x1d5   :  { %v6678_v62 = vadd.f32 %v4670_v51, %v3288_v44  ;;  %v4613_v53 = vpop.f32.mrb[108].mxu1  ;;  %v4671_v55 = vpop.f32.mrb[112].mxu0 }
 0x1d6   :  { %v4614_v22 = vpop.f32.mrb[109].mxu1  ;;  %v4672_v18 = vpop.f32.mrb[113].mxu0 }
 0x1d7   :  { %v4615_v63 = vadd.f32 %v4614_v22, %v4613_v53  ;;  %v4616_v0 = vpop.f32.mrb[110].mxu1  ;;  %v4673_v10 = vadd.f32 %v4672_v18, %v4671_v55  ;;  %v4674_v2 = vpop.f32.mrb[114].mxu0 }
 0x1d8   :  { %v4617_v50 = vpop.f32.mrb[111].mxu1  ;;  %v4675_v8 = vpop.f32.mrb[115].mxu0 }
 0x1d9   :  { %v3293_v56 = vadd.f32 %v4615_v63, %v6643_v12  ;;  %v4618_v58 = vadd.f32 %v4617_v50, %v4616_v0  ;;  %v4676_v60 = vadd.f32 %v4675_v8, %v4674_v2 }
 0x1db   :  { %v3296_v38 = vadd.f32 %v4618_v58, %v6645_v13  ;;  %v6682_v9 = vadd.f32 %v4673_v10, %v3293_v56 }
 0x1dd   :  { %v6684_v61 = vadd.f32 %v4676_v60, %v3296_v38  ;;  %v4619_v47 = vpop.f32.mrb[112].mxu1  ;;  %v4677_v25 = vpop.f32.mrb[116].mxu0 }
 0x1de   :  { %v4620_v11 = vpop.f32.mrb[113].mxu1  ;;  %v4678_v48 = vpop.f32.mrb[117].mxu0 }
 0x1df   :  { %v4621_v14 = vadd.f32 %v4620_v11, %v4619_v47  ;;  %v4622_v15 = vpop.f32.mrb[114].mxu1  ;;  %v4679_v16 = vadd.f32 %v4678_v48, %v4677_v25  ;;  %v4680_v17 = vpop.f32.mrb[118].mxu0 }
 0x1e0   :  { %v4623_v19 = vpop.f32.mrb[115].mxu1  ;;  %v4681_v23 = vpop.f32.mrb[119].mxu0 }
 0x1e1   :  { %v3301_v12 = vadd.f32 %v4621_v14, %v6649_v32  ;;  %v4624_v33 = vadd.f32 %v4623_v19, %v4622_v15  ;;  %v4682_v31 = vadd.f32 %v4681_v23, %v4680_v17 }
 0x1e3   :  { %v3304_v13 = vadd.f32 %v4624_v33, %v6651_v59  ;;  %v6688_v24 = vadd.f32 %v4679_v16, %v3301_v12 }
 0x1e5   :  { %v6690_v6 = vadd.f32 %v4682_v31, %v3304_v13  ;;  %v4625_v28 = vpop.f32.mrb[116].mxu1  ;;  %v4683_v34 = vpop.f32.mrb[120].mxu0 }
 0x1e6   :  { %v4626_v7 = vpop.f32.mrb[117].mxu1  ;;  %v4684_v52 = vpop.f32.mrb[121].mxu0 }
 0x1e7   :  { %v4627_v35 = vadd.f32 %v4626_v7, %v4625_v28  ;;  %v4628_v3 = vpop.f32.mrb[118].mxu1  ;;  %v4685_v20 = vadd.f32 %v4684_v52, %v4683_v34  ;;  %v4686_v41 = vpop.f32.mrb[122].mxu0 }
 0x1e8   :  { %v4629_v42 = vpop.f32.mrb[119].mxu1  ;;  %v4687_v4 = vpop.f32.mrb[123].mxu0 }
 0x1e9   :  { %v3309_v32 = vadd.f32 %v4627_v35, %v6655_v26  ;;  %v4630_v45 = vadd.f32 %v4629_v42, %v4628_v3  ;;  %v4688_v46 = vadd.f32 %v4687_v4, %v4686_v41 }
 0x1eb   :  { %v3312_v59 = vadd.f32 %v4630_v45, %v6657_v57  ;;  %v6694_v36 = vadd.f32 %v4685_v20, %v3309_v32 }
 0x1ed   :  { %v6696_v27 = vadd.f32 %v4688_v46, %v3312_v59  ;;  %v4631_v49 = vpop.f32.mrb[120].mxu1  ;;  %v4689_v30 = vpop.f32.mrb[124].mxu0 }
 0x1ee   :  { %v4632_v29 = vpop.f32.mrb[121].mxu1  ;;  %v4690_v43 = vpop.f32.mrb[125].mxu0 }
 0x1ef   :  { %v4633_v39 = vadd.f32 %v4632_v29, %v4631_v49  ;;  %v4634_v51 = vpop.f32.mrb[122].mxu1  ;;  %v4691_v44 = vadd.f32 %v4690_v43, %v4689_v30  ;;  %v4692_v53 = vpop.f32.mrb[126].mxu0 }
 0x1f0   :  { %v4635_v55 = vpop.f32.mrb[123].mxu1  ;;  %v4693_v22 = vpop.f32.mrb[127].mxu0 }
 0x1f1   :  { %v3317_v26 = vadd.f32 %v4633_v39, %v6660_v1 }
 0x1f3   :  { %v6699_v18 = vadd.f32 %v4691_v44, %v3317_v26 }
 0x1f5   :  { %v4711_v63 = vpop.f32.mrb[124].mxu1  ;;  %v4769_v57 = vpop.f32.mrb[128].mxu0 }
 0x1f6   :  { %v4712_v0 = vpop.f32.mrb[125].mxu1  ;;  %v4770_v10 = vpop.f32.mrb[129].mxu0 }
 0x1f7   :  { %v4713_v2 = vadd.f32 %v4712_v0, %v4711_v63  ;;  %v4714_v50 = vpop.f32.mrb[126].mxu1  ;;  %v4771_v8 = vadd.f32 %v4770_v10, %v4769_v57  ;;  %v4772_v56 = vpop.f32.mrb[130].mxu0 }
 0x1f8   :  { %v4715_v58 = vpop.f32.mrb[127].mxu1  ;;  %v4773_v60 = vpop.f32.mrb[131].mxu0 }
 0x1f9   :  { %v3445_v38 = vadd.f32 %v4713_v2, %v6664_v54  ;;  %v4716_v47 = vadd.f32 %v4715_v58, %v4714_v50  ;;  %v4774_v25 = vadd.f32 %v4773_v60, %v4772_v56 }
 0x1fb   :  { %v3448_v11 = vadd.f32 %v4716_v47, %v6666_v5  ;;  %v6703_v48 = vadd.f32 %v4771_v8, %v3445_v38 }
 0x1fd   :  { %v6705_v1 = vadd.f32 %v4774_v25, %v3448_v11  ;;  %v4717_v14 = vpop.f32.mrb[128].mxu1  ;;  %v4775_v15 = vpop.f32.mrb[132].mxu0 }
 0x1fe   :  { %v4718_v16 = vpop.f32.mrb[129].mxu1  ;;  %v4776_v17 = vpop.f32.mrb[133].mxu0 }
 0x1ff   :  { %v4719_v19 = vadd.f32 %v4718_v16, %v4717_v14  ;;  %v4720_v23 = vpop.f32.mrb[130].mxu1  ;;  %v4777_v12 = vadd.f32 %v4776_v17, %v4775_v15  ;;  %v4778_v33 = vpop.f32.mrb[134].mxu0 }
 0x200   :  { %v4721_v31 = vpop.f32.mrb[131].mxu1  ;;  %v4779_v13 = vpop.f32.mrb[135].mxu0 }
 0x201   :  { %v3453_v54 = vadd.f32 %v4719_v19, %v6670_v37  ;;  %v4722_v28 = vadd.f32 %v4721_v31, %v4720_v23  ;;  %v4780_v34 = vadd.f32 %v4779_v13, %v4778_v33 }
 0x203   :  { %v3456_v5 = vadd.f32 %v4722_v28, %v6672_v40  ;;  %v6709_v7 = vadd.f32 %v4777_v12, %v3453_v54 }
 0x205   :  { %v6711_v52 = vadd.f32 %v4780_v34, %v3456_v5  ;;  %v4723_v35 = vpop.f32.mrb[132].mxu1  ;;  %v4781_v3 = vpop.f32.mrb[136].mxu0 }
 0x206   :  { %v4724_v20 = vpop.f32.mrb[133].mxu1  ;;  %v4782_v41 = vpop.f32.mrb[137].mxu0 }
 0x207   :  { %v4725_v42 = vadd.f32 %v4724_v20, %v4723_v35  ;;  %v4726_v4 = vpop.f32.mrb[134].mxu1  ;;  %v4783_v32 = vadd.f32 %v4782_v41, %v4781_v3  ;;  %v4784_v45 = vpop.f32.mrb[138].mxu0 }
 0x208   :  { %v4727_v46 = vpop.f32.mrb[135].mxu1  ;;  %v4785_v59 = vpop.f32.mrb[139].mxu0 }
 0x209   :  { %v3461_v37 = vadd.f32 %v4725_v42, %v6676_v21  ;;  %v4728_v49 = vadd.f32 %v4727_v46, %v4726_v4  ;;  %v4786_v30 = vadd.f32 %v4785_v59, %v4784_v45 }
 0x20b   :  { %v3464_v40 = vadd.f32 %v4728_v49, %v6678_v62  ;;  %v6715_v29 = vadd.f32 %v4783_v32, %v3461_v37 }
 0x20d   :  { %v6717_v43 = vadd.f32 %v4786_v30, %v3464_v40  ;;  %v4729_v39 = vpop.f32.mrb[136].mxu1  ;;  %v4787_v51 = vpop.f32.mrb[140].mxu0 }
 0x20e   :  { %v4730_v44 = vpop.f32.mrb[137].mxu1  ;;  %v4788_v53 = vpop.f32.mrb[141].mxu0 }
 0x20f   :  { %v4731_v55 = vadd.f32 %v4730_v44, %v4729_v39  ;;  %v4732_v22 = vpop.f32.mrb[138].mxu1  ;;  %v4789_v26 = vadd.f32 %v4788_v53, %v4787_v51  ;;  %v4790_v63 = vpop.f32.mrb[142].mxu0 }
 0x210   :  { %v4733_v57 = vpop.f32.mrb[139].mxu1  ;;  %v4791_v0 = vpop.f32.mrb[143].mxu0 }
 0x211   :  { %v3469_v21 = vadd.f32 %v4731_v55, %v6682_v9  ;;  %v4734_v10 = vadd.f32 %v4733_v57, %v4732_v22  ;;  %v4792_v2 = vadd.f32 %v4791_v0, %v4790_v63 }
 0x213   :  { %v3472_v62 = vadd.f32 %v4734_v10, %v6684_v61  ;;  %v6721_v50 = vadd.f32 %v4789_v26, %v3469_v21 }
 0x215   :  { %v6723_v8 = vadd.f32 %v4792_v2, %v3472_v62  ;;  %v4735_v56 = vpop.f32.mrb[140].mxu1  ;;  %v4793_v58 = vpop.f32.mrb[144].mxu0 }
 0x216   :  { %v4736_v60 = vpop.f32.mrb[141].mxu1  ;;  %v4794_v38 = vpop.f32.mrb[145].mxu0 }
 0x217   :  { %v4737_v47 = vadd.f32 %v4736_v60, %v4735_v56  ;;  %v4738_v25 = vpop.f32.mrb[142].mxu1  ;;  %v4795_v11 = vadd.f32 %v4794_v38, %v4793_v58  ;;  %v4796_v14 = vpop.f32.mrb[146].mxu0 }
 0x218   :  { %v4739_v15 = vpop.f32.mrb[143].mxu1  ;;  %v4797_v16 = vpop.f32.mrb[147].mxu0 }
 0x219   :  { %v3477_v9 = vadd.f32 %v4737_v47, %v6688_v24  ;;  %v4740_v17 = vadd.f32 %v4739_v15, %v4738_v25  ;;  %v4798_v19 = vadd.f32 %v4797_v16, %v4796_v14 }
 0x21b   :  { %v3480_v61 = vadd.f32 %v4740_v17, %v6690_v6  ;;  %v6727_v23 = vadd.f32 %v4795_v11, %v3477_v9 }
 0x21d   :  { %v6729_v12 = vadd.f32 %v4798_v19, %v3480_v61  ;;  %v4741_v33 = vpop.f32.mrb[144].mxu1  ;;  %v4799_v31 = vpop.f32.mrb[148].mxu0 }
 0x21e   :  { %v4742_v13 = vpop.f32.mrb[145].mxu1  ;;  %v4800_v54 = vpop.f32.mrb[149].mxu0 }
 0x21f   :  { %v4743_v28 = vadd.f32 %v4742_v13, %v4741_v33  ;;  %v4744_v34 = vpop.f32.mrb[146].mxu1  ;;  %v4801_v5 = vadd.f32 %v4800_v54, %v4799_v31  ;;  %v4802_v35 = vpop.f32.mrb[150].mxu0 }
 0x220   :  { %v4745_v3 = vpop.f32.mrb[147].mxu1  ;;  %v4803_v20 = vpop.f32.mrb[151].mxu0 }
 0x221   :  { %v3485_v24 = vadd.f32 %v4743_v28, %v6694_v36  ;;  %v4746_v41 = vadd.f32 %v4745_v3, %v4744_v34  ;;  %v4804_v42 = vadd.f32 %v4803_v20, %v4802_v35 }
 0x223   :  { %v3488_v6 = vadd.f32 %v4746_v41, %v6696_v27  ;;  %v6733_v4 = vadd.f32 %v4801_v5, %v3485_v24 }
 0x225   :  { %v6735_v32 = vadd.f32 %v4804_v42, %v3488_v6  ;;  %v4747_v45 = vpop.f32.mrb[148].mxu1  ;;  %v4805_v46 = vpop.f32.mrb[152].mxu0 }
 0x226   :  { %v4748_v59 = vpop.f32.mrb[149].mxu1  ;;  %v4806_v37 = vpop.f32.mrb[153].mxu0 }
 0x227   :  { %v4749_v49 = vadd.f32 %v4748_v59, %v4747_v45  ;;  %v4750_v30 = vpop.f32.mrb[150].mxu1  ;;  %v4807_v40 = vadd.f32 %v4806_v37, %v4805_v46  ;;  %v4808_v39 = vpop.f32.mrb[154].mxu0 }
 0x228   :  { %v4751_v51 = vpop.f32.mrb[151].mxu1  ;;  %v4809_v44 = vpop.f32.mrb[155].mxu0 }
 0x229   :  { %v3493_v36 = vadd.f32 %v4749_v49, %v6699_v18 }
 0x22b   :  { %v6738_v53 = vadd.f32 %v4807_v40, %v3493_v36 }
 0x22d   :  { %v4827_v55 = vpop.f32.mrb[152].mxu1  ;;  %v3708_v27 = vpop.f32.mrb[156].mxu0 }
 0x22e   :  { %v4828_v22 = vpop.f32.mrb[153].mxu1  ;;  %v4890_v26 = vpop.f32.mrb[157].mxu0 }
 0x22f   :  { %v4829_v63 = vadd.f32 %v4828_v22, %v4827_v55  ;;  %v4830_v57 = vpop.f32.mrb[154].mxu1  ;;  %v3711_v0 = vpop.f32.mrb[158].mxu0 }
 0x230   :  { %v4831_v21 = vpop.f32.mrb[155].mxu1  ;;  %v4891_v10 = vpop.f32.mrb[159].mxu0 }
 0x231   :  { %v4832_v2 = vadd.f32 %v4831_v21, %v4830_v57  ;;  %v3621_v62 = vadd.f32 %v4829_v63, %v6703_v48 }
 0x233   :  { %v3709_v56 = vadd.f32 %v3708_v27, %v3621_v62  ;;  %v3624_v58 = vadd.f32 %v4832_v2, %v6705_v1 }
 0x235   :  { %v3762_v60 = vmax.f32 %v3709_v56, 0.0  ;;  %v3712_v18 = vadd.f32 %v3711_v0, %v3624_v58  ;;  %v4833_v38 = vpop.f32.mrb[156].mxu1  ;;  %v3716_v47 = vpop.f32.mrb[160].mxu0 }
 0x236   :  { %v4834_v25 = vpop.f32.mrb[157].mxu1  ;;  %v4894_v11 = vpop.f32.mrb[161].mxu0 }
 0x237   :  { %3776 = vst.msk [vmem:[%s6807_s3] sm:$0xff] %vm3775_vm2, %v3762_v60  ;;  %v3763_v14 = vmax.f32 %v3712_v18, 0.0  ;;  %v4835_v15 = vadd.f32 %v4834_v25, %v4833_v38  ;;  %v4836_v16 = vpop.f32.mrb[158].mxu1  ;;  %v3719_v9 = vpop.f32.mrb[162].mxu0 }
 0x238   :  { %v4837_v48 = vpop.f32.mrb[159].mxu1  ;;  %v4895_v17 = vpop.f32.mrb[163].mxu0 }
 0x239   :  { %3777 = vst.msk [vmem:[%s6807_s3 + $0x8] sm:$0xff] %vm3775_vm2, %v3763_v14  ;;  %v4838_v1 = vadd.f32 %v4837_v48, %v4836_v16  ;;  %v3629_v19 = vadd.f32 %v4835_v15, %v6709_v7 }
 0x23b   :  { %v3717_v61 = vadd.f32 %v3716_v47, %v3629_v19  ;;  %v3632_v33 = vadd.f32 %v4838_v1, %v6711_v52 }
 0x23d   :  { %v3764_v31 = vmax.f32 %v3717_v61, 0.0  ;;  %v3720_v13 = vadd.f32 %v3719_v9, %v3632_v33  ;;  %v4839_v54 = vpop.f32.mrb[160].mxu1  ;;  %v3724_v28 = vpop.f32.mrb[164].mxu0 }
 0x23e   :  { %v4840_v34 = vpop.f32.mrb[161].mxu1  ;;  %v4898_v5 = vpop.f32.mrb[165].mxu0 }
 0x23f   :  { %3778 = vst.msk [vmem:[%s6807_s3 + $0x10] sm:$0xff] %vm3775_vm2, %v3764_v31  ;;  %v3765_v35 = vmax.f32 %v3720_v13, 0.0  ;;  %v4841_v3 = vadd.f32 %v4840_v34, %v4839_v54  ;;  %v4842_v20 = vpop.f32.mrb[162].mxu1  ;;  %v3727_v24 = vpop.f32.mrb[166].mxu0 }
 0x240   :  { %v4843_v41 = vpop.f32.mrb[163].mxu1  ;;  %v4899_v7 = vpop.f32.mrb[167].mxu0 }
 0x241   :  { %3779 = vst.msk [vmem:[%s6807_s3 + $0x18] sm:$0xff] %vm3775_vm2, %v3765_v35  ;;  %v4844_v52 = vadd.f32 %v4843_v41, %v4842_v20  ;;  %v3637_v42 = vadd.f32 %v4841_v3, %v6715_v29 }
 0x243   :  { %v3725_v6 = vadd.f32 %v3724_v28, %v3637_v42  ;;  %v3640_v45 = vadd.f32 %v4844_v52, %v6717_v43 }
 0x245   :  { %v3766_v46 = vmax.f32 %v3725_v6, 0.0  ;;  %v3728_v59 = vadd.f32 %v3727_v24, %v3640_v45  ;;  %v4845_v37 = vpop.f32.mrb[164].mxu1  ;;  %v3732_v49 = vpop.f32.mrb[168].mxu0 }
 0x246   :  { %v4846_v30 = vpop.f32.mrb[165].mxu1  ;;  %v4902_v40 = vpop.f32.mrb[169].mxu0 }
 0x247   :  { %3780 = vst.msk [vmem:[%s6807_s3 + $0x20] sm:$0xff] %vm3775_vm2, %v3766_v46  ;;  %v3767_v39 = vmax.f32 %v3728_v59, 0.0  ;;  %v4847_v51 = vadd.f32 %v4846_v30, %v4845_v37  ;;  %v4848_v44 = vpop.f32.mrb[166].mxu1  ;;  %v3735_v36 = vpop.f32.mrb[170].mxu0 }
 0x248   :  { %v4849_v55 = vpop.f32.mrb[167].mxu1  ;;  %v4903_v29 = vpop.f32.mrb[171].mxu0 }
 0x249   :  { %3781 = vst.msk [vmem:[%s6807_s3 + $0x28] sm:$0xff] %vm3775_vm2, %v3767_v39  ;;  %v4850_v43 = vadd.f32 %v4849_v55, %v4848_v44  ;;  %v3645_v27 = vadd.f32 %v4847_v51, %v6721_v50 }
 0x24b   :  { %v3733_v22 = vadd.f32 %v3732_v49, %v3645_v27  ;;  %v3648_v26 = vadd.f32 %v4850_v43, %v6723_v8 }
 0x24d   :  { %v3768_v63 = vmax.f32 %v3733_v22, 0.0  ;;  %v3736_v57 = vadd.f32 %v3735_v36, %v3648_v26  ;;  %v4851_v0 = vpop.f32.mrb[168].mxu1  ;;  %v3740_v21 = vpop.f32.mrb[172].mxu0 }
 0x24e   :  { %v4852_v10 = vpop.f32.mrb[169].mxu1  ;;  %v4906_v2 = vpop.f32.mrb[173].mxu0 }
 0x24f   :  { %3782 = vst.msk [vmem:[%s6807_s3 + $0x30] sm:$0xff] %vm3775_vm2, %v3768_v63  ;;  %v3769_v62 = vmax.f32 %v3736_v57, 0.0  ;;  %v4853_v56 = vadd.f32 %v4852_v10, %v4851_v0  ;;  %v4854_v58 = vpop.f32.mrb[170].mxu1  ;;  %v3743_v60 = vpop.f32.mrb[174].mxu0 }
 0x250   :  { %v4855_v18 = vpop.f32.mrb[171].mxu1  ;;  %v4907_v50 = vpop.f32.mrb[175].mxu0 }
 0x251   :  { %3783 = vst.msk [vmem:[%s6807_s3 + $0x38] sm:$0xff] %vm3775_vm2, %v3769_v62  ;;  %v4856_v8 = vadd.f32 %v4855_v18, %v4854_v58  ;;  %v3653_v38 = vadd.f32 %v4853_v56, %v6727_v23 }
 0x253   :  { %v3741_v47 = vadd.f32 %v3740_v21, %v3653_v38  ;;  %v3656_v25 = vadd.f32 %v4856_v8, %v6729_v12 }
 0x255   :  { %v3770_v11 = vmax.f32 %v3741_v47, 0.0  ;;  %v3744_v14 = vadd.f32 %v3743_v60, %v3656_v25  ;;  %v4857_v15 = vpop.f32.mrb[172].mxu1  ;;  %v3748_v16 = vpop.f32.mrb[176].mxu0 }
 0x256   :  { %v4858_v9 = vpop.f32.mrb[173].mxu1  ;;  %v4910_v48 = vpop.f32.mrb[177].mxu0 }
 0x257   :  { %3784 = vst.msk [vmem:[%s6807_s3 + $0x40] sm:$0xff] %vm3775_vm2, %v3770_v11  ;;  %v3771_v17 = vmax.f32 %v3744_v14, 0.0  ;;  %v4859_v1 = vadd.f32 %v4858_v9, %v4857_v15  ;;  %v4860_v19 = vpop.f32.mrb[174].mxu1  ;;  %v3751_v61 = vpop.f32.mrb[178].mxu0 }
 0x258   :  { %v4861_v33 = vpop.f32.mrb[175].mxu1  ;;  %v4911_v23 = vpop.f32.mrb[179].mxu0 }
 0x259   :  { %3785 = vst.msk [vmem:[%s6807_s3 + $0x48] sm:$0xff] %vm3775_vm2, %v3771_v17  ;;  %v4862_v12 = vadd.f32 %v4861_v33, %v4860_v19  ;;  %v3661_v31 = vadd.f32 %v4859_v1, %v6733_v4 }
 0x25b   :  { %v3749_v13 = vadd.f32 %v3748_v16, %v3661_v31  ;;  %v3664_v54 = vadd.f32 %v4862_v12, %v6735_v32 }
 0x25d   :  { %v3772_v28 = vmax.f32 %v3749_v13, 0.0  ;;  %v3752_v34 = vadd.f32 %v3751_v61, %v3664_v54  ;;  %v4863_v5 = vpop.f32.mrb[176].mxu1  ;;  %v3756_v35 = vpop.f32.mrb[180].mxu0 }
 0x25e   :  { %v4864_v3 = vpop.f32.mrb[177].mxu1  ;;  %v4914_v20 = vpop.f32.mrb[181].mxu0 }
 0x25f   :  { %3786 = vst.msk [vmem:[%s6807_s3 + $0x50] sm:$0xff] %vm3775_vm2, %v3772_v28  ;;  %v3773_v24 = vmax.f32 %v3752_v34, 0.0  ;;  %v4865_v41 = vadd.f32 %v4864_v3, %v4863_v5  ;;  %v4866_v7 = vpop.f32.mrb[178].mxu1  ;;  %v3759_v52 = vpop.f32.mrb[182].mxu0 }
 0x260   :  { %v4867_v42 = vpop.f32.mrb[179].mxu1  ;;  %v4915_v4 = vpop.f32.mrb[183].mxu0 }
 0x261   :  { %3787 = vst.msk [vmem:[%s6807_s3 + $0x58] sm:$0xff] %vm3775_vm2, %v3773_v24  ;;  %v3669_v32 = vadd.f32 %v4865_v41, %v6738_v53 }
 0x263   :  { %v3757_v6 = vadd.f32 %v3756_v35, %v3669_v32 }
 0x265   :  { %v3774_v45 = vmax.f32 %v3757_v6, 0.0 }
 0x267   :  { %3789 = vst.msk [vmem:[%s6807_s3 + $0x60] sm:$0x3] %vm3788_vm3, %v3774_v45 }

// kernel: conv_autoencoder_forward.10
= control target key start
LH: loop header
LB: loop body
LE: loop exit
PB: predicated region body
PF: predicated region fallthrough
CT: control target
= control target key end

     0   :  { %s2002_s12 = smov 0   ;;  %s2004_s13 = smov 0   ;;  %s2432_s0 = inlined_call_operand.vmem [shape: bf16[392,288], index: 0, kind: input, shape index: {}]   ;;  %s2433_s1 = inlined_call_operand.vmem [shape: bf16[288,16], index: 1, kind: input, shape index: {}]   ;;  %s2434_s2 = inlined_call_operand.vmem [shape: f32[1,16], index: 2, kind: input, shape index: {}]   ;;  %s2435_s3 = inlined_call_operand.vmem [shape: f32[392,16], index: 3, kind: output, shape index: {}]  }
   0x1   :  { %s2006_s14 = smov 0  }
   0x2 LB: > { %s2015_s15 = sadd.s32 4294967295, %s1948_s14   ;;  %s2017_s16 = sadd.s32 1, %s1948_s14   ;;  %s1948_s14 = sphi %s2006_s14, %s2444_s14   ;;  %s1944_s13 = sphi %s2004_s13, %s2443_s13   ;;  %s1940_s12 = sphi %s2002_s12, %s2442_s12  }
   0x3   : > { %s85_s17 = ssub.s32 %s1948_s14, %s2017_s16  ;;  %s88_s18 = sadd.s32 1, %s1944_s13 }
   0x4   : > { %p86_p0 = scmp.eq.s32.totalorder %s85_s17, 0  ;;  %p98_p1 = scmp.ne.s32.totalorder %s1944_s13, %s1940_s12 }
   0x5   : > { %p99_p2 = scmp.eq.s32.totalorder %s2015_s15, 1  ;;  %p1434_p3 = scmp.ge.s32.totalorder %s1948_s14, 1 }
   0x6   : > { %s2025_s19 = scalar_select %p86_p0, %s1944_s13, %s88_s18  }
   0x7   : > { %p2027_p4 = por %p99_p2, %p98_p1  ;;  %p149_p5 = scmp.lt.s32.totalorder %s1948_s14, 3 }
   0x9   : > { %p150_p6 = pnand %p1434_p3, %p149_p5 }
   0xa   : > { %v1812_v0 = vld [vmem:[%s2433_s1 + $0x40] sm:$0xff] (!%p150_p6)   ;;  %s2035_s23 = sshll.u32 (!%p150_p6), %s2015_s15, 5  ;;  %v1814_v2 = vld [vmem:[%s2433_s1 + $0x48] sm:$0xff] (!%p150_p6)   ;;  %v1816_v4 = vld [vmem:[%s2433_s1 + $0x50] sm:$0xff] (!%p150_p6)   ;;  %vm656_vm0 = vcmask (!%p150_p6), 261120   ;;  %s175_s22 = sand.u32 (!%p150_p6), 1, %s1940_s12  }
   0xb   : > { %153 = sbr.rel (%p150_p6) target bundleno = 411 (0x19b), region = 32  ;;  %v1813_v1 = vld [vmem:[%s2433_s1] sm:$0xff] (!%p150_p6)   ;;  %1541 = vmatprep.subr.bf16.mxu0 (!%p150_p6), %v1812_v0  ;;  %1707 = vmatprep.subr.bf16.mxu1 (!%p150_p6), %v1812_v0  ;;  %p184_p7 = scmp.lt.s32.totalorder (!%p150_p6), %s2035_s23, 48  ;;  %v1815_v3 = vld [vmem:[%s2433_s1 + $0x8] sm:$0xff] (!%p150_p6)   ;;  %v1817_v5 = vld [vmem:[%s2433_s1 + $0x10] sm:$0xff] (!%p150_p6)   ;;  %vm1059_vm1 = vcmask (!%p150_p6), 130048  }
   0xc   : > { %1542 = vmatpush3.bf16.msra.mxu0 (!%p150_p6), %v1813_v1  ;;  %1715 = vmatpush3.bf16.msra.mxu1 (!%p150_p6), %v1813_v1  ;;  %v1818_v6 = vld [vmem:[%s2433_s1 + $0x58] sm:$0xff] (!%p150_p6)   ;;  %v1820_v8 = vld [vmem:[%s2433_s1 + $0x60] sm:$0xff] (!%p150_p6)   ;;  %v1822_v10 = vld [vmem:[%s2433_s1 + $0x68] sm:$0xff] (!%p150_p6)   ;;  %s1435_s26 = sshll.u32 (!%p150_p6), %s175_s22, 8 }
   0xd   : > { %1543 = vmatprep.subr.bf16.mxu0 (!%p150_p6), %v1814_v2  ;;  %1708 = vmatprep.subr.bf16.mxu1 (!%p150_p6), %v1814_v2  ;;  %v1819_v7 = vld [vmem:[%s2433_s1 + $0x18] sm:$0xff] (!%p150_p6)   ;;  %v1821_v9 = vld [vmem:[%s2433_s1 + $0x20] sm:$0xff] (!%p150_p6)   ;;  %v1823_v13 = vld [vmem:[%s2433_s1 + $0x28] sm:$0xff] (!%p150_p6)   ;;  %s2185_s12 = scalar_lea.vmem (!%p150_p6), [#allocation2], %s1435_s26  }
   0xe   : > { %v1824_v14 = vld [vmem:[%s2433_s1 + $0x70] sm:$0xff] (!%p150_p6)   ;;  %v1826_v16 = vld [vmem:[%s2433_s1 + $0x78] sm:$0xff] (!%p150_p6)   ;;  %v1834_v18 = vld [vmem:[%s2433_s1 + $0x80] sm:$0xff] (!%p150_p6)  }
   0xf   : > { %v1825_v15 = vld [vmem:[%s2433_s1 + $0x30] sm:$0xff] (!%p150_p6)   ;;  %v1827_v17 = vld [vmem:[%s2433_s1 + $0x38] sm:$0xff] (!%p150_p6)   ;;  %v1847_v23 = vld [vmem:[%s2433_s1 + $0x88] sm:$0xff] (!%p150_p6)  }
  0x10   : > { %1544 = vmatpush3.bf16.msra.mxu0 (!%p150_p6), %v1815_v3  ;;  %1716 = vmatpush3.bf16.msra.mxu1 (!%p150_p6), %v1815_v3 }
  0x11   : > { %1545 = vmatprep.subr.bf16.mxu0 (!%p150_p6), %v1816_v4  ;;  %1709 = vmatprep.subr.bf16.mxu1 (!%p150_p6), %v1816_v4 }
  0x12   : > { %s185_s5 = scalar_select %p184_p7, %s2035_s23, 48 }
  0x13   : > { %s1100_s27 = ssub.s32 (%p2027_p4), 49, %s2035_s23  ;;  %s1538_s28 = sshll.u32 (%p2027_p4), %s2015_s15, 8 }
  0x14   : > { %s1723_s10 = smul.u32 12, %s185_s5  ;;  %1546 = vmatpush3.bf16.msra.mxu0 %v1817_v5  ;;  %1717 = vmatpush3.bf16.msra.mxu1 %v1817_v5  ;;  %p1101_p8 = scmp.lt.s32.totalorder (%p2027_p4), %s1100_s27, 32 }
  0x15   : > { %1547 = vmatprep.subr.bf16.mxu0 %v1818_v6  ;;  %1710 = vmatprep.subr.bf16.mxu1 %v1818_v6  ;;  %s2300_s4 = scalar_lea.vmem (%p2027_p4), %s2435_s3, %s1538_s28  }
  0x16   : > { %s2066_s24 = scalar_lea.vmem %s2432_s0, %s1723_s10 }
  0x17   : > { %v1830_v11 = vld [vmem:[%s2066_s24 + $0x4] ss:$12 sps:$4 sm:$0xff]   ;;  %v1828_v19 = vld [vmem:[%s2066_s24] ss:$12 sps:$4 sm:$0xff]   ;;  %v1835_v21 = vld [vmem:[%s2066_s24 + $0x1c] ss:$12 sps:$4 sm:$0xff]  }
  0x18   : > { %1548 = vmatpush3.bf16.msra.mxu0 %v1819_v7  ;;  %1718 = vmatpush3.bf16.msra.mxu1 %v1819_v7  ;;  %v1833_v12 = vld [vmem:[%s2066_s24 + $0x124] ss:$12 sps:$4 sm:$0xff]   ;;  %v1831_v20 = vld [vmem:[%s2066_s24 + $0x120] ss:$12 sps:$4 sm:$0xff]   ;;  %v1837_v22 = vld [vmem:[%s2066_s24 + $0x13c] ss:$12 sps:$4 sm:$0xff]  }
  0x19   : > { %1549 = vmatprep.subr.bf16.mxu0 %v1820_v8  ;;  %1711 = vmatprep.subr.bf16.mxu1 %v1820_v8  ;;  %v1839_v24 = vld [vmem:[%s2066_s24 + $0x18] ss:$12 sps:$4 sm:$0xff]   ;;  %v1841_v26 = vld [vmem:[%s2066_s24 + $0x34] ss:$12 sps:$4 sm:$0xff]   ;;  %v1845_v28 = vld [vmem:[%s2066_s24 + $0x30] ss:$12 sps:$4 sm:$0xff]  }
  0x1a   : > { %737 = vmatprep.mubr.bf16.mxu0 %v1830_v11  ;;  %833 = vmatprep.mubr.bf16.mxu1 %v1833_v12  ;;  %v1840_v25 = vld [vmem:[%s2066_s24 + $0x138] ss:$12 sps:$4 sm:$0xff]   ;;  %v1843_v27 = vld [vmem:[%s2066_s24 + $0x154] ss:$12 sps:$4 sm:$0xff]   ;;  %v1846_v29 = vld [vmem:[%s2066_s24 + $0x150] ss:$12 sps:$4 sm:$0xff]  }
  0x1b   : > { %v1848_v30 = vld [vmem:[%s2066_s24 + $0x4c] ss:$12 sps:$4 sm:$0xff]   ;;  %v1852_v32 = vld [vmem:[%s2066_s24 + $0x48] ss:$12 sps:$4 sm:$0xff]   ;;  %v1854_v34 = vld [vmem:[%s2066_s24 + $0x64] ss:$12 sps:$4 sm:$0xff]  }
  0x1c   : > { %1550 = vmatpush3.bf16.msra.mxu0 %v1821_v9  ;;  %1719 = vmatpush3.bf16.msra.mxu1 %v1821_v9  ;;  %v1850_v31 = vld [vmem:[%s2066_s24 + $0x16c] ss:$12 sps:$4 sm:$0xff]   ;;  %v1853_v33 = vld [vmem:[%s2066_s24 + $0x168] ss:$12 sps:$4 sm:$0xff]   ;;  %v1863_v41 = vld [vmem:[%s2066_s24 + $0x50] ss:$12 sps:$4 sm:$0xff]  }
  0x1d   : > { %1551 = vmatprep.subr.bf16.mxu0 %v1822_v10  ;;  %1712 = vmatprep.subr.bf16.mxu1 %v1822_v10  ;;  %v1856_v35 = vld [vmem:[%s2066_s24 + $0x8] ss:$12 sps:$4 sm:$0xff]   ;;  %v1857_v36 = vld [vmem:[%s2066_s24 + $0x60] ss:$12 sps:$4 sm:$0xff]   ;;  %v1861_v39 = vld [vmem:[%s2066_s24 + $0x38] ss:$12 sps:$4 sm:$0xff]  }
  0x1e   : > { %v1858_v37 = vld [vmem:[%s2066_s24 + $0x20] ss:$12 sps:$4 sm:$0xff]   ;;  %v1859_v38 = vld [vmem:[%s2066_s24 + $0x7c] ss:$12 sps:$4 sm:$0xff]   ;;  %v1862_v40 = vld [vmem:[%s2066_s24 + $0x78] ss:$12 sps:$4 sm:$0xff]  }
  0x1f   : > { %v1864_v42 = vld [vmem:[%s2066_s24 + $0x94] ss:$12 sps:$4 sm:$0xff]   ;;  %v1867_v44 = vld [vmem:[%s2066_s24 + $0x90] ss:$12 sps:$4 sm:$0xff]   ;;  %v1869_v46 = vld [vmem:[%s2066_s24 + $0xac] ss:$12 sps:$4 sm:$0xff]  }
  0x20   : > { %1552 = vmatpush3.bf16.msra.mxu0 %v1823_v13  ;;  %1720 = vmatpush3.bf16.msra.mxu1 %v1823_v13  ;;  %v1866_v43 = vld [vmem:[%s2066_s24 + $0x68] ss:$12 sps:$4 sm:$0xff]   ;;  %v1868_v45 = vld [vmem:[%s2066_s24 + $0x80] ss:$12 sps:$4 sm:$0xff]   ;;  %v1871_v47 = vld [vmem:[%s2066_s24 + $0x98] ss:$12 sps:$4 sm:$0xff]  }
  0x21   : > { %1553 = vmatprep.subr.bf16.mxu0 %v1824_v14  ;;  %1713 = vmatprep.subr.bf16.mxu1 %v1824_v14  ;;  %v1872_v48 = vld [vmem:[%s2066_s24 + $0xa8] ss:$12 sps:$4 sm:$0xff]   ;;  %v1873_v49 = vld [vmem:[%s2066_s24 + $0xb0] ss:$12 sps:$4 sm:$0xff]   ;;  %v1877_v52 = vld [vmem:[%s2066_s24 + $0xc0] ss:$12 sps:$4 sm:$0xff]  }
  0x22   : > { %v1874_v50 = vld [vmem:[%s2066_s24 + $0xc4] ss:$12 sps:$4 sm:$0xff]   ;;  %v1876_v51 = vld [vmem:[%s2066_s24 + $0xc8] ss:$12 sps:$4 sm:$0xff]   ;;  %v1878_v53 = vld [vmem:[%s2066_s24 + $0xe0] ss:$12 sps:$4 sm:$0xff]  }
  0x23   : > { %v1879_v54 = vld [vmem:[%s2066_s24 + $0xdc] ss:$12 sps:$4 sm:$0xff]   ;;  %v1881_v55 = vld [vmem:[%s2066_s24 + $0xf8] ss:$12 sps:$4 sm:$0xff]   ;;  %v1884_v58 = vld [vmem:[%s2066_s24 + $0xf4] ss:$12 sps:$4 sm:$0xff]  }
  0x24   : > { %1554 = vmatpush3.bf16.msra.mxu0 %v1825_v15  ;;  %1721 = vmatpush3.bf16.msra.mxu1 %v1825_v15  ;;  %v1882_v56 = vld [vmem:[%s2066_s24 + $0xd8] ss:$12 sps:$4 sm:$0xff]   ;;  %v1883_v57 = vld [vmem:[%s2066_s24 + $0x110] ss:$12 sps:$4 sm:$0xff]   ;;  %v1886_v59 = vld [vmem:[%s2066_s24 + $0x128] ss:$12 sps:$4 sm:$0xff]  }
  0x25   : > { %1555 = vmatprep.subr.bf16.mxu0 %v1826_v16  ;;  %1714 = vmatprep.subr.bf16.mxu1 %v1826_v16  ;;  %v1887_v60 = vld [vmem:[%s2066_s24 + $0xf0] ss:$12 sps:$4 sm:$0xff]   ;;  %v1888_v61 = vld [vmem:[%s2066_s24 + $0x140] ss:$12 sps:$4 sm:$0xff]   ;;  %v1891_v63 = vld [vmem:[%s2066_s24 + $0x158] ss:$12 sps:$4 sm:$0xff]  }
  0x26   : > { %v1889_v62 = vld [vmem:[%s2066_s24 + $0x10c] ss:$12 sps:$4 sm:$0xff]   ;;  %v1892_v0 = vld [vmem:[%s2066_s24 + $0x108] ss:$12 sps:$4 sm:$0xff]   ;;  %v1893_v1 = vld [vmem:[%s2066_s24 + $0x170] ss:$12 sps:$4 sm:$0xff]  }
  0x28   : > { %1556 = vmatpush3.bf16.msra.mxu0 %v1827_v17  ;;  %1722 = vmatpush3.bf16.msra.mxu1 %v1827_v17 }
  0x29   : > { %1671 = vmatprep.subr.bf16.mxu1 %v1834_v18 }
  0x2b   : > { %738 = vmatmul.mubr.bf16.vlgmr.msra.gmra.mrb[0].mxu0 %v1828_v19  ;;  %834 = vmatmul.mubr.bf16.vlgmr.msra.gmra.mrb[0].mxu1 %v1831_v20 }
  0x2c   : > { %1672 = vmatpush3.bf16.msra.mxu1 %v1834_v18  ;;  %745 = vmatprep.mubr.bf16.mxu0 %v1835_v21 }
  0x2d   : > { %841 = vmatprep.mubr.bf16.mxu1 %v1837_v22  ;;  %1673 = vmatprep.subr.bf16.mxu1 %v1847_v23 }
  0x30   : > { %1674 = vmatpush3.bf16.msra.mxu1 %v1847_v23 }
  0x33   : > { %746 = vmatmul.mubr.bf16.gmra.mrb[4].mxu0 %v1839_v24  ;;  %842 = vmatmul.mubr.bf16.gmra.mrb[4].mxu1 %v1840_v25 }
  0x34   : > { %753 = vmatprep.mubr.bf16.mxu0 %v1841_v26  ;;  %849 = vmatprep.mubr.bf16.mxu1 %v1843_v27 }
  0x3b   : > { %754 = vmatmul.mubr.bf16.gmra.mrb[8].mxu0 %v1845_v28  ;;  %850 = vmatmul.mubr.bf16.gmra.mrb[8].mxu1 %v1846_v29 }
  0x3c   : > { %761 = vmatprep.mubr.bf16.mxu0 %v1848_v30  ;;  %857 = vmatprep.mubr.bf16.mxu1 %v1850_v31 }
  0x43   : > { %762 = vmatmul.mubr.bf16.gmra.mrb[12].mxu0 %v1852_v32  ;;  %858 = vmatmul.mubr.bf16.gmra.mrb[12].mxu1 %v1853_v33 }
  0x44   : > { %769 = vmatprep.mubr.bf16.mxu0 %v1854_v34  ;;  %1675 = vmatprep.mubr.msk.bf16.mxu1 %vm656_vm0, %v1856_v35 }
  0x4b   : > { %770 = vmatmul.mubr.bf16.gmra.mrb[16].mxu0 %v1857_v36  ;;  %1676 = vmatmul.mubr.msk.bf16.vlgmr.msra.gmra.mrb[16].mxu1 %vm656_vm0, %v1858_v37 }
  0x4c   : > { %777 = vmatprep.mubr.bf16.mxu0 %v1859_v38  ;;  %1679 = vmatprep.mubr.msk.bf16.mxu1 %vm656_vm0, %v1861_v39 }
  0x53   : > { %778 = vmatmul.mubr.bf16.gmra.mrb[20].mxu0 %v1862_v40  ;;  %1680 = vmatmul.mubr.msk.bf16.gmra.mrb[20].mxu1 %vm656_vm0, %v1863_v41 }
  0x54   : > { %785 = vmatprep.mubr.bf16.mxu0 %v1864_v42  ;;  %1683 = vmatprep.mubr.msk.bf16.mxu1 %vm656_vm0, %v1866_v43 }
  0x5b   : > { %786 = vmatmul.mubr.bf16.gmra.mrb[24].mxu0 %v1867_v44  ;;  %1684 = vmatmul.mubr.msk.bf16.gmra.mrb[24].mxu1 %vm656_vm0, %v1868_v45 }
  0x5c   : > { %793 = vmatprep.mubr.bf16.mxu0 %v1869_v46  ;;  %1687 = vmatprep.mubr.msk.bf16.mxu1 %vm656_vm0, %v1871_v47 }
  0x63   : > { %794 = vmatmul.mubr.bf16.gmra.mrb[28].mxu0 %v1872_v48  ;;  %1688 = vmatmul.mubr.msk.bf16.gmra.mrb[28].mxu1 %vm656_vm0, %v1873_v49 }
  0x64   : > { %801 = vmatprep.mubr.bf16.mxu0 %v1874_v50  ;;  %1691 = vmatprep.mubr.msk.bf16.mxu1 %vm656_vm0, %v1876_v51  ;;  %v2179_v50 = vld [vmem:[%s2434_s2] ss:$0 sm:$0xff] }
  0x6b   : > { %802 = vmatmul.mubr.bf16.gmra.mrb[32].mxu0 %v1877_v52  ;;  %1692 = vmatmul.mubr.msk.bf16.gmra.mrb[32].mxu1 %vm656_vm0, %v1878_v53 }
  0x6c   : > { %809 = vmatprep.mubr.bf16.mxu0 %v1879_v54  ;;  %1695 = vmatprep.mubr.msk.bf16.mxu1 %vm656_vm0, %v1881_v55 }
  0x73   : > { %810 = vmatmul.mubr.bf16.gmra.mrb[36].mxu0 %v1882_v56  ;;  %1696 = vmatmul.mubr.msk.bf16.gmra.mrb[36].mxu1 %vm656_vm0, %v1883_v57 }
  0x74   : > { %817 = vmatprep.mubr.bf16.mxu0 %v1884_v58  ;;  %1699 = vmatprep.mubr.msk.bf16.mxu1 %vm656_vm0, %v1886_v59 }
  0x7b   : > { %818 = vmatmul.mubr.bf16.gmra.mrb[40].mxu0 %v1887_v60  ;;  %1700 = vmatmul.mubr.msk.bf16.gmra.mrb[40].mxu1 %vm656_vm0, %v1888_v61 }
  0x7c   : > { %825 = vmatprep.mubr.bf16.mxu0 %v1889_v62  ;;  %1703 = vmatprep.mubr.msk.bf16.mxu1 %vm656_vm0, %v1891_v63 }
  0x83   : > { %826 = vmatmul.mubr.bf16.gmra.mrb[44].mxu0 %v1892_v0  ;;  %1704 = vmatmul.mubr.msk.bf16.gmra.mrb[44].mxu1 %vm656_vm0, %v1893_v1 }
  0xfe   : > { %v1557_v2 = vpop.f32.mrb[0].mxu0  ;;  %v1629_v3 = vpop.f32.mrb[0].mxu1 }
  0xff   : > { %v1558_v4 = vpop.f32.mrb[1].mxu0  ;;  %v1630_v5 = vpop.f32.mrb[1].mxu1 }
 0x100   : > { %v1559_v6 = vadd.f32 %v1558_v4, %v1557_v2  ;;  %v1560_v7 = vpop.f32.mrb[2].mxu0  ;;  %v2159_v8 = vadd.f32 %v1630_v5, %v1629_v3  ;;  %v1632_v9 = vpop.f32.mrb[2].mxu1 }
 0x101   : > { %v1561_v10 = vpop.f32.mrb[3].mxu0  ;;  %v1633_v11 = vpop.f32.mrb[3].mxu1 }
 0x102   : > { %v1562_v12 = vadd.f32 %v1561_v10, %v1560_v7  ;;  %v2161_v13 = vadd.f32 %v1633_v11, %v1632_v9  ;;  %v740_v54 = vadd.f32 %v1559_v6, %v2179_v50 }
 0x104   : > { %v743_v63 = vadd.f32 %v1562_v12, %v2179_v50 }
 0x106   : > { %v1563_v14 = vpop.f32.mrb[4].mxu0  ;;  %v1635_v15 = vpop.f32.mrb[4].mxu1 }
 0x107   : > { %v1564_v16 = vpop.f32.mrb[5].mxu0  ;;  %v1636_v17 = vpop.f32.mrb[5].mxu1 }
 0x108   : > { %v1565_v18 = vadd.f32 %v1564_v16, %v1563_v14  ;;  %v1566_v19 = vpop.f32.mrb[6].mxu0  ;;  %v2163_v20 = vadd.f32 %v1636_v17, %v1635_v15  ;;  %v1638_v21 = vpop.f32.mrb[6].mxu1 }
 0x109   : > { %v1567_v22 = vpop.f32.mrb[7].mxu0  ;;  %v1639_v23 = vpop.f32.mrb[7].mxu1 }
 0x10a   : > { %v1568_v24 = vadd.f32 %v1567_v22, %v1566_v19  ;;  %v2165_v25 = vadd.f32 %v1639_v23, %v1638_v21  ;;  %v748_v51 = vadd.f32 %v1565_v18, %v2179_v50 }
 0x10c   : > { %v751_v58 = vadd.f32 %v1568_v24, %v2179_v50 }
 0x10e   : > { %v1569_v26 = vpop.f32.mrb[8].mxu0  ;;  %v1641_v27 = vpop.f32.mrb[8].mxu1 }
 0x10f   : > { %v1570_v28 = vpop.f32.mrb[9].mxu0  ;;  %v1642_v29 = vpop.f32.mrb[9].mxu1 }
 0x110   : > { %v1571_v30 = vadd.f32 %v1570_v28, %v1569_v26  ;;  %v1572_v31 = vpop.f32.mrb[10].mxu0  ;;  %v2167_v32 = vadd.f32 %v1642_v29, %v1641_v27  ;;  %v1644_v33 = vpop.f32.mrb[10].mxu1 }
 0x111   : > { %v1573_v34 = vpop.f32.mrb[11].mxu0  ;;  %v1645_v35 = vpop.f32.mrb[11].mxu1 }
 0x112   : > { %v1574_v36 = vadd.f32 %v1573_v34, %v1572_v31  ;;  %v2169_v37 = vadd.f32 %v1645_v35, %v1644_v33  ;;  %v756_v14 = vadd.f32 %v1571_v30, %v2179_v50 }
 0x114   : > { %v759_v24 = vadd.f32 %v1574_v36, %v2179_v50 }
 0x116   : > { %v1575_v38 = vpop.f32.mrb[12].mxu0  ;;  %v1647_v39 = vpop.f32.mrb[12].mxu1 }
 0x117   : > { %v1576_v40 = vpop.f32.mrb[13].mxu0  ;;  %v1648_v41 = vpop.f32.mrb[13].mxu1 }
 0x118   : > { %v1577_v42 = vadd.f32 %v1576_v40, %v1575_v38  ;;  %v1578_v43 = vpop.f32.mrb[14].mxu0  ;;  %v2171_v44 = vadd.f32 %v1648_v41, %v1647_v39  ;;  %v1650_v45 = vpop.f32.mrb[14].mxu1 }
 0x119   : > { %v1579_v46 = vpop.f32.mrb[15].mxu0  ;;  %v1651_v47 = vpop.f32.mrb[15].mxu1 }
 0x11a   : > { %v1580_v48 = vadd.f32 %v1579_v46, %v1578_v43  ;;  %v2173_v49 = vadd.f32 %v1651_v47, %v1650_v45  ;;  %v764_v10 = vadd.f32 %v1577_v42, %v2179_v50 }
 0x11c   : > { %v767_v18 = vadd.f32 %v1580_v48, %v2179_v50 }
 0x11e   : > { %v1581_v52 = vpop.f32.mrb[16].mxu0  ;;  %v1677_v53 = vpop.f32.mrb[16].mxu1 }
 0x11f   : > { %v909_v55 = vadd.f32 %v1677_v53, %v748_v51  ;;  %v1582_v56 = vpop.f32.mrb[17].mxu0  ;;  %v900_v57 = vpop.f32.mrb[17].mxu1 }
 0x120   : > { %v1583_v59 = vadd.f32 %v1582_v56, %v1581_v52  ;;  %v901_v60 = vadd.f32 %v900_v57, %v740_v54  ;;  %v1584_v61 = vpop.f32.mrb[18].mxu0  ;;  %v1678_v62 = vpop.f32.mrb[18].mxu1 }
 0x121   : > { %v1029_v0 = vmax.f32 %v909_v55, 0.0  ;;  %v912_v1 = vadd.f32 %v1678_v62, %v751_v58  ;;  %v1585_v2 = vpop.f32.mrb[19].mxu0  ;;  %v903_v3 = vpop.f32.mrb[19].mxu1 }
 0x122   : > { %v1027_v4 = vmax.f32 %v901_v60, 0.0  ;;  %v1586_v5 = vadd.f32 %v1585_v2, %v1584_v61  ;;  %v904_v7 = vadd.f32 %v903_v3, %v743_v63  ;;  %v772_v40 = vadd.f32 %v1583_v59, %v2179_v50 }
 0x123   : > { %1062 = vst.msk [vmem:[%s2185_s12 + $0x10] sm:$0xff] %vm1059_vm1, %v1029_v0  ;;  %v1030_v6 = vmax.f32 %v912_v1, 0.0 }
 0x124   : > { %1060 = vst.msk [vmem:[%s2185_s12] sm:$0xff] %vm1059_vm1, %v1027_v4  ;;  %v1028_v9 = vmax.f32 %v904_v7, 0.0  ;;  %v775_v52 = vadd.f32 %v1586_v5, %v2179_v50 }
 0x125   : > { %1063 = vst.msk [vmem:[%s2185_s12 + $0x18] sm:$0xff] %vm1059_vm1, %v1030_v6 }
 0x126   : > { %1061 = vst.msk [vmem:[%s2185_s12 + $0x8] sm:$0xff] %vm1059_vm1, %v1028_v9  ;;  %v1587_v11 = vpop.f32.mrb[20].mxu0  ;;  %v1681_v12 = vpop.f32.mrb[20].mxu1 }
 0x127   : > { %v925_v15 = vadd.f32 %v1681_v12, %v764_v10  ;;  %v1588_v16 = vpop.f32.mrb[21].mxu0  ;;  %v916_v17 = vpop.f32.mrb[21].mxu1 }
 0x128   : > { %v1589_v19 = vadd.f32 %v1588_v16, %v1587_v11  ;;  %v917_v21 = vadd.f32 %v916_v17, %v756_v14  ;;  %v1590_v22 = vpop.f32.mrb[22].mxu0  ;;  %v1682_v23 = vpop.f32.mrb[22].mxu1 }
 0x129   : > { %v1033_v26 = vmax.f32 %v925_v15, 0.0  ;;  %v928_v27 = vadd.f32 %v1682_v23, %v767_v18  ;;  %v1591_v28 = vpop.f32.mrb[23].mxu0  ;;  %v919_v29 = vpop.f32.mrb[23].mxu1 }
 0x12a   : > { %v1031_v30 = vmax.f32 %v917_v21, 0.0  ;;  %v1592_v31 = vadd.f32 %v1591_v28, %v1590_v22  ;;  %v920_v33 = vadd.f32 %v919_v29, %v759_v24  ;;  %v780_v38 = vadd.f32 %v1589_v19, %v2179_v50 }
 0x12b   : > { %1066 = vst.msk [vmem:[%s2185_s12 + $0x30] sm:$0xff] %vm1059_vm1, %v1033_v26  ;;  %v1034_v34 = vmax.f32 %v928_v27, 0.0 }
 0x12c   : > { %1064 = vst.msk [vmem:[%s2185_s12 + $0x20] sm:$0xff] %vm1059_vm1, %v1031_v30  ;;  %v1032_v35 = vmax.f32 %v920_v33, 0.0  ;;  %v783_v45 = vadd.f32 %v1592_v31, %v2179_v50 }
 0x12d   : > { %1067 = vst.msk [vmem:[%s2185_s12 + $0x38] sm:$0xff] %vm1059_vm1, %v1034_v34 }
 0x12e   : > { %1065 = vst.msk [vmem:[%s2185_s12 + $0x28] sm:$0xff] %vm1059_vm1, %v1032_v35  ;;  %v1593_v36 = vpop.f32.mrb[24].mxu0  ;;  %v1685_v39 = vpop.f32.mrb[24].mxu1 }
 0x12f   : > { %v941_v41 = vadd.f32 %v1685_v39, %v780_v38  ;;  %v1594_v42 = vpop.f32.mrb[25].mxu0  ;;  %v932_v43 = vpop.f32.mrb[25].mxu1 }
 0x130   : > { %v1595_v46 = vadd.f32 %v1594_v42, %v1593_v36  ;;  %v933_v47 = vadd.f32 %v932_v43, %v772_v40  ;;  %v1596_v48 = vpop.f32.mrb[26].mxu0  ;;  %v1686_v51 = vpop.f32.mrb[26].mxu1 }
 0x131   : > { %v1037_v53 = vmax.f32 %v941_v41, 0.0  ;;  %v944_v54 = vadd.f32 %v1686_v51, %v783_v45  ;;  %v1597_v55 = vpop.f32.mrb[27].mxu0  ;;  %v935_v56 = vpop.f32.mrb[27].mxu1 }
 0x132   : > { %v1035_v57 = vmax.f32 %v933_v47, 0.0  ;;  %v1598_v58 = vadd.f32 %v1597_v55, %v1596_v48  ;;  %v936_v59 = vadd.f32 %v935_v56, %v775_v52  ;;  %v788_v0 = vadd.f32 %v1595_v46, %v2179_v50 }
 0x133   : > { %1070 = vst.msk [vmem:[%s2185_s12 + $0x50] sm:$0xff] %vm1059_vm1, %v1037_v53  ;;  %v1038_v60 = vmax.f32 %v944_v54, 0.0 }
 0x134   : > { %1068 = vst.msk [vmem:[%s2185_s12 + $0x40] sm:$0xff] %vm1059_vm1, %v1035_v57  ;;  %v1036_v61 = vmax.f32 %v936_v59, 0.0  ;;  %v791_v6 = vadd.f32 %v1598_v58, %v2179_v50  ;;  %v844_v58 = vadd.f32 %v2163_v20, %v2179_v50 }
 0x135   : > { %1071 = vst.msk [vmem:[%s2185_s12 + $0x58] sm:$0xff] %vm1059_vm1, %v1038_v60 }
 0x136   : > { %1069 = vst.msk [vmem:[%s2185_s12 + $0x48] sm:$0xff] %vm1059_vm1, %v1036_v61  ;;  %v1599_v62 = vpop.f32.mrb[28].mxu0  ;;  %v1689_v63 = vpop.f32.mrb[28].mxu1 }
 0x137   : > { %v1600_v1 = vpop.f32.mrb[29].mxu0  ;;  %v948_v2 = vpop.f32.mrb[29].mxu1 }
 0x138   : > { %v1601_v3 = vadd.f32 %v1600_v1, %v1599_v62  ;;  %v949_v4 = vadd.f32 %v948_v2, %v788_v0  ;;  %v1602_v5 = vpop.f32.mrb[30].mxu0  ;;  %v1690_v7 = vpop.f32.mrb[30].mxu1 }
 0x139   : > { %v1603_v9 = vpop.f32.mrb[31].mxu0  ;;  %v951_v10 = vpop.f32.mrb[31].mxu1 }
 0x13a   : > { %v796_v11 = vadd.f32 %v1601_v3, %v2179_v50  ;;  %v1039_v12 = vmax.f32 %v949_v4, 0.0  ;;  %v1604_v14 = vadd.f32 %v1603_v9, %v1602_v5  ;;  %v952_v15 = vadd.f32 %v951_v10, %v791_v6 }
 0x13b   : > { %v847_v3 = vadd.f32 %v2165_v25, %v2179_v50  ;;  %v839_v9 = vadd.f32 %v2161_v13, %v2179_v50 }
 0x13c   : > { %v957_v16 = vadd.f32 %v1689_v63, %v796_v11  ;;  %1072 = vst.msk [vmem:[%s2185_s12 + $0x60] sm:$0xff] %vm1059_vm1, %v1039_v12  ;;  %v799_v17 = vadd.f32 %v1604_v14, %v2179_v50  ;;  %v1040_v18 = vmax.f32 %v952_v15, 0.0  ;;  %v836_v63 = vadd.f32 %v2159_v8, %v2179_v50 }
 0x13e   : > { %v1041_v19 = vmax.f32 %v957_v16, 0.0  ;;  %v960_v21 = vadd.f32 %v1690_v7, %v799_v17  ;;  %1073 = vst.msk [vmem:[%s2185_s12 + $0x68] sm:$0xff] %vm1059_vm1, %v1040_v18  ;;  %v1605_v22 = vpop.f32.mrb[32].mxu0  ;;  %v1693_v23 = vpop.f32.mrb[32].mxu1 }
 0x13f   : > { %v1606_v24 = vpop.f32.mrb[33].mxu0  ;;  %v964_v26 = vpop.f32.mrb[33].mxu1 }
 0x140   : > { %1074 = vst.msk [vmem:[%s2185_s12 + $0x70] sm:$0xff] %vm1059_vm1, %v1041_v19  ;;  %v1042_v27 = vmax.f32 %v960_v21, 0.0  ;;  %v1607_v28 = vadd.f32 %v1606_v24, %v1605_v22  ;;  %v1608_v29 = vpop.f32.mrb[34].mxu0  ;;  %v1694_v30 = vpop.f32.mrb[34].mxu1  ;;  %v860_v21 = vadd.f32 %v2171_v44, %v2179_v50 }
 0x141   : > { %v1609_v31 = vpop.f32.mrb[35].mxu0  ;;  %v967_v33 = vpop.f32.mrb[35].mxu1 }
 0x142   : > { %1075 = vst.msk [vmem:[%s2185_s12 + $0x78] sm:$0xff] %vm1059_vm1, %v1042_v27  ;;  %v804_v34 = vadd.f32 %v1607_v28, %v2179_v50  ;;  %v1610_v35 = vadd.f32 %v1609_v31, %v1608_v29  ;;  %v852_v27 = vadd.f32 %v2167_v32, %v2179_v50  ;;  %v863_v31 = vadd.f32 %v2173_v49, %v2179_v50 }
 0x144   : > { %v965_v38 = vadd.f32 %v964_v26, %v804_v34  ;;  %v807_v36 = vadd.f32 %v1610_v35, %v2179_v50 }
 0x146   : > { %v1043_v39 = vmax.f32 %v965_v38, 0.0  ;;  %v968_v40 = vadd.f32 %v967_v33, %v807_v36  ;;  %v1611_v41 = vpop.f32.mrb[36].mxu0  ;;  %v2233_v42 = vpop.f32.mrb[36].mxu1  ;;  %v855_v36 = vadd.f32 %v2169_v37, %v2179_v50 }
 0x147   : > { %v1612_v43 = vpop.f32.mrb[37].mxu0  ;;  %v980_v45 = vpop.f32.mrb[37].mxu1 }
 0x148   : > { %1076 = vst.msk [vmem:[%s2185_s12 + $0x80] sm:$0xff] %vm1059_vm1, %v1043_v39  ;;  %v1044_v46 = vmax.f32 %v968_v40, 0.0  ;;  %v1613_v47 = vadd.f32 %v1612_v43, %v1611_v41  ;;  %v1614_v48 = vpop.f32.mrb[38].mxu0  ;;  %v2237_v51 = vpop.f32.mrb[38].mxu1 }
 0x149   : > { %v1615_v52 = vpop.f32.mrb[39].mxu0  ;;  %v983_v53 = vpop.f32.mrb[39].mxu1 }
 0x14a   : > { %1077 = vst.msk [vmem:[%s2185_s12 + $0x88] sm:$0xff] %vm1059_vm1, %v1044_v46  ;;  %v812_v54 = vadd.f32 %v1613_v47, %v2179_v50  ;;  %v1616_v55 = vadd.f32 %v1615_v52, %v1614_v48 }
 0x14c   : > { %v973_v56 = vadd.f32 %v1693_v23, %v812_v54  ;;  %v815_v57 = vadd.f32 %v1616_v55, %v2179_v50 }
 0x14e   : > { %v1045_v59 = vmax.f32 %v973_v56, 0.0  ;;  %v976_v60 = vadd.f32 %v1694_v30, %v815_v57  ;;  %v1617_v61 = vpop.f32.mrb[40].mxu0  ;;  %v1701_v62 = vpop.f32.mrb[40].mxu1 }
 0x14f   : > { %v1005_v0 = vadd.f32 %v1701_v62, %v844_v58  ;;  %v1618_v1 = vpop.f32.mrb[41].mxu0  ;;  %v996_v2 = vpop.f32.mrb[41].mxu1 }
 0x150   : > { %1078 = vst.msk [vmem:[%s2185_s12 + $0x90] sm:$0xff] %vm1059_vm1, %v1045_v59  ;;  %v1046_v4 = vmax.f32 %v976_v60, 0.0  ;;  %v1619_v5 = vadd.f32 %v1618_v1, %v1617_v61  ;;  %v997_v20 = vadd.f32 %v996_v2, %v836_v63  ;;  %v1620_v7 = vpop.f32.mrb[42].mxu0  ;;  %v1702_v6 = vpop.f32.mrb[42].mxu1 }
 0x151   : > { %v1053_v8 = vmax.f32 %v1005_v0, 0.0  ;;  %v1008_v10 = vadd.f32 %v1702_v6, %v847_v3  ;;  %v1621_v11 = vpop.f32.mrb[43].mxu0  ;;  %v999_v12 = vpop.f32.mrb[43].mxu1 }
 0x152   : > { %1079 = vst.msk [vmem:[%s2185_s12 + $0x98] sm:$0xff] %vm1059_vm1, %v1046_v4  ;;  %v820_v25 = vadd.f32 %v1619_v5, %v2179_v50  ;;  %v1051_v14 = vmax.f32 %v997_v20, 0.0  ;;  %v1622_v15 = vadd.f32 %v1621_v11, %v1620_v7  ;;  %v1000_v16 = vadd.f32 %v999_v12, %v839_v9 }
 0x153   : > { %1086 = vst.msk [vmem:[%s2185_s12 + $0xd0] sm:$0xff] %vm1059_vm1, %v1053_v8  ;;  %v1054_v17 = vmax.f32 %v1008_v10, 0.0 }
 0x154   : > { %v981_v18 = vadd.f32 %v980_v45, %v820_v25  ;;  %1084 = vst.msk [vmem:[%s2185_s12 + $0xc0] sm:$0xff] %vm1059_vm1, %v1051_v14  ;;  %v823_v13 = vadd.f32 %v1622_v15, %v2179_v50  ;;  %v1052_v19 = vmax.f32 %v1000_v16, 0.0 }
 0x155   : > { %1087 = vst.msk [vmem:[%s2185_s12 + $0xd8] sm:$0xff] %vm1059_vm1, %v1054_v17 }
 0x156   : > { %v1047_v22 = vmax.f32 %v981_v18, 0.0  ;;  %v984_v23 = vadd.f32 %v983_v53, %v823_v13  ;;  %1085 = vst.msk [vmem:[%s2185_s12 + $0xc8] sm:$0xff] %vm1059_vm1, %v1052_v19  ;;  %v1623_v24 = vpop.f32.mrb[44].mxu0  ;;  %v1705_v26 = vpop.f32.mrb[44].mxu1 }
 0x157   : > { %v1021_v28 = vadd.f32 %v1705_v26, %v860_v21  ;;  %v1624_v29 = vpop.f32.mrb[45].mxu0  ;;  %v1012_v30 = vpop.f32.mrb[45].mxu1 }
 0x158   : > { %1080 = vst.msk [vmem:[%s2185_s12 + $0xa0] sm:$0xff] %vm1059_vm1, %v1047_v22  ;;  %v1048_v44 = vmax.f32 %v984_v23, 0.0  ;;  %v1625_v33 = vadd.f32 %v1624_v29, %v1623_v24  ;;  %v1013_v34 = vadd.f32 %v1012_v30, %v852_v27  ;;  %v1626_v35 = vpop.f32.mrb[46].mxu0  ;;  %v1706_v38 = vpop.f32.mrb[46].mxu1 }
 0x159   : > { %v1057_v32 = vmax.f32 %v1021_v28, 0.0  ;;  %v1024_v39 = vadd.f32 %v1706_v38, %v863_v31  ;;  %v1627_v40 = vpop.f32.mrb[47].mxu0  ;;  %v1015_v41 = vpop.f32.mrb[47].mxu1 }
 0x15a   : > { %1081 = vst.msk [vmem:[%s2185_s12 + $0xa8] sm:$0xff] %vm1059_vm1, %v1048_v44  ;;  %v828_v49 = vadd.f32 %v1625_v33, %v2179_v50  ;;  %v1055_v43 = vmax.f32 %v1013_v34, 0.0  ;;  %v1628_v45 = vadd.f32 %v1627_v40, %v1626_v35  ;;  %v1016_v46 = vadd.f32 %v1015_v41, %v855_v36 }
 0x15b   : > { %1090 = vst.msk [vmem:[%s2185_s12 + $0xf0] sm:$0xff] %vm1059_vm1, %v1057_v32  ;;  %v1058_v47 = vmax.f32 %v1024_v39, 0.0 }
 0x15c   : > { %v989_v37 = vadd.f32 %v2233_v42, %v828_v49  ;;  %1088 = vst.msk [vmem:[%s2185_s12 + $0xe0] sm:$0xff] %vm1059_vm1, %v1055_v43  ;;  %v831_v48 = vadd.f32 %v1628_v45, %v2179_v50  ;;  %v1056_v52 = vmax.f32 %v1016_v46, 0.0  ;;  %1098 = sbr.rel (!%p2027_p4) target bundleno = 411 (0x19b), region = 36 }
 0x15d   : > { %1091 = vst.msk [vmem:[%s2185_s12 + $0xf8] sm:$0xff] %vm1059_vm1, %v1058_v47 }
 0x15e   : > { %v1049_v53 = vmax.f32 %v989_v37, 0.0  ;;  %v992_v54 = vadd.f32 %v2237_v51, %v831_v48  ;;  %1089 = vst.msk [vmem:[%s2185_s12 + $0xe8] sm:$0xff] %vm1059_vm1, %v1056_v52 }
 0x160   : > { %1082 = vst.msk [vmem:[%s2185_s12 + $0xb0] sm:$0xff] %vm1059_vm1, %v1049_v53  ;;  %v1050_v55 = vmax.f32 %v992_v54, 0.0 }
 0x162   : > { %1083 = vst.msk [vmem:[%s2185_s12 + $0xb8] sm:$0xff] %vm1059_vm1, %v1050_v55 }
 0x163   : > { %s2446_s27 = smov (!%p1101_p8, %s1100_s27), 32 }
 0x164   : > { %s1523_s5 = sshll.u32 %s2446_s27, 7 }
 0x165   : > { %p1526_p9 = scmp.eq.s32.totalorder %s1523_s5, 0 }
 0x166   : > { %s2306_s6 = sshrl.u32 (!%p1526_p9), %s2446_s27, 5 }
 0x167   : > { %1109 = sbr.rel (%p1526_p9) target bundleno = 411 (0x19b), region = 40  ;;  %p1527_p10 = scmp.le.s32.totalorder (!%p1526_p9), %s2306_s6, 0 }
 0x16e   : > { %1387 = sbr.rel (%p1527_p10) target bundleno = 390 (0x186), region = 116  ;;  %s2437_s15 = smov (!%p1527_p10), %s2300_s4 }
 0x16f   : > { %s2438_s20 = smov (!%p1527_p10), %s2185_s12  ;;  %s2315_s23 = smov (!%p1527_p10), 0  }
 0x170   : > { %s2317_s7 = smov (!%p1527_p10), 0  }
 0x175 LB: >> { %v1233_v50 = vld [vmem:[%s1956_s20] sm:$0xff]  ;;  %v1235_v42 = vld [vmem:[%s1956_s20 + $0x8] sm:$0xff]  ;;  %v1237_v51 = vld [vmem:[%s1956_s20 + $0x10] sm:$0xff]  ;;  %s1297_s8 = sadd.s32 1, %s1960_s23  ;;  %s1227_s7 = sadd.s32 1, %s1964_s7   ;;  %s1964_s7 = sphi %s2317_s7, %s1227_s7   ;;  %s1960_s23 = sphi %s2315_s23, %s2441_s23   ;;  %s1956_s20 = sphi %s2438_s20, %s2440_s20   ;;  %s1952_s15 = sphi %s2437_s15, %s2439_s15  }
 0x176   : >> { %1234 = vst [vmem:[%s1952_s15] sm:$0xff] %v1233_v50  ;;  %1236 = vst [vmem:[%s1952_s15 + $0x8] sm:$0xff] %v1235_v42  ;;  %v1239_v56 = vld [vmem:[%s1956_s20 + $0x18] sm:$0xff]  ;;  %v1241_v57 = vld [vmem:[%s1956_s20 + $0x20] sm:$0xff]  ;;  %p1298_p11 = scmp.ge.s32.totalorder %s1297_s8, %s2306_s6  ;;  %p1226_p12 = scmp.ge.s32.totalorder %s1227_s7, %s2306_s6 }
 0x177   : >> { %1238 = vst [vmem:[%s1952_s15 + $0x10] sm:$0xff] %v1237_v51  ;;  %v1243_v58 = vld [vmem:[%s1956_s20 + $0x28] sm:$0xff]  ;;  %1240 = vst [vmem:[%s1952_s15 + $0x18] sm:$0xff] %v1239_v56  ;;  %v1245_v59 = vld [vmem:[%s1956_s20 + $0x30] sm:$0xff] }
 0x178   : >> { %1242 = vst [vmem:[%s1952_s15 + $0x20] sm:$0xff] %v1241_v57  ;;  %1244 = vst [vmem:[%s1952_s15 + $0x28] sm:$0xff] %v1243_v58  ;;  %v1247_v60 = vld [vmem:[%s1956_s20 + $0x38] sm:$0xff]  ;;  %v1249_v61 = vld [vmem:[%s1956_s20 + $0x40] sm:$0xff]  ;;  %s2448_s8 = smov (%p1298_p11, %s1297_s8), 0 }
 0x179   : >> { %1246 = vst [vmem:[%s1952_s15 + $0x30] sm:$0xff] %v1245_v59  ;;  %1248 = vst [vmem:[%s1952_s15 + $0x38] sm:$0xff] %v1247_v60  ;;  %v1251_v62 = vld [vmem:[%s1956_s20 + $0x48] sm:$0xff]  ;;  %v1253_v63 = vld [vmem:[%s1956_s20 + $0x50] sm:$0xff]  ;;  %s1528_s9 = sshll.u32 %s2448_s8, 8  ;;  %s2441_s23 = smov %s2448_s8 }
 0x17a   : >> { %1250 = vst [vmem:[%s1952_s15 + $0x40] sm:$0xff] %v1249_v61  ;;  %v1255_v0 = vld [vmem:[%s1956_s20 + $0x58] sm:$0xff]  ;;  %1252 = vst [vmem:[%s1952_s15 + $0x48] sm:$0xff] %v1251_v62  ;;  %v1257_v1 = vld [vmem:[%s1956_s20 + $0x60] sm:$0xff]  ;;  %s2373_s10 = scalar_lea.vmem %s2185_s12, %s1528_s9 [#allocation2]   ;;  %s1303_s11 = scalar_lea.vmem %s2300_s4, %s1528_s9  }
 0x17b   : >> { %1254 = vst [vmem:[%s1952_s15 + $0x50] sm:$0xff] %v1253_v63  ;;  %1256 = vst [vmem:[%s1952_s15 + $0x58] sm:$0xff] %v1255_v0  ;;  %v1259_v2 = vld [vmem:[%s1956_s20 + $0x68] sm:$0xff]  ;;  %v1261_v3 = vld [vmem:[%s1956_s20 + $0x70] sm:$0xff] }
 0x17c   : >> { %1258 = vst [vmem:[%s1952_s15 + $0x60] sm:$0xff] %v1257_v1  ;;  %1260 = vst [vmem:[%s1952_s15 + $0x68] sm:$0xff] %v1259_v2  ;;  %v1263_v4 = vld [vmem:[%s1956_s20 + $0x78] sm:$0xff]  ;;  %v1265_v5 = vld [vmem:[%s1956_s20 + $0x80] sm:$0xff] }
 0x17d   : >> { %1262 = vst [vmem:[%s1952_s15 + $0x70] sm:$0xff] %v1261_v3  ;;  %v1267_v20 = vld [vmem:[%s1956_s20 + $0x88] sm:$0xff]  ;;  %1264 = vst [vmem:[%s1952_s15 + $0x78] sm:$0xff] %v1263_v4  ;;  %v1269_v7 = vld [vmem:[%s1956_s20 + $0x90] sm:$0xff] }
 0x17e   : >> { %1266 = vst [vmem:[%s1952_s15 + $0x80] sm:$0xff] %v1265_v5  ;;  %1268 = vst [vmem:[%s1952_s15 + $0x88] sm:$0xff] %v1267_v20  ;;  %v1271_v6 = vld [vmem:[%s1956_s20 + $0x98] sm:$0xff]  ;;  %v1273_v9 = vld [vmem:[%s1956_s20 + $0xa0] sm:$0xff] }
 0x17f   : >> { %1270 = vst [vmem:[%s1952_s15 + $0x90] sm:$0xff] %v1269_v7  ;;  %1272 = vst [vmem:[%s1952_s15 + $0x98] sm:$0xff] %v1271_v6  ;;  %v1275_v8 = vld [vmem:[%s1956_s20 + $0xa8] sm:$0xff]  ;;  %v1277_v10 = vld [vmem:[%s1956_s20 + $0xb0] sm:$0xff]  ;;  %1229 = sbr.rel (!%p1226_p12) target bundleno = 373 (0x175), region = 122 }
 0x180   : >> { %1274 = vst [vmem:[%s1952_s15 + $0xa0] sm:$0xff] %v1273_v9  ;;  %v1279_v11 = vld [vmem:[%s1956_s20 + $0xb8] sm:$0xff]  ;;  %1276 = vst [vmem:[%s1952_s15 + $0xa8] sm:$0xff] %v1275_v8  ;;  %v1281_v12 = vld [vmem:[%s1956_s20 + $0xc0] sm:$0xff] }
 0x181   : >> { %1278 = vst [vmem:[%s1952_s15 + $0xb0] sm:$0xff] %v1277_v10  ;;  %1280 = vst [vmem:[%s1952_s15 + $0xb8] sm:$0xff] %v1279_v11  ;;  %v1283_v25 = vld [vmem:[%s1956_s20 + $0xc8] sm:$0xff]  ;;  %v1285_v14 = vld [vmem:[%s1956_s20 + $0xd0] sm:$0xff] }
 0x182   : >> { %1282 = vst [vmem:[%s1952_s15 + $0xc0] sm:$0xff] %v1281_v12  ;;  %1284 = vst [vmem:[%s1952_s15 + $0xc8] sm:$0xff] %v1283_v25  ;;  %v1287_v15 = vld [vmem:[%s1956_s20 + $0xd8] sm:$0xff]  ;;  %v1289_v16 = vld [vmem:[%s1956_s20 + $0xe0] sm:$0xff] }
 0x183   : >> { %1286 = vst [vmem:[%s1952_s15 + $0xd0] sm:$0xff] %v1285_v14  ;;  %v1291_v17 = vld [vmem:[%s1956_s20 + $0xe8] sm:$0xff]  ;;  %1288 = vst [vmem:[%s1952_s15 + $0xd8] sm:$0xff] %v1287_v15  ;;  %v1293_v18 = vld [vmem:[%s1956_s20 + $0xf0] sm:$0xff] }
 0x184   : >> { %1290 = vst [vmem:[%s1952_s15 + $0xe0] sm:$0xff] %v1289_v16  ;;  %1292 = vst [vmem:[%s1952_s15 + $0xe8] sm:$0xff] %v1291_v17  ;;  %v1295_v13 = vld [vmem:[%s1956_s20 + $0xf8] sm:$0xff]  ;;  %s2440_s20 = smov %s2373_s10 }
 0x185   : >> { %1294 = vst [vmem:[%s1952_s15 + $0xf0] sm:$0xff] %v1293_v18  ;;  %1296 = vst [vmem:[%s1952_s15 + $0xf8] sm:$0xff] %v1295_v13  ;;  %s2439_s15 = smov %s1303_s11 }
 0x186 PF: > { %s2414_s14 = sand.u32 31, %s2446_s27   ;;  %s1539_s17 = sshll.u32 %s2306_s6, 8 }
 0x187   : > { %s1308_s18 = scalar_lea.vmem %s2185_s12, %s1539_s17 [#allocation2]   ;;  %s1310_s21 = scalar_lea.vmem %s2300_s4, %s1539_s17  }
 0x188   : > { %p1533_p13 = scmp.le.s32.totalorder %s2414_s14, 0 }
 0x189   : > { %s1966_s22 = smov (!%p1533_p13), %s1310_s21   ;;  %s1970_s24 = smov (!%p1533_p13), %s1308_s18  }
 0x18a   : > { %1401 = sbr.rel (%p1533_p13) target bundleno = 411 (0x19b), region = 127  ;;  %s1974_s25 = smov (!%p1533_p13), 0  }
 0x18b   : > { %s1978_s26 = smov (!%p1533_p13), 0  }
 0x191 LB: >> { %v1320_v19 = vld [vmem:[%s1972_s24] sm:$0xff]  ;;  %s1322_s27 = sadd.s32 1, %s1976_s25  ;;  %s1314_s26 = sadd.s32 1, %s1980_s26   ;;  %s1980_s26 = sphi %s1978_s26, %s1314_s26   ;;  %s1976_s25 = sphi %s1974_s25, %s1975_s25   ;;  %s1972_s24 = sphi %s1970_s24, %s1327_s24   ;;  %s1968_s22 = sphi %s1966_s22, %s1328_s22  }
 0x192   : >> { %1321 = vst [vmem:[%s1968_s22] sm:$0xff] %v1320_v19  ;;  %p1323_p0 = scmp.ge.s32.totalorder %s1322_s27, %s2414_s14  ;;  %p1313_p1 = scmp.ge.s32.totalorder %s1314_s26, %s2414_s14 }
 0x194   : >> { %s2450_s27 = smov (%p1323_p0, %s1322_s27), 0  ;;  %1316 = sbr.rel (!%p1313_p1) target bundleno = 401 (0x191), region = 133 }
 0x195   : >> { %s1534_s12 = sshll.u32 %s2450_s27, 3  ;;  %s1975_s25 = smov %s2450_s27  }
 0x196   : >> { %s1327_s24 = scalar_lea.vmem %s1308_s18, %s1534_s12 [#allocation2]   ;;  %s1328_s22 = scalar_lea.vmem %s1310_s21, %s1534_s12  }
 0x19b PF: > { %p10_p2 = scmp.ge.s32.totalorder %s2017_s16, 4   ;;  %s2442_s12 = smov %s1944_s13 }
 0x19c   : > { %s2443_s13 = smov %s2025_s19  ;;  %s2444_s14 = smov %s2017_s16 }
 0x19d   :  { %12 = sbr.rel (!%p10_p2) target bundleno = 2 (0x2), region = 144 }

// kernel: conv_autoencoder_forward.11
= control target key start
LH: loop header
LB: loop body
LE: loop exit
PB: predicated region body
PF: predicated region fallthrough
CT: control target
= control target key end

     0   :  { %s3342_s0 = inlined_call_operand.vmem [shape: bf16[1,144], index: 0, kind: input, shape index: {}]   ;;  %s3343_s1 = inlined_call_operand.vmem [shape: bf16[144,1568], index: 1, kind: input, shape index: {}]   ;;  %s3344_s2 = inlined_call_operand.<no memory space> [shape: f32[1,1], index: 2, kind: input, shape index: {}]   ;;  %s3345_s3 = inlined_call_operand.vmem [shape: f32[1,1568], index: 3, kind: output, shape index: {}]  }
   0x1   :  { %v8_v0 = vstv %s3344_s2 }
   0x2   :  { %9 = vst [vmem:[#allocation2] sm:$0x1] %v8_v0 }
   0x3   :  { %s2334_s14 = smov 0   ;;  %s2336_s15 = smov 0  }
   0x4   :  { %s2338_s16 = smov 0  }
   0x5 LB: > { %s1614_s2 = sadd.s32 4294967295, %s2175_s16   ;;  %s2351_s17 = sadd.s32 1, %s2175_s16   ;;  %s2175_s16 = sphi %s2338_s16, %s3371_s16   ;;  %s2171_s15 = sphi %s2336_s15, %s3370_s15   ;;  %s2167_s14 = sphi %s2334_s14, %s3369_s14  }
   0x6   : > { %s40_s18 = ssub.s32 %s2175_s16, %s2351_s17  ;;  %s43_s19 = sadd.s32 1, %s2171_s15 }
   0x7   : > { %p41_p0 = scmp.eq.s32.totalorder %s40_s18, 0  ;;  %p50_p1 = scmp.ne.s32.totalorder %s2171_s15, %s2167_s14 }
   0x8   : > { %p51_p2 = scmp.eq.s32.totalorder %s2175_s16, 0  ;;  %p101_p3 = scmp.eq.s32.totalorder %s1614_s2, 6 }
   0x9   : > { %s2362_s20 = scalar_select %p41_p0, %s2171_s15, %s43_s19  }
   0xa   : > { %p52_p4 = por %p51_p2, %p50_p1  ;;  %p2364_p5 = por %p101_p3, %p50_p1 }
   0xb   : > { %p1617_p6 = scmp.ge.s32.totalorder %s2175_s16, 7 }
   0xd   : > { %129 = sbr.rel (%p1617_p6) target bundleno = 179 (0xb3), region = 24 }
  0x14   : > { %132 = sbr.rel (!%p52_p4) target bundleno = 179 (0xb3), region = 28  ;;  %s134_s22 = sand.u32 (%p52_p4), 1, %s2171_s15  }
  0x15   : > { %s1618_s23 = sshll.u32 (%p52_p4), %s2175_s16, 1  ;;  %s1701_s24 = smul.u32 (%p52_p4), 144, %s134_s22 }
  0x16   : > { %s138_s25 = ssub.s32 (%p52_p4), 13, %s1618_s23  ;;  %s1692_s26 = sshll.u32 (%p52_p4), %s2175_s16, 3 }
  0x17   : > { %p139_p7 = scmp.lt.s32.totalorder (%p52_p4), %s138_s25, 2  ;;  %s2375_s29 = scalar_lea.vmem (%p52_p4), %s3343_s1, %s1692_s26  }
  0x18   : > { %s2379_s5 = scalar_lea.vmem (%p52_p4), [#allocation3], %s1701_s24  }
  0x1b   : > { %s3373_s25 = smov (!%p139_p7, %s138_s25), 2 }
  0x1c   : > { %s141_s30 = smul.u32 1152, %s3373_s25  ;;  %s2377_s4 = sshll.u32 %s3373_s25, 2 }
  0x1e   : > { %p1622_p8 = scmp.eq.s32.totalorder %s141_s30, 0 }
  0x1f   : > { %p149_p9 = scmp.lt.u32.totalorder (!%p1622_p8), %s2377_s4, 8 }
  0x20   : > { %148 = sbr.rel (%p1622_p8) target bundleno = 179 (0xb3), region = 32 }
  0x27   : > { %152 = sbr.rel (%p149_p9) target bundleno = 158 (0x9e), region = 36  ;;  %s2383_s6 = sand.u32 (!%p149_p9), 7, %s2377_s4  }
  0x28   : > { %p202_p10 = scmp.eq.s32.totalorder (!%p149_p9), %s2383_s6, 0  ;;  %p1623_p11 = scmp.ne.s32.totalorder (!%p149_p9), %s2383_s6, 0 }
  0x2e   : > { %205 = sbr.rel (%p1623_p11) target bundleno = 92 (0x5c), region = 51  ;;  %s206_s7 = sshrl.u32 (!%p1623_p11), %s2377_s4, 3 }
  0x2f   : > { %s2390_s8 = sshrl.u32 (!%p1623_p11), %s206_s7, 2 }
  0x30   : > { %p1624_p12 = scmp.le.s32.totalorder (!%p1623_p11), %s2390_s8, 0 }
  0x35   : > { %1487 = sbr.rel (%p1624_p12) target bundleno = 72 (0x48), region = 229  ;;  %s3347_s9 = smov (!%p1624_p12), %s2379_s5 }
  0x36   : > { %s3348_s10 = smov (!%p1624_p12), %s2375_s29  ;;  %s2399_s11 = smov (!%p1624_p12), 0  }
  0x37   : > { %s2401_s12 = smov (!%p1624_p12), 0  }
  0x3c LB: >> { %v219_v1 = vld [vmem:[%s2183_s10] sm:$0xff]  ;;  %v227_v2 = vld [vmem:[%s2183_s10 + $0x34] sm:$0xff]  ;;  %v235_v3 = vld [vmem:[%s2183_s10 + $0x68] sm:$0xff]  ;;  %s363_s13 = sadd.s32 1, %s2187_s11  ;;  %s213_s12 = sadd.s32 1, %s2191_s12   ;;  %s2191_s12 = sphi %s2401_s12, %s213_s12   ;;  %s2187_s11 = sphi %s2399_s11, %s3349_s11   ;;  %s2183_s10 = sphi %s3348_s10, %s368_s10   ;;  %s2179_s9 = sphi %s3347_s9, %s369_s9  }
  0x3d   : >> { %220 = vst [vmem:[%s2179_s9] sm:$0xff] %v219_v1  ;;  %228 = vst [vmem:[%s2179_s9 + $0x8] sm:$0xff] %v227_v2  ;;  %v243_v4 = vld [vmem:[%s2183_s10 + $0x9c] sm:$0xff]  ;;  %v251_v5 = vld [vmem:[%s2183_s10 + $0xd0] sm:$0xff]  ;;  %p364_p13 = scmp.ge.s32.totalorder %s363_s13, %s2390_s8  ;;  %p212_p0 = scmp.ge.s32.totalorder %s213_s12, %s2390_s8 }
  0x3e   : >> { %236 = vst [vmem:[%s2179_s9 + $0x10] sm:$0xff] %v235_v3  ;;  %v259_v6 = vld [vmem:[%s2183_s10 + $0x104] sm:$0xff]  ;;  %244 = vst [vmem:[%s2179_s9 + $0x18] sm:$0xff] %v243_v4  ;;  %v267_v7 = vld [vmem:[%s2183_s10 + $0x138] sm:$0xff] }
  0x3f   : >> { %252 = vst [vmem:[%s2179_s9 + $0x20] sm:$0xff] %v251_v5  ;;  %260 = vst [vmem:[%s2179_s9 + $0x28] sm:$0xff] %v259_v6  ;;  %v275_v8 = vld [vmem:[%s2183_s10 + $0x16c] sm:$0xff]  ;;  %v283_v9 = vld [vmem:[%s2183_s10 + $0x1a0] sm:$0xff]  ;;  %s3375_s13 = smov (%p364_p13, %s363_s13), 0 }
  0x40   : >> { %268 = vst [vmem:[%s2179_s9 + $0x30] sm:$0xff] %v267_v7  ;;  %276 = vst [vmem:[%s2179_s9 + $0x38] sm:$0xff] %v275_v8  ;;  %v291_v10 = vld [vmem:[%s2183_s10 + $0x1d4] sm:$0xff]  ;;  %v299_v11 = vld [vmem:[%s2183_s10 + $0x208] sm:$0xff]  ;;  %s1625_s18 = sshll.u32 %s3375_s13, 5  ;;  %s3349_s11 = smov %s3375_s13 }
  0x41   : >> { %284 = vst [vmem:[%s2179_s9 + $0x40] sm:$0xff] %v283_v9  ;;  %v307_v12 = vld [vmem:[%s2183_s10 + $0x23c] sm:$0xff]  ;;  %292 = vst [vmem:[%s2179_s9 + $0x48] sm:$0xff] %v291_v10  ;;  %v315_v13 = vld [vmem:[%s2183_s10 + $0x270] sm:$0xff]  ;;  %215 = sbr.rel (!%p212_p0) target bundleno = 60 (0x3c), region = 235 }
  0x42   : >> { %300 = vst [vmem:[%s2179_s9 + $0x50] sm:$0xff] %v299_v11  ;;  %308 = vst [vmem:[%s2179_s9 + $0x58] sm:$0xff] %v307_v12  ;;  %v323_v14 = vld [vmem:[%s2183_s10 + $0x2a4] sm:$0xff]  ;;  %v331_v15 = vld [vmem:[%s2183_s10 + $0x2d8] sm:$0xff] }
  0x43   : >> { %316 = vst [vmem:[%s2179_s9 + $0x60] sm:$0xff] %v315_v13  ;;  %324 = vst [vmem:[%s2179_s9 + $0x68] sm:$0xff] %v323_v14  ;;  %v339_v16 = vld [vmem:[%s2183_s10 + $0x30c] sm:$0xff]  ;;  %v347_v17 = vld [vmem:[%s2183_s10 + $0x340] sm:$0xff] }
  0x44   : >> { %332 = vst [vmem:[%s2179_s9 + $0x70] sm:$0xff] %v331_v15  ;;  %v355_v18 = vld [vmem:[%s2183_s10 + $0x374] sm:$0xff]  ;;  %340 = vst [vmem:[%s2179_s9 + $0x78] sm:$0xff] %v339_v16  ;;  %v357_v19 = vld [vmem:[%s2183_s10 + $0x37c] sm:$0xff] }
  0x45   : >> { %348 = vst [vmem:[%s2179_s9 + $0x80] sm:$0xff] %v347_v17  ;;  %356 = vst [vmem:[%s2179_s9 + $0x88] sm:$0xff] %v355_v18  ;;  %v359_v20 = vld [vmem:[%s2183_s10 + $0x384] sm:$0xff]  ;;  %v361_v21 = vld [vmem:[%s2183_s10 + $0x38c] sm:$0xff]  ;;  %s368_s10 = scalar_lea.vmem %s2375_s29, %s1625_s18  }
  0x46   : >> { %358 = vst [vmem:[%s2179_s9 + $0x90] sm:$0xff] %v357_v19  ;;  %360 = vst [vmem:[%s2179_s9 + $0x98] sm:$0xff] %v359_v20 }
  0x47   : >> { %362 = vst [vmem:[%s2179_s9 + $0xa0] sm:$0xff] %v361_v21  ;;  %s369_s9 = scalar_lea.vmem %s2379_s5, %s1625_s18 [#allocation3]  }
  0x48 PF: > { %s2473_s19 = sand.u32 3, %s206_s7   ;;  %s1693_s22 = sshll.u32 %s2390_s8, 9 }
  0x49   : > { %s374_s23 = sshra.s32 %s1693_s22, 4  ;;  %p1630_p1 = scmp.le.s32.totalorder %s2473_s19, 0 }
  0x4a   : > { %s2477_s24 = scalar_lea.vmem %s2375_s29, %s374_s23   ;;  %s2480_s25 = scalar_lea.vmem %s2379_s5, %s374_s23 [#allocation3]  }
  0x4b   : > { %1501 = sbr.rel (%p1630_p1) target bundleno = 92 (0x5c), region = 240  ;;  %s3350_s26 = smov (!%p1630_p1), %s2480_s25 }
  0x4c   : > { %s3351_s27 = smov (!%p1630_p1), %s2477_s24  ;;  %s2489_s28 = smov (!%p1630_p1), 0  }
  0x4d   : > { %s2491_s30 = smov (!%p1630_p1), 0  }
  0x52 LB: >> { %v390_v22 = vld [vmem:[%s2199_s27] sm:$0xff]  ;;  %v392_v23 = vld [vmem:[%s2199_s27 + $0x34] sm:$0xff]  ;;  %v394_v24 = vld [vmem:[%s2199_s27 + $0x68] sm:$0xff]  ;;  %s426_s7 = sadd.s32 1, %s2203_s28  ;;  %s384_s30 = sadd.s32 1, %s2207_s30   ;;  %s2207_s30 = sphi %s2491_s30, %s384_s30   ;;  %s2203_s28 = sphi %s2489_s28, %s3352_s28   ;;  %s2199_s27 = sphi %s3351_s27, %s431_s27   ;;  %s2195_s26 = sphi %s3350_s26, %s432_s26  }
  0x53   : >> { %391 = vst [vmem:[%s2195_s26] sm:$0xff] %v390_v22  ;;  %393 = vst [vmem:[%s2195_s26 + $0x8] sm:$0xff] %v392_v23  ;;  %v396_v25 = vld [vmem:[%s2199_s27 + $0x9c] sm:$0xff]  ;;  %v398_v26 = vld [vmem:[%s2199_s27 + $0xd0] sm:$0xff]  ;;  %p427_p2 = scmp.ge.s32.totalorder %s426_s7, %s2473_s19  ;;  %p383_p3 = scmp.ge.s32.totalorder %s384_s30, %s2473_s19 }
  0x54   : >> { %395 = vst [vmem:[%s2195_s26 + $0x10] sm:$0xff] %v394_v24  ;;  %v400_v27 = vld [vmem:[%s2199_s27 + $0x104] sm:$0xff]  ;;  %397 = vst [vmem:[%s2195_s26 + $0x18] sm:$0xff] %v396_v25  ;;  %v402_v28 = vld [vmem:[%s2199_s27 + $0x138] sm:$0xff] }
  0x55   : >> { %399 = vst [vmem:[%s2195_s26 + $0x20] sm:$0xff] %v398_v26  ;;  %401 = vst [vmem:[%s2195_s26 + $0x28] sm:$0xff] %v400_v27  ;;  %v404_v29 = vld [vmem:[%s2199_s27 + $0x16c] sm:$0xff]  ;;  %v406_v30 = vld [vmem:[%s2199_s27 + $0x1a0] sm:$0xff]  ;;  %s3377_s7 = smov (%p427_p2, %s426_s7), 0  ;;  %386 = sbr.rel (!%p383_p3) target bundleno = 82 (0x52), region = 246 }
  0x56   : >> { %403 = vst [vmem:[%s2195_s26 + $0x30] sm:$0xff] %v402_v28  ;;  %405 = vst [vmem:[%s2195_s26 + $0x38] sm:$0xff] %v404_v29  ;;  %v408_v31 = vld [vmem:[%s2199_s27 + $0x1d4] sm:$0xff]  ;;  %v410_v32 = vld [vmem:[%s2199_s27 + $0x208] sm:$0xff]  ;;  %s1631_s8 = sshll.u32 %s3377_s7, 3  ;;  %s3352_s28 = smov %s3377_s7 }
  0x57   : >> { %407 = vst [vmem:[%s2195_s26 + $0x40] sm:$0xff] %v406_v30  ;;  %v412_v33 = vld [vmem:[%s2199_s27 + $0x23c] sm:$0xff]  ;;  %409 = vst [vmem:[%s2195_s26 + $0x48] sm:$0xff] %v408_v31  ;;  %v414_v34 = vld [vmem:[%s2199_s27 + $0x270] sm:$0xff] }
  0x58   : >> { %411 = vst [vmem:[%s2195_s26 + $0x50] sm:$0xff] %v410_v32  ;;  %413 = vst [vmem:[%s2195_s26 + $0x58] sm:$0xff] %v412_v33  ;;  %v416_v35 = vld [vmem:[%s2199_s27 + $0x2a4] sm:$0xff]  ;;  %v418_v36 = vld [vmem:[%s2199_s27 + $0x2d8] sm:$0xff] }
  0x59   : >> { %415 = vst [vmem:[%s2195_s26 + $0x60] sm:$0xff] %v414_v34  ;;  %417 = vst [vmem:[%s2195_s26 + $0x68] sm:$0xff] %v416_v35  ;;  %v420_v37 = vld [vmem:[%s2199_s27 + $0x30c] sm:$0xff]  ;;  %v422_v38 = vld [vmem:[%s2199_s27 + $0x340] sm:$0xff] }
  0x5a   : >> { %419 = vst [vmem:[%s2195_s26 + $0x70] sm:$0xff] %v418_v36  ;;  %v424_v39 = vld [vmem:[%s2199_s27 + $0x374] sm:$0xff]  ;;  %421 = vst [vmem:[%s2195_s26 + $0x78] sm:$0xff] %v420_v37  ;;  %s431_s27 = scalar_lea.vmem %s2477_s24, %s1631_s8  }
  0x5b   : >> { %423 = vst [vmem:[%s2195_s26 + $0x80] sm:$0xff] %v422_v38  ;;  %425 = vst [vmem:[%s2195_s26 + $0x88] sm:$0xff] %v424_v39  ;;  %s432_s26 = scalar_lea.vmem %s2480_s25, %s1631_s8 [#allocation3]  }
  0x5c PF: > { %435 = sbr.rel (%p202_p10) target bundleno = 158 (0x9e), region = 69  ;;  %s437_s9 = ssub.s32 (!%p202_p10), %s2377_s4, %s2383_s6 }
  0x5d   : > { %s441_s10 = sshrl.u32 (!%p202_p10), %s2377_s4, 3  ;;  %s2558_s11 = scalar_lea.vmem (!%p202_p10), %s2375_s29, %s437_s9 }
  0x5e   : > { %s2561_s12 = scalar_lea.vmem (!%p202_p10), %s2379_s5, %s437_s9 [#allocation3]  ;;  %s2565_s13 = sshrl.u32 (!%p202_p10), %s441_s10, 2 }
  0x5f   : > { %p1633_p4 = scmp.le.s32.totalorder (!%p202_p10), %s2565_s13, 0 }
  0x63   : > { %1515 = sbr.rel (%p1633_p4) target bundleno = 118 (0x76), region = 251  ;;  %s3353_s18 = smov (!%p1633_p4), %s2379_s5 }
  0x64   : > { %s3354_s19 = smov (!%p1633_p4), %s2375_s29  ;;  %s2574_s22 = smov (!%p1633_p4), 0  }
  0x65   : > { %s2576_s23 = smov (!%p1633_p4), 0  }
  0x6a LB: >> { %v454_v40 = vld [vmem:[%s2215_s19] sm:$0xff]  ;;  %v462_v41 = vld [vmem:[%s2215_s19 + $0x34] sm:$0xff]  ;;  %v470_v42 = vld [vmem:[%s2215_s19 + $0x68] sm:$0xff]  ;;  %s598_s24 = sadd.s32 1, %s2219_s22  ;;  %s448_s23 = sadd.s32 1, %s2223_s23   ;;  %s2223_s23 = sphi %s2576_s23, %s448_s23   ;;  %s2219_s22 = sphi %s2574_s22, %s3355_s22   ;;  %s2215_s19 = sphi %s3354_s19, %s603_s19   ;;  %s2211_s18 = sphi %s3353_s18, %s604_s18  }
  0x6b   : >> { %455 = vst [vmem:[%s2211_s18] sm:$0xff] %v454_v40  ;;  %463 = vst [vmem:[%s2211_s18 + $0x8] sm:$0xff] %v462_v41  ;;  %v478_v43 = vld [vmem:[%s2215_s19 + $0x9c] sm:$0xff]  ;;  %v486_v44 = vld [vmem:[%s2215_s19 + $0xd0] sm:$0xff]  ;;  %p599_p6 = scmp.ge.s32.totalorder %s598_s24, %s2565_s13  ;;  %p447_p7 = scmp.ge.s32.totalorder %s448_s23, %s2565_s13 }
  0x6c   : >> { %471 = vst [vmem:[%s2211_s18 + $0x10] sm:$0xff] %v470_v42  ;;  %v494_v45 = vld [vmem:[%s2215_s19 + $0x104] sm:$0xff]  ;;  %479 = vst [vmem:[%s2211_s18 + $0x18] sm:$0xff] %v478_v43  ;;  %v502_v46 = vld [vmem:[%s2215_s19 + $0x138] sm:$0xff] }
  0x6d   : >> { %487 = vst [vmem:[%s2211_s18 + $0x20] sm:$0xff] %v486_v44  ;;  %495 = vst [vmem:[%s2211_s18 + $0x28] sm:$0xff] %v494_v45  ;;  %v510_v47 = vld [vmem:[%s2215_s19 + $0x16c] sm:$0xff]  ;;  %v518_v48 = vld [vmem:[%s2215_s19 + $0x1a0] sm:$0xff]  ;;  %s3379_s24 = smov (%p599_p6, %s598_s24), 0 }
  0x6e   : >> { %503 = vst [vmem:[%s2211_s18 + $0x30] sm:$0xff] %v502_v46  ;;  %511 = vst [vmem:[%s2211_s18 + $0x38] sm:$0xff] %v510_v47  ;;  %v526_v49 = vld [vmem:[%s2215_s19 + $0x1d4] sm:$0xff]  ;;  %v534_v50 = vld [vmem:[%s2215_s19 + $0x208] sm:$0xff]  ;;  %s1634_s25 = sshll.u32 %s3379_s24, 5  ;;  %s3355_s22 = smov %s3379_s24 }
  0x6f   : >> { %519 = vst [vmem:[%s2211_s18 + $0x40] sm:$0xff] %v518_v48  ;;  %v542_v51 = vld [vmem:[%s2215_s19 + $0x23c] sm:$0xff]  ;;  %527 = vst [vmem:[%s2211_s18 + $0x48] sm:$0xff] %v526_v49  ;;  %v550_v52 = vld [vmem:[%s2215_s19 + $0x270] sm:$0xff]  ;;  %450 = sbr.rel (!%p447_p7) target bundleno = 106 (0x6a), region = 257 }
  0x70   : >> { %535 = vst [vmem:[%s2211_s18 + $0x50] sm:$0xff] %v534_v50  ;;  %543 = vst [vmem:[%s2211_s18 + $0x58] sm:$0xff] %v542_v51  ;;  %v558_v53 = vld [vmem:[%s2215_s19 + $0x2a4] sm:$0xff]  ;;  %v566_v54 = vld [vmem:[%s2215_s19 + $0x2d8] sm:$0xff] }
  0x71   : >> { %551 = vst [vmem:[%s2211_s18 + $0x60] sm:$0xff] %v550_v52  ;;  %559 = vst [vmem:[%s2211_s18 + $0x68] sm:$0xff] %v558_v53  ;;  %v574_v55 = vld [vmem:[%s2215_s19 + $0x30c] sm:$0xff]  ;;  %v582_v56 = vld [vmem:[%s2215_s19 + $0x340] sm:$0xff] }
  0x72   : >> { %567 = vst [vmem:[%s2211_s18 + $0x70] sm:$0xff] %v566_v54  ;;  %v590_v57 = vld [vmem:[%s2215_s19 + $0x374] sm:$0xff]  ;;  %575 = vst [vmem:[%s2211_s18 + $0x78] sm:$0xff] %v574_v55  ;;  %v592_v58 = vld [vmem:[%s2215_s19 + $0x37c] sm:$0xff] }
  0x73   : >> { %583 = vst [vmem:[%s2211_s18 + $0x80] sm:$0xff] %v582_v56  ;;  %591 = vst [vmem:[%s2211_s18 + $0x88] sm:$0xff] %v590_v57  ;;  %v594_v59 = vld [vmem:[%s2215_s19 + $0x384] sm:$0xff]  ;;  %v596_v60 = vld [vmem:[%s2215_s19 + $0x38c] sm:$0xff]  ;;  %s603_s19 = scalar_lea.vmem %s2375_s29, %s1634_s25  }
  0x74   : >> { %593 = vst [vmem:[%s2211_s18 + $0x90] sm:$0xff] %v592_v58  ;;  %595 = vst [vmem:[%s2211_s18 + $0x98] sm:$0xff] %v594_v59 }
  0x75   : >> { %597 = vst [vmem:[%s2211_s18 + $0xa0] sm:$0xff] %v596_v60  ;;  %s604_s18 = scalar_lea.vmem %s2379_s5, %s1634_s25 [#allocation3]  }
  0x76 PF: > { %s2648_s26 = sand.u32 3, %s441_s10   ;;  %s1695_s27 = sshll.u32 %s2565_s13, 9 }
  0x77   : > { %s609_s28 = sshra.s32 %s1695_s27, 4  ;;  %p1639_p8 = scmp.le.s32.totalorder %s2648_s26, 0 }
  0x78   : > { %s2652_s30 = scalar_lea.vmem %s2375_s29, %s609_s28   ;;  %s2655_s7 = scalar_lea.vmem %s2379_s5, %s609_s28 [#allocation3]  }
  0x79   : > { %1529 = sbr.rel (%p1639_p8) target bundleno = 138 (0x8a), region = 262  ;;  %s3356_s8 = smov (!%p1639_p8), %s2655_s7 }
  0x7a   : > { %s3357_s9 = smov (!%p1639_p8), %s2652_s30  ;;  %s2664_s18 = smov (!%p1639_p8), 0  }
  0x7b   : > { %s2666_s19 = smov (!%p1639_p8), 0  }
  0x80 LB: >> { %v625_v61 = vld [vmem:[%s2231_s9] sm:$0xff]  ;;  %v627_v62 = vld [vmem:[%s2231_s9 + $0x34] sm:$0xff]  ;;  %v629_v63 = vld [vmem:[%s2231_s9 + $0x68] sm:$0xff]  ;;  %s661_s10 = sadd.s32 1, %s2235_s18  ;;  %s619_s19 = sadd.s32 1, %s2239_s19   ;;  %s2239_s19 = sphi %s2666_s19, %s619_s19   ;;  %s2235_s18 = sphi %s2664_s18, %s3358_s18   ;;  %s2231_s9 = sphi %s3357_s9, %s666_s9   ;;  %s2227_s8 = sphi %s3356_s8, %s667_s8  }
  0x81   : >> { %626 = vst [vmem:[%s2227_s8] sm:$0xff] %v625_v61  ;;  %628 = vst [vmem:[%s2227_s8 + $0x8] sm:$0xff] %v627_v62  ;;  %v631_v0 = vld [vmem:[%s2231_s9 + $0x9c] sm:$0xff]  ;;  %v633_v1 = vld [vmem:[%s2231_s9 + $0xd0] sm:$0xff]  ;;  %p662_p9 = scmp.ge.s32.totalorder %s661_s10, %s2648_s26  ;;  %p618_p10 = scmp.ge.s32.totalorder %s619_s19, %s2648_s26 }
  0x82   : >> { %630 = vst [vmem:[%s2227_s8 + $0x10] sm:$0xff] %v629_v63  ;;  %v635_v2 = vld [vmem:[%s2231_s9 + $0x104] sm:$0xff]  ;;  %632 = vst [vmem:[%s2227_s8 + $0x18] sm:$0xff] %v631_v0  ;;  %v637_v3 = vld [vmem:[%s2231_s9 + $0x138] sm:$0xff] }
  0x83   : >> { %634 = vst [vmem:[%s2227_s8 + $0x20] sm:$0xff] %v633_v1  ;;  %636 = vst [vmem:[%s2227_s8 + $0x28] sm:$0xff] %v635_v2  ;;  %v639_v4 = vld [vmem:[%s2231_s9 + $0x16c] sm:$0xff]  ;;  %v641_v5 = vld [vmem:[%s2231_s9 + $0x1a0] sm:$0xff]  ;;  %s3381_s10 = smov (%p662_p9, %s661_s10), 0  ;;  %621 = sbr.rel (!%p618_p10) target bundleno = 128 (0x80), region = 268 }
  0x84   : >> { %638 = vst [vmem:[%s2227_s8 + $0x30] sm:$0xff] %v637_v3  ;;  %640 = vst [vmem:[%s2227_s8 + $0x38] sm:$0xff] %v639_v4  ;;  %v643_v6 = vld [vmem:[%s2231_s9 + $0x1d4] sm:$0xff]  ;;  %v645_v7 = vld [vmem:[%s2231_s9 + $0x208] sm:$0xff]  ;;  %s1640_s13 = sshll.u32 %s3381_s10, 3  ;;  %s3358_s18 = smov %s3381_s10 }
  0x85   : >> { %642 = vst [vmem:[%s2227_s8 + $0x40] sm:$0xff] %v641_v5  ;;  %v647_v8 = vld [vmem:[%s2231_s9 + $0x23c] sm:$0xff]  ;;  %644 = vst [vmem:[%s2227_s8 + $0x48] sm:$0xff] %v643_v6  ;;  %v649_v9 = vld [vmem:[%s2231_s9 + $0x270] sm:$0xff] }
  0x86   : >> { %646 = vst [vmem:[%s2227_s8 + $0x50] sm:$0xff] %v645_v7  ;;  %648 = vst [vmem:[%s2227_s8 + $0x58] sm:$0xff] %v647_v8  ;;  %v651_v10 = vld [vmem:[%s2231_s9 + $0x2a4] sm:$0xff]  ;;  %v653_v11 = vld [vmem:[%s2231_s9 + $0x2d8] sm:$0xff] }
  0x87   : >> { %650 = vst [vmem:[%s2227_s8 + $0x60] sm:$0xff] %v649_v9  ;;  %652 = vst [vmem:[%s2227_s8 + $0x68] sm:$0xff] %v651_v10  ;;  %v655_v12 = vld [vmem:[%s2231_s9 + $0x30c] sm:$0xff]  ;;  %v657_v13 = vld [vmem:[%s2231_s9 + $0x340] sm:$0xff] }
  0x88   : >> { %654 = vst [vmem:[%s2227_s8 + $0x70] sm:$0xff] %v653_v11  ;;  %v659_v14 = vld [vmem:[%s2231_s9 + $0x374] sm:$0xff]  ;;  %656 = vst [vmem:[%s2227_s8 + $0x78] sm:$0xff] %v655_v12  ;;  %s666_s9 = scalar_lea.vmem %s2652_s30, %s1640_s13  }
  0x89   : >> { %658 = vst [vmem:[%s2227_s8 + $0x80] sm:$0xff] %v657_v13  ;;  %660 = vst [vmem:[%s2227_s8 + $0x88] sm:$0xff] %v659_v14  ;;  %s667_s8 = scalar_lea.vmem %s2655_s7, %s1640_s13 [#allocation3]  }
  0x8a PF: > { %s2305_s22 = smov 0  }
  0x8b   : > { %s2728_s23 = sshllo.u32 %s2305_s22, %s2383_s6 }
  0x8c   : > { %v677_v15 = vld [vmem:[%s2558_s11] sm:%s2728_s23]  ;;  %v679_v16 = vld [vmem:[%s2558_s11 + $0x34] sm:%s2728_s23] }
  0x8d   : > { %678 = vst [vmem:[%s2561_s12] sm:%s2728_s23] %v677_v15  ;;  %680 = vst [vmem:[%s2561_s12 + $0x8] sm:%s2728_s23] %v679_v16 }
  0x8e   : > { %v681_v17 = vld [vmem:[%s2558_s11 + $0x68] sm:%s2728_s23]  ;;  %v683_v18 = vld [vmem:[%s2558_s11 + $0x9c] sm:%s2728_s23] }
  0x8f   : > { %682 = vst [vmem:[%s2561_s12 + $0x10] sm:%s2728_s23] %v681_v17  ;;  %684 = vst [vmem:[%s2561_s12 + $0x18] sm:%s2728_s23] %v683_v18 }
  0x90   : > { %v685_v19 = vld [vmem:[%s2558_s11 + $0xd0] sm:%s2728_s23]  ;;  %v687_v20 = vld [vmem:[%s2558_s11 + $0x104] sm:%s2728_s23] }
  0x91   : > { %686 = vst [vmem:[%s2561_s12 + $0x20] sm:%s2728_s23] %v685_v19  ;;  %688 = vst [vmem:[%s2561_s12 + $0x28] sm:%s2728_s23] %v687_v20 }
  0x92   : > { %v689_v21 = vld [vmem:[%s2558_s11 + $0x138] sm:%s2728_s23]  ;;  %v691_v22 = vld [vmem:[%s2558_s11 + $0x16c] sm:%s2728_s23] }
  0x93   : > { %690 = vst [vmem:[%s2561_s12 + $0x30] sm:%s2728_s23] %v689_v21  ;;  %692 = vst [vmem:[%s2561_s12 + $0x38] sm:%s2728_s23] %v691_v22 }
  0x94   : > { %v693_v23 = vld [vmem:[%s2558_s11 + $0x1a0] sm:%s2728_s23]  ;;  %v695_v24 = vld [vmem:[%s2558_s11 + $0x1d4] sm:%s2728_s23] }
  0x95   : > { %694 = vst [vmem:[%s2561_s12 + $0x40] sm:%s2728_s23] %v693_v23  ;;  %696 = vst [vmem:[%s2561_s12 + $0x48] sm:%s2728_s23] %v695_v24 }
  0x96   : > { %v697_v25 = vld [vmem:[%s2558_s11 + $0x208] sm:%s2728_s23]  ;;  %v699_v26 = vld [vmem:[%s2558_s11 + $0x23c] sm:%s2728_s23] }
  0x97   : > { %698 = vst [vmem:[%s2561_s12 + $0x50] sm:%s2728_s23] %v697_v25  ;;  %700 = vst [vmem:[%s2561_s12 + $0x58] sm:%s2728_s23] %v699_v26 }
  0x98   : > { %v701_v27 = vld [vmem:[%s2558_s11 + $0x270] sm:%s2728_s23]  ;;  %v703_v28 = vld [vmem:[%s2558_s11 + $0x2a4] sm:%s2728_s23] }
  0x99   : > { %702 = vst [vmem:[%s2561_s12 + $0x60] sm:%s2728_s23] %v701_v27  ;;  %704 = vst [vmem:[%s2561_s12 + $0x68] sm:%s2728_s23] %v703_v28 }
  0x9a   : > { %v705_v29 = vld [vmem:[%s2558_s11 + $0x2d8] sm:%s2728_s23]  ;;  %v707_v30 = vld [vmem:[%s2558_s11 + $0x30c] sm:%s2728_s23] }
  0x9b   : > { %706 = vst [vmem:[%s2561_s12 + $0x70] sm:%s2728_s23] %v705_v29  ;;  %708 = vst [vmem:[%s2561_s12 + $0x78] sm:%s2728_s23] %v707_v30 }
  0x9c   : > { %v709_v31 = vld [vmem:[%s2558_s11 + $0x340] sm:%s2728_s23]  ;;  %v711_v32 = vld [vmem:[%s2558_s11 + $0x374] sm:%s2728_s23] }
  0x9d   : > { %710 = vst [vmem:[%s2561_s12 + $0x80] sm:%s2728_s23] %v709_v31  ;;  %712 = vst [vmem:[%s2561_s12 + $0x88] sm:%s2728_s23] %v711_v32 }
  0x9e PF: > { %p1642_p11 = scmp.ge.u32.totalorder %s2377_s4, 8 }
  0x9f   : > { %s2306_s6 = smov (!%p1642_p11), 0  }
  0xa0   : > { %155 = sbr.rel (%p1642_p11) target bundleno = 179 (0xb3), region = 40  ;;  %s2804_s11 = sshllo.u32 (!%p1642_p11), %s2306_s6, %s2377_s4 }
  0xa1   : > { %v165_v33 = vld [vmem:[%s2375_s29] sm:%s2804_s11] (!%p1642_p11)  ;;  %v167_v34 = vld [vmem:[%s2375_s29 + $0x34] sm:%s2804_s11] (!%p1642_p11) }
  0xa2   : > { %166 = vst [vmem:[%s2379_s5] sm:%s2804_s11] (!%p1642_p11), %v165_v33  ;;  %168 = vst [vmem:[%s2379_s5 + $0x8] sm:%s2804_s11] (!%p1642_p11), %v167_v34 }
  0xa3   : > { %v169_v35 = vld [vmem:[%s2375_s29 + $0x68] sm:%s2804_s11] (!%p1642_p11)  ;;  %v171_v36 = vld [vmem:[%s2375_s29 + $0x9c] sm:%s2804_s11] (!%p1642_p11) }
  0xa4   : > { %170 = vst [vmem:[%s2379_s5 + $0x10] sm:%s2804_s11] (!%p1642_p11), %v169_v35  ;;  %172 = vst [vmem:[%s2379_s5 + $0x18] sm:%s2804_s11] (!%p1642_p11), %v171_v36 }
  0xa5   : > { %v173_v37 = vld [vmem:[%s2375_s29 + $0xd0] sm:%s2804_s11] (!%p1642_p11)  ;;  %v175_v38 = vld [vmem:[%s2375_s29 + $0x104] sm:%s2804_s11] (!%p1642_p11) }
  0xa6   : > { %174 = vst [vmem:[%s2379_s5 + $0x20] sm:%s2804_s11] (!%p1642_p11), %v173_v37  ;;  %176 = vst [vmem:[%s2379_s5 + $0x28] sm:%s2804_s11] (!%p1642_p11), %v175_v38 }
  0xa7   : > { %v177_v39 = vld [vmem:[%s2375_s29 + $0x138] sm:%s2804_s11]  ;;  %v179_v40 = vld [vmem:[%s2375_s29 + $0x16c] sm:%s2804_s11] }
  0xa8   : > { %178 = vst [vmem:[%s2379_s5 + $0x30] sm:%s2804_s11] %v177_v39  ;;  %180 = vst [vmem:[%s2379_s5 + $0x38] sm:%s2804_s11] %v179_v40 }
  0xa9   : > { %v181_v41 = vld [vmem:[%s2375_s29 + $0x1a0] sm:%s2804_s11]  ;;  %v183_v42 = vld [vmem:[%s2375_s29 + $0x1d4] sm:%s2804_s11] }
  0xaa   : > { %182 = vst [vmem:[%s2379_s5 + $0x40] sm:%s2804_s11] %v181_v41  ;;  %184 = vst [vmem:[%s2379_s5 + $0x48] sm:%s2804_s11] %v183_v42 }
  0xab   : > { %v185_v43 = vld [vmem:[%s2375_s29 + $0x208] sm:%s2804_s11]  ;;  %v187_v44 = vld [vmem:[%s2375_s29 + $0x23c] sm:%s2804_s11] }
  0xac   : > { %186 = vst [vmem:[%s2379_s5 + $0x50] sm:%s2804_s11] %v185_v43  ;;  %188 = vst [vmem:[%s2379_s5 + $0x58] sm:%s2804_s11] %v187_v44 }
  0xad   : > { %v189_v45 = vld [vmem:[%s2375_s29 + $0x270] sm:%s2804_s11]  ;;  %v191_v46 = vld [vmem:[%s2375_s29 + $0x2a4] sm:%s2804_s11] }
  0xae   : > { %190 = vst [vmem:[%s2379_s5 + $0x60] sm:%s2804_s11] %v189_v45  ;;  %192 = vst [vmem:[%s2379_s5 + $0x68] sm:%s2804_s11] %v191_v46 }
  0xaf   : > { %v193_v47 = vld [vmem:[%s2375_s29 + $0x2d8] sm:%s2804_s11]  ;;  %v195_v48 = vld [vmem:[%s2375_s29 + $0x30c] sm:%s2804_s11] }
  0xb0   : > { %194 = vst [vmem:[%s2379_s5 + $0x70] sm:%s2804_s11] %v193_v47  ;;  %196 = vst [vmem:[%s2379_s5 + $0x78] sm:%s2804_s11] %v195_v48 }
  0xb1   : > { %v197_v49 = vld [vmem:[%s2375_s29 + $0x340] sm:%s2804_s11]  ;;  %v199_v50 = vld [vmem:[%s2375_s29 + $0x374] sm:%s2804_s11] }
  0xb2   : > { %198 = vst [vmem:[%s2379_s5 + $0x80] sm:%s2804_s11] %v197_v49  ;;  %200 = vst [vmem:[%s2379_s5 + $0x88] sm:%s2804_s11] %v199_v50 }
  0xb3 PF: > { %p1643_p12 = scmp.ge.s32.totalorder %s2175_s16, 1  ;;  %p715_p13 = scmp.lt.s32.totalorder %s2175_s16, 8 }
  0xb5   : > { %p716_p0 = pnand %p1643_p12, %p715_p13 }
  0xb6   : > { %s722_s4 = sand.u32 (!%p716_p0), 1, %s2167_s14   ;;  %v1645_v51 = vld.sshfl [vmem:[%s3342_s0] sm:$0x11 pattern:$0x75316420] (!%p716_p0)  ;;  %v780_v52 = vlaneseq (!%p716_p0)  ;;  %v2308_v57 = vmov (!%p716_p0), 0  }
  0xb7   : > { %719 = sbr.rel (%p716_p0) target bundleno = 643 (0x283), region = 94  ;;  %v774_v53 = vld [vmem:[#allocation2] sm:$0x1] (!%p716_p0)  ;;  %v2307_v55 = vmov (!%p716_p0), 1966171168   ;;  %1989 = vset.pattern.permute.xlu0 (!%p716_p0), %v2308_v57  ;;  %v792_v59 = vcombine.high (!%p716_p0), %v1645_v51, %v1645_v51  ;;  %vm898_vm0 = vcmask (!%p716_p0), 130048  }
  0xb8   : > { %s1702_s29 = smul.u32 (!%p716_p0), 144, %s722_s4  ;;  %v781_v54 = vshrl.u32 (!%p716_p0), %v780_v52, 7  ;;  %v794_v56 = vunpack.c.l.s4 (!%p716_p0), %v2307_v55  ;;  %777 = vperm.xlu0 (!%p716_p0), %1989, %v774_v53   ;;  %s1644_s25 = sshll.u32 (!%p716_p0), %s722_s4, 1  ;;  %vm977_vm1 = vcmp.lt.s32.totalorder (!%p716_p0), %v780_v52, 256 }
  0xb9   : > { %s2916_s26 = scalar_lea.vmem (!%p716_p0), [#allocation4], %s1644_s25  }
  0xba   : > { %s2887_s5 = scalar_lea.vmem (!%p716_p0), [#allocation3], %s1702_s29  ;;  %v795_v60 = vunpack.c.0.s8 (!%p716_p0), %v794_v56  ;;  %v782_v17 = vsub.s32 (!%p716_p0), 0, %v781_v54 }
  0xbb   : > { %v1990_v58 = vld [vmem:[%s2887_s5 + $0x4] ss:$8 sps:$4 sm:$0xff] (!%p716_p0)   ;;  %v1992_v61 = vld [vmem:[%s2887_s5] ss:$8 sps:$4 sm:$0xff] (!%p716_p0)   ;;  %v1993_v62 = vld [vmem:[%s2887_s5 + $0x14] ss:$8 sps:$4 sm:$0xff] (!%p716_p0)  }
  0xbc   : > { %902 = vmatprep.subr.bf16.mxu0 (!%p716_p0), %v1990_v58  ;;  %v2892_v63 = vsub.s32 (!%p716_p0), %v795_v60, %v781_v54  ;;  %v1995_v0 = vld [vmem:[%s2887_s5 + $0x10] ss:$8 sps:$4 sm:$0xff] (!%p716_p0)   ;;  %v1996_v1 = vld [vmem:[%s2887_s5 + $0x24] ss:$8 sps:$4 sm:$0xff] (!%p716_p0)   ;;  %v1998_v3 = vld [vmem:[%s2887_s5 + $0x20] ss:$8 sps:$4 sm:$0xff] (!%p716_p0)  }
  0xbd   : > { %903 = vmatpush1.bf16.msra.mxu0 (!%p716_p0), %v1992_v61  ;;  %v1999_v4 = vld [vmem:[%s2887_s5 + $0x34] ss:$8 sps:$4 sm:$0xff] (!%p716_p0)   ;;  %v2001_v5 = vld [vmem:[%s2887_s5 + $0x30] ss:$8 sps:$4 sm:$0xff] (!%p716_p0)   ;;  %v2002_v6 = vld [vmem:[%s2887_s5 + $0x44] ss:$8 sps:$4 sm:$0xff] (!%p716_p0)  }
  0xbe   : > { %904 = vmatprep.subr.bf16.mxu0 %v1993_v62  ;;  %v806_v2 = vrot.slane %v792_v59, %v2892_v63  ;;  %v2004_v7 = vld [vmem:[%s2887_s5 + $0x40] ss:$8 sps:$4 sm:$0xff]   ;;  %v2005_v8 = vld [vmem:[%s2887_s5 + $0x54] ss:$8 sps:$4 sm:$0xff]   ;;  %v2007_v9 = vld [vmem:[%s2887_s5 + $0x50] ss:$8 sps:$4 sm:$0xff]   ;;  %v799_v16 = vrot.slane %v1645_v51, %v2892_v63 }
  0xbf   : > { %v2008_v10 = vld [vmem:[%s2887_s5 + $0x64] ss:$8 sps:$4 sm:$0xff]   ;;  %v2010_v11 = vld [vmem:[%s2887_s5 + $0x60] ss:$8 sps:$4 sm:$0xff]   ;;  %v2011_v12 = vld [vmem:[%s2887_s5 + $0x74] ss:$8 sps:$4 sm:$0xff]  }
  0xc0   : > { %1664 = vmatprep.mubr.msk.bf16.mxu0 %vm898_vm0, %v806_v2  ;;  %v2013_v13 = vld [vmem:[%s2887_s5 + $0x70] ss:$8 sps:$4 sm:$0xff]   ;;  %v2014_v14 = vld [vmem:[%s2887_s5 + $0x84] ss:$8 sps:$4 sm:$0xff]   ;;  %v2016_v15 = vld [vmem:[%s2887_s5 + $0x80] ss:$8 sps:$4 sm:$0xff]  }
  0xc1   : > { %905 = vmatpush1.bf16.msra.mxu0 %v1995_v0  ;;  %s1666_s27 = sshll.u32 (%p2364_p5), %s1614_s2, 1 }
  0xc2   : > { %906 = vmatprep.subr.bf16.mxu0 %v1996_v1  ;;  %s988_s28 = ssub.s32 (%p2364_p5), 13, %s1666_s27  ;;  %s2926_s7 = scalar_lea.vmem (%p2364_p5), %s3345_s3, %s1666_s27  }
  0xc3   : > { %p989_p1 = scmp.lt.s32.totalorder (%p2364_p5), %s988_s28, 2 }
  0xc5   : > { %907 = vmatpush1.bf16.msra.mxu0 %v1998_v3 }
  0xc6   : > { %908 = vmatprep.subr.bf16.mxu0 %v1999_v4 }
  0xc9   : > { %909 = vmatpush1.bf16.msra.mxu0 %v2001_v5 }
  0xca   : > { %910 = vmatprep.subr.bf16.mxu0 %v2002_v6 }
  0xcd   : > { %911 = vmatpush1.bf16.msra.mxu0 %v2004_v7 }
  0xce   : > { %912 = vmatprep.subr.bf16.mxu0 %v2005_v8 }
  0xd1   : > { %913 = vmatpush1.bf16.msra.mxu0 %v2007_v9 }
  0xd2   : > { %914 = vmatprep.subr.bf16.mxu0 %v2008_v10 }
  0xd5   : > { %915 = vmatpush1.bf16.msra.mxu0 %v2010_v11 }
  0xd6   : > { %916 = vmatprep.subr.bf16.mxu0 %v2011_v12 }
  0xd9   : > { %917 = vmatpush1.bf16.msra.mxu0 %v2013_v13 }
  0xda   : > { %918 = vmatprep.subr.bf16.mxu0 %v2014_v14 }
  0xdd   : > { %919 = vmatpush1.bf16.msra.mxu0 %v2016_v15 }
  0xe0   : > { %935 = vmatmul.mubr.bf16.vlgmr.msra.gmra.mrb[0].mxu0 %v799_v16 }
 0x137   : > { %v778_v18 = vpop.permute.xlu0 %777 }
 0x138   : > { %v783_v19 = vrot.slane %v778_v18, %v782_v17 }
 0x1b3   : > { %v936_v20 = vpop.f32.mrb[0].mxu0 }
 0x1b4   : > { %v937_v21 = vadd.f32 %v936_v20, %v783_v19  ;;  %v938_v22 = vpop.f32.mrb[1].mxu0 }
 0x1b5   : > { %v939_v23 = vadd.f32 %v938_v22, %v783_v19  ;;  %v940_v24 = vpop.f32.mrb[2].mxu0 }
 0x1b6   : > { %v943_v25 = vsub.f32 0.0, %v937_v21  ;;  %v941_v26 = vpop.f32.mrb[3].mxu0 }
 0x1b7   : > { %v944_v27 = vsub.f32 0.0, %v939_v23 }
 0x1b8   : > { %v945_v28 = vmul.f32 1.442695, %v943_v25 }
 0x1b9   : > { %v947_v29 = vmul.f32 1.442695, %v944_v27 }
 0x1ba   : > { %2017 = vpow2.f32 %v945_v28 }
 0x1bb   : > { %2019 = vpow2.f32 %v947_v29 }
 0x1c4   : > { %v2018_v30 = vpop.eup %2017 }
 0x1c5   : > { %v2020_v31 = vpop.eup %2019  ;;  %v949_v32 = vadd.f32 1.0, %v2018_v30 }
 0x1c6   : > { %v950_v33 = vadd.f32 1.0, %v2020_v31 }
 0x1c7   : > { %2021 = vrcp.f32 %v949_v32 }
 0x1c8   : > { %2023 = vrcp.f32 %v950_v33 }
 0x1d1   : > { %v2022_v34 = vpop.eup %2021 }
 0x1d2   : > { %v2024_v35 = vpop.eup %2023  ;;  %v953_v36 = vmax.f32 %v2022_v34, 0.0 }
 0x1d3   : > { %v954_v37 = vmax.f32 %v2024_v35, 0.0 }
 0x1d4   : > { %v955_v38 = vmin.f32 %v953_v36, 1.0 }
 0x1d5   : > { %v956_v39 = vmin.f32 %v954_v37, 1.0 }
 0x1d7   : > { %v959_v40 = vcombine.low %v955_v38, %v956_v39  ;;  %986 = sbr.rel (!%p2364_p5) target bundleno = 643 (0x283), region = 102 }
 0x1d9   : > { %v966_v41 = vrot.slane %v959_v40, %v2892_v63 }
 0x1db   : > { %v973_v42 = vrot.slane %v966_v41, %v2892_v63 }
 0x1dd   : > { %979 = vst.msk [vmem:[%s2916_s26] sm:$0x3] %vm977_vm1, %v973_v42 }
 0x1de   : > { %s3383_s28 = smov (!%p989_p1, %s988_s28), 2 }
 0x1df   : > { %s1667_s8 = sshll.u32 %s3383_s28, 4 }
 0x1e0   : > { %p1669_p2 = scmp.eq.s32.totalorder %s1667_s8, 0 }
 0x1e1   : > { %p997_p3 = scmp.lt.u32.totalorder (!%p1669_p2), %s3383_s28, 8 }
 0x1e2   : > { %996 = sbr.rel (%p1669_p2) target bundleno = 643 (0x283), region = 106 }
 0x1e9   : > { %1000 = sbr.rel (%p997_p3) target bundleno = 634 (0x27a), region = 110  ;;  %s2933_s21 = sand.u32 (!%p997_p3), 7, %s3383_s28  }
 0x1ea   : > { %p1016_p5 = scmp.eq.s32.totalorder (!%p997_p3), %s2933_s21, 0  ;;  %p1670_p4 = scmp.ne.s32.totalorder (!%p997_p3), %s2933_s21, 0 }
 0x1f0   : > { %1019 = sbr.rel (%p1670_p4) target bundleno = 563 (0x233), region = 125  ;;  %s1020_s16 = sshrl.u32 (!%p1670_p4), %s3383_s28, 3 }
 0x1f1   : > { %s2940_s2 = sshrl.u32 (!%p1670_p4), %s1020_s16, 6 }
 0x1f2   : > { %p1671_p6 = scmp.le.s32.totalorder (!%p1670_p4), %s2940_s2, 0 }
 0x1f7   : > { %1543 = sbr.rel (%p1671_p6) target bundleno = 543 (0x21f), region = 273  ;;  %s3359_s9 = smov (!%p1671_p6), %s2926_s7 }
 0x1f8   : > { %s3360_s18 = smov (!%p1671_p6), %s2916_s26  ;;  %s2949_s19 = smov (!%p1671_p6), 0  }
 0x1f9   : > { %s2951_s10 = smov (!%p1671_p6), 0  }
 0x1fe LB: >> { %v1033_v43 = vld [vmem:[%s2247_s18] sm:$0xff]  ;;  %v1035_v44 = vld [vmem:[%s2247_s18 + $0x8] sm:$0xff]  ;;  %v1037_v45 = vld [vmem:[%s2247_s18 + $0x10] sm:$0xff]  ;;  %s1161_s13 = sadd.s32 1, %s2251_s19  ;;  %s1027_s10 = sadd.s32 1, %s2255_s10   ;;  %s2255_s10 = sphi %s2951_s10, %s1027_s10   ;;  %s2251_s19 = sphi %s2949_s19, %s3363_s19   ;;  %s2247_s18 = sphi %s3360_s18, %s3362_s18   ;;  %s2243_s9 = sphi %s3359_s9, %s3361_s9  }
 0x1ff   : >> { %1034 = vst [vmem:[%s2243_s9] sm:$0xff] %v1033_v43  ;;  %1036 = vst [vmem:[%s2243_s9 + $0x8] sm:$0xff] %v1035_v44  ;;  %v1039_v46 = vld [vmem:[%s2247_s18 + $0x18] sm:$0xff]  ;;  %v1041_v47 = vld [vmem:[%s2247_s18 + $0x20] sm:$0xff]  ;;  %p1162_p7 = scmp.ge.s32.totalorder %s1161_s13, %s2940_s2  ;;  %p1026_p8 = scmp.ge.s32.totalorder %s1027_s10, %s2940_s2 }
 0x200   : >> { %1038 = vst [vmem:[%s2243_s9 + $0x10] sm:$0xff] %v1037_v45  ;;  %v1043_v48 = vld [vmem:[%s2247_s18 + $0x28] sm:$0xff]  ;;  %1040 = vst [vmem:[%s2243_s9 + $0x18] sm:$0xff] %v1039_v46  ;;  %v1045_v49 = vld [vmem:[%s2247_s18 + $0x30] sm:$0xff] }
 0x201   : >> { %1042 = vst [vmem:[%s2243_s9 + $0x20] sm:$0xff] %v1041_v47  ;;  %1044 = vst [vmem:[%s2243_s9 + $0x28] sm:$0xff] %v1043_v48  ;;  %v1047_v50 = vld [vmem:[%s2247_s18 + $0x38] sm:$0xff]  ;;  %v1049_v51 = vld [vmem:[%s2247_s18 + $0x40] sm:$0xff]  ;;  %s3385_s13 = smov (%p1162_p7, %s1161_s13), 0 }
 0x202   : >> { %1046 = vst [vmem:[%s2243_s9 + $0x30] sm:$0xff] %v1045_v49  ;;  %1048 = vst [vmem:[%s2243_s9 + $0x38] sm:$0xff] %v1047_v50  ;;  %v1051_v52 = vld [vmem:[%s2247_s18 + $0x48] sm:$0xff]  ;;  %v1053_v53 = vld [vmem:[%s2247_s18 + $0x50] sm:$0xff]  ;;  %s1672_s22 = sshll.u32 %s3385_s13, 9  ;;  %s3363_s19 = smov %s3385_s13 }
 0x203   : >> { %1050 = vst [vmem:[%s2243_s9 + $0x40] sm:$0xff] %v1049_v51  ;;  %v1055_v54 = vld [vmem:[%s2247_s18 + $0x58] sm:$0xff]  ;;  %1052 = vst [vmem:[%s2243_s9 + $0x48] sm:$0xff] %v1051_v52  ;;  %v1057_v55 = vld [vmem:[%s2247_s18 + $0x60] sm:$0xff]  ;;  %s3007_s23 = scalar_lea.vmem %s2916_s26, %s1672_s22 [#allocation4]   ;;  %s3010_s6 = scalar_lea.vmem %s2926_s7, %s1672_s22  }
 0x204   : >> { %1054 = vst [vmem:[%s2243_s9 + $0x50] sm:$0xff] %v1053_v53  ;;  %1056 = vst [vmem:[%s2243_s9 + $0x58] sm:$0xff] %v1055_v54  ;;  %v1059_v56 = vld [vmem:[%s2247_s18 + $0x68] sm:$0xff]  ;;  %v1061_v57 = vld [vmem:[%s2247_s18 + $0x70] sm:$0xff] }
 0x205   : >> { %1058 = vst [vmem:[%s2243_s9 + $0x60] sm:$0xff] %v1057_v55  ;;  %1060 = vst [vmem:[%s2243_s9 + $0x68] sm:$0xff] %v1059_v56  ;;  %v1063_v58 = vld [vmem:[%s2247_s18 + $0x78] sm:$0xff]  ;;  %v1065_v59 = vld [vmem:[%s2247_s18 + $0x80] sm:$0xff] }
 0x206   : >> { %1062 = vst [vmem:[%s2243_s9 + $0x70] sm:$0xff] %v1061_v57  ;;  %v1067_v60 = vld [vmem:[%s2247_s18 + $0x88] sm:$0xff]  ;;  %1064 = vst [vmem:[%s2243_s9 + $0x78] sm:$0xff] %v1063_v58  ;;  %v1069_v61 = vld [vmem:[%s2247_s18 + $0x90] sm:$0xff] }
 0x207   : >> { %1066 = vst [vmem:[%s2243_s9 + $0x80] sm:$0xff] %v1065_v59  ;;  %1068 = vst [vmem:[%s2243_s9 + $0x88] sm:$0xff] %v1067_v60  ;;  %v1071_v62 = vld [vmem:[%s2247_s18 + $0x98] sm:$0xff]  ;;  %v1073_v63 = vld [vmem:[%s2247_s18 + $0xa0] sm:$0xff] }
 0x208   : >> { %1070 = vst [vmem:[%s2243_s9 + $0x90] sm:$0xff] %v1069_v61  ;;  %1072 = vst [vmem:[%s2243_s9 + $0x98] sm:$0xff] %v1071_v62  ;;  %v1075_v0 = vld [vmem:[%s2247_s18 + $0xa8] sm:$0xff]  ;;  %v1077_v1 = vld [vmem:[%s2247_s18 + $0xb0] sm:$0xff] }
 0x209   : >> { %1074 = vst [vmem:[%s2243_s9 + $0xa0] sm:$0xff] %v1073_v63  ;;  %v1079_v2 = vld [vmem:[%s2247_s18 + $0xb8] sm:$0xff]  ;;  %1076 = vst [vmem:[%s2243_s9 + $0xa8] sm:$0xff] %v1075_v0  ;;  %v1081_v3 = vld [vmem:[%s2247_s18 + $0xc0] sm:$0xff] }
 0x20a   : >> { %1078 = vst [vmem:[%s2243_s9 + $0xb0] sm:$0xff] %v1077_v1  ;;  %1080 = vst [vmem:[%s2243_s9 + $0xb8] sm:$0xff] %v1079_v2  ;;  %v1083_v4 = vld [vmem:[%s2247_s18 + $0xc8] sm:$0xff]  ;;  %v1085_v5 = vld [vmem:[%s2247_s18 + $0xd0] sm:$0xff] }
 0x20b   : >> { %1082 = vst [vmem:[%s2243_s9 + $0xc0] sm:$0xff] %v1081_v3  ;;  %1084 = vst [vmem:[%s2243_s9 + $0xc8] sm:$0xff] %v1083_v4  ;;  %v1087_v6 = vld [vmem:[%s2247_s18 + $0xd8] sm:$0xff]  ;;  %v1089_v7 = vld [vmem:[%s2247_s18 + $0xe0] sm:$0xff] }
 0x20c   : >> { %1086 = vst [vmem:[%s2243_s9 + $0xd0] sm:$0xff] %v1085_v5  ;;  %v1091_v8 = vld [vmem:[%s2247_s18 + $0xe8] sm:$0xff]  ;;  %1088 = vst [vmem:[%s2243_s9 + $0xd8] sm:$0xff] %v1087_v6  ;;  %v1093_v9 = vld [vmem:[%s2247_s18 + $0xf0] sm:$0xff] }
 0x20d   : >> { %1090 = vst [vmem:[%s2243_s9 + $0xe0] sm:$0xff] %v1089_v7  ;;  %1092 = vst [vmem:[%s2243_s9 + $0xe8] sm:$0xff] %v1091_v8  ;;  %v1095_v10 = vld [vmem:[%s2247_s18 + $0xf8] sm:$0xff]  ;;  %v1097_v11 = vld [vmem:[%s2247_s18 + $0x100] sm:$0xff] }
 0x20e   : >> { %1094 = vst [vmem:[%s2243_s9 + $0xf0] sm:$0xff] %v1093_v9  ;;  %1096 = vst [vmem:[%s2243_s9 + $0xf8] sm:$0xff] %v1095_v10  ;;  %v1099_v12 = vld [vmem:[%s2247_s18 + $0x108] sm:$0xff]  ;;  %v1101_v13 = vld [vmem:[%s2247_s18 + $0x110] sm:$0xff] }
 0x20f   : >> { %1098 = vst [vmem:[%s2243_s9 + $0x100] sm:$0xff] %v1097_v11  ;;  %v1103_v14 = vld [vmem:[%s2247_s18 + $0x118] sm:$0xff]  ;;  %1100 = vst [vmem:[%s2243_s9 + $0x108] sm:$0xff] %v1099_v12  ;;  %v1105_v15 = vld [vmem:[%s2247_s18 + $0x120] sm:$0xff] }
 0x210   : >> { %1102 = vst [vmem:[%s2243_s9 + $0x110] sm:$0xff] %v1101_v13  ;;  %1104 = vst [vmem:[%s2243_s9 + $0x118] sm:$0xff] %v1103_v14  ;;  %v1107_v16 = vld [vmem:[%s2247_s18 + $0x128] sm:$0xff]  ;;  %v1109_v17 = vld [vmem:[%s2247_s18 + $0x130] sm:$0xff] }
 0x211   : >> { %1106 = vst [vmem:[%s2243_s9 + $0x120] sm:$0xff] %v1105_v15  ;;  %1108 = vst [vmem:[%s2243_s9 + $0x128] sm:$0xff] %v1107_v16  ;;  %v1111_v18 = vld [vmem:[%s2247_s18 + $0x138] sm:$0xff]  ;;  %v1113_v19 = vld [vmem:[%s2247_s18 + $0x140] sm:$0xff] }
 0x212   : >> { %1110 = vst [vmem:[%s2243_s9 + $0x130] sm:$0xff] %v1109_v17  ;;  %v1115_v20 = vld [vmem:[%s2247_s18 + $0x148] sm:$0xff]  ;;  %1112 = vst [vmem:[%s2243_s9 + $0x138] sm:$0xff] %v1111_v18  ;;  %v1117_v21 = vld [vmem:[%s2247_s18 + $0x150] sm:$0xff] }
 0x213   : >> { %1114 = vst [vmem:[%s2243_s9 + $0x140] sm:$0xff] %v1113_v19  ;;  %1116 = vst [vmem:[%s2243_s9 + $0x148] sm:$0xff] %v1115_v20  ;;  %v1119_v22 = vld [vmem:[%s2247_s18 + $0x158] sm:$0xff]  ;;  %v1121_v23 = vld [vmem:[%s2247_s18 + $0x160] sm:$0xff] }
 0x214   : >> { %1118 = vst [vmem:[%s2243_s9 + $0x150] sm:$0xff] %v1117_v21  ;;  %1120 = vst [vmem:[%s2243_s9 + $0x158] sm:$0xff] %v1119_v22  ;;  %v1123_v24 = vld [vmem:[%s2247_s18 + $0x168] sm:$0xff]  ;;  %v1125_v25 = vld [vmem:[%s2247_s18 + $0x170] sm:$0xff] }
 0x215   : >> { %1122 = vst [vmem:[%s2243_s9 + $0x160] sm:$0xff] %v1121_v23  ;;  %v1127_v26 = vld [vmem:[%s2247_s18 + $0x178] sm:$0xff]  ;;  %1124 = vst [vmem:[%s2243_s9 + $0x168] sm:$0xff] %v1123_v24  ;;  %v1129_v27 = vld [vmem:[%s2247_s18 + $0x180] sm:$0xff] }
 0x216   : >> { %1126 = vst [vmem:[%s2243_s9 + $0x170] sm:$0xff] %v1125_v25  ;;  %1128 = vst [vmem:[%s2243_s9 + $0x178] sm:$0xff] %v1127_v26  ;;  %v1131_v28 = vld [vmem:[%s2247_s18 + $0x188] sm:$0xff]  ;;  %v1133_v29 = vld [vmem:[%s2247_s18 + $0x190] sm:$0xff] }
 0x217   : >> { %1130 = vst [vmem:[%s2243_s9 + $0x180] sm:$0xff] %v1129_v27  ;;  %1132 = vst [vmem:[%s2243_s9 + $0x188] sm:$0xff] %v1131_v28  ;;  %v1135_v30 = vld [vmem:[%s2247_s18 + $0x198] sm:$0xff]  ;;  %v1137_v31 = vld [vmem:[%s2247_s18 + $0x1a0] sm:$0xff] }
 0x218   : >> { %1134 = vst [vmem:[%s2243_s9 + $0x190] sm:$0xff] %v1133_v29  ;;  %v1139_v32 = vld [vmem:[%s2247_s18 + $0x1a8] sm:$0xff]  ;;  %1136 = vst [vmem:[%s2243_s9 + $0x198] sm:$0xff] %v1135_v30  ;;  %v1141_v33 = vld [vmem:[%s2247_s18 + $0x1b0] sm:$0xff]  ;;  %1029 = sbr.rel (!%p1026_p8) target bundleno = 510 (0x1fe), region = 279 }
 0x219   : >> { %1138 = vst [vmem:[%s2243_s9 + $0x1a0] sm:$0xff] %v1137_v31  ;;  %1140 = vst [vmem:[%s2243_s9 + $0x1a8] sm:$0xff] %v1139_v32  ;;  %v1143_v34 = vld [vmem:[%s2247_s18 + $0x1b8] sm:$0xff]  ;;  %v1145_v35 = vld [vmem:[%s2247_s18 + $0x1c0] sm:$0xff] }
 0x21a   : >> { %1142 = vst [vmem:[%s2243_s9 + $0x1b0] sm:$0xff] %v1141_v33  ;;  %1144 = vst [vmem:[%s2243_s9 + $0x1b8] sm:$0xff] %v1143_v34  ;;  %v1147_v36 = vld [vmem:[%s2247_s18 + $0x1c8] sm:$0xff]  ;;  %v1149_v37 = vld [vmem:[%s2247_s18 + $0x1d0] sm:$0xff] }
 0x21b   : >> { %1146 = vst [vmem:[%s2243_s9 + $0x1c0] sm:$0xff] %v1145_v35  ;;  %v1151_v38 = vld [vmem:[%s2247_s18 + $0x1d8] sm:$0xff]  ;;  %1148 = vst [vmem:[%s2243_s9 + $0x1c8] sm:$0xff] %v1147_v36  ;;  %v1153_v39 = vld [vmem:[%s2247_s18 + $0x1e0] sm:$0xff] }
 0x21c   : >> { %1150 = vst [vmem:[%s2243_s9 + $0x1d0] sm:$0xff] %v1149_v37  ;;  %1152 = vst [vmem:[%s2243_s9 + $0x1d8] sm:$0xff] %v1151_v38  ;;  %v1155_v40 = vld [vmem:[%s2247_s18 + $0x1e8] sm:$0xff]  ;;  %v1157_v41 = vld [vmem:[%s2247_s18 + $0x1f0] sm:$0xff] }
 0x21d   : >> { %1154 = vst [vmem:[%s2243_s9 + $0x1e0] sm:$0xff] %v1153_v39  ;;  %1156 = vst [vmem:[%s2243_s9 + $0x1e8] sm:$0xff] %v1155_v40  ;;  %v1159_v42 = vld [vmem:[%s2247_s18 + $0x1f8] sm:$0xff]  ;;  %s3362_s18 = smov %s3007_s23 }
 0x21e   : >> { %1158 = vst [vmem:[%s2243_s9 + $0x1f0] sm:$0xff] %v1157_v41  ;;  %1160 = vst [vmem:[%s2243_s9 + $0x1f8] sm:$0xff] %v1159_v42  ;;  %s3361_s9 = smov %s3010_s6 }
 0x21f PF: > { %s3116_s11 = sand.u32 63, %s1020_s16   ;;  %s1697_s4 = sshll.u32 %s2940_s2, 13 }
 0x220   : > { %s1172_s12 = sshra.s32 %s1697_s4, 4  ;;  %p1677_p9 = scmp.le.s32.totalorder %s3116_s11, 0 }
 0x221   : > { %s1173_s24 = scalar_lea.vmem %s2916_s26, %s1172_s12 [#allocation4]   ;;  %s1176_s29 = scalar_lea.vmem %s2926_s7, %s1172_s12  }
 0x222   : > { %1557 = sbr.rel (%p1677_p9) target bundleno = 563 (0x233), region = 284  ;;  %s2257_s5 = smov (!%p1677_p9), %s1176_s29  }
 0x223   : > { %s2261_s25 = smov (!%p1677_p9), %s1173_s24   ;;  %s2265_s27 = smov (!%p1677_p9), 0  }
 0x224   : > { %s2269_s14 = smov (!%p1677_p9), 0  }
 0x229 LB: >> { %v1188_v43 = vld [vmem:[%s2263_s25] sm:$0xff]  ;;  %s1190_s30 = sadd.s32 1, %s2267_s27  ;;  %s1182_s14 = sadd.s32 1, %s2271_s14   ;;  %s2271_s14 = sphi %s2269_s14, %s1182_s14   ;;  %s2267_s27 = sphi %s2265_s27, %s2266_s27   ;;  %s2263_s25 = sphi %s2261_s25, %s1195_s25   ;;  %s2259_s5 = sphi %s2257_s5, %s1196_s5  }
 0x22a   : >> { %1189 = vst [vmem:[%s2259_s5] sm:$0xff] %v1188_v43  ;;  %p1191_p10 = scmp.ge.s32.totalorder %s1190_s30, %s3116_s11  ;;  %p1181_p11 = scmp.ge.s32.totalorder %s1182_s14, %s3116_s11 }
 0x22c   : >> { %s3387_s30 = smov (%p1191_p10, %s1190_s30), 0  ;;  %1184 = sbr.rel (!%p1181_p11) target bundleno = 553 (0x229), region = 290 }
 0x22d   : >> { %s1678_s8 = sshll.u32 %s3387_s30, 3  ;;  %s2266_s27 = smov %s3387_s30  }
 0x22e   : >> { %s1195_s25 = scalar_lea.vmem %s1173_s24, %s1678_s8 [#allocation4]   ;;  %s1196_s5 = scalar_lea.vmem %s1176_s29, %s1678_s8  }
 0x233 PF: > { %1199 = sbr.rel (%p1016_p5) target bundleno = 634 (0x27a), region = 143  ;;  %s3128_s16 = ssub.s32 (!%p1016_p5), %s3383_s28, %s2933_s21 }
 0x234   : > { %s1205_s2 = sshrl.u32 (!%p1016_p5), %s3383_s28, 3  ;;  %s1202_s9 = scalar_lea.vmem (!%p1016_p5), %s2916_s26, %s3128_s16 [#allocation4] }
 0x235   : > { %s1204_s18 = scalar_lea.vmem (!%p1016_p5), %s2926_s7, %s3128_s16  ;;  %s3137_s19 = sshrl.u32 (!%p1016_p5), %s1205_s2, 6 }
 0x236   : > { %p1680_p12 = scmp.le.s32.totalorder (!%p1016_p5), %s3137_s19, 0 }
 0x23a   : > { %1571 = sbr.rel (%p1680_p12) target bundleno = 610 (0x262), region = 295  ;;  %s3364_s10 = smov (!%p1680_p12), %s2926_s7 }
 0x23b   : > { %s3365_s13 = smov (!%p1680_p12), %s2916_s26  ;;  %s3146_s22 = smov (!%p1680_p12), 0  }
 0x23c   : > { %s3148_s23 = smov (!%p1680_p12), 0  }
 0x241 LB: >> { %v1218_v44 = vld [vmem:[%s2279_s13] sm:$0xff]  ;;  %v1220_v45 = vld [vmem:[%s2279_s13 + $0x8] sm:$0xff]  ;;  %v1222_v46 = vld [vmem:[%s2279_s13 + $0x10] sm:$0xff]  ;;  %s1346_s6 = sadd.s32 1, %s2283_s22  ;;  %s1212_s23 = sadd.s32 1, %s2287_s23   ;;  %s2287_s23 = sphi %s3148_s23, %s1212_s23   ;;  %s2283_s22 = sphi %s3146_s22, %s3368_s22   ;;  %s2279_s13 = sphi %s3365_s13, %s3367_s13   ;;  %s2275_s10 = sphi %s3364_s10, %s3366_s10  }
 0x242   : >> { %1219 = vst [vmem:[%s2275_s10] sm:$0xff] %v1218_v44  ;;  %1221 = vst [vmem:[%s2275_s10 + $0x8] sm:$0xff] %v1220_v45  ;;  %v1224_v47 = vld [vmem:[%s2279_s13 + $0x18] sm:$0xff]  ;;  %v1226_v48 = vld [vmem:[%s2279_s13 + $0x20] sm:$0xff]  ;;  %p1347_p13 = scmp.ge.s32.totalorder %s1346_s6, %s3137_s19  ;;  %p1211_p0 = scmp.ge.s32.totalorder %s1212_s23, %s3137_s19 }
 0x243   : >> { %1223 = vst [vmem:[%s2275_s10 + $0x10] sm:$0xff] %v1222_v46  ;;  %v1228_v49 = vld [vmem:[%s2279_s13 + $0x28] sm:$0xff]  ;;  %1225 = vst [vmem:[%s2275_s10 + $0x18] sm:$0xff] %v1224_v47  ;;  %v1230_v50 = vld [vmem:[%s2279_s13 + $0x30] sm:$0xff] }
 0x244   : >> { %1227 = vst [vmem:[%s2275_s10 + $0x20] sm:$0xff] %v1226_v48  ;;  %1229 = vst [vmem:[%s2275_s10 + $0x28] sm:$0xff] %v1228_v49  ;;  %v1232_v51 = vld [vmem:[%s2279_s13 + $0x38] sm:$0xff]  ;;  %v1234_v52 = vld [vmem:[%s2279_s13 + $0x40] sm:$0xff]  ;;  %s3389_s6 = smov (%p1347_p13, %s1346_s6), 0 }
 0x245   : >> { %1231 = vst [vmem:[%s2275_s10 + $0x30] sm:$0xff] %v1230_v50  ;;  %1233 = vst [vmem:[%s2275_s10 + $0x38] sm:$0xff] %v1232_v51  ;;  %v1236_v53 = vld [vmem:[%s2279_s13 + $0x48] sm:$0xff]  ;;  %v1238_v54 = vld [vmem:[%s2279_s13 + $0x50] sm:$0xff]  ;;  %s1681_s11 = sshll.u32 %s3389_s6, 9  ;;  %s3368_s22 = smov %s3389_s6 }
 0x246   : >> { %1235 = vst [vmem:[%s2275_s10 + $0x40] sm:$0xff] %v1234_v52  ;;  %v1240_v55 = vld [vmem:[%s2279_s13 + $0x58] sm:$0xff]  ;;  %1237 = vst [vmem:[%s2275_s10 + $0x48] sm:$0xff] %v1236_v53  ;;  %v1242_v56 = vld [vmem:[%s2279_s13 + $0x60] sm:$0xff]  ;;  %s3204_s4 = scalar_lea.vmem %s2916_s26, %s1681_s11 [#allocation4]   ;;  %s3207_s12 = scalar_lea.vmem %s2926_s7, %s1681_s11  }
 0x247   : >> { %1239 = vst [vmem:[%s2275_s10 + $0x50] sm:$0xff] %v1238_v54  ;;  %1241 = vst [vmem:[%s2275_s10 + $0x58] sm:$0xff] %v1240_v55  ;;  %v1244_v57 = vld [vmem:[%s2279_s13 + $0x68] sm:$0xff]  ;;  %v1246_v58 = vld [vmem:[%s2279_s13 + $0x70] sm:$0xff] }
 0x248   : >> { %1243 = vst [vmem:[%s2275_s10 + $0x60] sm:$0xff] %v1242_v56  ;;  %1245 = vst [vmem:[%s2275_s10 + $0x68] sm:$0xff] %v1244_v57  ;;  %v1248_v59 = vld [vmem:[%s2279_s13 + $0x78] sm:$0xff]  ;;  %v1250_v60 = vld [vmem:[%s2279_s13 + $0x80] sm:$0xff] }
 0x249   : >> { %1247 = vst [vmem:[%s2275_s10 + $0x70] sm:$0xff] %v1246_v58  ;;  %v1252_v61 = vld [vmem:[%s2279_s13 + $0x88] sm:$0xff]  ;;  %1249 = vst [vmem:[%s2275_s10 + $0x78] sm:$0xff] %v1248_v59  ;;  %v1254_v62 = vld [vmem:[%s2279_s13 + $0x90] sm:$0xff] }
 0x24a   : >> { %1251 = vst [vmem:[%s2275_s10 + $0x80] sm:$0xff] %v1250_v60  ;;  %1253 = vst [vmem:[%s2275_s10 + $0x88] sm:$0xff] %v1252_v61  ;;  %v1256_v63 = vld [vmem:[%s2279_s13 + $0x98] sm:$0xff]  ;;  %v1258_v0 = vld [vmem:[%s2279_s13 + $0xa0] sm:$0xff] }
 0x24b   : >> { %1255 = vst [vmem:[%s2275_s10 + $0x90] sm:$0xff] %v1254_v62  ;;  %1257 = vst [vmem:[%s2275_s10 + $0x98] sm:$0xff] %v1256_v63  ;;  %v1260_v1 = vld [vmem:[%s2279_s13 + $0xa8] sm:$0xff]  ;;  %v1262_v2 = vld [vmem:[%s2279_s13 + $0xb0] sm:$0xff] }
 0x24c   : >> { %1259 = vst [vmem:[%s2275_s10 + $0xa0] sm:$0xff] %v1258_v0  ;;  %v1264_v3 = vld [vmem:[%s2279_s13 + $0xb8] sm:$0xff]  ;;  %1261 = vst [vmem:[%s2275_s10 + $0xa8] sm:$0xff] %v1260_v1  ;;  %v1266_v4 = vld [vmem:[%s2279_s13 + $0xc0] sm:$0xff] }
 0x24d   : >> { %1263 = vst [vmem:[%s2275_s10 + $0xb0] sm:$0xff] %v1262_v2  ;;  %1265 = vst [vmem:[%s2275_s10 + $0xb8] sm:$0xff] %v1264_v3  ;;  %v1268_v5 = vld [vmem:[%s2279_s13 + $0xc8] sm:$0xff]  ;;  %v1270_v6 = vld [vmem:[%s2279_s13 + $0xd0] sm:$0xff] }
 0x24e   : >> { %1267 = vst [vmem:[%s2275_s10 + $0xc0] sm:$0xff] %v1266_v4  ;;  %1269 = vst [vmem:[%s2275_s10 + $0xc8] sm:$0xff] %v1268_v5  ;;  %v1272_v7 = vld [vmem:[%s2279_s13 + $0xd8] sm:$0xff]  ;;  %v1274_v8 = vld [vmem:[%s2279_s13 + $0xe0] sm:$0xff] }
 0x24f   : >> { %1271 = vst [vmem:[%s2275_s10 + $0xd0] sm:$0xff] %v1270_v6  ;;  %v1276_v9 = vld [vmem:[%s2279_s13 + $0xe8] sm:$0xff]  ;;  %1273 = vst [vmem:[%s2275_s10 + $0xd8] sm:$0xff] %v1272_v7  ;;  %v1278_v10 = vld [vmem:[%s2279_s13 + $0xf0] sm:$0xff] }
 0x250   : >> { %1275 = vst [vmem:[%s2275_s10 + $0xe0] sm:$0xff] %v1274_v8  ;;  %1277 = vst [vmem:[%s2275_s10 + $0xe8] sm:$0xff] %v1276_v9  ;;  %v1280_v11 = vld [vmem:[%s2279_s13 + $0xf8] sm:$0xff]  ;;  %v1282_v12 = vld [vmem:[%s2279_s13 + $0x100] sm:$0xff] }
 0x251   : >> { %1279 = vst [vmem:[%s2275_s10 + $0xf0] sm:$0xff] %v1278_v10  ;;  %1281 = vst [vmem:[%s2275_s10 + $0xf8] sm:$0xff] %v1280_v11  ;;  %v1284_v13 = vld [vmem:[%s2279_s13 + $0x108] sm:$0xff]  ;;  %v1286_v14 = vld [vmem:[%s2279_s13 + $0x110] sm:$0xff] }
 0x252   : >> { %1283 = vst [vmem:[%s2275_s10 + $0x100] sm:$0xff] %v1282_v12  ;;  %v1288_v15 = vld [vmem:[%s2279_s13 + $0x118] sm:$0xff]  ;;  %1285 = vst [vmem:[%s2275_s10 + $0x108] sm:$0xff] %v1284_v13  ;;  %v1290_v16 = vld [vmem:[%s2279_s13 + $0x120] sm:$0xff] }
 0x253   : >> { %1287 = vst [vmem:[%s2275_s10 + $0x110] sm:$0xff] %v1286_v14  ;;  %1289 = vst [vmem:[%s2275_s10 + $0x118] sm:$0xff] %v1288_v15  ;;  %v1292_v17 = vld [vmem:[%s2279_s13 + $0x128] sm:$0xff]  ;;  %v1294_v18 = vld [vmem:[%s2279_s13 + $0x130] sm:$0xff] }
 0x254   : >> { %1291 = vst [vmem:[%s2275_s10 + $0x120] sm:$0xff] %v1290_v16  ;;  %1293 = vst [vmem:[%s2275_s10 + $0x128] sm:$0xff] %v1292_v17  ;;  %v1296_v19 = vld [vmem:[%s2279_s13 + $0x138] sm:$0xff]  ;;  %v1298_v20 = vld [vmem:[%s2279_s13 + $0x140] sm:$0xff] }
 0x255   : >> { %1295 = vst [vmem:[%s2275_s10 + $0x130] sm:$0xff] %v1294_v18  ;;  %v1300_v21 = vld [vmem:[%s2279_s13 + $0x148] sm:$0xff]  ;;  %1297 = vst [vmem:[%s2275_s10 + $0x138] sm:$0xff] %v1296_v19  ;;  %v1302_v22 = vld [vmem:[%s2279_s13 + $0x150] sm:$0xff] }
 0x256   : >> { %1299 = vst [vmem:[%s2275_s10 + $0x140] sm:$0xff] %v1298_v20  ;;  %1301 = vst [vmem:[%s2275_s10 + $0x148] sm:$0xff] %v1300_v21  ;;  %v1304_v23 = vld [vmem:[%s2279_s13 + $0x158] sm:$0xff]  ;;  %v1306_v24 = vld [vmem:[%s2279_s13 + $0x160] sm:$0xff] }
 0x257   : >> { %1303 = vst [vmem:[%s2275_s10 + $0x150] sm:$0xff] %v1302_v22  ;;  %1305 = vst [vmem:[%s2275_s10 + $0x158] sm:$0xff] %v1304_v23  ;;  %v1308_v25 = vld [vmem:[%s2279_s13 + $0x168] sm:$0xff]  ;;  %v1310_v26 = vld [vmem:[%s2279_s13 + $0x170] sm:$0xff] }
 0x258   : >> { %1307 = vst [vmem:[%s2275_s10 + $0x160] sm:$0xff] %v1306_v24  ;;  %v1312_v27 = vld [vmem:[%s2279_s13 + $0x178] sm:$0xff]  ;;  %1309 = vst [vmem:[%s2275_s10 + $0x168] sm:$0xff] %v1308_v25  ;;  %v1314_v28 = vld [vmem:[%s2279_s13 + $0x180] sm:$0xff] }
 0x259   : >> { %1311 = vst [vmem:[%s2275_s10 + $0x170] sm:$0xff] %v1310_v26  ;;  %1313 = vst [vmem:[%s2275_s10 + $0x178] sm:$0xff] %v1312_v27  ;;  %v1316_v29 = vld [vmem:[%s2279_s13 + $0x188] sm:$0xff]  ;;  %v1318_v30 = vld [vmem:[%s2279_s13 + $0x190] sm:$0xff] }
 0x25a   : >> { %1315 = vst [vmem:[%s2275_s10 + $0x180] sm:$0xff] %v1314_v28  ;;  %1317 = vst [vmem:[%s2275_s10 + $0x188] sm:$0xff] %v1316_v29  ;;  %v1320_v31 = vld [vmem:[%s2279_s13 + $0x198] sm:$0xff]  ;;  %v1322_v32 = vld [vmem:[%s2279_s13 + $0x1a0] sm:$0xff] }
 0x25b   : >> { %1319 = vst [vmem:[%s2275_s10 + $0x190] sm:$0xff] %v1318_v30  ;;  %v1324_v33 = vld [vmem:[%s2279_s13 + $0x1a8] sm:$0xff]  ;;  %1321 = vst [vmem:[%s2275_s10 + $0x198] sm:$0xff] %v1320_v31  ;;  %v1326_v34 = vld [vmem:[%s2279_s13 + $0x1b0] sm:$0xff]  ;;  %1214 = sbr.rel (!%p1211_p0) target bundleno = 577 (0x241), region = 301 }
 0x25c   : >> { %1323 = vst [vmem:[%s2275_s10 + $0x1a0] sm:$0xff] %v1322_v32  ;;  %1325 = vst [vmem:[%s2275_s10 + $0x1a8] sm:$0xff] %v1324_v33  ;;  %v1328_v35 = vld [vmem:[%s2279_s13 + $0x1b8] sm:$0xff]  ;;  %v1330_v36 = vld [vmem:[%s2279_s13 + $0x1c0] sm:$0xff] }
 0x25d   : >> { %1327 = vst [vmem:[%s2275_s10 + $0x1b0] sm:$0xff] %v1326_v34  ;;  %1329 = vst [vmem:[%s2275_s10 + $0x1b8] sm:$0xff] %v1328_v35  ;;  %v1332_v37 = vld [vmem:[%s2279_s13 + $0x1c8] sm:$0xff]  ;;  %v1334_v38 = vld [vmem:[%s2279_s13 + $0x1d0] sm:$0xff] }
 0x25e   : >> { %1331 = vst [vmem:[%s2275_s10 + $0x1c0] sm:$0xff] %v1330_v36  ;;  %v1336_v39 = vld [vmem:[%s2279_s13 + $0x1d8] sm:$0xff]  ;;  %1333 = vst [vmem:[%s2275_s10 + $0x1c8] sm:$0xff] %v1332_v37  ;;  %v1338_v40 = vld [vmem:[%s2279_s13 + $0x1e0] sm:$0xff] }
 0x25f   : >> { %1335 = vst [vmem:[%s2275_s10 + $0x1d0] sm:$0xff] %v1334_v38  ;;  %1337 = vst [vmem:[%s2275_s10 + $0x1d8] sm:$0xff] %v1336_v39  ;;  %v1340_v41 = vld [vmem:[%s2279_s13 + $0x1e8] sm:$0xff]  ;;  %v1342_v42 = vld [vmem:[%s2279_s13 + $0x1f0] sm:$0xff] }
 0x260   : >> { %1339 = vst [vmem:[%s2275_s10 + $0x1e0] sm:$0xff] %v1338_v40  ;;  %1341 = vst [vmem:[%s2275_s10 + $0x1e8] sm:$0xff] %v1340_v41  ;;  %v1344_v43 = vld [vmem:[%s2279_s13 + $0x1f8] sm:$0xff]  ;;  %s3367_s13 = smov %s3204_s4 }
 0x261   : >> { %1343 = vst [vmem:[%s2275_s10 + $0x1f0] sm:$0xff] %v1342_v42  ;;  %1345 = vst [vmem:[%s2275_s10 + $0x1f8] sm:$0xff] %v1344_v43  ;;  %s3366_s10 = smov %s3207_s12 }
 0x262 PF: > { %s3313_s24 = sand.u32 63, %s1205_s2   ;;  %s1699_s29 = sshll.u32 %s3137_s19, 13 }
 0x263   : > { %s1357_s5 = sshra.s32 %s1699_s29, 4  ;;  %p1686_p1 = scmp.le.s32.totalorder %s3313_s24, 0 }
 0x264   : > { %s1358_s25 = scalar_lea.vmem %s2916_s26, %s1357_s5 [#allocation4]   ;;  %s1361_s27 = scalar_lea.vmem %s2926_s7, %s1357_s5  }
 0x265   : > { %1585 = sbr.rel (%p1686_p1) target bundleno = 630 (0x276), region = 306  ;;  %s2289_s14 = smov (!%p1686_p1), %s1361_s27  }
 0x266   : > { %s2293_s30 = smov (!%p1686_p1), %s1358_s25   ;;  %s2297_s8 = smov (!%p1686_p1), 0  }
 0x267   : > { %s2301_s23 = smov (!%p1686_p1), 0  }
 0x26c LB: >> { %v1373_v44 = vld [vmem:[%s2295_s30] sm:$0xff]  ;;  %s1375_s2 = sadd.s32 1, %s2299_s8  ;;  %s1367_s23 = sadd.s32 1, %s2303_s23   ;;  %s2303_s23 = sphi %s2301_s23, %s1367_s23   ;;  %s2299_s8 = sphi %s2297_s8, %s2298_s8   ;;  %s2295_s30 = sphi %s2293_s30, %s1380_s30   ;;  %s2291_s14 = sphi %s2289_s14, %s1381_s14  }
 0x26d   : >> { %1374 = vst [vmem:[%s2291_s14] sm:$0xff] %v1373_v44  ;;  %p1376_p2 = scmp.ge.s32.totalorder %s1375_s2, %s3313_s24  ;;  %p1366_p3 = scmp.ge.s32.totalorder %s1367_s23, %s3313_s24 }
 0x26f   : >> { %s3391_s2 = smov (%p1376_p2, %s1375_s2), 0  ;;  %1369 = sbr.rel (!%p1366_p3) target bundleno = 620 (0x26c), region = 312 }
 0x270   : >> { %s1687_s19 = sshll.u32 %s3391_s2, 3  ;;  %s2298_s8 = smov %s3391_s2  }
 0x271   : >> { %s1380_s30 = scalar_lea.vmem %s1358_s25, %s1687_s19 [#allocation4]   ;;  %s1381_s14 = scalar_lea.vmem %s1361_s27, %s1687_s19  }
 0x276 PF: > { %s2309_s10 = smov 0  }
 0x277   : > { %s1382_s13 = sshllo.u32 %s2309_s10, %s2933_s21 }
 0x278   : > { %v1391_v45 = vld [vmem:[%s1202_s9] sm:%s1382_s13] }
 0x279   : > { %1392 = vst [vmem:[%s1204_s18] sm:%s1382_s13] %v1391_v45 }
 0x27a PF: > { %p1689_p5 = scmp.ge.u32.totalorder %s3383_s28, 8 }
 0x27b   : > { %s2310_s22 = smov (!%p1689_p5), 0  }
 0x27c   : > { %1003 = sbr.rel (%p1689_p5) target bundleno = 643 (0x283), region = 114  ;;  %s1004_s6 = sshllo.u32 (!%p1689_p5), %s2310_s22, %s3383_s28 }
 0x27d   : > { %v1013_v46 = vld [vmem:[%s2916_s26] sm:%s1004_s6] (!%p1689_p5) }
 0x27e   : > { %1014 = vst [vmem:[%s2926_s7] sm:%s1004_s6] (!%p1689_p5), %v1013_v46 }
 0x283 PF: > { %p12_p4 = scmp.ge.s32.totalorder %s2351_s17, 9   ;;  %s3369_s14 = smov %s2171_s15 }
 0x284   : > { %s3370_s15 = smov %s2362_s20  ;;  %s3371_s16 = smov %s2351_s17 }
 0x285   :  { %14 = sbr.rel (!%p12_p4) target bundleno = 5 (0x5), region = 323 }

</bundles_post_ra>
